<compile_context>
chip_gen: v5e
topology: v5e:2x2
jax: 0.10.0
libtpu: 0.0.40
codegen_flags: <defaults>
</compile_context>

<pallas_src>
import jax
import jax.numpy as jnp
from jax.experimental import pallas as pl
from jax.experimental.pallas import tpu as pltpu

B, S, T = 2, 8, 8      # batch, src len, trg len
E, H = 32, 32          # embedding dim, GRU hidden dim
V = 16                 # vocab size (src and trg)
F32 = jnp.float32
H3 = 3 * H


def _gru_update(gx, gh, h, hidden):
    """PyTorch GRUCell gate math given input/hidden gate pre-activations."""
    r = jax.nn.sigmoid(gx[:, :hidden] + gh[:, :hidden])
    z = jax.nn.sigmoid(gx[:, hidden:2 * hidden] + gh[:, hidden:2 * hidden])
    n = jnp.tanh(gx[:, 2 * hidden:] + r * gh[:, 2 * hidden:])
    return (1.0 - z) * n + z * h


# --------------------------- fused seq2seq kernel ----------------------------
def seq2seq_kernel(src_emb_ref, trg_emb_ref, mask_ref,
                   enc_wih_ref, enc_bih_ref,
                   enc_whh_f_ref, enc_bhh_f_ref,
                   enc_whh_b_ref, enc_bhh_b_ref,
                   w_bridge_ref, b_bridge_ref,
                   w_key_ref, w_hq_ref, v_att_ref,
                   dec_wih_ep_ref, dec_b_ep_ref,
                   dec_wc_ref, dec_bhh_ref, wp_h_ref,
                   pre_out_ref, h_out_ref,
                   enc_hid_scr):
    mask = mask_ref[...]                                   # [B, S]

    # ------------------------------ encoder ------------------------------
    # hoisted input projections for BOTH directions: one matmul, biases folded
    src_flat = src_emb_ref[...].reshape(B * S, E)
    gx_all = (jnp.dot(src_flat, enc_wih_ref[...], preferred_element_type=F32)
              + enc_bih_ref[...]).reshape(B, S, 2 * H3)
    gx_f_all = gx_all[:, :, :H3]                           # [B, S, 3H]
    gx_b_all = gx_all[:, :, H3:]

    whh_f = enc_whh_f_ref[...]
    whh_b = enc_whh_b_ref[...]
    bhh_f = jnp.broadcast_to(enc_bhh_f_ref[...], (B, H3))  # hoisted broadcasts
    bhh_b = jnp.broadcast_to(enc_bhh_b_ref[...], (B, H3))

    h_f = jnp.zeros((B, H), dtype=F32)
    h_b = jnp.zeros((B, H), dtype=F32)

    # forward (position t) and backward (position S-1-t) chains interleaved;
    # fully unrolled (S is small and static).
    for t in range(S):
        u = S - 1 - t
        m_t = mask[:, t:t + 1]                             # [B, 1]
        m_u = mask[:, u:u + 1]

        gh_f = jnp.dot(h_f, whh_f, preferred_element_type=F32) + bhh_f
        gh_b = jnp.dot(h_b, whh_b, preferred_element_type=F32) + bhh_b

        hf_new = _gru_update(gx_f_all[:, t, :], gh_f, h_f, H)
        hb_new = _gru_update(gx_b_all[:, u, :], gh_b, h_b, H)

        # freeze hidden on padded steps; zero padded outputs (pack/pad behavior)
        h_f = m_t * hf_new + (1.0 - m_t) * h_f
        h_b = m_u * hb_new + (1.0 - m_u) * h_b

        enc_hid_scr[:, t, 0:H] = h_f * m_t
        enc_hid_scr[:, u, H:2 * H] = h_b * m_u

    enc_hid = enc_hid_scr[...]                             # [B, S, 2H]
    enc_final = jnp.concatenate([h_f, h_b], axis=-1)       # [B, 2H]

    # ------------------------------ decoder ------------------------------
    # bridge: initial decoder hidden
    h = jnp.tanh(jnp.dot(enc_final, w_bridge_ref[...],
                         preferred_element_type=F32) + b_bridge_ref[...])

    # attention keys for all source positions: one matmul
    keys = jnp.dot(enc_hid.reshape(B * S, 2 * H), w_key_ref[...],
                   preferred_element_type=F32).reshape(B, S, H)

    # hoisted target-embedding projections: [gate-input (3H) | pre-output (H)]
    trg_flat = trg_emb_ref[...].reshape(B * T, E)
    ep_all = (jnp.dot(trg_flat, dec_wih_ep_ref[...], preferred_element_type=F32)
              + dec_b_ep_ref[...]).reshape(B, T, 4 * H)
    gx_dec_all = ep_all[:, :, :H3]                         # includes b_ih
    pre_e_all = ep_all[:, :, H3:]                          # includes b_pre

    w_hq = w_hq_ref[...]                                   # [H, 4H] = [whh | w_query]
    w_c = dec_wc_ref[...]                                  # [2H,4H] = [wih_c | wp_c]
    wp_h = wp_h_ref[...]
    bhh_d = jnp.broadcast_to(dec_bhh_ref[...], (B, H3))
    v_att = v_att_ref[...]                                 # [1, 1, H]
    att_bias = (mask - 1.0) * 1e9                          # [B, S] additive mask

    for t in range(T):
        # fused shared-operand matmuls
        hq = jnp.dot(h, w_hq, preferred_element_type=F32)  # [B, 4H]
        gh = hq[:, :H3] + bhh_d
        query = hq[:, H3:]                                 # [B, H]

        # Bahdanau attention, lane-friendly [B, S] scores
        att = jnp.tanh(query[:, None, :] + keys)           # [B, S, H]
        scores = jnp.sum(att * v_att, axis=-1) + att_bias  # [B, S]
        smax = jnp.max(scores, axis=-1, keepdims=True)
        e = jnp.exp(scores - smax)
        alphas = e / jnp.sum(e, axis=-1, keepdims=True)    # [B, S]
        context = jnp.sum(alphas[:, :, None] * enc_hid, axis=1)   # [B, 2H]

        cproj = jnp.dot(context, w_c, preferred_element_type=F32)  # [B, 4H]
        gx = gx_dec_all[:, t, :] + cproj[:, :H3]
        h = _gru_update(gx, gh, h, H)

        # pre-output projection of [emb ; hidden ; context]
        pre_out_ref[:, t, :] = (pre_e_all[:, t, :]
                                + jnp.dot(h, wp_h, preferred_element_type=F32)
                                + cproj[:, H3:])

    h_out_ref[...] = h


# ------------------------------ pallas wrapper -------------------------------
def encoder_decoder_forward(src, trg, src_mask, trg_mask,
                            src_lengths, trg_lengths, params):
    """Mirrors EncoderDecoder.forward: encode(src) -> decode(trg | enc)."""
    p = params
    # embeddings (glue; gather stays in plain JAX)
    src_emb = p['src_emb'][src].astype(F32)                # [B, S, E]
    trg_emb = p['trg_emb'][trg].astype(F32)                # [B, T, E]
    mask_bs = src_mask[:, 0, :].astype(F32)                # [B, S]

    # weight concatenations for fused matmuls (tiny, trace-time)
    enc_wih_cat = jnp.concatenate([p['enc_wih_f'], p['enc_wih_b']], axis=1)
    enc_bih_cat = jnp.concatenate([p['enc_bih_f'], p['enc_bih_b']], axis=1)
    w_hq = jnp.concatenate([p['dec_whh'], p['w_query']], axis=1)
    dec_wih_ep = jnp.concatenate([p['dec_wih_e'], p['wp_e']], axis=1)
    dec_b_ep = jnp.concatenate([p['dec_bih'], p['b_pre']], axis=1)
    dec_wc = jnp.concatenate([p['dec_wih_c'], p['wp_c']], axis=1)

    ins = (src_emb, trg_emb, mask_bs,
           enc_wih_cat, enc_bih_cat,
           p['enc_whh_f'], p['enc_bhh_f'], p['enc_whh_b'], p['enc_bhh_b'],
           p['w_bridge'], p['b_bridge'],
           p['w_key'], w_hq, p['v_att'],
           dec_wih_ep, dec_b_ep, dec_wc, p['dec_bhh'], p['wp_h'])

    out_shape = (jax.ShapeDtypeStruct((B, T, H), F32),
                 jax.ShapeDtypeStruct((B, H), F32))
    vmem = pl.BlockSpec(memory_space=pltpu.MemorySpace.VMEM)
    pre_output, dec_hidden = pl.pallas_call(
        seq2seq_kernel,
        out_shape=out_shape,
        in_specs=[vmem] * len(ins),
        out_specs=(vmem, vmem),
        scratch_shapes=[pltpu.VMEM((B, S, 2 * H), F32)],
    )(*ins)
    # TODO(synk): trg_mask / trg_lengths are unused here, matching the
    # reference decoder (they are only consumed by the loss / evaluator).
    return pre_output, dec_hidden


# -------------------------------- param init ---------------------------------
def init_params(key):
    ks = jax.random.split(key, 24)

    def w(k, shape, scale=0.1):
        return (scale * jax.random.normal(k, shape)).astype(F32)

    return {
        'src_emb':   w(ks[0], (V, E)),
        'trg_emb':   w(ks[1], (V, E)),
        # encoder GRU (fwd / bwd)
        'enc_wih_f': w(ks[2], (E, 3 * H)), 'enc_whh_f': w(ks[3], (H, 3 * H)),
        'enc_bih_f': w(ks[4], (1, 3 * H)), 'enc_bhh_f': w(ks[5], (1, 3 * H)),
        'enc_wih_b': w(ks[6], (E, 3 * H)), 'enc_whh_b': w(ks[7], (H, 3 * H)),
        'enc_bih_b': w(ks[8], (1, 3 * H)), 'enc_bhh_b': w(ks[9], (1, 3 * H)),
        # bridge
        'w_bridge':  w(ks[10], (2 * H, H)), 'b_bridge': w(ks[11], (1, H)),
        # attention
        'w_key':     w(ks[12], (2 * H, H)),
        'w_query':   w(ks[13], (H, H)),
        'v_att':     w(ks[14], (1, 1, H)),
        # decoder GRU (input = [emb ; context])
        'dec_wih_e': w(ks[15], (E, 3 * H)),
        'dec_wih_c': w(ks[16], (2 * H, 3 * H)),
        'dec_whh':   w(ks[17], (H, 3 * H)),
        'dec_bih':   w(ks[18], (1, 3 * H)),
        'dec_bhh':   w(ks[19], (1, 3 * H)),
        # pre-output projection of [emb ; hidden ; context]
        'wp_e':      w(ks[20], (E, H)),
        'wp_h':      w(ks[21], (H, H)),
        'wp_c':      w(ks[22], (2 * H, H)),
        'b_pre':     w(ks[23], (1, H)),
    }


if __name__ == "__main__":
    key = jax.random.PRNGKey(0)
    pkey, skey, tkey = jax.random.split(key, 3)
    params = init_params(pkey)

    src = jax.random.randint(skey, (B, S), 1, V)
    trg = jax.random.randint(tkey, (B, T), 1, V)
    src_lengths = jnp.array([S, S - 3], dtype=jnp.int32)
    trg_lengths = jnp.array([T, T - 2], dtype=jnp.int32)
    src_mask = (jnp.arange(S)[None, :] < src_lengths[:, None])[:, None, :]  # [B,1,S]
    trg_mask = (jnp.arange(T)[None, :] < trg_lengths[:, None])[:, None, :]  # [B,1,T]

    fwd = jax.jit(encoder_decoder_forward)
    pre_output, dec_hidden = fwd(src, trg, src_mask, trg_mask,
                                 src_lengths, trg_lengths, params)
    jax.block_until_ready((pre_output, dec_hidden))

    assert pre_output.shape == (B, T, H)
    assert dec_hidden.shape == (B, H)
    assert bool(jnp.all(jnp.isfinite(pre_output)))
    assert bool(jnp.all(jnp.isfinite(dec_hidden)))
    print("KERNEL_OK")
</pallas_src>

<mosaic_0001>
module attributes {stable_mosaic.version = 11 : i64} {
  func.func @seq2seq_kernel(%arg0: memref<2x8x32xf32, #tpu.memory_space<vmem>>, %arg1: memref<2x8x32xf32, #tpu.memory_space<vmem>>, %arg2: memref<2x8xf32, #tpu.memory_space<vmem>>, %arg3: memref<32x192xf32, #tpu.memory_space<vmem>>, %arg4: memref<1x192xf32, #tpu.memory_space<vmem>>, %arg5: memref<32x96xf32, #tpu.memory_space<vmem>>, %arg6: memref<1x96xf32, #tpu.memory_space<vmem>>, %arg7: memref<32x96xf32, #tpu.memory_space<vmem>>, %arg8: memref<1x96xf32, #tpu.memory_space<vmem>>, %arg9: memref<64x32xf32, #tpu.memory_space<vmem>>, %arg10: memref<1x32xf32, #tpu.memory_space<vmem>>, %arg11: memref<64x32xf32, #tpu.memory_space<vmem>>, %arg12: memref<32x128xf32, #tpu.memory_space<vmem>>, %arg13: memref<1x1x32xf32, #tpu.memory_space<vmem>>, %arg14: memref<32x128xf32, #tpu.memory_space<vmem>>, %arg15: memref<1x128xf32, #tpu.memory_space<vmem>>, %arg16: memref<64x128xf32, #tpu.memory_space<vmem>>, %arg17: memref<1x96xf32, #tpu.memory_space<vmem>>, %arg18: memref<32x32xf32, #tpu.memory_space<vmem>>, %arg19: memref<2x8x32xf32, #tpu.memory_space<vmem>>, %arg20: memref<2x32xf32, #tpu.memory_space<vmem>>, %arg21: memref<2x8x64xf32, #tpu.memory_space<vmem>>) attributes {dimension_semantics = [], scalar_prefetch = 0 : i64, scratch_operands = 1 : i64, tpu.core_type = #tpu.core_type<tc>} {
    %c0 = arith.constant 0 : index
    %c0_0 = arith.constant 0 : index
    %0 = vector.load %arg2[%c0, %c0_0] : memref<2x8xf32, #tpu.memory_space<vmem>>, vector<2x8xf32>
    %c0_1 = arith.constant 0 : index
    %c0_2 = arith.constant 0 : index
    %c0_3 = arith.constant 0 : index
    %1 = vector.load %arg0[%c0_1, %c0_2, %c0_3] : memref<2x8x32xf32, #tpu.memory_space<vmem>>, vector<2x8x32xf32>
    %2 = vector.shape_cast %1 : vector<2x8x32xf32> to vector<16x32xf32>
    %c0_4 = arith.constant 0 : index
    %c0_5 = arith.constant 0 : index
    %3 = vector.load %arg3[%c0_4, %c0_5] : memref<32x192xf32, #tpu.memory_space<vmem>>, vector<32x192xf32>
    %cst = arith.constant dense<0.000000e+00> : vector<16x192xf32>
    %4 = tpu.matmul %2, %3, %cst {dimension_numbers = #tpu.dot_dimension_numbers<[1], [0], [0], [1], [0, 0, 1, 1], [], []>} : vector<16x32xf32>, vector<32x192xf32>, vector<16x192xf32> -> vector<16x192xf32>
    %c0_6 = arith.constant 0 : index
    %c0_7 = arith.constant 0 : index
    %5 = vector.load %arg4[%c0_6, %c0_7] : memref<1x192xf32, #tpu.memory_space<vmem>>, vector<1x192xf32>
    %6 = vector.broadcast %5 : vector<1x192xf32> to vector<16x192xf32>
    %7 = arith.addf %4, %6 : vector<16x192xf32>
    %8 = vector.shape_cast %7 : vector<16x192xf32> to vector<2x8x192xf32>
    %9 = vector.extract_strided_slice %8 {offsets = [0, 0, 0], sizes = [2, 8, 96], strides = [1, 1, 1]} : vector<2x8x192xf32> to vector<2x8x96xf32>
    %10 = vector.extract_strided_slice %8 {offsets = [0, 0, 96], sizes = [2, 8, 96], strides = [1, 1, 1]} : vector<2x8x192xf32> to vector<2x8x96xf32>
    %c0_8 = arith.constant 0 : index
    %c0_9 = arith.constant 0 : index
    %11 = vector.load %arg5[%c0_8, %c0_9] : memref<32x96xf32, #tpu.memory_space<vmem>>, vector<32x96xf32>
    %c0_10 = arith.constant 0 : index
    %c0_11 = arith.constant 0 : index
    %12 = vector.load %arg7[%c0_10, %c0_11] : memref<32x96xf32, #tpu.memory_space<vmem>>, vector<32x96xf32>
    %c0_12 = arith.constant 0 : index
    %c0_13 = arith.constant 0 : index
    %13 = vector.load %arg6[%c0_12, %c0_13] : memref<1x96xf32, #tpu.memory_space<vmem>>, vector<1x96xf32>
    %14 = vector.shape_cast %13 : vector<1x96xf32> to vector<1x96xf32>
    %15 = vector.broadcast %14 : vector<1x96xf32> to vector<2x96xf32>
    %c0_14 = arith.constant 0 : index
    %c0_15 = arith.constant 0 : index
    %16 = vector.load %arg8[%c0_14, %c0_15] : memref<1x96xf32, #tpu.memory_space<vmem>>, vector<1x96xf32>
    %17 = vector.shape_cast %16 : vector<1x96xf32> to vector<1x96xf32>
    %18 = vector.broadcast %17 : vector<1x96xf32> to vector<2x96xf32>
    %cst_16 = arith.constant 0.000000e+00 : f32
    %19 = vector.broadcast %cst_16 : f32 to vector<2x32xf32>
    %cst_17 = arith.constant 0.000000e+00 : f32
    %20 = vector.broadcast %cst_17 : f32 to vector<2x32xf32>
    %21 = vector.extract_strided_slice %0 {offsets = [0, 0], sizes = [2, 1], strides = [1, 1]} : vector<2x8xf32> to vector<2x1xf32>
    %22 = vector.extract_strided_slice %0 {offsets = [0, 7], sizes = [2, 1], strides = [1, 1]} : vector<2x8xf32> to vector<2x1xf32>
    %cst_18 = arith.constant dense<0.000000e+00> : vector<2x96xf32>
    %23 = tpu.matmul %19, %11, %cst_18 {dimension_numbers = #tpu.dot_dimension_numbers<[1], [0], [0], [1], [0, 0, 1, 1], [], []>} : vector<2x32xf32>, vector<32x96xf32>, vector<2x96xf32> -> vector<2x96xf32>
    %24 = arith.addf %23, %15 : vector<2x96xf32>
    %cst_19 = arith.constant dense<0.000000e+00> : vector<2x96xf32>
    %25 = tpu.matmul %20, %12, %cst_19 {dimension_numbers = #tpu.dot_dimension_numbers<[1], [0], [0], [1], [0, 0, 1, 1], [], []>} : vector<2x32xf32>, vector<32x96xf32>, vector<2x96xf32> -> vector<2x96xf32>
    %26 = arith.addf %25, %18 : vector<2x96xf32>
    %27 = vector.extract_strided_slice %9 {offsets = [0, 0, 0], sizes = [2, 1, 96], strides = [1, 1, 1]} : vector<2x8x96xf32> to vector<2x1x96xf32>
    %28 = vector.shape_cast %27 : vector<2x1x96xf32> to vector<2x96xf32>
    %29 = vector.extract_strided_slice %28 {offsets = [0, 0], sizes = [2, 32], strides = [1, 1]} : vector<2x96xf32> to vector<2x32xf32>
    %30 = vector.extract_strided_slice %24 {offsets = [0, 0], sizes = [2, 32], strides = [1, 1]} : vector<2x96xf32> to vector<2x32xf32>
    %31 = arith.addf %29, %30 : vector<2x32xf32>
    %32 = arith.negf %31 : vector<2x32xf32>
    %33 = math.exp %32 : vector<2x32xf32>
    %cst_20 = arith.constant 1.000000e+00 : f32
    %34 = vector.broadcast %cst_20 : f32 to vector<2x32xf32>
    %35 = arith.addf %34, %33 : vector<2x32xf32>
    %36 = arith.divf %34, %35 : vector<2x32xf32>
    %37 = vector.extract_strided_slice %28 {offsets = [0, 32], sizes = [2, 32], strides = [1, 1]} : vector<2x96xf32> to vector<2x32xf32>
    %38 = vector.extract_strided_slice %24 {offsets = [0, 32], sizes = [2, 32], strides = [1, 1]} : vector<2x96xf32> to vector<2x32xf32>
    %39 = arith.addf %37, %38 : vector<2x32xf32>
    %40 = arith.negf %39 : vector<2x32xf32>
    %41 = math.exp %40 : vector<2x32xf32>
    %cst_21 = arith.constant 1.000000e+00 : f32
    %42 = vector.broadcast %cst_21 : f32 to vector<2x32xf32>
    %43 = arith.addf %42, %41 : vector<2x32xf32>
    %44 = arith.divf %42, %43 : vector<2x32xf32>
    %45 = vector.extract_strided_slice %28 {offsets = [0, 64], sizes = [2, 32], strides = [1, 1]} : vector<2x96xf32> to vector<2x32xf32>
    %46 = vector.extract_strided_slice %24 {offsets = [0, 64], sizes = [2, 32], strides = [1, 1]} : vector<2x96xf32> to vector<2x32xf32>
    %47 = arith.mulf %36, %46 : vector<2x32xf32>
    %48 = arith.addf %45, %47 : vector<2x32xf32>
    %49 = math.tanh %48 : vector<2x32xf32>
    %cst_22 = arith.constant 1.000000e+00 : f32
    %50 = vector.broadcast %cst_22 : f32 to vector<2x32xf32>
    %51 = arith.subf %50, %44 : vector<2x32xf32>
    %52 = arith.mulf %51, %49 : vector<2x32xf32>
    %53 = arith.mulf %44, %19 : vector<2x32xf32>
    %54 = arith.addf %52, %53 : vector<2x32xf32>
    %55 = vector.extract_strided_slice %10 {offsets = [0, 7, 0], sizes = [2, 1, 96], strides = [1, 1, 1]} : vector<2x8x96xf32> to vector<2x1x96xf32>
    %56 = vector.shape_cast %55 : vector<2x1x96xf32> to vector<2x96xf32>
    %57 = vector.extract_strided_slice %56 {offsets = [0, 0], sizes = [2, 32], strides = [1, 1]} : vector<2x96xf32> to vector<2x32xf32>
    %58 = vector.extract_strided_slice %26 {offsets = [0, 0], sizes = [2, 32], strides = [1, 1]} : vector<2x96xf32> to vector<2x32xf32>
    %59 = arith.addf %57, %58 : vector<2x32xf32>
    %60 = arith.negf %59 : vector<2x32xf32>
    %61 = math.exp %60 : vector<2x32xf32>
    %cst_23 = arith.constant 1.000000e+00 : f32
    %62 = vector.broadcast %cst_23 : f32 to vector<2x32xf32>
    %63 = arith.addf %62, %61 : vector<2x32xf32>
    %64 = arith.divf %62, %63 : vector<2x32xf32>
    %65 = vector.extract_strided_slice %56 {offsets = [0, 32], sizes = [2, 32], strides = [1, 1]} : vector<2x96xf32> to vector<2x32xf32>
    %66 = vector.extract_strided_slice %26 {offsets = [0, 32], sizes = [2, 32], strides = [1, 1]} : vector<2x96xf32> to vector<2x32xf32>
    %67 = arith.addf %65, %66 : vector<2x32xf32>
    %68 = arith.negf %67 : vector<2x32xf32>
    %69 = math.exp %68 : vector<2x32xf32>
    %cst_24 = arith.constant 1.000000e+00 : f32
    %70 = vector.broadcast %cst_24 : f32 to vector<2x32xf32>
    %71 = arith.addf %70, %69 : vector<2x32xf32>
    %72 = arith.divf %70, %71 : vector<2x32xf32>
    %73 = vector.extract_strided_slice %56 {offsets = [0, 64], sizes = [2, 32], strides = [1, 1]} : vector<2x96xf32> to vector<2x32xf32>
    %74 = vector.extract_strided_slice %26 {offsets = [0, 64], sizes = [2, 32], strides = [1, 1]} : vector<2x96xf32> to vector<2x32xf32>
    %75 = arith.mulf %64, %74 : vector<2x32xf32>
    %76 = arith.addf %73, %75 : vector<2x32xf32>
    %77 = math.tanh %76 : vector<2x32xf32>
    %cst_25 = arith.constant 1.000000e+00 : f32
    %78 = vector.broadcast %cst_25 : f32 to vector<2x32xf32>
    %79 = arith.subf %78, %72 : vector<2x32xf32>
    %80 = arith.mulf %79, %77 : vector<2x32xf32>
    %81 = arith.mulf %72, %20 : vector<2x32xf32>
    %82 = arith.addf %80, %81 : vector<2x32xf32>
    %83 = vector.broadcast %21 : vector<2x1xf32> to vector<2x32xf32>
    %84 = arith.mulf %83, %54 : vector<2x32xf32>
    %cst_26 = arith.constant 1.000000e+00 : f32
    %85 = vector.broadcast %cst_26 : f32 to vector<2x1xf32>
    %86 = arith.subf %85, %21 : vector<2x1xf32>
    %87 = vector.broadcast %86 : vector<2x1xf32> to vector<2x32xf32>
    %88 = arith.mulf %87, %19 : vector<2x32xf32>
    %89 = arith.addf %84, %88 : vector<2x32xf32>
    %90 = vector.broadcast %22 : vector<2x1xf32> to vector<2x32xf32>
    %91 = arith.mulf %90, %82 : vector<2x32xf32>
    %cst_27 = arith.constant 1.000000e+00 : f32
    %92 = vector.broadcast %cst_27 : f32 to vector<2x1xf32>
    %93 = arith.subf %92, %22 : vector<2x1xf32>
    %94 = vector.broadcast %93 : vector<2x1xf32> to vector<2x32xf32>
    %95 = arith.mulf %94, %20 : vector<2x32xf32>
    %96 = arith.addf %91, %95 : vector<2x32xf32>
    %97 = vector.broadcast %21 : vector<2x1xf32> to vector<2x32xf32>
    %98 = arith.mulf %89, %97 : vector<2x32xf32>
    %c0_28 = arith.constant 0 : index
    %c0_29 = arith.constant 0 : index
    %c0_30 = arith.constant 0 : index
    %99 = vector.load %arg21[%c0_28, %c0_29, %c0_30] : memref<2x8x64xf32, #tpu.memory_space<vmem>>, vector<2x1x32xf32>
    %100 = vector.shape_cast %99 : vector<2x1x32xf32> to vector<2x32xf32>
    %101 = vector.shape_cast %98 : vector<2x32xf32> to vector<2x1x32xf32>
    tpu.vector_store %arg21[%c0_28, %c0_29, %c0_30], %101 {strides = array<i32>} : memref<2x8x64xf32, #tpu.memory_space<vmem>>, vector<2x1x32xf32>,
    %102 = vector.broadcast %22 : vector<2x1xf32> to vector<2x32xf32>
    %103 = arith.mulf %96, %102 : vector<2x32xf32>
    %c0_31 = arith.constant 0 : index
    %c7 = arith.constant 7 : index
    %c32 = arith.constant 32 : index
    %104 = vector.load %arg21[%c0_31, %c7, %c32] : memref<2x8x64xf32, #tpu.memory_space<vmem>>, vector<2x1x32xf32>
    %105 = vector.shape_cast %104 : vector<2x1x32xf32> to vector<2x32xf32>
    %106 = vector.shape_cast %103 : vector<2x32xf32> to vector<2x1x32xf32>
    tpu.vector_store %arg21[%c0_31, %c7, %c32], %106 {strides = array<i32>} : memref<2x8x64xf32, #tpu.memory_space<vmem>>, vector<2x1x32xf32>,
    %107 = vector.extract_strided_slice %0 {offsets = [0, 1], sizes = [2, 1], strides = [1, 1]} : vector<2x8xf32> to vector<2x1xf32>
    %108 = vector.extract_strided_slice %0 {offsets = [0, 6], sizes = [2, 1], strides = [1, 1]} : vector<2x8xf32> to vector<2x1xf32>
    %cst_32 = arith.constant dense<0.000000e+00> : vector<2x96xf32>
    %109 = tpu.matmul %89, %11, %cst_32 {dimension_numbers = #tpu.dot_dimension_numbers<[1], [0], [0], [1], [0, 0, 1, 1], [], []>} : vector<2x32xf32>, vector<32x96xf32>, vector<2x96xf32> -> vector<2x96xf32>
    %110 = arith.addf %109, %15 : vector<2x96xf32>
    %cst_33 = arith.constant dense<0.000000e+00> : vector<2x96xf32>
    %111 = tpu.matmul %96, %12, %cst_33 {dimension_numbers = #tpu.dot_dimension_numbers<[1], [0], [0], [1], [0, 0, 1, 1], [], []>} : vector<2x32xf32>, vector<32x96xf32>, vector<2x96xf32> -> vector<2x96xf32>
    %112 = arith.addf %111, %18 : vector<2x96xf32>
    %113 = vector.extract_strided_slice %9 {offsets = [0, 1, 0], sizes = [2, 1, 96], strides = [1, 1, 1]} : vector<2x8x96xf32> to vector<2x1x96xf32>
    %114 = vector.shape_cast %113 : vector<2x1x96xf32> to vector<2x96xf32>
    %115 = vector.extract_strided_slice %114 {offsets = [0, 0], sizes = [2, 32], strides = [1, 1]} : vector<2x96xf32> to vector<2x32xf32>
    %116 = vector.extract_strided_slice %110 {offsets = [0, 0], sizes = [2, 32], strides = [1, 1]} : vector<2x96xf32> to vector<2x32xf32>
    %117 = arith.addf %115, %116 : vector<2x32xf32>
    %118 = arith.negf %117 : vector<2x32xf32>
    %119 = math.exp %118 : vector<2x32xf32>
    %cst_34 = arith.constant 1.000000e+00 : f32
    %120 = vector.broadcast %cst_34 : f32 to vector<2x32xf32>
    %121 = arith.addf %120, %119 : vector<2x32xf32>
    %122 = arith.divf %120, %121 : vector<2x32xf32>
    %123 = vector.extract_strided_slice %114 {offsets = [0, 32], sizes = [2, 32], strides = [1, 1]} : vector<2x96xf32> to vector<2x32xf32>
    %124 = vector.extract_strided_slice %110 {offsets = [0, 32], sizes = [2, 32], strides = [1, 1]} : vector<2x96xf32> to vector<2x32xf32>
    %125 = arith.addf %123, %124 : vector<2x32xf32>
    %126 = arith.negf %125 : vector<2x32xf32>
    %127 = math.exp %126 : vector<2x32xf32>
    %cst_35 = arith.constant 1.000000e+00 : f32
    %128 = vector.broadcast %cst_35 : f32 to vector<2x32xf32>
    %129 = arith.addf %128, %127 : vector<2x32xf32>
    %130 = arith.divf %128, %129 : vector<2x32xf32>
    %131 = vector.extract_strided_slice %114 {offsets = [0, 64], sizes = [2, 32], strides = [1, 1]} : vector<2x96xf32> to vector<2x32xf32>
    %132 = vector.extract_strided_slice %110 {offsets = [0, 64], sizes = [2, 32], strides = [1, 1]} : vector<2x96xf32> to vector<2x32xf32>
    %133 = arith.mulf %122, %132 : vector<2x32xf32>
    %134 = arith.addf %131, %133 : vector<2x32xf32>
    %135 = math.tanh %134 : vector<2x32xf32>
    %cst_36 = arith.constant 1.000000e+00 : f32
    %136 = vector.broadcast %cst_36 : f32 to vector<2x32xf32>
    %137 = arith.subf %136, %130 : vector<2x32xf32>
    %138 = arith.mulf %137, %135 : vector<2x32xf32>
    %139 = arith.mulf %130, %89 : vector<2x32xf32>
    %140 = arith.addf %138, %139 : vector<2x32xf32>
    %141 = vector.extract_strided_slice %10 {offsets = [0, 6, 0], sizes = [2, 1, 96], strides = [1, 1, 1]} : vector<2x8x96xf32> to vector<2x1x96xf32>
    %142 = vector.shape_cast %141 : vector<2x1x96xf32> to vector<2x96xf32>
    %143 = vector.extract_strided_slice %142 {offsets = [0, 0], sizes = [2, 32], strides = [1, 1]} : vector<2x96xf32> to vector<2x32xf32>
    %144 = vector.extract_strided_slice %112 {offsets = [0, 0], sizes = [2, 32], strides = [1, 1]} : vector<2x96xf32> to vector<2x32xf32>
    %145 = arith.addf %143, %144 : vector<2x32xf32>
    %146 = arith.negf %145 : vector<2x32xf32>
    %147 = math.exp %146 : vector<2x32xf32>
    %cst_37 = arith.constant 1.000000e+00 : f32
    %148 = vector.broadcast %cst_37 : f32 to vector<2x32xf32>
    %149 = arith.addf %148, %147 : vector<2x32xf32>
    %150 = arith.divf %148, %149 : vector<2x32xf32>
    %151 = vector.extract_strided_slice %142 {offsets = [0, 32], sizes = [2, 32], strides = [1, 1]} : vector<2x96xf32> to vector<2x32xf32>
    %152 = vector.extract_strided_slice %112 {offsets = [0, 32], sizes = [2, 32], strides = [1, 1]} : vector<2x96xf32> to vector<2x32xf32>
    %153 = arith.addf %151, %152 : vector<2x32xf32>
    %154 = arith.negf %153 : vector<2x32xf32>
    %155 = math.exp %154 : vector<2x32xf32>
    %cst_38 = arith.constant 1.000000e+00 : f32
    %156 = vector.broadcast %cst_38 : f32 to vector<2x32xf32>
    %157 = arith.addf %156, %155 : vector<2x32xf32>
    %158 = arith.divf %156, %157 : vector<2x32xf32>
    %159 = vector.extract_strided_slice %142 {offsets = [0, 64], sizes = [2, 32], strides = [1, 1]} : vector<2x96xf32> to vector<2x32xf32>
    %160 = vector.extract_strided_slice %112 {offsets = [0, 64], sizes = [2, 32], strides = [1, 1]} : vector<2x96xf32> to vector<2x32xf32>
    %161 = arith.mulf %150, %160 : vector<2x32xf32>
    %162 = arith.addf %159, %161 : vector<2x32xf32>
    %163 = math.tanh %162 : vector<2x32xf32>
    %cst_39 = arith.constant 1.000000e+00 : f32
    %164 = vector.broadcast %cst_39 : f32 to vector<2x32xf32>
    %165 = arith.subf %164, %158 : vector<2x32xf32>
    %166 = arith.mulf %165, %163 : vector<2x32xf32>
    %167 = arith.mulf %158, %96 : vector<2x32xf32>
    %168 = arith.addf %166, %167 : vector<2x32xf32>
    %169 = vector.broadcast %107 : vector<2x1xf32> to vector<2x32xf32>
    %170 = arith.mulf %169, %140 : vector<2x32xf32>
    %cst_40 = arith.constant 1.000000e+00 : f32
    %171 = vector.broadcast %cst_40 : f32 to vector<2x1xf32>
    %172 = arith.subf %171, %107 : vector<2x1xf32>
    %173 = vector.broadcast %172 : vector<2x1xf32> to vector<2x32xf32>
    %174 = arith.mulf %173, %89 : vector<2x32xf32>
    %175 = arith.addf %170, %174 : vector<2x32xf32>
    %176 = vector.broadcast %108 : vector<2x1xf32> to vector<2x32xf32>
    %177 = arith.mulf %176, %168 : vector<2x32xf32>
    %cst_41 = arith.constant 1.000000e+00 : f32
    %178 = vector.broadcast %cst_41 : f32 to vector<2x1xf32>
    %179 = arith.subf %178, %108 : vector<2x1xf32>
    %180 = vector.broadcast %179 : vector<2x1xf32> to vector<2x32xf32>
    %181 = arith.mulf %180, %96 : vector<2x32xf32>
    %182 = arith.addf %177, %181 : vector<2x32xf32>
    %183 = vector.broadcast %107 : vector<2x1xf32> to vector<2x32xf32>
    %184 = arith.mulf %175, %183 : vector<2x32xf32>
    %c0_42 = arith.constant 0 : index
    %c1 = arith.constant 1 : index
    %c0_43 = arith.constant 0 : index
    %185 = vector.load %arg21[%c0_42, %c1, %c0_43] : memref<2x8x64xf32, #tpu.memory_space<vmem>>, vector<2x1x32xf32>
    %186 = vector.shape_cast %185 : vector<2x1x32xf32> to vector<2x32xf32>
    %187 = vector.shape_cast %184 : vector<2x32xf32> to vector<2x1x32xf32>
    tpu.vector_store %arg21[%c0_42, %c1, %c0_43], %187 {strides = array<i32>} : memref<2x8x64xf32, #tpu.memory_space<vmem>>, vector<2x1x32xf32>,
    %188 = vector.broadcast %108 : vector<2x1xf32> to vector<2x32xf32>
    %189 = arith.mulf %182, %188 : vector<2x32xf32>
    %c0_44 = arith.constant 0 : index
    %c6 = arith.constant 6 : index
    %c32_45 = arith.constant 32 : index
    %190 = vector.load %arg21[%c0_44, %c6, %c32_45] : memref<2x8x64xf32, #tpu.memory_space<vmem>>, vector<2x1x32xf32>
    %191 = vector.shape_cast %190 : vector<2x1x32xf32> to vector<2x32xf32>
    %192 = vector.shape_cast %189 : vector<2x32xf32> to vector<2x1x32xf32>
    tpu.vector_store %arg21[%c0_44, %c6, %c32_45], %192 {strides = array<i32>} : memref<2x8x64xf32, #tpu.memory_space<vmem>>, vector<2x1x32xf32>,
    %193 = vector.extract_strided_slice %0 {offsets = [0, 2], sizes = [2, 1], strides = [1, 1]} : vector<2x8xf32> to vector<2x1xf32>
    %194 = vector.extract_strided_slice %0 {offsets = [0, 5], sizes = [2, 1], strides = [1, 1]} : vector<2x8xf32> to vector<2x1xf32>
    %cst_46 = arith.constant dense<0.000000e+00> : vector<2x96xf32>
    %195 = tpu.matmul %175, %11, %cst_46 {dimension_numbers = #tpu.dot_dimension_numbers<[1], [0], [0], [1], [0, 0, 1, 1], [], []>} : vector<2x32xf32>, vector<32x96xf32>, vector<2x96xf32> -> vector<2x96xf32>
    %196 = arith.addf %195, %15 : vector<2x96xf32>
    %cst_47 = arith.constant dense<0.000000e+00> : vector<2x96xf32>
    %197 = tpu.matmul %182, %12, %cst_47 {dimension_numbers = #tpu.dot_dimension_numbers<[1], [0], [0], [1], [0, 0, 1, 1], [], []>} : vector<2x32xf32>, vector<32x96xf32>, vector<2x96xf32> -> vector<2x96xf32>
    %198 = arith.addf %197, %18 : vector<2x96xf32>
    %199 = vector.extract_strided_slice %9 {offsets = [0, 2, 0], sizes = [2, 1, 96], strides = [1, 1, 1]} : vector<2x8x96xf32> to vector<2x1x96xf32>
    %200 = vector.shape_cast %199 : vector<2x1x96xf32> to vector<2x96xf32>
    %201 = vector.extract_strided_slice %200 {offsets = [0, 0], sizes = [2, 32], strides = [1, 1]} : vector<2x96xf32> to vector<2x32xf32>
    %202 = vector.extract_strided_slice %196 {offsets = [0, 0], sizes = [2, 32], strides = [1, 1]} : vector<2x96xf32> to vector<2x32xf32>
    %203 = arith.addf %201, %202 : vector<2x32xf32>
    %204 = arith.negf %203 : vector<2x32xf32>
    %205 = math.exp %204 : vector<2x32xf32>
    %cst_48 = arith.constant 1.000000e+00 : f32
    %206 = vector.broadcast %cst_48 : f32 to vector<2x32xf32>
    %207 = arith.addf %206, %205 : vector<2x32xf32>
    %208 = arith.divf %206, %207 : vector<2x32xf32>
    %209 = vector.extract_strided_slice %200 {offsets = [0, 32], sizes = [2, 32], strides = [1, 1]} : vector<2x96xf32> to vector<2x32xf32>
    %210 = vector.extract_strided_slice %196 {offsets = [0, 32], sizes = [2, 32], strides = [1, 1]} : vector<2x96xf32> to vector<2x32xf32>
    %211 = arith.addf %209, %210 : vector<2x32xf32>
    %212 = arith.negf %211 : vector<2x32xf32>
    %213 = math.exp %212 : vector<2x32xf32>
    %cst_49 = arith.constant 1.000000e+00 : f32
    %214 = vector.broadcast %cst_49 : f32 to vector<2x32xf32>
    %215 = arith.addf %214, %213 : vector<2x32xf32>
    %216 = arith.divf %214, %215 : vector<2x32xf32>
    %217 = vector.extract_strided_slice %200 {offsets = [0, 64], sizes = [2, 32], strides = [1, 1]} : vector<2x96xf32> to vector<2x32xf32>
    %218 = vector.extract_strided_slice %196 {offsets = [0, 64], sizes = [2, 32], strides = [1, 1]} : vector<2x96xf32> to vector<2x32xf32>
    %219 = arith.mulf %208, %218 : vector<2x32xf32>
    %220 = arith.addf %217, %219 : vector<2x32xf32>
    %221 = math.tanh %220 : vector<2x32xf32>
    %cst_50 = arith.constant 1.000000e+00 : f32
    %222 = vector.broadcast %cst_50 : f32 to vector<2x32xf32>
    %223 = arith.subf %222, %216 : vector<2x32xf32>
    %224 = arith.mulf %223, %221 : vector<2x32xf32>
    %225 = arith.mulf %216, %175 : vector<2x32xf32>
    %226 = arith.addf %224, %225 : vector<2x32xf32>
    %227 = vector.extract_strided_slice %10 {offsets = [0, 5, 0], sizes = [2, 1, 96], strides = [1, 1, 1]} : vector<2x8x96xf32> to vector<2x1x96xf32>
    %228 = vector.shape_cast %227 : vector<2x1x96xf32> to vector<2x96xf32>
    %229 = vector.extract_strided_slice %228 {offsets = [0, 0], sizes = [2, 32], strides = [1, 1]} : vector<2x96xf32> to vector<2x32xf32>
    %230 = vector.extract_strided_slice %198 {offsets = [0, 0], sizes = [2, 32], strides = [1, 1]} : vector<2x96xf32> to vector<2x32xf32>
    %231 = arith.addf %229, %230 : vector<2x32xf32>
    %232 = arith.negf %231 : vector<2x32xf32>
    %233 = math.exp %232 : vector<2x32xf32>
    %cst_51 = arith.constant 1.000000e+00 : f32
    %234 = vector.broadcast %cst_51 : f32 to vector<2x32xf32>
    %235 = arith.addf %234, %233 : vector<2x32xf32>
    %236 = arith.divf %234, %235 : vector<2x32xf32>
    %237 = vector.extract_strided_slice %228 {offsets = [0, 32], sizes = [2, 32], strides = [1, 1]} : vector<2x96xf32> to vector<2x32xf32>
    %238 = vector.extract_strided_slice %198 {offsets = [0, 32], sizes = [2, 32], strides = [1, 1]} : vector<2x96xf32> to vector<2x32xf32>
    %239 = arith.addf %237, %238 : vector<2x32xf32>
    %240 = arith.negf %239 : vector<2x32xf32>
    %241 = math.exp %240 : vector<2x32xf32>
    %cst_52 = arith.constant 1.000000e+00 : f32
    %242 = vector.broadcast %cst_52 : f32 to vector<2x32xf32>
    %243 = arith.addf %242, %241 : vector<2x32xf32>
    %244 = arith.divf %242, %243 : vector<2x32xf32>
    %245 = vector.extract_strided_slice %228 {offsets = [0, 64], sizes = [2, 32], strides = [1, 1]} : vector<2x96xf32> to vector<2x32xf32>
    %246 = vector.extract_strided_slice %198 {offsets = [0, 64], sizes = [2, 32], strides = [1, 1]} : vector<2x96xf32> to vector<2x32xf32>
    %247 = arith.mulf %236, %246 : vector<2x32xf32>
    %248 = arith.addf %245, %247 : vector<2x32xf32>
    %249 = math.tanh %248 : vector<2x32xf32>
    %cst_53 = arith.constant 1.000000e+00 : f32
    %250 = vector.broadcast %cst_53 : f32 to vector<2x32xf32>
    %251 = arith.subf %250, %244 : vector<2x32xf32>
    %252 = arith.mulf %251, %249 : vector<2x32xf32>
    %253 = arith.mulf %244, %182 : vector<2x32xf32>
    %254 = arith.addf %252, %253 : vector<2x32xf32>
    %255 = vector.broadcast %193 : vector<2x1xf32> to vector<2x32xf32>
    %256 = arith.mulf %255, %226 : vector<2x32xf32>
    %cst_54 = arith.constant 1.000000e+00 : f32
    %257 = vector.broadcast %cst_54 : f32 to vector<2x1xf32>
    %258 = arith.subf %257, %193 : vector<2x1xf32>
    %259 = vector.broadcast %258 : vector<2x1xf32> to vector<2x32xf32>
    %260 = arith.mulf %259, %175 : vector<2x32xf32>
    %261 = arith.addf %256, %260 : vector<2x32xf32>
    %262 = vector.broadcast %194 : vector<2x1xf32> to vector<2x32xf32>
    %263 = arith.mulf %262, %254 : vector<2x32xf32>
    %cst_55 = arith.constant 1.000000e+00 : f32
    %264 = vector.broadcast %cst_55 : f32 to vector<2x1xf32>
    %265 = arith.subf %264, %194 : vector<2x1xf32>
    %266 = vector.broadcast %265 : vector<2x1xf32> to vector<2x32xf32>
    %267 = arith.mulf %266, %182 : vector<2x32xf32>
    %268 = arith.addf %263, %267 : vector<2x32xf32>
    %269 = vector.broadcast %193 : vector<2x1xf32> to vector<2x32xf32>
    %270 = arith.mulf %261, %269 : vector<2x32xf32>
    %c0_56 = arith.constant 0 : index
    %c2 = arith.constant 2 : index
    %c0_57 = arith.constant 0 : index
    %271 = vector.load %arg21[%c0_56, %c2, %c0_57] : memref<2x8x64xf32, #tpu.memory_space<vmem>>, vector<2x1x32xf32>
    %272 = vector.shape_cast %271 : vector<2x1x32xf32> to vector<2x32xf32>
    %273 = vector.shape_cast %270 : vector<2x32xf32> to vector<2x1x32xf32>
    tpu.vector_store %arg21[%c0_56, %c2, %c0_57], %273 {strides = array<i32>} : memref<2x8x64xf32, #tpu.memory_space<vmem>>, vector<2x1x32xf32>,
    %274 = vector.broadcast %194 : vector<2x1xf32> to vector<2x32xf32>
    %275 = arith.mulf %268, %274 : vector<2x32xf32>
    %c0_58 = arith.constant 0 : index
    %c5 = arith.constant 5 : index
    %c32_59 = arith.constant 32 : index
    %276 = vector.load %arg21[%c0_58, %c5, %c32_59] : memref<2x8x64xf32, #tpu.memory_space<vmem>>, vector<2x1x32xf32>
    %277 = vector.shape_cast %276 : vector<2x1x32xf32> to vector<2x32xf32>
    %278 = vector.shape_cast %275 : vector<2x32xf32> to vector<2x1x32xf32>
    tpu.vector_store %arg21[%c0_58, %c5, %c32_59], %278 {strides = array<i32>} : memref<2x8x64xf32, #tpu.memory_space<vmem>>, vector<2x1x32xf32>,
    %279 = vector.extract_strided_slice %0 {offsets = [0, 3], sizes = [2, 1], strides = [1, 1]} : vector<2x8xf32> to vector<2x1xf32>
    %280 = vector.extract_strided_slice %0 {offsets = [0, 4], sizes = [2, 1], strides = [1, 1]} : vector<2x8xf32> to vector<2x1xf32>
    %cst_60 = arith.constant dense<0.000000e+00> : vector<2x96xf32>
    %281 = tpu.matmul %261, %11, %cst_60 {dimension_numbers = #tpu.dot_dimension_numbers<[1], [0], [0], [1], [0, 0, 1, 1], [], []>} : vector<2x32xf32>, vector<32x96xf32>, vector<2x96xf32> -> vector<2x96xf32>
    %282 = arith.addf %281, %15 : vector<2x96xf32>
    %cst_61 = arith.constant dense<0.000000e+00> : vector<2x96xf32>
    %283 = tpu.matmul %268, %12, %cst_61 {dimension_numbers = #tpu.dot_dimension_numbers<[1], [0], [0], [1], [0, 0, 1, 1], [], []>} : vector<2x32xf32>, vector<32x96xf32>, vector<2x96xf32> -> vector<2x96xf32>
    %284 = arith.addf %283, %18 : vector<2x96xf32>
    %285 = vector.extract_strided_slice %9 {offsets = [0, 3, 0], sizes = [2, 1, 96], strides = [1, 1, 1]} : vector<2x8x96xf32> to vector<2x1x96xf32>
    %286 = vector.shape_cast %285 : vector<2x1x96xf32> to vector<2x96xf32>
    %287 = vector.extract_strided_slice %286 {offsets = [0, 0], sizes = [2, 32], strides = [1, 1]} : vector<2x96xf32> to vector<2x32xf32>
    %288 = vector.extract_strided_slice %282 {offsets = [0, 0], sizes = [2, 32], strides = [1, 1]} : vector<2x96xf32> to vector<2x32xf32>
    %289 = arith.addf %287, %288 : vector<2x32xf32>
    %290 = arith.negf %289 : vector<2x32xf32>
    %291 = math.exp %290 : vector<2x32xf32>
    %cst_62 = arith.constant 1.000000e+00 : f32
    %292 = vector.broadcast %cst_62 : f32 to vector<2x32xf32>
    %293 = arith.addf %292, %291 : vector<2x32xf32>
    %294 = arith.divf %292, %293 : vector<2x32xf32>
    %295 = vector.extract_strided_slice %286 {offsets = [0, 32], sizes = [2, 32], strides = [1, 1]} : vector<2x96xf32> to vector<2x32xf32>
    %296 = vector.extract_strided_slice %282 {offsets = [0, 32], sizes = [2, 32], strides = [1, 1]} : vector<2x96xf32> to vector<2x32xf32>
    %297 = arith.addf %295, %296 : vector<2x32xf32>
    %298 = arith.negf %297 : vector<2x32xf32>
    %299 = math.exp %298 : vector<2x32xf32>
    %cst_63 = arith.constant 1.000000e+00 : f32
    %300 = vector.broadcast %cst_63 : f32 to vector<2x32xf32>
    %301 = arith.addf %300, %299 : vector<2x32xf32>
    %302 = arith.divf %300, %301 : vector<2x32xf32>
    %303 = vector.extract_strided_slice %286 {offsets = [0, 64], sizes = [2, 32], strides = [1, 1]} : vector<2x96xf32> to vector<2x32xf32>
    %304 = vector.extract_strided_slice %282 {offsets = [0, 64], sizes = [2, 32], strides = [1, 1]} : vector<2x96xf32> to vector<2x32xf32>
    %305 = arith.mulf %294, %304 : vector<2x32xf32>
    %306 = arith.addf %303, %305 : vector<2x32xf32>
    %307 = math.tanh %306 : vector<2x32xf32>
    %cst_64 = arith.constant 1.000000e+00 : f32
    %308 = vector.broadcast %cst_64 : f32 to vector<2x32xf32>
    %309 = arith.subf %308, %302 : vector<2x32xf32>
    %310 = arith.mulf %309, %307 : vector<2x32xf32>
    %311 = arith.mulf %302, %261 : vector<2x32xf32>
    %312 = arith.addf %310, %311 : vector<2x32xf32>
    %313 = vector.extract_strided_slice %10 {offsets = [0, 4, 0], sizes = [2, 1, 96], strides = [1, 1, 1]} : vector<2x8x96xf32> to vector<2x1x96xf32>
    %314 = vector.shape_cast %313 : vector<2x1x96xf32> to vector<2x96xf32>
    %315 = vector.extract_strided_slice %314 {offsets = [0, 0], sizes = [2, 32], strides = [1, 1]} : vector<2x96xf32> to vector<2x32xf32>
    %316 = vector.extract_strided_slice %284 {offsets = [0, 0], sizes = [2, 32], strides = [1, 1]} : vector<2x96xf32> to vector<2x32xf32>
    %317 = arith.addf %315, %316 : vector<2x32xf32>
    %318 = arith.negf %317 : vector<2x32xf32>
    %319 = math.exp %318 : vector<2x32xf32>
    %cst_65 = arith.constant 1.000000e+00 : f32
    %320 = vector.broadcast %cst_65 : f32 to vector<2x32xf32>
    %321 = arith.addf %320, %319 : vector<2x32xf32>
    %322 = arith.divf %320, %321 : vector<2x32xf32>
    %323 = vector.extract_strided_slice %314 {offsets = [0, 32], sizes = [2, 32], strides = [1, 1]} : vector<2x96xf32> to vector<2x32xf32>
    %324 = vector.extract_strided_slice %284 {offsets = [0, 32], sizes = [2, 32], strides = [1, 1]} : vector<2x96xf32> to vector<2x32xf32>
    %325 = arith.addf %323, %324 : vector<2x32xf32>
    %326 = arith.negf %325 : vector<2x32xf32>
    %327 = math.exp %326 : vector<2x32xf32>
    %cst_66 = arith.constant 1.000000e+00 : f32
    %328 = vector.broadcast %cst_66 : f32 to vector<2x32xf32>
    %329 = arith.addf %328, %327 : vector<2x32xf32>
    %330 = arith.divf %328, %329 : vector<2x32xf32>
    %331 = vector.extract_strided_slice %314 {offsets = [0, 64], sizes = [2, 32], strides = [1, 1]} : vector<2x96xf32> to vector<2x32xf32>
    %332 = vector.extract_strided_slice %284 {offsets = [0, 64], sizes = [2, 32], strides = [1, 1]} : vector<2x96xf32> to vector<2x32xf32>
    %333 = arith.mulf %322, %332 : vector<2x32xf32>
    %334 = arith.addf %331, %333 : vector<2x32xf32>
    %335 = math.tanh %334 : vector<2x32xf32>
    %cst_67 = arith.constant 1.000000e+00 : f32
    %336 = vector.broadcast %cst_67 : f32 to vector<2x32xf32>
    %337 = arith.subf %336, %330 : vector<2x32xf32>
    %338 = arith.mulf %337, %335 : vector<2x32xf32>
    %339 = arith.mulf %330, %268 : vector<2x32xf32>
    %340 = arith.addf %338, %339 : vector<2x32xf32>
    %341 = vector.broadcast %279 : vector<2x1xf32> to vector<2x32xf32>
    %342 = arith.mulf %341, %312 : vector<2x32xf32>
    %cst_68 = arith.constant 1.000000e+00 : f32
    %343 = vector.broadcast %cst_68 : f32 to vector<2x1xf32>
    %344 = arith.subf %343, %279 : vector<2x1xf32>
    %345 = vector.broadcast %344 : vector<2x1xf32> to vector<2x32xf32>
    %346 = arith.mulf %345, %261 : vector<2x32xf32>
    %347 = arith.addf %342, %346 : vector<2x32xf32>
    %348 = vector.broadcast %280 : vector<2x1xf32> to vector<2x32xf32>
    %349 = arith.mulf %348, %340 : vector<2x32xf32>
    %cst_69 = arith.constant 1.000000e+00 : f32
    %350 = vector.broadcast %cst_69 : f32 to vector<2x1xf32>
    %351 = arith.subf %350, %280 : vector<2x1xf32>
    %352 = vector.broadcast %351 : vector<2x1xf32> to vector<2x32xf32>
    %353 = arith.mulf %352, %268 : vector<2x32xf32>
    %354 = arith.addf %349, %353 : vector<2x32xf32>
    %355 = vector.broadcast %279 : vector<2x1xf32> to vector<2x32xf32>
    %356 = arith.mulf %347, %355 : vector<2x32xf32>
    %c0_70 = arith.constant 0 : index
    %c3 = arith.constant 3 : index
    %c0_71 = arith.constant 0 : index
    %357 = vector.load %arg21[%c0_70, %c3, %c0_71] : memref<2x8x64xf32, #tpu.memory_space<vmem>>, vector<2x1x32xf32>
    %358 = vector.shape_cast %357 : vector<2x1x32xf32> to vector<2x32xf32>
    %359 = vector.shape_cast %356 : vector<2x32xf32> to vector<2x1x32xf32>
    tpu.vector_store %arg21[%c0_70, %c3, %c0_71], %359 {strides = array<i32>} : memref<2x8x64xf32, #tpu.memory_space<vmem>>, vector<2x1x32xf32>,
    %360 = vector.broadcast %280 : vector<2x1xf32> to vector<2x32xf32>
    %361 = arith.mulf %354, %360 : vector<2x32xf32>
    %c0_72 = arith.constant 0 : index
    %c4 = arith.constant 4 : index
    %c32_73 = arith.constant 32 : index
    %362 = vector.load %arg21[%c0_72, %c4, %c32_73] : memref<2x8x64xf32, #tpu.memory_space<vmem>>, vector<2x1x32xf32>
    %363 = vector.shape_cast %362 : vector<2x1x32xf32> to vector<2x32xf32>
    %364 = vector.shape_cast %361 : vector<2x32xf32> to vector<2x1x32xf32>
    tpu.vector_store %arg21[%c0_72, %c4, %c32_73], %364 {strides = array<i32>} : memref<2x8x64xf32, #tpu.memory_space<vmem>>, vector<2x1x32xf32>,
    %365 = vector.extract_strided_slice %0 {offsets = [0, 4], sizes = [2, 1], strides = [1, 1]} : vector<2x8xf32> to vector<2x1xf32>
    %366 = vector.extract_strided_slice %0 {offsets = [0, 3], sizes = [2, 1], strides = [1, 1]} : vector<2x8xf32> to vector<2x1xf32>
    %cst_74 = arith.constant dense<0.000000e+00> : vector<2x96xf32>
    %367 = tpu.matmul %347, %11, %cst_74 {dimension_numbers = #tpu.dot_dimension_numbers<[1], [0], [0], [1], [0, 0, 1, 1], [], []>} : vector<2x32xf32>, vector<32x96xf32>, vector<2x96xf32> -> vector<2x96xf32>
    %368 = arith.addf %367, %15 : vector<2x96xf32>
    %cst_75 = arith.constant dense<0.000000e+00> : vector<2x96xf32>
    %369 = tpu.matmul %354, %12, %cst_75 {dimension_numbers = #tpu.dot_dimension_numbers<[1], [0], [0], [1], [0, 0, 1, 1], [], []>} : vector<2x32xf32>, vector<32x96xf32>, vector<2x96xf32> -> vector<2x96xf32>
    %370 = arith.addf %369, %18 : vector<2x96xf32>
    %371 = vector.extract_strided_slice %9 {offsets = [0, 4, 0], sizes = [2, 1, 96], strides = [1, 1, 1]} : vector<2x8x96xf32> to vector<2x1x96xf32>
    %372 = vector.shape_cast %371 : vector<2x1x96xf32> to vector<2x96xf32>
    %373 = vector.extract_strided_slice %372 {offsets = [0, 0], sizes = [2, 32], strides = [1, 1]} : vector<2x96xf32> to vector<2x32xf32>
    %374 = vector.extract_strided_slice %368 {offsets = [0, 0], sizes = [2, 32], strides = [1, 1]} : vector<2x96xf32> to vector<2x32xf32>
    %375 = arith.addf %373, %374 : vector<2x32xf32>
    %376 = arith.negf %375 : vector<2x32xf32>
    %377 = math.exp %376 : vector<2x32xf32>
    %cst_76 = arith.constant 1.000000e+00 : f32
    %378 = vector.broadcast %cst_76 : f32 to vector<2x32xf32>
    %379 = arith.addf %378, %377 : vector<2x32xf32>
    %380 = arith.divf %378, %379 : vector<2x32xf32>
    %381 = vector.extract_strided_slice %372 {offsets = [0, 32], sizes = [2, 32], strides = [1, 1]} : vector<2x96xf32> to vector<2x32xf32>
    %382 = vector.extract_strided_slice %368 {offsets = [0, 32], sizes = [2, 32], strides = [1, 1]} : vector<2x96xf32> to vector<2x32xf32>
    %383 = arith.addf %381, %382 : vector<2x32xf32>
    %384 = arith.negf %383 : vector<2x32xf32>
    %385 = math.exp %384 : vector<2x32xf32>
    %cst_77 = arith.constant 1.000000e+00 : f32
    %386 = vector.broadcast %cst_77 : f32 to vector<2x32xf32>
    %387 = arith.addf %386, %385 : vector<2x32xf32>
    %388 = arith.divf %386, %387 : vector<2x32xf32>
    %389 = vector.extract_strided_slice %372 {offsets = [0, 64], sizes = [2, 32], strides = [1, 1]} : vector<2x96xf32> to vector<2x32xf32>
    %390 = vector.extract_strided_slice %368 {offsets = [0, 64], sizes = [2, 32], strides = [1, 1]} : vector<2x96xf32> to vector<2x32xf32>
    %391 = arith.mulf %380, %390 : vector<2x32xf32>
    %392 = arith.addf %389, %391 : vector<2x32xf32>
    %393 = math.tanh %392 : vector<2x32xf32>
    %cst_78 = arith.constant 1.000000e+00 : f32
    %394 = vector.broadcast %cst_78 : f32 to vector<2x32xf32>
    %395 = arith.subf %394, %388 : vector<2x32xf32>
    %396 = arith.mulf %395, %393 : vector<2x32xf32>
    %397 = arith.mulf %388, %347 : vector<2x32xf32>
    %398 = arith.addf %396, %397 : vector<2x32xf32>
    %399 = vector.extract_strided_slice %10 {offsets = [0, 3, 0], sizes = [2, 1, 96], strides = [1, 1, 1]} : vector<2x8x96xf32> to vector<2x1x96xf32>
    %400 = vector.shape_cast %399 : vector<2x1x96xf32> to vector<2x96xf32>
    %401 = vector.extract_strided_slice %400 {offsets = [0, 0], sizes = [2, 32], strides = [1, 1]} : vector<2x96xf32> to vector<2x32xf32>
    %402 = vector.extract_strided_slice %370 {offsets = [0, 0], sizes = [2, 32], strides = [1, 1]} : vector<2x96xf32> to vector<2x32xf32>
    %403 = arith.addf %401, %402 : vector<2x32xf32>
    %404 = arith.negf %403 : vector<2x32xf32>
    %405 = math.exp %404 : vector<2x32xf32>
    %cst_79 = arith.constant 1.000000e+00 : f32
    %406 = vector.broadcast %cst_79 : f32 to vector<2x32xf32>
    %407 = arith.addf %406, %405 : vector<2x32xf32>
    %408 = arith.divf %406, %407 : vector<2x32xf32>
    %409 = vector.extract_strided_slice %400 {offsets = [0, 32], sizes = [2, 32], strides = [1, 1]} : vector<2x96xf32> to vector<2x32xf32>
    %410 = vector.extract_strided_slice %370 {offsets = [0, 32], sizes = [2, 32], strides = [1, 1]} : vector<2x96xf32> to vector<2x32xf32>
    %411 = arith.addf %409, %410 : vector<2x32xf32>
    %412 = arith.negf %411 : vector<2x32xf32>
    %413 = math.exp %412 : vector<2x32xf32>
    %cst_80 = arith.constant 1.000000e+00 : f32
    %414 = vector.broadcast %cst_80 : f32 to vector<2x32xf32>
    %415 = arith.addf %414, %413 : vector<2x32xf32>
    %416 = arith.divf %414, %415 : vector<2x32xf32>
    %417 = vector.extract_strided_slice %400 {offsets = [0, 64], sizes = [2, 32], strides = [1, 1]} : vector<2x96xf32> to vector<2x32xf32>
    %418 = vector.extract_strided_slice %370 {offsets = [0, 64], sizes = [2, 32], strides = [1, 1]} : vector<2x96xf32> to vector<2x32xf32>
    %419 = arith.mulf %408, %418 : vector<2x32xf32>
    %420 = arith.addf %417, %419 : vector<2x32xf32>
    %421 = math.tanh %420 : vector<2x32xf32>
    %cst_81 = arith.constant 1.000000e+00 : f32
    %422 = vector.broadcast %cst_81 : f32 to vector<2x32xf32>
    %423 = arith.subf %422, %416 : vector<2x32xf32>
    %424 = arith.mulf %423, %421 : vector<2x32xf32>
    %425 = arith.mulf %416, %354 : vector<2x32xf32>
    %426 = arith.addf %424, %425 : vector<2x32xf32>
    %427 = vector.broadcast %365 : vector<2x1xf32> to vector<2x32xf32>
    %428 = arith.mulf %427, %398 : vector<2x32xf32>
    %cst_82 = arith.constant 1.000000e+00 : f32
    %429 = vector.broadcast %cst_82 : f32 to vector<2x1xf32>
    %430 = arith.subf %429, %365 : vector<2x1xf32>
    %431 = vector.broadcast %430 : vector<2x1xf32> to vector<2x32xf32>
    %432 = arith.mulf %431, %347 : vector<2x32xf32>
    %433 = arith.addf %428, %432 : vector<2x32xf32>
    %434 = vector.broadcast %366 : vector<2x1xf32> to vector<2x32xf32>
    %435 = arith.mulf %434, %426 : vector<2x32xf32>
    %cst_83 = arith.constant 1.000000e+00 : f32
    %436 = vector.broadcast %cst_83 : f32 to vector<2x1xf32>
    %437 = arith.subf %436, %366 : vector<2x1xf32>
    %438 = vector.broadcast %437 : vector<2x1xf32> to vector<2x32xf32>
    %439 = arith.mulf %438, %354 : vector<2x32xf32>
    %440 = arith.addf %435, %439 : vector<2x32xf32>
    %441 = vector.broadcast %365 : vector<2x1xf32> to vector<2x32xf32>
    %442 = arith.mulf %433, %441 : vector<2x32xf32>
    %c0_84 = arith.constant 0 : index
    %c4_85 = arith.constant 4 : index
    %c0_86 = arith.constant 0 : index
    %443 = vector.load %arg21[%c0_84, %c4_85, %c0_86] : memref<2x8x64xf32, #tpu.memory_space<vmem>>, vector<2x1x32xf32>
    %444 = vector.shape_cast %443 : vector<2x1x32xf32> to vector<2x32xf32>
    %445 = vector.shape_cast %442 : vector<2x32xf32> to vector<2x1x32xf32>
    tpu.vector_store %arg21[%c0_84, %c4_85, %c0_86], %445 {strides = array<i32>} : memref<2x8x64xf32, #tpu.memory_space<vmem>>, vector<2x1x32xf32>,
    %446 = vector.broadcast %366 : vector<2x1xf32> to vector<2x32xf32>
    %447 = arith.mulf %440, %446 : vector<2x32xf32>
    %c0_87 = arith.constant 0 : index
    %c3_88 = arith.constant 3 : index
    %c32_89 = arith.constant 32 : index
    %448 = vector.load %arg21[%c0_87, %c3_88, %c32_89] : memref<2x8x64xf32, #tpu.memory_space<vmem>>, vector<2x1x32xf32>
    %449 = vector.shape_cast %448 : vector<2x1x32xf32> to vector<2x32xf32>
    %450 = vector.shape_cast %447 : vector<2x32xf32> to vector<2x1x32xf32>
    tpu.vector_store %arg21[%c0_87, %c3_88, %c32_89], %450 {strides = array<i32>} : memref<2x8x64xf32, #tpu.memory_space<vmem>>, vector<2x1x32xf32>,
    %451 = vector.extract_strided_slice %0 {offsets = [0, 5], sizes = [2, 1], strides = [1, 1]} : vector<2x8xf32> to vector<2x1xf32>
    %452 = vector.extract_strided_slice %0 {offsets = [0, 2], sizes = [2, 1], strides = [1, 1]} : vector<2x8xf32> to vector<2x1xf32>
    %cst_90 = arith.constant dense<0.000000e+00> : vector<2x96xf32>
    %453 = tpu.matmul %433, %11, %cst_90 {dimension_numbers = #tpu.dot_dimension_numbers<[1], [0], [0], [1], [0, 0, 1, 1], [], []>} : vector<2x32xf32>, vector<32x96xf32>, vector<2x96xf32> -> vector<2x96xf32>
    %454 = arith.addf %453, %15 : vector<2x96xf32>
    %cst_91 = arith.constant dense<0.000000e+00> : vector<2x96xf32>
    %455 = tpu.matmul %440, %12, %cst_91 {dimension_numbers = #tpu.dot_dimension_numbers<[1], [0], [0], [1], [0, 0, 1, 1], [], []>} : vector<2x32xf32>, vector<32x96xf32>, vector<2x96xf32> -> vector<2x96xf32>
    %456 = arith.addf %455, %18 : vector<2x96xf32>
    %457 = vector.extract_strided_slice %9 {offsets = [0, 5, 0], sizes = [2, 1, 96], strides = [1, 1, 1]} : vector<2x8x96xf32> to vector<2x1x96xf32>
    %458 = vector.shape_cast %457 : vector<2x1x96xf32> to vector<2x96xf32>
    %459 = vector.extract_strided_slice %458 {offsets = [0, 0], sizes = [2, 32], strides = [1, 1]} : vector<2x96xf32> to vector<2x32xf32>
    %460 = vector.extract_strided_slice %454 {offsets = [0, 0], sizes = [2, 32], strides = [1, 1]} : vector<2x96xf32> to vector<2x32xf32>
    %461 = arith.addf %459, %460 : vector<2x32xf32>
    %462 = arith.negf %461 : vector<2x32xf32>
    %463 = math.exp %462 : vector<2x32xf32>
    %cst_92 = arith.constant 1.000000e+00 : f32
    %464 = vector.broadcast %cst_92 : f32 to vector<2x32xf32>
    %465 = arith.addf %464, %463 : vector<2x32xf32>
    %466 = arith.divf %464, %465 : vector<2x32xf32>
    %467 = vector.extract_strided_slice %458 {offsets = [0, 32], sizes = [2, 32], strides = [1, 1]} : vector<2x96xf32> to vector<2x32xf32>
    %468 = vector.extract_strided_slice %454 {offsets = [0, 32], sizes = [2, 32], strides = [1, 1]} : vector<2x96xf32> to vector<2x32xf32>
    %469 = arith.addf %467, %468 : vector<2x32xf32>
    %470 = arith.negf %469 : vector<2x32xf32>
    %471 = math.exp %470 : vector<2x32xf32>
    %cst_93 = arith.constant 1.000000e+00 : f32
    %472 = vector.broadcast %cst_93 : f32 to vector<2x32xf32>
    %473 = arith.addf %472, %471 : vector<2x32xf32>
    %474 = arith.divf %472, %473 : vector<2x32xf32>
    %475 = vector.extract_strided_slice %458 {offsets = [0, 64], sizes = [2, 32], strides = [1, 1]} : vector<2x96xf32> to vector<2x32xf32>
    %476 = vector.extract_strided_slice %454 {offsets = [0, 64], sizes = [2, 32], strides = [1, 1]} : vector<2x96xf32> to vector<2x32xf32>
    %477 = arith.mulf %466, %476 : vector<2x32xf32>
    %478 = arith.addf %475, %477 : vector<2x32xf32>
    %479 = math.tanh %478 : vector<2x32xf32>
    %cst_94 = arith.constant 1.000000e+00 : f32
    %480 = vector.broadcast %cst_94 : f32 to vector<2x32xf32>
    %481 = arith.subf %480, %474 : vector<2x32xf32>
    %482 = arith.mulf %481, %479 : vector<2x32xf32>
    %483 = arith.mulf %474, %433 : vector<2x32xf32>
    %484 = arith.addf %482, %483 : vector<2x32xf32>
    %485 = vector.extract_strided_slice %10 {offsets = [0, 2, 0], sizes = [2, 1, 96], strides = [1, 1, 1]} : vector<2x8x96xf32> to vector<2x1x96xf32>
    %486 = vector.shape_cast %485 : vector<2x1x96xf32> to vector<2x96xf32>
    %487 = vector.extract_strided_slice %486 {offsets = [0, 0], sizes = [2, 32], strides = [1, 1]} : vector<2x96xf32> to vector<2x32xf32>
    %488 = vector.extract_strided_slice %456 {offsets = [0, 0], sizes = [2, 32], strides = [1, 1]} : vector<2x96xf32> to vector<2x32xf32>
    %489 = arith.addf %487, %488 : vector<2x32xf32>
    %490 = arith.negf %489 : vector<2x32xf32>
    %491 = math.exp %490 : vector<2x32xf32>
    %cst_95 = arith.constant 1.000000e+00 : f32
    %492 = vector.broadcast %cst_95 : f32 to vector<2x32xf32>
    %493 = arith.addf %492, %491 : vector<2x32xf32>
    %494 = arith.divf %492, %493 : vector<2x32xf32>
    %495 = vector.extract_strided_slice %486 {offsets = [0, 32], sizes = [2, 32], strides = [1, 1]} : vector<2x96xf32> to vector<2x32xf32>
    %496 = vector.extract_strided_slice %456 {offsets = [0, 32], sizes = [2, 32], strides = [1, 1]} : vector<2x96xf32> to vector<2x32xf32>
    %497 = arith.addf %495, %496 : vector<2x32xf32>
    %498 = arith.negf %497 : vector<2x32xf32>
    %499 = math.exp %498 : vector<2x32xf32>
    %cst_96 = arith.constant 1.000000e+00 : f32
    %500 = vector.broadcast %cst_96 : f32 to vector<2x32xf32>
    %501 = arith.addf %500, %499 : vector<2x32xf32>
    %502 = arith.divf %500, %501 : vector<2x32xf32>
    %503 = vector.extract_strided_slice %486 {offsets = [0, 64], sizes = [2, 32], strides = [1, 1]} : vector<2x96xf32> to vector<2x32xf32>
    %504 = vector.extract_strided_slice %456 {offsets = [0, 64], sizes = [2, 32], strides = [1, 1]} : vector<2x96xf32> to vector<2x32xf32>
    %505 = arith.mulf %494, %504 : vector<2x32xf32>
    %506 = arith.addf %503, %505 : vector<2x32xf32>
    %507 = math.tanh %506 : vector<2x32xf32>
    %cst_97 = arith.constant 1.000000e+00 : f32
    %508 = vector.broadcast %cst_97 : f32 to vector<2x32xf32>
    %509 = arith.subf %508, %502 : vector<2x32xf32>
    %510 = arith.mulf %509, %507 : vector<2x32xf32>
    %511 = arith.mulf %502, %440 : vector<2x32xf32>
    %512 = arith.addf %510, %511 : vector<2x32xf32>
    %513 = vector.broadcast %451 : vector<2x1xf32> to vector<2x32xf32>
    %514 = arith.mulf %513, %484 : vector<2x32xf32>
    %cst_98 = arith.constant 1.000000e+00 : f32
    %515 = vector.broadcast %cst_98 : f32 to vector<2x1xf32>
    %516 = arith.subf %515, %451 : vector<2x1xf32>
    %517 = vector.broadcast %516 : vector<2x1xf32> to vector<2x32xf32>
    %518 = arith.mulf %517, %433 : vector<2x32xf32>
    %519 = arith.addf %514, %518 : vector<2x32xf32>
    %520 = vector.broadcast %452 : vector<2x1xf32> to vector<2x32xf32>
    %521 = arith.mulf %520, %512 : vector<2x32xf32>
    %cst_99 = arith.constant 1.000000e+00 : f32
    %522 = vector.broadcast %cst_99 : f32 to vector<2x1xf32>
    %523 = arith.subf %522, %452 : vector<2x1xf32>
    %524 = vector.broadcast %523 : vector<2x1xf32> to vector<2x32xf32>
    %525 = arith.mulf %524, %440 : vector<2x32xf32>
    %526 = arith.addf %521, %525 : vector<2x32xf32>
    %527 = vector.broadcast %451 : vector<2x1xf32> to vector<2x32xf32>
    %528 = arith.mulf %519, %527 : vector<2x32xf32>
    %c0_100 = arith.constant 0 : index
    %c5_101 = arith.constant 5 : index
    %c0_102 = arith.constant 0 : index
    %529 = vector.load %arg21[%c0_100, %c5_101, %c0_102] : memref<2x8x64xf32, #tpu.memory_space<vmem>>, vector<2x1x32xf32>
    %530 = vector.shape_cast %529 : vector<2x1x32xf32> to vector<2x32xf32>
    %531 = vector.shape_cast %528 : vector<2x32xf32> to vector<2x1x32xf32>
    tpu.vector_store %arg21[%c0_100, %c5_101, %c0_102], %531 {strides = array<i32>} : memref<2x8x64xf32, #tpu.memory_space<vmem>>, vector<2x1x32xf32>,
    %532 = vector.broadcast %452 : vector<2x1xf32> to vector<2x32xf32>
    %533 = arith.mulf %526, %532 : vector<2x32xf32>
    %c0_103 = arith.constant 0 : index
    %c2_104 = arith.constant 2 : index
    %c32_105 = arith.constant 32 : index
    %534 = vector.load %arg21[%c0_103, %c2_104, %c32_105] : memref<2x8x64xf32, #tpu.memory_space<vmem>>, vector<2x1x32xf32>
    %535 = vector.shape_cast %534 : vector<2x1x32xf32> to vector<2x32xf32>
    %536 = vector.shape_cast %533 : vector<2x32xf32> to vector<2x1x32xf32>
    tpu.vector_store %arg21[%c0_103, %c2_104, %c32_105], %536 {strides = array<i32>} : memref<2x8x64xf32, #tpu.memory_space<vmem>>, vector<2x1x32xf32>,
    %537 = vector.extract_strided_slice %0 {offsets = [0, 6], sizes = [2, 1], strides = [1, 1]} : vector<2x8xf32> to vector<2x1xf32>
    %538 = vector.extract_strided_slice %0 {offsets = [0, 1], sizes = [2, 1], strides = [1, 1]} : vector<2x8xf32> to vector<2x1xf32>
    %cst_106 = arith.constant dense<0.000000e+00> : vector<2x96xf32>
    %539 = tpu.matmul %519, %11, %cst_106 {dimension_numbers = #tpu.dot_dimension_numbers<[1], [0], [0], [1], [0, 0, 1, 1], [], []>} : vector<2x32xf32>, vector<32x96xf32>, vector<2x96xf32> -> vector<2x96xf32>
    %540 = arith.addf %539, %15 : vector<2x96xf32>
    %cst_107 = arith.constant dense<0.000000e+00> : vector<2x96xf32>
    %541 = tpu.matmul %526, %12, %cst_107 {dimension_numbers = #tpu.dot_dimension_numbers<[1], [0], [0], [1], [0, 0, 1, 1], [], []>} : vector<2x32xf32>, vector<32x96xf32>, vector<2x96xf32> -> vector<2x96xf32>
    %542 = arith.addf %541, %18 : vector<2x96xf32>
    %543 = vector.extract_strided_slice %9 {offsets = [0, 6, 0], sizes = [2, 1, 96], strides = [1, 1, 1]} : vector<2x8x96xf32> to vector<2x1x96xf32>
    %544 = vector.shape_cast %543 : vector<2x1x96xf32> to vector<2x96xf32>
    %545 = vector.extract_strided_slice %544 {offsets = [0, 0], sizes = [2, 32], strides = [1, 1]} : vector<2x96xf32> to vector<2x32xf32>
    %546 = vector.extract_strided_slice %540 {offsets = [0, 0], sizes = [2, 32], strides = [1, 1]} : vector<2x96xf32> to vector<2x32xf32>
    %547 = arith.addf %545, %546 : vector<2x32xf32>
    %548 = arith.negf %547 : vector<2x32xf32>
    %549 = math.exp %548 : vector<2x32xf32>
    %cst_108 = arith.constant 1.000000e+00 : f32
    %550 = vector.broadcast %cst_108 : f32 to vector<2x32xf32>
    %551 = arith.addf %550, %549 : vector<2x32xf32>
    %552 = arith.divf %550, %551 : vector<2x32xf32>
    %553 = vector.extract_strided_slice %544 {offsets = [0, 32], sizes = [2, 32], strides = [1, 1]} : vector<2x96xf32> to vector<2x32xf32>
    %554 = vector.extract_strided_slice %540 {offsets = [0, 32], sizes = [2, 32], strides = [1, 1]} : vector<2x96xf32> to vector<2x32xf32>
    %555 = arith.addf %553, %554 : vector<2x32xf32>
    %556 = arith.negf %555 : vector<2x32xf32>
    %557 = math.exp %556 : vector<2x32xf32>
    %cst_109 = arith.constant 1.000000e+00 : f32
    %558 = vector.broadcast %cst_109 : f32 to vector<2x32xf32>
    %559 = arith.addf %558, %557 : vector<2x32xf32>
    %560 = arith.divf %558, %559 : vector<2x32xf32>
    %561 = vector.extract_strided_slice %544 {offsets = [0, 64], sizes = [2, 32], strides = [1, 1]} : vector<2x96xf32> to vector<2x32xf32>
    %562 = vector.extract_strided_slice %540 {offsets = [0, 64], sizes = [2, 32], strides = [1, 1]} : vector<2x96xf32> to vector<2x32xf32>
    %563 = arith.mulf %552, %562 : vector<2x32xf32>
    %564 = arith.addf %561, %563 : vector<2x32xf32>
    %565 = math.tanh %564 : vector<2x32xf32>
    %cst_110 = arith.constant 1.000000e+00 : f32
    %566 = vector.broadcast %cst_110 : f32 to vector<2x32xf32>
    %567 = arith.subf %566, %560 : vector<2x32xf32>
    %568 = arith.mulf %567, %565 : vector<2x32xf32>
    %569 = arith.mulf %560, %519 : vector<2x32xf32>
    %570 = arith.addf %568, %569 : vector<2x32xf32>
    %571 = vector.extract_strided_slice %10 {offsets = [0, 1, 0], sizes = [2, 1, 96], strides = [1, 1, 1]} : vector<2x8x96xf32> to vector<2x1x96xf32>
    %572 = vector.shape_cast %571 : vector<2x1x96xf32> to vector<2x96xf32>
    %573 = vector.extract_strided_slice %572 {offsets = [0, 0], sizes = [2, 32], strides = [1, 1]} : vector<2x96xf32> to vector<2x32xf32>
    %574 = vector.extract_strided_slice %542 {offsets = [0, 0], sizes = [2, 32], strides = [1, 1]} : vector<2x96xf32> to vector<2x32xf32>
    %575 = arith.addf %573, %574 : vector<2x32xf32>
    %576 = arith.negf %575 : vector<2x32xf32>
    %577 = math.exp %576 : vector<2x32xf32>
    %cst_111 = arith.constant 1.000000e+00 : f32
    %578 = vector.broadcast %cst_111 : f32 to vector<2x32xf32>
    %579 = arith.addf %578, %577 : vector<2x32xf32>
    %580 = arith.divf %578, %579 : vector<2x32xf32>
    %581 = vector.extract_strided_slice %572 {offsets = [0, 32], sizes = [2, 32], strides = [1, 1]} : vector<2x96xf32> to vector<2x32xf32>
    %582 = vector.extract_strided_slice %542 {offsets = [0, 32], sizes = [2, 32], strides = [1, 1]} : vector<2x96xf32> to vector<2x32xf32>
    %583 = arith.addf %581, %582 : vector<2x32xf32>
    %584 = arith.negf %583 : vector<2x32xf32>
    %585 = math.exp %584 : vector<2x32xf32>
    %cst_112 = arith.constant 1.000000e+00 : f32
    %586 = vector.broadcast %cst_112 : f32 to vector<2x32xf32>
    %587 = arith.addf %586, %585 : vector<2x32xf32>
    %588 = arith.divf %586, %587 : vector<2x32xf32>
    %589 = vector.extract_strided_slice %572 {offsets = [0, 64], sizes = [2, 32], strides = [1, 1]} : vector<2x96xf32> to vector<2x32xf32>
    %590 = vector.extract_strided_slice %542 {offsets = [0, 64], sizes = [2, 32], strides = [1, 1]} : vector<2x96xf32> to vector<2x32xf32>
    %591 = arith.mulf %580, %590 : vector<2x32xf32>
    %592 = arith.addf %589, %591 : vector<2x32xf32>
    %593 = math.tanh %592 : vector<2x32xf32>
    %cst_113 = arith.constant 1.000000e+00 : f32
    %594 = vector.broadcast %cst_113 : f32 to vector<2x32xf32>
    %595 = arith.subf %594, %588 : vector<2x32xf32>
    %596 = arith.mulf %595, %593 : vector<2x32xf32>
    %597 = arith.mulf %588, %526 : vector<2x32xf32>
    %598 = arith.addf %596, %597 : vector<2x32xf32>
    %599 = vector.broadcast %537 : vector<2x1xf32> to vector<2x32xf32>
    %600 = arith.mulf %599, %570 : vector<2x32xf32>
    %cst_114 = arith.constant 1.000000e+00 : f32
    %601 = vector.broadcast %cst_114 : f32 to vector<2x1xf32>
    %602 = arith.subf %601, %537 : vector<2x1xf32>
    %603 = vector.broadcast %602 : vector<2x1xf32> to vector<2x32xf32>
    %604 = arith.mulf %603, %519 : vector<2x32xf32>
    %605 = arith.addf %600, %604 : vector<2x32xf32>
    %606 = vector.broadcast %538 : vector<2x1xf32> to vector<2x32xf32>
    %607 = arith.mulf %606, %598 : vector<2x32xf32>
    %cst_115 = arith.constant 1.000000e+00 : f32
    %608 = vector.broadcast %cst_115 : f32 to vector<2x1xf32>
    %609 = arith.subf %608, %538 : vector<2x1xf32>
    %610 = vector.broadcast %609 : vector<2x1xf32> to vector<2x32xf32>
    %611 = arith.mulf %610, %526 : vector<2x32xf32>
    %612 = arith.addf %607, %611 : vector<2x32xf32>
    %613 = vector.broadcast %537 : vector<2x1xf32> to vector<2x32xf32>
    %614 = arith.mulf %605, %613 : vector<2x32xf32>
    %c0_116 = arith.constant 0 : index
    %c6_117 = arith.constant 6 : index
    %c0_118 = arith.constant 0 : index
    %615 = vector.load %arg21[%c0_116, %c6_117, %c0_118] : memref<2x8x64xf32, #tpu.memory_space<vmem>>, vector<2x1x32xf32>
    %616 = vector.shape_cast %615 : vector<2x1x32xf32> to vector<2x32xf32>
    %617 = vector.shape_cast %614 : vector<2x32xf32> to vector<2x1x32xf32>
    tpu.vector_store %arg21[%c0_116, %c6_117, %c0_118], %617 {strides = array<i32>} : memref<2x8x64xf32, #tpu.memory_space<vmem>>, vector<2x1x32xf32>,
    %618 = vector.broadcast %538 : vector<2x1xf32> to vector<2x32xf32>
    %619 = arith.mulf %612, %618 : vector<2x32xf32>
    %c0_119 = arith.constant 0 : index
    %c1_120 = arith.constant 1 : index
    %c32_121 = arith.constant 32 : index
    %620 = vector.load %arg21[%c0_119, %c1_120, %c32_121] : memref<2x8x64xf32, #tpu.memory_space<vmem>>, vector<2x1x32xf32>
    %621 = vector.shape_cast %620 : vector<2x1x32xf32> to vector<2x32xf32>
    %622 = vector.shape_cast %619 : vector<2x32xf32> to vector<2x1x32xf32>
    tpu.vector_store %arg21[%c0_119, %c1_120, %c32_121], %622 {strides = array<i32>} : memref<2x8x64xf32, #tpu.memory_space<vmem>>, vector<2x1x32xf32>,
    %623 = vector.extract_strided_slice %0 {offsets = [0, 7], sizes = [2, 1], strides = [1, 1]} : vector<2x8xf32> to vector<2x1xf32>
    %624 = vector.extract_strided_slice %0 {offsets = [0, 0], sizes = [2, 1], strides = [1, 1]} : vector<2x8xf32> to vector<2x1xf32>
    %cst_122 = arith.constant dense<0.000000e+00> : vector<2x96xf32>
    %625 = tpu.matmul %605, %11, %cst_122 {dimension_numbers = #tpu.dot_dimension_numbers<[1], [0], [0], [1], [0, 0, 1, 1], [], []>} : vector<2x32xf32>, vector<32x96xf32>, vector<2x96xf32> -> vector<2x96xf32>
    %626 = arith.addf %625, %15 : vector<2x96xf32>
    %cst_123 = arith.constant dense<0.000000e+00> : vector<2x96xf32>
    %627 = tpu.matmul %612, %12, %cst_123 {dimension_numbers = #tpu.dot_dimension_numbers<[1], [0], [0], [1], [0, 0, 1, 1], [], []>} : vector<2x32xf32>, vector<32x96xf32>, vector<2x96xf32> -> vector<2x96xf32>
    %628 = arith.addf %627, %18 : vector<2x96xf32>
    %629 = vector.extract_strided_slice %9 {offsets = [0, 7, 0], sizes = [2, 1, 96], strides = [1, 1, 1]} : vector<2x8x96xf32> to vector<2x1x96xf32>
    %630 = vector.shape_cast %629 : vector<2x1x96xf32> to vector<2x96xf32>
    %631 = vector.extract_strided_slice %630 {offsets = [0, 0], sizes = [2, 32], strides = [1, 1]} : vector<2x96xf32> to vector<2x32xf32>
    %632 = vector.extract_strided_slice %626 {offsets = [0, 0], sizes = [2, 32], strides = [1, 1]} : vector<2x96xf32> to vector<2x32xf32>
    %633 = arith.addf %631, %632 : vector<2x32xf32>
    %634 = arith.negf %633 : vector<2x32xf32>
    %635 = math.exp %634 : vector<2x32xf32>
    %cst_124 = arith.constant 1.000000e+00 : f32
    %636 = vector.broadcast %cst_124 : f32 to vector<2x32xf32>
    %637 = arith.addf %636, %635 : vector<2x32xf32>
    %638 = arith.divf %636, %637 : vector<2x32xf32>
    %639 = vector.extract_strided_slice %630 {offsets = [0, 32], sizes = [2, 32], strides = [1, 1]} : vector<2x96xf32> to vector<2x32xf32>
    %640 = vector.extract_strided_slice %626 {offsets = [0, 32], sizes = [2, 32], strides = [1, 1]} : vector<2x96xf32> to vector<2x32xf32>
    %641 = arith.addf %639, %640 : vector<2x32xf32>
    %642 = arith.negf %641 : vector<2x32xf32>
    %643 = math.exp %642 : vector<2x32xf32>
    %cst_125 = arith.constant 1.000000e+00 : f32
    %644 = vector.broadcast %cst_125 : f32 to vector<2x32xf32>
    %645 = arith.addf %644, %643 : vector<2x32xf32>
    %646 = arith.divf %644, %645 : vector<2x32xf32>
    %647 = vector.extract_strided_slice %630 {offsets = [0, 64], sizes = [2, 32], strides = [1, 1]} : vector<2x96xf32> to vector<2x32xf32>
    %648 = vector.extract_strided_slice %626 {offsets = [0, 64], sizes = [2, 32], strides = [1, 1]} : vector<2x96xf32> to vector<2x32xf32>
    %649 = arith.mulf %638, %648 : vector<2x32xf32>
    %650 = arith.addf %647, %649 : vector<2x32xf32>
    %651 = math.tanh %650 : vector<2x32xf32>
    %cst_126 = arith.constant 1.000000e+00 : f32
    %652 = vector.broadcast %cst_126 : f32 to vector<2x32xf32>
    %653 = arith.subf %652, %646 : vector<2x32xf32>
    %654 = arith.mulf %653, %651 : vector<2x32xf32>
    %655 = arith.mulf %646, %605 : vector<2x32xf32>
    %656 = arith.addf %654, %655 : vector<2x32xf32>
    %657 = vector.extract_strided_slice %10 {offsets = [0, 0, 0], sizes = [2, 1, 96], strides = [1, 1, 1]} : vector<2x8x96xf32> to vector<2x1x96xf32>
    %658 = vector.shape_cast %657 : vector<2x1x96xf32> to vector<2x96xf32>
    %659 = vector.extract_strided_slice %658 {offsets = [0, 0], sizes = [2, 32], strides = [1, 1]} : vector<2x96xf32> to vector<2x32xf32>
    %660 = vector.extract_strided_slice %628 {offsets = [0, 0], sizes = [2, 32], strides = [1, 1]} : vector<2x96xf32> to vector<2x32xf32>
    %661 = arith.addf %659, %660 : vector<2x32xf32>
    %662 = arith.negf %661 : vector<2x32xf32>
    %663 = math.exp %662 : vector<2x32xf32>
    %cst_127 = arith.constant 1.000000e+00 : f32
    %664 = vector.broadcast %cst_127 : f32 to vector<2x32xf32>
    %665 = arith.addf %664, %663 : vector<2x32xf32>
    %666 = arith.divf %664, %665 : vector<2x32xf32>
    %667 = vector.extract_strided_slice %658 {offsets = [0, 32], sizes = [2, 32], strides = [1, 1]} : vector<2x96xf32> to vector<2x32xf32>
    %668 = vector.extract_strided_slice %628 {offsets = [0, 32], sizes = [2, 32], strides = [1, 1]} : vector<2x96xf32> to vector<2x32xf32>
    %669 = arith.addf %667, %668 : vector<2x32xf32>
    %670 = arith.negf %669 : vector<2x32xf32>
    %671 = math.exp %670 : vector<2x32xf32>
    %cst_128 = arith.constant 1.000000e+00 : f32
    %672 = vector.broadcast %cst_128 : f32 to vector<2x32xf32>
    %673 = arith.addf %672, %671 : vector<2x32xf32>
    %674 = arith.divf %672, %673 : vector<2x32xf32>
    %675 = vector.extract_strided_slice %658 {offsets = [0, 64], sizes = [2, 32], strides = [1, 1]} : vector<2x96xf32> to vector<2x32xf32>
    %676 = vector.extract_strided_slice %628 {offsets = [0, 64], sizes = [2, 32], strides = [1, 1]} : vector<2x96xf32> to vector<2x32xf32>
    %677 = arith.mulf %666, %676 : vector<2x32xf32>
    %678 = arith.addf %675, %677 : vector<2x32xf32>
    %679 = math.tanh %678 : vector<2x32xf32>
    %cst_129 = arith.constant 1.000000e+00 : f32
    %680 = vector.broadcast %cst_129 : f32 to vector<2x32xf32>
    %681 = arith.subf %680, %674 : vector<2x32xf32>
    %682 = arith.mulf %681, %679 : vector<2x32xf32>
    %683 = arith.mulf %674, %612 : vector<2x32xf32>
    %684 = arith.addf %682, %683 : vector<2x32xf32>
    %685 = vector.broadcast %623 : vector<2x1xf32> to vector<2x32xf32>
    %686 = arith.mulf %685, %656 : vector<2x32xf32>
    %cst_130 = arith.constant 1.000000e+00 : f32
    %687 = vector.broadcast %cst_130 : f32 to vector<2x1xf32>
    %688 = arith.subf %687, %623 : vector<2x1xf32>
    %689 = vector.broadcast %688 : vector<2x1xf32> to vector<2x32xf32>
    %690 = arith.mulf %689, %605 : vector<2x32xf32>
    %691 = arith.addf %686, %690 : vector<2x32xf32>
    %692 = vector.broadcast %624 : vector<2x1xf32> to vector<2x32xf32>
    %693 = arith.mulf %692, %684 : vector<2x32xf32>
    %cst_131 = arith.constant 1.000000e+00 : f32
    %694 = vector.broadcast %cst_131 : f32 to vector<2x1xf32>
    %695 = arith.subf %694, %624 : vector<2x1xf32>
    %696 = vector.broadcast %695 : vector<2x1xf32> to vector<2x32xf32>
    %697 = arith.mulf %696, %612 : vector<2x32xf32>
    %698 = arith.addf %693, %697 : vector<2x32xf32>
    %699 = vector.broadcast %623 : vector<2x1xf32> to vector<2x32xf32>
    %700 = arith.mulf %691, %699 : vector<2x32xf32>
    %c0_132 = arith.constant 0 : index
    %c7_133 = arith.constant 7 : index
    %c0_134 = arith.constant 0 : index
    %701 = vector.load %arg21[%c0_132, %c7_133, %c0_134] : memref<2x8x64xf32, #tpu.memory_space<vmem>>, vector<2x1x32xf32>
    %702 = vector.shape_cast %701 : vector<2x1x32xf32> to vector<2x32xf32>
    %703 = vector.shape_cast %700 : vector<2x32xf32> to vector<2x1x32xf32>
    tpu.vector_store %arg21[%c0_132, %c7_133, %c0_134], %703 {strides = array<i32>} : memref<2x8x64xf32, #tpu.memory_space<vmem>>, vector<2x1x32xf32>,
    %704 = vector.broadcast %624 : vector<2x1xf32> to vector<2x32xf32>
    %705 = arith.mulf %698, %704 : vector<2x32xf32>
    %c0_135 = arith.constant 0 : index
    %c0_136 = arith.constant 0 : index
    %c32_137 = arith.constant 32 : index
    %706 = vector.load %arg21[%c0_135, %c0_136, %c32_137] : memref<2x8x64xf32, #tpu.memory_space<vmem>>, vector<2x1x32xf32>
    %707 = vector.shape_cast %706 : vector<2x1x32xf32> to vector<2x32xf32>
    %708 = vector.shape_cast %705 : vector<2x32xf32> to vector<2x1x32xf32>
    tpu.vector_store %arg21[%c0_135, %c0_136, %c32_137], %708 {strides = array<i32>} : memref<2x8x64xf32, #tpu.memory_space<vmem>>, vector<2x1x32xf32>,
    %c0_138 = arith.constant 0 : index
    %c0_139 = arith.constant 0 : index
    %c0_140 = arith.constant 0 : index
    %709 = vector.load %arg21[%c0_138, %c0_139, %c0_140] : memref<2x8x64xf32, #tpu.memory_space<vmem>>, vector<2x8x64xf32>
    %710 = tpu.concatenate %691, %698 in 1 : vector<2x32xf32>, vector<2x32xf32> -> vector<2x64xf32>
    %c0_141 = arith.constant 0 : index
    %c0_142 = arith.constant 0 : index
    %711 = vector.load %arg9[%c0_141, %c0_142] : memref<64x32xf32, #tpu.memory_space<vmem>>, vector<64x32xf32>
    %cst_143 = arith.constant dense<0.000000e+00> : vector<2x32xf32>
    %712 = tpu.matmul %710, %711, %cst_143 {dimension_numbers = #tpu.dot_dimension_numbers<[1], [0], [0], [1], [0, 0, 1, 1], [], []>} : vector<2x64xf32>, vector<64x32xf32>, vector<2x32xf32> -> vector<2x32xf32>
    %c0_144 = arith.constant 0 : index
    %c0_145 = arith.constant 0 : index
    %713 = vector.load %arg10[%c0_144, %c0_145] : memref<1x32xf32, #tpu.memory_space<vmem>>, vector<1x32xf32>
    %714 = vector.broadcast %713 : vector<1x32xf32> to vector<2x32xf32>
    %715 = arith.addf %712, %714 : vector<2x32xf32>
    %716 = math.tanh %715 : vector<2x32xf32>
    %717 = vector.shape_cast %709 : vector<2x8x64xf32> to vector<16x64xf32>
    %c0_146 = arith.constant 0 : index
    %c0_147 = arith.constant 0 : index
    %718 = vector.load %arg11[%c0_146, %c0_147] : memref<64x32xf32, #tpu.memory_space<vmem>>, vector<64x32xf32>
    %cst_148 = arith.constant dense<0.000000e+00> : vector<16x32xf32>
    %719 = tpu.matmul %717, %718, %cst_148 {dimension_numbers = #tpu.dot_dimension_numbers<[1], [0], [0], [1], [0, 0, 1, 1], [], []>} : vector<16x64xf32>, vector<64x32xf32>, vector<16x32xf32> -> vector<16x32xf32>
    %720 = vector.shape_cast %719 : vector<16x32xf32> to vector<2x8x32xf32>
    %c0_149 = arith.constant 0 : index
    %c0_150 = arith.constant 0 : index
    %c0_151 = arith.constant 0 : index
    %721 = vector.load %arg1[%c0_149, %c0_150, %c0_151] : memref<2x8x32xf32, #tpu.memory_space<vmem>>, vector<2x8x32xf32>
    %722 = vector.shape_cast %721 : vector<2x8x32xf32> to vector<16x32xf32>
    %c0_152 = arith.constant 0 : index
    %c0_153 = arith.constant 0 : index
    %723 = vector.load %arg14[%c0_152, %c0_153] : memref<32x128xf32, #tpu.memory_space<vmem>>, vector<32x128xf32>
    %cst_154 = arith.constant dense<0.000000e+00> : vector<16x128xf32>
    %724 = tpu.matmul %722, %723, %cst_154 {dimension_numbers = #tpu.dot_dimension_numbers<[1], [0], [0], [1], [0, 0, 1, 1], [], []>} : vector<16x32xf32>, vector<32x128xf32>, vector<16x128xf32> -> vector<16x128xf32>
    %c0_155 = arith.constant 0 : index
    %c0_156 = arith.constant 0 : index
    %725 = vector.load %arg15[%c0_155, %c0_156] : memref<1x128xf32, #tpu.memory_space<vmem>>, vector<1x128xf32>
    %726 = vector.broadcast %725 : vector<1x128xf32> to vector<16x128xf32>
    %727 = arith.addf %724, %726 : vector<16x128xf32>
    %728 = vector.shape_cast %727 : vector<16x128xf32> to vector<2x8x128xf32>
    %729 = vector.extract_strided_slice %728 {offsets = [0, 0, 0], sizes = [2, 8, 96], strides = [1, 1, 1]} : vector<2x8x128xf32> to vector<2x8x96xf32>
    %730 = vector.extract_strided_slice %728 {offsets = [0, 0, 96], sizes = [2, 8, 32], strides = [1, 1, 1]} : vector<2x8x128xf32> to vector<2x8x32xf32>
    %c0_157 = arith.constant 0 : index
    %c0_158 = arith.constant 0 : index
    %731 = vector.load %arg12[%c0_157, %c0_158] : memref<32x128xf32, #tpu.memory_space<vmem>>, vector<32x128xf32>
    %c0_159 = arith.constant 0 : index
    %c0_160 = arith.constant 0 : index
    %732 = vector.load %arg16[%c0_159, %c0_160] : memref<64x128xf32, #tpu.memory_space<vmem>>, vector<64x128xf32>
    %c0_161 = arith.constant 0 : index
    %c0_162 = arith.constant 0 : index
    %733 = vector.load %arg18[%c0_161, %c0_162] : memref<32x32xf32, #tpu.memory_space<vmem>>, vector<32x32xf32>
    %c0_163 = arith.constant 0 : index
    %c0_164 = arith.constant 0 : index
    %734 = vector.load %arg17[%c0_163, %c0_164] : memref<1x96xf32, #tpu.memory_space<vmem>>, vector<1x96xf32>
    %735 = vector.shape_cast %734 : vector<1x96xf32> to vector<1x96xf32>
    %736 = vector.broadcast %735 : vector<1x96xf32> to vector<2x96xf32>
    %c0_165 = arith.constant 0 : index
    %c0_166 = arith.constant 0 : index
    %c0_167 = arith.constant 0 : index
    %737 = vector.load %arg13[%c0_165, %c0_166, %c0_167] : memref<1x1x32xf32, #tpu.memory_space<vmem>>, vector<1x1x32xf32>
    %cst_168 = arith.constant 1.000000e+00 : f32
    %738 = vector.broadcast %cst_168 : f32 to vector<2x8xf32>
    %739 = arith.subf %0, %738 : vector<2x8xf32>
    %cst_169 = arith.constant 1.000000e+09 : f32
    %740 = vector.broadcast %cst_169 : f32 to vector<2x8xf32>
    %741 = arith.mulf %739, %740 : vector<2x8xf32>
    %cst_170 = arith.constant dense<0.000000e+00> : vector<2x128xf32>
    %742 = tpu.matmul %716, %731, %cst_170 {dimension_numbers = #tpu.dot_dimension_numbers<[1], [0], [0], [1], [0, 0, 1, 1], [], []>} : vector<2x32xf32>, vector<32x128xf32>, vector<2x128xf32> -> vector<2x128xf32>
    %743 = vector.extract_strided_slice %742 {offsets = [0, 0], sizes = [2, 96], strides = [1, 1]} : vector<2x128xf32> to vector<2x96xf32>
    %744 = arith.addf %743, %736 : vector<2x96xf32>
    %745 = vector.extract_strided_slice %742 {offsets = [0, 96], sizes = [2, 32], strides = [1, 1]} : vector<2x128xf32> to vector<2x32xf32>
    %746 = vector.shape_cast %745 : vector<2x32xf32> to vector<2x1x32xf32>
    %747 = vector.broadcast %746 : vector<2x1x32xf32> to vector<2x8x32xf32>
    %748 = arith.addf %747, %720 : vector<2x8x32xf32>
    %749 = math.tanh %748 : vector<2x8x32xf32>
    %750 = vector.broadcast %737 : vector<1x1x32xf32> to vector<2x8x32xf32>
    %751 = arith.mulf %749, %750 : vector<2x8x32xf32>
    %cst_171 = arith.constant dense<0.000000e+00> : vector<2x8xf32>
    %752 = vector.multi_reduction <add>, %751, %cst_171 [2] : vector<2x8x32xf32> to vector<2x8xf32>
    %753 = arith.addf %752, %741 : vector<2x8xf32>
    %cst_172 = arith.constant dense<0xFF800000> : vector<2xf32>
    %754 = vector.multi_reduction <maximumf>, %753, %cst_172 [1] : vector<2x8xf32> to vector<2xf32>
    %755 = vector.shape_cast %754 : vector<2xf32> to vector<2x1xf32>
    %756 = vector.broadcast %755 : vector<2x1xf32> to vector<2x8xf32>
    %757 = arith.subf %753, %756 : vector<2x8xf32>
    %758 = math.exp %757 : vector<2x8xf32>
    %cst_173 = arith.constant dense<0.000000e+00> : vector<2xf32>
    %759 = vector.multi_reduction <add>, %758, %cst_173 [1] : vector<2x8xf32> to vector<2xf32>
    %760 = vector.shape_cast %759 : vector<2xf32> to vector<2x1xf32>
    %761 = vector.broadcast %760 : vector<2x1xf32> to vector<2x8xf32>
    %762 = arith.divf %758, %761 : vector<2x8xf32>
    %763 = vector.shape_cast %762 : vector<2x8xf32> to vector<2x8x1xf32>
    %764 = vector.broadcast %763 : vector<2x8x1xf32> to vector<2x8x64xf32>
    %765 = arith.mulf %764, %709 : vector<2x8x64xf32>
    %cst_174 = arith.constant dense<0.000000e+00> : vector<2x64xf32>
    %766 = vector.multi_reduction <add>, %765, %cst_174 [1] : vector<2x8x64xf32> to vector<2x64xf32>
    %cst_175 = arith.constant dense<0.000000e+00> : vector<2x128xf32>
    %767 = tpu.matmul %766, %732, %cst_175 {dimension_numbers = #tpu.dot_dimension_numbers<[1], [0], [0], [1], [0, 0, 1, 1], [], []>} : vector<2x64xf32>, vector<64x128xf32>, vector<2x128xf32> -> vector<2x128xf32>
    %768 = vector.extract_strided_slice %729 {offsets = [0, 0, 0], sizes = [2, 1, 96], strides = [1, 1, 1]} : vector<2x8x96xf32> to vector<2x1x96xf32>
    %769 = vector.shape_cast %768 : vector<2x1x96xf32> to vector<2x96xf32>
    %770 = vector.extract_strided_slice %767 {offsets = [0, 0], sizes = [2, 96], strides = [1, 1]} : vector<2x128xf32> to vector<2x96xf32>
    %771 = arith.addf %769, %770 : vector<2x96xf32>
    %772 = vector.extract_strided_slice %771 {offsets = [0, 0], sizes = [2, 32], strides = [1, 1]} : vector<2x96xf32> to vector<2x32xf32>
    %773 = vector.extract_strided_slice %744 {offsets = [0, 0], sizes = [2, 32], strides = [1, 1]} : vector<2x96xf32> to vector<2x32xf32>
    %774 = arith.addf %772, %773 : vector<2x32xf32>
    %775 = arith.negf %774 : vector<2x32xf32>
    %776 = math.exp %775 : vector<2x32xf32>
    %cst_176 = arith.constant 1.000000e+00 : f32
    %777 = vector.broadcast %cst_176 : f32 to vector<2x32xf32>
    %778 = arith.addf %777, %776 : vector<2x32xf32>
    %779 = arith.divf %777, %778 : vector<2x32xf32>
    %780 = vector.extract_strided_slice %771 {offsets = [0, 32], sizes = [2, 32], strides = [1, 1]} : vector<2x96xf32> to vector<2x32xf32>
    %781 = vector.extract_strided_slice %744 {offsets = [0, 32], sizes = [2, 32], strides = [1, 1]} : vector<2x96xf32> to vector<2x32xf32>
    %782 = arith.addf %780, %781 : vector<2x32xf32>
    %783 = arith.negf %782 : vector<2x32xf32>
    %784 = math.exp %783 : vector<2x32xf32>
    %cst_177 = arith.constant 1.000000e+00 : f32
    %785 = vector.broadcast %cst_177 : f32 to vector<2x32xf32>
    %786 = arith.addf %785, %784 : vector<2x32xf32>
    %787 = arith.divf %785, %786 : vector<2x32xf32>
    %788 = vector.extract_strided_slice %771 {offsets = [0, 64], sizes = [2, 32], strides = [1, 1]} : vector<2x96xf32> to vector<2x32xf32>
    %789 = vector.extract_strided_slice %744 {offsets = [0, 64], sizes = [2, 32], strides = [1, 1]} : vector<2x96xf32> to vector<2x32xf32>
    %790 = arith.mulf %779, %789 : vector<2x32xf32>
    %791 = arith.addf %788, %790 : vector<2x32xf32>
    %792 = math.tanh %791 : vector<2x32xf32>
    %cst_178 = arith.constant 1.000000e+00 : f32
    %793 = vector.broadcast %cst_178 : f32 to vector<2x32xf32>
    %794 = arith.subf %793, %787 : vector<2x32xf32>
    %795 = arith.mulf %794, %792 : vector<2x32xf32>
    %796 = arith.mulf %787, %716 : vector<2x32xf32>
    %797 = arith.addf %795, %796 : vector<2x32xf32>
    %798 = vector.extract_strided_slice %730 {offsets = [0, 0, 0], sizes = [2, 1, 32], strides = [1, 1, 1]} : vector<2x8x32xf32> to vector<2x1x32xf32>
    %799 = vector.shape_cast %798 : vector<2x1x32xf32> to vector<2x32xf32>
    %cst_179 = arith.constant dense<0.000000e+00> : vector<2x32xf32>
    %800 = tpu.matmul %797, %733, %cst_179 {dimension_numbers = #tpu.dot_dimension_numbers<[1], [0], [0], [1], [0, 0, 1, 1], [], []>} : vector<2x32xf32>, vector<32x32xf32>, vector<2x32xf32> -> vector<2x32xf32>
    %801 = arith.addf %799, %800 : vector<2x32xf32>
    %802 = vector.extract_strided_slice %767 {offsets = [0, 96], sizes = [2, 32], strides = [1, 1]} : vector<2x128xf32> to vector<2x32xf32>
    %803 = arith.addf %801, %802 : vector<2x32xf32>
    %c0_180 = arith.constant 0 : index
    %c0_181 = arith.constant 0 : index
    %c0_182 = arith.constant 0 : index
    %804 = vector.load %arg19[%c0_180, %c0_181, %c0_182] : memref<2x8x32xf32, #tpu.memory_space<vmem>>, vector<2x1x32xf32>
    %805 = vector.shape_cast %804 : vector<2x1x32xf32> to vector<2x32xf32>
    %806 = vector.shape_cast %803 : vector<2x32xf32> to vector<2x1x32xf32>
    tpu.vector_store %arg19[%c0_180, %c0_181, %c0_182], %806 {strides = array<i32>} : memref<2x8x32xf32, #tpu.memory_space<vmem>>, vector<2x1x32xf32>,
    %cst_183 = arith.constant dense<0.000000e+00> : vector<2x128xf32>
    %807 = tpu.matmul %797, %731, %cst_183 {dimension_numbers = #tpu.dot_dimension_numbers<[1], [0], [0], [1], [0, 0, 1, 1], [], []>} : vector<2x32xf32>, vector<32x128xf32>, vector<2x128xf32> -> vector<2x128xf32>
    %808 = vector.extract_strided_slice %807 {offsets = [0, 0], sizes = [2, 96], strides = [1, 1]} : vector<2x128xf32> to vector<2x96xf32>
    %809 = arith.addf %808, %736 : vector<2x96xf32>
    %810 = vector.extract_strided_slice %807 {offsets = [0, 96], sizes = [2, 32], strides = [1, 1]} : vector<2x128xf32> to vector<2x32xf32>
    %811 = vector.shape_cast %810 : vector<2x32xf32> to vector<2x1x32xf32>
    %812 = vector.broadcast %811 : vector<2x1x32xf32> to vector<2x8x32xf32>
    %813 = arith.addf %812, %720 : vector<2x8x32xf32>
    %814 = math.tanh %813 : vector<2x8x32xf32>
    %815 = vector.broadcast %737 : vector<1x1x32xf32> to vector<2x8x32xf32>
    %816 = arith.mulf %814, %815 : vector<2x8x32xf32>
    %cst_184 = arith.constant dense<0.000000e+00> : vector<2x8xf32>
    %817 = vector.multi_reduction <add>, %816, %cst_184 [2] : vector<2x8x32xf32> to vector<2x8xf32>
    %818 = arith.addf %817, %741 : vector<2x8xf32>
    %cst_185 = arith.constant dense<0xFF800000> : vector<2xf32>
    %819 = vector.multi_reduction <maximumf>, %818, %cst_185 [1] : vector<2x8xf32> to vector<2xf32>
    %820 = vector.shape_cast %819 : vector<2xf32> to vector<2x1xf32>
    %821 = vector.broadcast %820 : vector<2x1xf32> to vector<2x8xf32>
    %822 = arith.subf %818, %821 : vector<2x8xf32>
    %823 = math.exp %822 : vector<2x8xf32>
    %cst_186 = arith.constant dense<0.000000e+00> : vector<2xf32>
    %824 = vector.multi_reduction <add>, %823, %cst_186 [1] : vector<2x8xf32> to vector<2xf32>
    %825 = vector.shape_cast %824 : vector<2xf32> to vector<2x1xf32>
    %826 = vector.broadcast %825 : vector<2x1xf32> to vector<2x8xf32>
    %827 = arith.divf %823, %826 : vector<2x8xf32>
    %828 = vector.shape_cast %827 : vector<2x8xf32> to vector<2x8x1xf32>
    %829 = vector.broadcast %828 : vector<2x8x1xf32> to vector<2x8x64xf32>
    %830 = arith.mulf %829, %709 : vector<2x8x64xf32>
    %cst_187 = arith.constant dense<0.000000e+00> : vector<2x64xf32>
    %831 = vector.multi_reduction <add>, %830, %cst_187 [1] : vector<2x8x64xf32> to vector<2x64xf32>
    %cst_188 = arith.constant dense<0.000000e+00> : vector<2x128xf32>
    %832 = tpu.matmul %831, %732, %cst_188 {dimension_numbers = #tpu.dot_dimension_numbers<[1], [0], [0], [1], [0, 0, 1, 1], [], []>} : vector<2x64xf32>, vector<64x128xf32>, vector<2x128xf32> -> vector<2x128xf32>
    %833 = vector.extract_strided_slice %729 {offsets = [0, 1, 0], sizes = [2, 1, 96], strides = [1, 1, 1]} : vector<2x8x96xf32> to vector<2x1x96xf32>
    %834 = vector.shape_cast %833 : vector<2x1x96xf32> to vector<2x96xf32>
    %835 = vector.extract_strided_slice %832 {offsets = [0, 0], sizes = [2, 96], strides = [1, 1]} : vector<2x128xf32> to vector<2x96xf32>
    %836 = arith.addf %834, %835 : vector<2x96xf32>
    %837 = vector.extract_strided_slice %836 {offsets = [0, 0], sizes = [2, 32], strides = [1, 1]} : vector<2x96xf32> to vector<2x32xf32>
    %838 = vector.extract_strided_slice %809 {offsets = [0, 0], sizes = [2, 32], strides = [1, 1]} : vector<2x96xf32> to vector<2x32xf32>
    %839 = arith.addf %837, %838 : vector<2x32xf32>
    %840 = arith.negf %839 : vector<2x32xf32>
    %841 = math.exp %840 : vector<2x32xf32>
    %cst_189 = arith.constant 1.000000e+00 : f32
    %842 = vector.broadcast %cst_189 : f32 to vector<2x32xf32>
    %843 = arith.addf %842, %841 : vector<2x32xf32>
    %844 = arith.divf %842, %843 : vector<2x32xf32>
    %845 = vector.extract_strided_slice %836 {offsets = [0, 32], sizes = [2, 32], strides = [1, 1]} : vector<2x96xf32> to vector<2x32xf32>
    %846 = vector.extract_strided_slice %809 {offsets = [0, 32], sizes = [2, 32], strides = [1, 1]} : vector<2x96xf32> to vector<2x32xf32>
    %847 = arith.addf %845, %846 : vector<2x32xf32>
    %848 = arith.negf %847 : vector<2x32xf32>
    %849 = math.exp %848 : vector<2x32xf32>
    %cst_190 = arith.constant 1.000000e+00 : f32
    %850 = vector.broadcast %cst_190 : f32 to vector<2x32xf32>
    %851 = arith.addf %850, %849 : vector<2x32xf32>
    %852 = arith.divf %850, %851 : vector<2x32xf32>
    %853 = vector.extract_strided_slice %836 {offsets = [0, 64], sizes = [2, 32], strides = [1, 1]} : vector<2x96xf32> to vector<2x32xf32>
    %854 = vector.extract_strided_slice %809 {offsets = [0, 64], sizes = [2, 32], strides = [1, 1]} : vector<2x96xf32> to vector<2x32xf32>
    %855 = arith.mulf %844, %854 : vector<2x32xf32>
    %856 = arith.addf %853, %855 : vector<2x32xf32>
    %857 = math.tanh %856 : vector<2x32xf32>
    %cst_191 = arith.constant 1.000000e+00 : f32
    %858 = vector.broadcast %cst_191 : f32 to vector<2x32xf32>
    %859 = arith.subf %858, %852 : vector<2x32xf32>
    %860 = arith.mulf %859, %857 : vector<2x32xf32>
    %861 = arith.mulf %852, %797 : vector<2x32xf32>
    %862 = arith.addf %860, %861 : vector<2x32xf32>
    %863 = vector.extract_strided_slice %730 {offsets = [0, 1, 0], sizes = [2, 1, 32], strides = [1, 1, 1]} : vector<2x8x32xf32> to vector<2x1x32xf32>
    %864 = vector.shape_cast %863 : vector<2x1x32xf32> to vector<2x32xf32>
    %cst_192 = arith.constant dense<0.000000e+00> : vector<2x32xf32>
    %865 = tpu.matmul %862, %733, %cst_192 {dimension_numbers = #tpu.dot_dimension_numbers<[1], [0], [0], [1], [0, 0, 1, 1], [], []>} : vector<2x32xf32>, vector<32x32xf32>, vector<2x32xf32> -> vector<2x32xf32>
    %866 = arith.addf %864, %865 : vector<2x32xf32>
    %867 = vector.extract_strided_slice %832 {offsets = [0, 96], sizes = [2, 32], strides = [1, 1]} : vector<2x128xf32> to vector<2x32xf32>
    %868 = arith.addf %866, %867 : vector<2x32xf32>
    %c0_193 = arith.constant 0 : index
    %c1_194 = arith.constant 1 : index
    %c0_195 = arith.constant 0 : index
    %869 = vector.load %arg19[%c0_193, %c1_194, %c0_195] : memref<2x8x32xf32, #tpu.memory_space<vmem>>, vector<2x1x32xf32>
    %870 = vector.shape_cast %869 : vector<2x1x32xf32> to vector<2x32xf32>
    %871 = vector.shape_cast %868 : vector<2x32xf32> to vector<2x1x32xf32>
    tpu.vector_store %arg19[%c0_193, %c1_194, %c0_195], %871 {strides = array<i32>} : memref<2x8x32xf32, #tpu.memory_space<vmem>>, vector<2x1x32xf32>,
    %cst_196 = arith.constant dense<0.000000e+00> : vector<2x128xf32>
    %872 = tpu.matmul %862, %731, %cst_196 {dimension_numbers = #tpu.dot_dimension_numbers<[1], [0], [0], [1], [0, 0, 1, 1], [], []>} : vector<2x32xf32>, vector<32x128xf32>, vector<2x128xf32> -> vector<2x128xf32>
    %873 = vector.extract_strided_slice %872 {offsets = [0, 0], sizes = [2, 96], strides = [1, 1]} : vector<2x128xf32> to vector<2x96xf32>
    %874 = arith.addf %873, %736 : vector<2x96xf32>
    %875 = vector.extract_strided_slice %872 {offsets = [0, 96], sizes = [2, 32], strides = [1, 1]} : vector<2x128xf32> to vector<2x32xf32>
    %876 = vector.shape_cast %875 : vector<2x32xf32> to vector<2x1x32xf32>
    %877 = vector.broadcast %876 : vector<2x1x32xf32> to vector<2x8x32xf32>
    %878 = arith.addf %877, %720 : vector<2x8x32xf32>
    %879 = math.tanh %878 : vector<2x8x32xf32>
    %880 = vector.broadcast %737 : vector<1x1x32xf32> to vector<2x8x32xf32>
    %881 = arith.mulf %879, %880 : vector<2x8x32xf32>
    %cst_197 = arith.constant dense<0.000000e+00> : vector<2x8xf32>
    %882 = vector.multi_reduction <add>, %881, %cst_197 [2] : vector<2x8x32xf32> to vector<2x8xf32>
    %883 = arith.addf %882, %741 : vector<2x8xf32>
    %cst_198 = arith.constant dense<0xFF800000> : vector<2xf32>
    %884 = vector.multi_reduction <maximumf>, %883, %cst_198 [1] : vector<2x8xf32> to vector<2xf32>
    %885 = vector.shape_cast %884 : vector<2xf32> to vector<2x1xf32>
    %886 = vector.broadcast %885 : vector<2x1xf32> to vector<2x8xf32>
    %887 = arith.subf %883, %886 : vector<2x8xf32>
    %888 = math.exp %887 : vector<2x8xf32>
    %cst_199 = arith.constant dense<0.000000e+00> : vector<2xf32>
    %889 = vector.multi_reduction <add>, %888, %cst_199 [1] : vector<2x8xf32> to vector<2xf32>
    %890 = vector.shape_cast %889 : vector<2xf32> to vector<2x1xf32>
    %891 = vector.broadcast %890 : vector<2x1xf32> to vector<2x8xf32>
    %892 = arith.divf %888, %891 : vector<2x8xf32>
    %893 = vector.shape_cast %892 : vector<2x8xf32> to vector<2x8x1xf32>
    %894 = vector.broadcast %893 : vector<2x8x1xf32> to vector<2x8x64xf32>
    %895 = arith.mulf %894, %709 : vector<2x8x64xf32>
    %cst_200 = arith.constant dense<0.000000e+00> : vector<2x64xf32>
    %896 = vector.multi_reduction <add>, %895, %cst_200 [1] : vector<2x8x64xf32> to vector<2x64xf32>
    %cst_201 = arith.constant dense<0.000000e+00> : vector<2x128xf32>
    %897 = tpu.matmul %896, %732, %cst_201 {dimension_numbers = #tpu.dot_dimension_numbers<[1], [0], [0], [1], [0, 0, 1, 1], [], []>} : vector<2x64xf32>, vector<64x128xf32>, vector<2x128xf32> -> vector<2x128xf32>
    %898 = vector.extract_strided_slice %729 {offsets = [0, 2, 0], sizes = [2, 1, 96], strides = [1, 1, 1]} : vector<2x8x96xf32> to vector<2x1x96xf32>
    %899 = vector.shape_cast %898 : vector<2x1x96xf32> to vector<2x96xf32>
    %900 = vector.extract_strided_slice %897 {offsets = [0, 0], sizes = [2, 96], strides = [1, 1]} : vector<2x128xf32> to vector<2x96xf32>
    %901 = arith.addf %899, %900 : vector<2x96xf32>
    %902 = vector.extract_strided_slice %901 {offsets = [0, 0], sizes = [2, 32], strides = [1, 1]} : vector<2x96xf32> to vector<2x32xf32>
    %903 = vector.extract_strided_slice %874 {offsets = [0, 0], sizes = [2, 32], strides = [1, 1]} : vector<2x96xf32> to vector<2x32xf32>
    %904 = arith.addf %902, %903 : vector<2x32xf32>
    %905 = arith.negf %904 : vector<2x32xf32>
    %906 = math.exp %905 : vector<2x32xf32>
    %cst_202 = arith.constant 1.000000e+00 : f32
    %907 = vector.broadcast %cst_202 : f32 to vector<2x32xf32>
    %908 = arith.addf %907, %906 : vector<2x32xf32>
    %909 = arith.divf %907, %908 : vector<2x32xf32>
    %910 = vector.extract_strided_slice %901 {offsets = [0, 32], sizes = [2, 32], strides = [1, 1]} : vector<2x96xf32> to vector<2x32xf32>
    %911 = vector.extract_strided_slice %874 {offsets = [0, 32], sizes = [2, 32], strides = [1, 1]} : vector<2x96xf32> to vector<2x32xf32>
    %912 = arith.addf %910, %911 : vector<2x32xf32>
    %913 = arith.negf %912 : vector<2x32xf32>
    %914 = math.exp %913 : vector<2x32xf32>
    %cst_203 = arith.constant 1.000000e+00 : f32
    %915 = vector.broadcast %cst_203 : f32 to vector<2x32xf32>
    %916 = arith.addf %915, %914 : vector<2x32xf32>
    %917 = arith.divf %915, %916 : vector<2x32xf32>
    %918 = vector.extract_strided_slice %901 {offsets = [0, 64], sizes = [2, 32], strides = [1, 1]} : vector<2x96xf32> to vector<2x32xf32>
    %919 = vector.extract_strided_slice %874 {offsets = [0, 64], sizes = [2, 32], strides = [1, 1]} : vector<2x96xf32> to vector<2x32xf32>
    %920 = arith.mulf %909, %919 : vector<2x32xf32>
    %921 = arith.addf %918, %920 : vector<2x32xf32>
    %922 = math.tanh %921 : vector<2x32xf32>
    %cst_204 = arith.constant 1.000000e+00 : f32
    %923 = vector.broadcast %cst_204 : f32 to vector<2x32xf32>
    %924 = arith.subf %923, %917 : vector<2x32xf32>
    %925 = arith.mulf %924, %922 : vector<2x32xf32>
    %926 = arith.mulf %917, %862 : vector<2x32xf32>
    %927 = arith.addf %925, %926 : vector<2x32xf32>
    %928 = vector.extract_strided_slice %730 {offsets = [0, 2, 0], sizes = [2, 1, 32], strides = [1, 1, 1]} : vector<2x8x32xf32> to vector<2x1x32xf32>
    %929 = vector.shape_cast %928 : vector<2x1x32xf32> to vector<2x32xf32>
    %cst_205 = arith.constant dense<0.000000e+00> : vector<2x32xf32>
    %930 = tpu.matmul %927, %733, %cst_205 {dimension_numbers = #tpu.dot_dimension_numbers<[1], [0], [0], [1], [0, 0, 1, 1], [], []>} : vector<2x32xf32>, vector<32x32xf32>, vector<2x32xf32> -> vector<2x32xf32>
    %931 = arith.addf %929, %930 : vector<2x32xf32>
    %932 = vector.extract_strided_slice %897 {offsets = [0, 96], sizes = [2, 32], strides = [1, 1]} : vector<2x128xf32> to vector<2x32xf32>
    %933 = arith.addf %931, %932 : vector<2x32xf32>
    %c0_206 = arith.constant 0 : index
    %c2_207 = arith.constant 2 : index
    %c0_208 = arith.constant 0 : index
    %934 = vector.load %arg19[%c0_206, %c2_207, %c0_208] : memref<2x8x32xf32, #tpu.memory_space<vmem>>, vector<2x1x32xf32>
    %935 = vector.shape_cast %934 : vector<2x1x32xf32> to vector<2x32xf32>
    %936 = vector.shape_cast %933 : vector<2x32xf32> to vector<2x1x32xf32>
    tpu.vector_store %arg19[%c0_206, %c2_207, %c0_208], %936 {strides = array<i32>} : memref<2x8x32xf32, #tpu.memory_space<vmem>>, vector<2x1x32xf32>,
    %cst_209 = arith.constant dense<0.000000e+00> : vector<2x128xf32>
    %937 = tpu.matmul %927, %731, %cst_209 {dimension_numbers = #tpu.dot_dimension_numbers<[1], [0], [0], [1], [0, 0, 1, 1], [], []>} : vector<2x32xf32>, vector<32x128xf32>, vector<2x128xf32> -> vector<2x128xf32>
    %938 = vector.extract_strided_slice %937 {offsets = [0, 0], sizes = [2, 96], strides = [1, 1]} : vector<2x128xf32> to vector<2x96xf32>
    %939 = arith.addf %938, %736 : vector<2x96xf32>
    %940 = vector.extract_strided_slice %937 {offsets = [0, 96], sizes = [2, 32], strides = [1, 1]} : vector<2x128xf32> to vector<2x32xf32>
    %941 = vector.shape_cast %940 : vector<2x32xf32> to vector<2x1x32xf32>
    %942 = vector.broadcast %941 : vector<2x1x32xf32> to vector<2x8x32xf32>
    %943 = arith.addf %942, %720 : vector<2x8x32xf32>
    %944 = math.tanh %943 : vector<2x8x32xf32>
    %945 = vector.broadcast %737 : vector<1x1x32xf32> to vector<2x8x32xf32>
    %946 = arith.mulf %944, %945 : vector<2x8x32xf32>
    %cst_210 = arith.constant dense<0.000000e+00> : vector<2x8xf32>
    %947 = vector.multi_reduction <add>, %946, %cst_210 [2] : vector<2x8x32xf32> to vector<2x8xf32>
    %948 = arith.addf %947, %741 : vector<2x8xf32>
    %cst_211 = arith.constant dense<0xFF800000> : vector<2xf32>
    %949 = vector.multi_reduction <maximumf>, %948, %cst_211 [1] : vector<2x8xf32> to vector<2xf32>
    %950 = vector.shape_cast %949 : vector<2xf32> to vector<2x1xf32>
    %951 = vector.broadcast %950 : vector<2x1xf32> to vector<2x8xf32>
    %952 = arith.subf %948, %951 : vector<2x8xf32>
    %953 = math.exp %952 : vector<2x8xf32>
    %cst_212 = arith.constant dense<0.000000e+00> : vector<2xf32>
    %954 = vector.multi_reduction <add>, %953, %cst_212 [1] : vector<2x8xf32> to vector<2xf32>
    %955 = vector.shape_cast %954 : vector<2xf32> to vector<2x1xf32>
    %956 = vector.broadcast %955 : vector<2x1xf32> to vector<2x8xf32>
    %957 = arith.divf %953, %956 : vector<2x8xf32>
    %958 = vector.shape_cast %957 : vector<2x8xf32> to vector<2x8x1xf32>
    %959 = vector.broadcast %958 : vector<2x8x1xf32> to vector<2x8x64xf32>
    %960 = arith.mulf %959, %709 : vector<2x8x64xf32>
    %cst_213 = arith.constant dense<0.000000e+00> : vector<2x64xf32>
    %961 = vector.multi_reduction <add>, %960, %cst_213 [1] : vector<2x8x64xf32> to vector<2x64xf32>
    %cst_214 = arith.constant dense<0.000000e+00> : vector<2x128xf32>
    %962 = tpu.matmul %961, %732, %cst_214 {dimension_numbers = #tpu.dot_dimension_numbers<[1], [0], [0], [1], [0, 0, 1, 1], [], []>} : vector<2x64xf32>, vector<64x128xf32>, vector<2x128xf32> -> vector<2x128xf32>
    %963 = vector.extract_strided_slice %729 {offsets = [0, 3, 0], sizes = [2, 1, 96], strides = [1, 1, 1]} : vector<2x8x96xf32> to vector<2x1x96xf32>
    %964 = vector.shape_cast %963 : vector<2x1x96xf32> to vector<2x96xf32>
    %965 = vector.extract_strided_slice %962 {offsets = [0, 0], sizes = [2, 96], strides = [1, 1]} : vector<2x128xf32> to vector<2x96xf32>
    %966 = arith.addf %964, %965 : vector<2x96xf32>
    %967 = vector.extract_strided_slice %966 {offsets = [0, 0], sizes = [2, 32], strides = [1, 1]} : vector<2x96xf32> to vector<2x32xf32>
    %968 = vector.extract_strided_slice %939 {offsets = [0, 0], sizes = [2, 32], strides = [1, 1]} : vector<2x96xf32> to vector<2x32xf32>
    %969 = arith.addf %967, %968 : vector<2x32xf32>
    %970 = arith.negf %969 : vector<2x32xf32>
    %971 = math.exp %970 : vector<2x32xf32>
    %cst_215 = arith.constant 1.000000e+00 : f32
    %972 = vector.broadcast %cst_215 : f32 to vector<2x32xf32>
    %973 = arith.addf %972, %971 : vector<2x32xf32>
    %974 = arith.divf %972, %973 : vector<2x32xf32>
    %975 = vector.extract_strided_slice %966 {offsets = [0, 32], sizes = [2, 32], strides = [1, 1]} : vector<2x96xf32> to vector<2x32xf32>
    %976 = vector.extract_strided_slice %939 {offsets = [0, 32], sizes = [2, 32], strides = [1, 1]} : vector<2x96xf32> to vector<2x32xf32>
    %977 = arith.addf %975, %976 : vector<2x32xf32>
    %978 = arith.negf %977 : vector<2x32xf32>
    %979 = math.exp %978 : vector<2x32xf32>
    %cst_216 = arith.constant 1.000000e+00 : f32
    %980 = vector.broadcast %cst_216 : f32 to vector<2x32xf32>
    %981 = arith.addf %980, %979 : vector<2x32xf32>
    %982 = arith.divf %980, %981 : vector<2x32xf32>
    %983 = vector.extract_strided_slice %966 {offsets = [0, 64], sizes = [2, 32], strides = [1, 1]} : vector<2x96xf32> to vector<2x32xf32>
    %984 = vector.extract_strided_slice %939 {offsets = [0, 64], sizes = [2, 32], strides = [1, 1]} : vector<2x96xf32> to vector<2x32xf32>
    %985 = arith.mulf %974, %984 : vector<2x32xf32>
    %986 = arith.addf %983, %985 : vector<2x32xf32>
    %987 = math.tanh %986 : vector<2x32xf32>
    %cst_217 = arith.constant 1.000000e+00 : f32
    %988 = vector.broadcast %cst_217 : f32 to vector<2x32xf32>
    %989 = arith.subf %988, %982 : vector<2x32xf32>
    %990 = arith.mulf %989, %987 : vector<2x32xf32>
    %991 = arith.mulf %982, %927 : vector<2x32xf32>
    %992 = arith.addf %990, %991 : vector<2x32xf32>
    %993 = vector.extract_strided_slice %730 {offsets = [0, 3, 0], sizes = [2, 1, 32], strides = [1, 1, 1]} : vector<2x8x32xf32> to vector<2x1x32xf32>
    %994 = vector.shape_cast %993 : vector<2x1x32xf32> to vector<2x32xf32>
    %cst_218 = arith.constant dense<0.000000e+00> : vector<2x32xf32>
    %995 = tpu.matmul %992, %733, %cst_218 {dimension_numbers = #tpu.dot_dimension_numbers<[1], [0], [0], [1], [0, 0, 1, 1], [], []>} : vector<2x32xf32>, vector<32x32xf32>, vector<2x32xf32> -> vector<2x32xf32>
    %996 = arith.addf %994, %995 : vector<2x32xf32>
    %997 = vector.extract_strided_slice %962 {offsets = [0, 96], sizes = [2, 32], strides = [1, 1]} : vector<2x128xf32> to vector<2x32xf32>
    %998 = arith.addf %996, %997 : vector<2x32xf32>
    %c0_219 = arith.constant 0 : index
    %c3_220 = arith.constant 3 : index
    %c0_221 = arith.constant 0 : index
    %999 = vector.load %arg19[%c0_219, %c3_220, %c0_221] : memref<2x8x32xf32, #tpu.memory_space<vmem>>, vector<2x1x32xf32>
    %1000 = vector.shape_cast %999 : vector<2x1x32xf32> to vector<2x32xf32>
    %1001 = vector.shape_cast %998 : vector<2x32xf32> to vector<2x1x32xf32>
    tpu.vector_store %arg19[%c0_219, %c3_220, %c0_221], %1001 {strides = array<i32>} : memref<2x8x32xf32, #tpu.memory_space<vmem>>, vector<2x1x32xf32>,
    %cst_222 = arith.constant dense<0.000000e+00> : vector<2x128xf32>
    %1002 = tpu.matmul %992, %731, %cst_222 {dimension_numbers = #tpu.dot_dimension_numbers<[1], [0], [0], [1], [0, 0, 1, 1], [], []>} : vector<2x32xf32>, vector<32x128xf32>, vector<2x128xf32> -> vector<2x128xf32>
    %1003 = vector.extract_strided_slice %1002 {offsets = [0, 0], sizes = [2, 96], strides = [1, 1]} : vector<2x128xf32> to vector<2x96xf32>
    %1004 = arith.addf %1003, %736 : vector<2x96xf32>
    %1005 = vector.extract_strided_slice %1002 {offsets = [0, 96], sizes = [2, 32], strides = [1, 1]} : vector<2x128xf32> to vector<2x32xf32>
    %1006 = vector.shape_cast %1005 : vector<2x32xf32> to vector<2x1x32xf32>
    %1007 = vector.broadcast %1006 : vector<2x1x32xf32> to vector<2x8x32xf32>
    %1008 = arith.addf %1007, %720 : vector<2x8x32xf32>
    %1009 = math.tanh %1008 : vector<2x8x32xf32>
    %1010 = vector.broadcast %737 : vector<1x1x32xf32> to vector<2x8x32xf32>
    %1011 = arith.mulf %1009, %1010 : vector<2x8x32xf32>
    %cst_223 = arith.constant dense<0.000000e+00> : vector<2x8xf32>
    %1012 = vector.multi_reduction <add>, %1011, %cst_223 [2] : vector<2x8x32xf32> to vector<2x8xf32>
    %1013 = arith.addf %1012, %741 : vector<2x8xf32>
    %cst_224 = arith.constant dense<0xFF800000> : vector<2xf32>
    %1014 = vector.multi_reduction <maximumf>, %1013, %cst_224 [1] : vector<2x8xf32> to vector<2xf32>
    %1015 = vector.shape_cast %1014 : vector<2xf32> to vector<2x1xf32>
    %1016 = vector.broadcast %1015 : vector<2x1xf32> to vector<2x8xf32>
    %1017 = arith.subf %1013, %1016 : vector<2x8xf32>
    %1018 = math.exp %1017 : vector<2x8xf32>
    %cst_225 = arith.constant dense<0.000000e+00> : vector<2xf32>
    %1019 = vector.multi_reduction <add>, %1018, %cst_225 [1] : vector<2x8xf32> to vector<2xf32>
    %1020 = vector.shape_cast %1019 : vector<2xf32> to vector<2x1xf32>
    %1021 = vector.broadcast %1020 : vector<2x1xf32> to vector<2x8xf32>
    %1022 = arith.divf %1018, %1021 : vector<2x8xf32>
    %1023 = vector.shape_cast %1022 : vector<2x8xf32> to vector<2x8x1xf32>
    %1024 = vector.broadcast %1023 : vector<2x8x1xf32> to vector<2x8x64xf32>
    %1025 = arith.mulf %1024, %709 : vector<2x8x64xf32>
    %cst_226 = arith.constant dense<0.000000e+00> : vector<2x64xf32>
    %1026 = vector.multi_reduction <add>, %1025, %cst_226 [1] : vector<2x8x64xf32> to vector<2x64xf32>
    %cst_227 = arith.constant dense<0.000000e+00> : vector<2x128xf32>
    %1027 = tpu.matmul %1026, %732, %cst_227 {dimension_numbers = #tpu.dot_dimension_numbers<[1], [0], [0], [1], [0, 0, 1, 1], [], []>} : vector<2x64xf32>, vector<64x128xf32>, vector<2x128xf32> -> vector<2x128xf32>
    %1028 = vector.extract_strided_slice %729 {offsets = [0, 4, 0], sizes = [2, 1, 96], strides = [1, 1, 1]} : vector<2x8x96xf32> to vector<2x1x96xf32>
    %1029 = vector.shape_cast %1028 : vector<2x1x96xf32> to vector<2x96xf32>
    %1030 = vector.extract_strided_slice %1027 {offsets = [0, 0], sizes = [2, 96], strides = [1, 1]} : vector<2x128xf32> to vector<2x96xf32>
    %1031 = arith.addf %1029, %1030 : vector<2x96xf32>
    %1032 = vector.extract_strided_slice %1031 {offsets = [0, 0], sizes = [2, 32], strides = [1, 1]} : vector<2x96xf32> to vector<2x32xf32>
    %1033 = vector.extract_strided_slice %1004 {offsets = [0, 0], sizes = [2, 32], strides = [1, 1]} : vector<2x96xf32> to vector<2x32xf32>
    %1034 = arith.addf %1032, %1033 : vector<2x32xf32>
    %1035 = arith.negf %1034 : vector<2x32xf32>
    %1036 = math.exp %1035 : vector<2x32xf32>
    %cst_228 = arith.constant 1.000000e+00 : f32
    %1037 = vector.broadcast %cst_228 : f32 to vector<2x32xf32>
    %1038 = arith.addf %1037, %1036 : vector<2x32xf32>
    %1039 = arith.divf %1037, %1038 : vector<2x32xf32>
    %1040 = vector.extract_strided_slice %1031 {offsets = [0, 32], sizes = [2, 32], strides = [1, 1]} : vector<2x96xf32> to vector<2x32xf32>
    %1041 = vector.extract_strided_slice %1004 {offsets = [0, 32], sizes = [2, 32], strides = [1, 1]} : vector<2x96xf32> to vector<2x32xf32>
    %1042 = arith.addf %1040, %1041 : vector<2x32xf32>
    %1043 = arith.negf %1042 : vector<2x32xf32>
    %1044 = math.exp %1043 : vector<2x32xf32>
    %cst_229 = arith.constant 1.000000e+00 : f32
    %1045 = vector.broadcast %cst_229 : f32 to vector<2x32xf32>
    %1046 = arith.addf %1045, %1044 : vector<2x32xf32>
    %1047 = arith.divf %1045, %1046 : vector<2x32xf32>
    %1048 = vector.extract_strided_slice %1031 {offsets = [0, 64], sizes = [2, 32], strides = [1, 1]} : vector<2x96xf32> to vector<2x32xf32>
    %1049 = vector.extract_strided_slice %1004 {offsets = [0, 64], sizes = [2, 32], strides = [1, 1]} : vector<2x96xf32> to vector<2x32xf32>
    %1050 = arith.mulf %1039, %1049 : vector<2x32xf32>
    %1051 = arith.addf %1048, %1050 : vector<2x32xf32>
    %1052 = math.tanh %1051 : vector<2x32xf32>
    %cst_230 = arith.constant 1.000000e+00 : f32
    %1053 = vector.broadcast %cst_230 : f32 to vector<2x32xf32>
    %1054 = arith.subf %1053, %1047 : vector<2x32xf32>
    %1055 = arith.mulf %1054, %1052 : vector<2x32xf32>
    %1056 = arith.mulf %1047, %992 : vector<2x32xf32>
    %1057 = arith.addf %1055, %1056 : vector<2x32xf32>
    %1058 = vector.extract_strided_slice %730 {offsets = [0, 4, 0], sizes = [2, 1, 32], strides = [1, 1, 1]} : vector<2x8x32xf32> to vector<2x1x32xf32>
    %1059 = vector.shape_cast %1058 : vector<2x1x32xf32> to vector<2x32xf32>
    %cst_231 = arith.constant dense<0.000000e+00> : vector<2x32xf32>
    %1060 = tpu.matmul %1057, %733, %cst_231 {dimension_numbers = #tpu.dot_dimension_numbers<[1], [0], [0], [1], [0, 0, 1, 1], [], []>} : vector<2x32xf32>, vector<32x32xf32>, vector<2x32xf32> -> vector<2x32xf32>
    %1061 = arith.addf %1059, %1060 : vector<2x32xf32>
    %1062 = vector.extract_strided_slice %1027 {offsets = [0, 96], sizes = [2, 32], strides = [1, 1]} : vector<2x128xf32> to vector<2x32xf32>
    %1063 = arith.addf %1061, %1062 : vector<2x32xf32>
    %c0_232 = arith.constant 0 : index
    %c4_233 = arith.constant 4 : index
    %c0_234 = arith.constant 0 : index
    %1064 = vector.load %arg19[%c0_232, %c4_233, %c0_234] : memref<2x8x32xf32, #tpu.memory_space<vmem>>, vector<2x1x32xf32>
    %1065 = vector.shape_cast %1064 : vector<2x1x32xf32> to vector<2x32xf32>
    %1066 = vector.shape_cast %1063 : vector<2x32xf32> to vector<2x1x32xf32>
    tpu.vector_store %arg19[%c0_232, %c4_233, %c0_234], %1066 {strides = array<i32>} : memref<2x8x32xf32, #tpu.memory_space<vmem>>, vector<2x1x32xf32>,
    %cst_235 = arith.constant dense<0.000000e+00> : vector<2x128xf32>
    %1067 = tpu.matmul %1057, %731, %cst_235 {dimension_numbers = #tpu.dot_dimension_numbers<[1], [0], [0], [1], [0, 0, 1, 1], [], []>} : vector<2x32xf32>, vector<32x128xf32>, vector<2x128xf32> -> vector<2x128xf32>
    %1068 = vector.extract_strided_slice %1067 {offsets = [0, 0], sizes = [2, 96], strides = [1, 1]} : vector<2x128xf32> to vector<2x96xf32>
    %1069 = arith.addf %1068, %736 : vector<2x96xf32>
    %1070 = vector.extract_strided_slice %1067 {offsets = [0, 96], sizes = [2, 32], strides = [1, 1]} : vector<2x128xf32> to vector<2x32xf32>
    %1071 = vector.shape_cast %1070 : vector<2x32xf32> to vector<2x1x32xf32>
    %1072 = vector.broadcast %1071 : vector<2x1x32xf32> to vector<2x8x32xf32>
    %1073 = arith.addf %1072, %720 : vector<2x8x32xf32>
    %1074 = math.tanh %1073 : vector<2x8x32xf32>
    %1075 = vector.broadcast %737 : vector<1x1x32xf32> to vector<2x8x32xf32>
    %1076 = arith.mulf %1074, %1075 : vector<2x8x32xf32>
    %cst_236 = arith.constant dense<0.000000e+00> : vector<2x8xf32>
    %1077 = vector.multi_reduction <add>, %1076, %cst_236 [2] : vector<2x8x32xf32> to vector<2x8xf32>
    %1078 = arith.addf %1077, %741 : vector<2x8xf32>
    %cst_237 = arith.constant dense<0xFF800000> : vector<2xf32>
    %1079 = vector.multi_reduction <maximumf>, %1078, %cst_237 [1] : vector<2x8xf32> to vector<2xf32>
    %1080 = vector.shape_cast %1079 : vector<2xf32> to vector<2x1xf32>
    %1081 = vector.broadcast %1080 : vector<2x1xf32> to vector<2x8xf32>
    %1082 = arith.subf %1078, %1081 : vector<2x8xf32>
    %1083 = math.exp %1082 : vector<2x8xf32>
    %cst_238 = arith.constant dense<0.000000e+00> : vector<2xf32>
    %1084 = vector.multi_reduction <add>, %1083, %cst_238 [1] : vector<2x8xf32> to vector<2xf32>
    %1085 = vector.shape_cast %1084 : vector<2xf32> to vector<2x1xf32>
    %1086 = vector.broadcast %1085 : vector<2x1xf32> to vector<2x8xf32>
    %1087 = arith.divf %1083, %1086 : vector<2x8xf32>
    %1088 = vector.shape_cast %1087 : vector<2x8xf32> to vector<2x8x1xf32>
    %1089 = vector.broadcast %1088 : vector<2x8x1xf32> to vector<2x8x64xf32>
    %1090 = arith.mulf %1089, %709 : vector<2x8x64xf32>
    %cst_239 = arith.constant dense<0.000000e+00> : vector<2x64xf32>
    %1091 = vector.multi_reduction <add>, %1090, %cst_239 [1] : vector<2x8x64xf32> to vector<2x64xf32>
    %cst_240 = arith.constant dense<0.000000e+00> : vector<2x128xf32>
    %1092 = tpu.matmul %1091, %732, %cst_240 {dimension_numbers = #tpu.dot_dimension_numbers<[1], [0], [0], [1], [0, 0, 1, 1], [], []>} : vector<2x64xf32>, vector<64x128xf32>, vector<2x128xf32> -> vector<2x128xf32>
    %1093 = vector.extract_strided_slice %729 {offsets = [0, 5, 0], sizes = [2, 1, 96], strides = [1, 1, 1]} : vector<2x8x96xf32> to vector<2x1x96xf32>
    %1094 = vector.shape_cast %1093 : vector<2x1x96xf32> to vector<2x96xf32>
    %1095 = vector.extract_strided_slice %1092 {offsets = [0, 0], sizes = [2, 96], strides = [1, 1]} : vector<2x128xf32> to vector<2x96xf32>
    %1096 = arith.addf %1094, %1095 : vector<2x96xf32>
    %1097 = vector.extract_strided_slice %1096 {offsets = [0, 0], sizes = [2, 32], strides = [1, 1]} : vector<2x96xf32> to vector<2x32xf32>
    %1098 = vector.extract_strided_slice %1069 {offsets = [0, 0], sizes = [2, 32], strides = [1, 1]} : vector<2x96xf32> to vector<2x32xf32>
    %1099 = arith.addf %1097, %1098 : vector<2x32xf32>
    %1100 = arith.negf %1099 : vector<2x32xf32>
    %1101 = math.exp %1100 : vector<2x32xf32>
    %cst_241 = arith.constant 1.000000e+00 : f32
    %1102 = vector.broadcast %cst_241 : f32 to vector<2x32xf32>
    %1103 = arith.addf %1102, %1101 : vector<2x32xf32>
    %1104 = arith.divf %1102, %1103 : vector<2x32xf32>
    %1105 = vector.extract_strided_slice %1096 {offsets = [0, 32], sizes = [2, 32], strides = [1, 1]} : vector<2x96xf32> to vector<2x32xf32>
    %1106 = vector.extract_strided_slice %1069 {offsets = [0, 32], sizes = [2, 32], strides = [1, 1]} : vector<2x96xf32> to vector<2x32xf32>
    %1107 = arith.addf %1105, %1106 : vector<2x32xf32>
    %1108 = arith.negf %1107 : vector<2x32xf32>
    %1109 = math.exp %1108 : vector<2x32xf32>
    %cst_242 = arith.constant 1.000000e+00 : f32
    %1110 = vector.broadcast %cst_242 : f32 to vector<2x32xf32>
    %1111 = arith.addf %1110, %1109 : vector<2x32xf32>
    %1112 = arith.divf %1110, %1111 : vector<2x32xf32>
    %1113 = vector.extract_strided_slice %1096 {offsets = [0, 64], sizes = [2, 32], strides = [1, 1]} : vector<2x96xf32> to vector<2x32xf32>
    %1114 = vector.extract_strided_slice %1069 {offsets = [0, 64], sizes = [2, 32], strides = [1, 1]} : vector<2x96xf32> to vector<2x32xf32>
    %1115 = arith.mulf %1104, %1114 : vector<2x32xf32>
    %1116 = arith.addf %1113, %1115 : vector<2x32xf32>
    %1117 = math.tanh %1116 : vector<2x32xf32>
    %cst_243 = arith.constant 1.000000e+00 : f32
    %1118 = vector.broadcast %cst_243 : f32 to vector<2x32xf32>
    %1119 = arith.subf %1118, %1112 : vector<2x32xf32>
    %1120 = arith.mulf %1119, %1117 : vector<2x32xf32>
    %1121 = arith.mulf %1112, %1057 : vector<2x32xf32>
    %1122 = arith.addf %1120, %1121 : vector<2x32xf32>
    %1123 = vector.extract_strided_slice %730 {offsets = [0, 5, 0], sizes = [2, 1, 32], strides = [1, 1, 1]} : vector<2x8x32xf32> to vector<2x1x32xf32>
    %1124 = vector.shape_cast %1123 : vector<2x1x32xf32> to vector<2x32xf32>
    %cst_244 = arith.constant dense<0.000000e+00> : vector<2x32xf32>
    %1125 = tpu.matmul %1122, %733, %cst_244 {dimension_numbers = #tpu.dot_dimension_numbers<[1], [0], [0], [1], [0, 0, 1, 1], [], []>} : vector<2x32xf32>, vector<32x32xf32>, vector<2x32xf32> -> vector<2x32xf32>
    %1126 = arith.addf %1124, %1125 : vector<2x32xf32>
    %1127 = vector.extract_strided_slice %1092 {offsets = [0, 96], sizes = [2, 32], strides = [1, 1]} : vector<2x128xf32> to vector<2x32xf32>
    %1128 = arith.addf %1126, %1127 : vector<2x32xf32>
    %c0_245 = arith.constant 0 : index
    %c5_246 = arith.constant 5 : index
    %c0_247 = arith.constant 0 : index
    %1129 = vector.load %arg19[%c0_245, %c5_246, %c0_247] : memref<2x8x32xf32, #tpu.memory_space<vmem>>, vector<2x1x32xf32>
    %1130 = vector.shape_cast %1129 : vector<2x1x32xf32> to vector<2x32xf32>
    %1131 = vector.shape_cast %1128 : vector<2x32xf32> to vector<2x1x32xf32>
    tpu.vector_store %arg19[%c0_245, %c5_246, %c0_247], %1131 {strides = array<i32>} : memref<2x8x32xf32, #tpu.memory_space<vmem>>, vector<2x1x32xf32>,
    %cst_248 = arith.constant dense<0.000000e+00> : vector<2x128xf32>
    %1132 = tpu.matmul %1122, %731, %cst_248 {dimension_numbers = #tpu.dot_dimension_numbers<[1], [0], [0], [1], [0, 0, 1, 1], [], []>} : vector<2x32xf32>, vector<32x128xf32>, vector<2x128xf32> -> vector<2x128xf32>
    %1133 = vector.extract_strided_slice %1132 {offsets = [0, 0], sizes = [2, 96], strides = [1, 1]} : vector<2x128xf32> to vector<2x96xf32>
    %1134 = arith.addf %1133, %736 : vector<2x96xf32>
    %1135 = vector.extract_strided_slice %1132 {offsets = [0, 96], sizes = [2, 32], strides = [1, 1]} : vector<2x128xf32> to vector<2x32xf32>
    %1136 = vector.shape_cast %1135 : vector<2x32xf32> to vector<2x1x32xf32>
    %1137 = vector.broadcast %1136 : vector<2x1x32xf32> to vector<2x8x32xf32>
    %1138 = arith.addf %1137, %720 : vector<2x8x32xf32>
    %1139 = math.tanh %1138 : vector<2x8x32xf32>
    %1140 = vector.broadcast %737 : vector<1x1x32xf32> to vector<2x8x32xf32>
    %1141 = arith.mulf %1139, %1140 : vector<2x8x32xf32>
    %cst_249 = arith.constant dense<0.000000e+00> : vector<2x8xf32>
    %1142 = vector.multi_reduction <add>, %1141, %cst_249 [2] : vector<2x8x32xf32> to vector<2x8xf32>
    %1143 = arith.addf %1142, %741 : vector<2x8xf32>
    %cst_250 = arith.constant dense<0xFF800000> : vector<2xf32>
    %1144 = vector.multi_reduction <maximumf>, %1143, %cst_250 [1] : vector<2x8xf32> to vector<2xf32>
    %1145 = vector.shape_cast %1144 : vector<2xf32> to vector<2x1xf32>
    %1146 = vector.broadcast %1145 : vector<2x1xf32> to vector<2x8xf32>
    %1147 = arith.subf %1143, %1146 : vector<2x8xf32>
    %1148 = math.exp %1147 : vector<2x8xf32>
    %cst_251 = arith.constant dense<0.000000e+00> : vector<2xf32>
    %1149 = vector.multi_reduction <add>, %1148, %cst_251 [1] : vector<2x8xf32> to vector<2xf32>
    %1150 = vector.shape_cast %1149 : vector<2xf32> to vector<2x1xf32>
    %1151 = vector.broadcast %1150 : vector<2x1xf32> to vector<2x8xf32>
    %1152 = arith.divf %1148, %1151 : vector<2x8xf32>
    %1153 = vector.shape_cast %1152 : vector<2x8xf32> to vector<2x8x1xf32>
    %1154 = vector.broadcast %1153 : vector<2x8x1xf32> to vector<2x8x64xf32>
    %1155 = arith.mulf %1154, %709 : vector<2x8x64xf32>
    %cst_252 = arith.constant dense<0.000000e+00> : vector<2x64xf32>
    %1156 = vector.multi_reduction <add>, %1155, %cst_252 [1] : vector<2x8x64xf32> to vector<2x64xf32>
    %cst_253 = arith.constant dense<0.000000e+00> : vector<2x128xf32>
    %1157 = tpu.matmul %1156, %732, %cst_253 {dimension_numbers = #tpu.dot_dimension_numbers<[1], [0], [0], [1], [0, 0, 1, 1], [], []>} : vector<2x64xf32>, vector<64x128xf32>, vector<2x128xf32> -> vector<2x128xf32>
    %1158 = vector.extract_strided_slice %729 {offsets = [0, 6, 0], sizes = [2, 1, 96], strides = [1, 1, 1]} : vector<2x8x96xf32> to vector<2x1x96xf32>
    %1159 = vector.shape_cast %1158 : vector<2x1x96xf32> to vector<2x96xf32>
    %1160 = vector.extract_strided_slice %1157 {offsets = [0, 0], sizes = [2, 96], strides = [1, 1]} : vector<2x128xf32> to vector<2x96xf32>
    %1161 = arith.addf %1159, %1160 : vector<2x96xf32>
    %1162 = vector.extract_strided_slice %1161 {offsets = [0, 0], sizes = [2, 32], strides = [1, 1]} : vector<2x96xf32> to vector<2x32xf32>
    %1163 = vector.extract_strided_slice %1134 {offsets = [0, 0], sizes = [2, 32], strides = [1, 1]} : vector<2x96xf32> to vector<2x32xf32>
    %1164 = arith.addf %1162, %1163 : vector<2x32xf32>
    %1165 = arith.negf %1164 : vector<2x32xf32>
    %1166 = math.exp %1165 : vector<2x32xf32>
    %cst_254 = arith.constant 1.000000e+00 : f32
    %1167 = vector.broadcast %cst_254 : f32 to vector<2x32xf32>
    %1168 = arith.addf %1167, %1166 : vector<2x32xf32>
    %1169 = arith.divf %1167, %1168 : vector<2x32xf32>
    %1170 = vector.extract_strided_slice %1161 {offsets = [0, 32], sizes = [2, 32], strides = [1, 1]} : vector<2x96xf32> to vector<2x32xf32>
    %1171 = vector.extract_strided_slice %1134 {offsets = [0, 32], sizes = [2, 32], strides = [1, 1]} : vector<2x96xf32> to vector<2x32xf32>
    %1172 = arith.addf %1170, %1171 : vector<2x32xf32>
    %1173 = arith.negf %1172 : vector<2x32xf32>
    %1174 = math.exp %1173 : vector<2x32xf32>
    %cst_255 = arith.constant 1.000000e+00 : f32
    %1175 = vector.broadcast %cst_255 : f32 to vector<2x32xf32>
    %1176 = arith.addf %1175, %1174 : vector<2x32xf32>
    %1177 = arith.divf %1175, %1176 : vector<2x32xf32>
    %1178 = vector.extract_strided_slice %1161 {offsets = [0, 64], sizes = [2, 32], strides = [1, 1]} : vector<2x96xf32> to vector<2x32xf32>
    %1179 = vector.extract_strided_slice %1134 {offsets = [0, 64], sizes = [2, 32], strides = [1, 1]} : vector<2x96xf32> to vector<2x32xf32>
    %1180 = arith.mulf %1169, %1179 : vector<2x32xf32>
    %1181 = arith.addf %1178, %1180 : vector<2x32xf32>
    %1182 = math.tanh %1181 : vector<2x32xf32>
    %cst_256 = arith.constant 1.000000e+00 : f32
    %1183 = vector.broadcast %cst_256 : f32 to vector<2x32xf32>
    %1184 = arith.subf %1183, %1177 : vector<2x32xf32>
    %1185 = arith.mulf %1184, %1182 : vector<2x32xf32>
    %1186 = arith.mulf %1177, %1122 : vector<2x32xf32>
    %1187 = arith.addf %1185, %1186 : vector<2x32xf32>
    %1188 = vector.extract_strided_slice %730 {offsets = [0, 6, 0], sizes = [2, 1, 32], strides = [1, 1, 1]} : vector<2x8x32xf32> to vector<2x1x32xf32>
    %1189 = vector.shape_cast %1188 : vector<2x1x32xf32> to vector<2x32xf32>
    %cst_257 = arith.constant dense<0.000000e+00> : vector<2x32xf32>
    %1190 = tpu.matmul %1187, %733, %cst_257 {dimension_numbers = #tpu.dot_dimension_numbers<[1], [0], [0], [1], [0, 0, 1, 1], [], []>} : vector<2x32xf32>, vector<32x32xf32>, vector<2x32xf32> -> vector<2x32xf32>
    %1191 = arith.addf %1189, %1190 : vector<2x32xf32>
    %1192 = vector.extract_strided_slice %1157 {offsets = [0, 96], sizes = [2, 32], strides = [1, 1]} : vector<2x128xf32> to vector<2x32xf32>
    %1193 = arith.addf %1191, %1192 : vector<2x32xf32>
    %c0_258 = arith.constant 0 : index
    %c6_259 = arith.constant 6 : index
    %c0_260 = arith.constant 0 : index
    %1194 = vector.load %arg19[%c0_258, %c6_259, %c0_260] : memref<2x8x32xf32, #tpu.memory_space<vmem>>, vector<2x1x32xf32>
    %1195 = vector.shape_cast %1194 : vector<2x1x32xf32> to vector<2x32xf32>
    %1196 = vector.shape_cast %1193 : vector<2x32xf32> to vector<2x1x32xf32>
    tpu.vector_store %arg19[%c0_258, %c6_259, %c0_260], %1196 {strides = array<i32>} : memref<2x8x32xf32, #tpu.memory_space<vmem>>, vector<2x1x32xf32>,
    %cst_261 = arith.constant dense<0.000000e+00> : vector<2x128xf32>
    %1197 = tpu.matmul %1187, %731, %cst_261 {dimension_numbers = #tpu.dot_dimension_numbers<[1], [0], [0], [1], [0, 0, 1, 1], [], []>} : vector<2x32xf32>, vector<32x128xf32>, vector<2x128xf32> -> vector<2x128xf32>
    %1198 = vector.extract_strided_slice %1197 {offsets = [0, 0], sizes = [2, 96], strides = [1, 1]} : vector<2x128xf32> to vector<2x96xf32>
    %1199 = arith.addf %1198, %736 : vector<2x96xf32>
    %1200 = vector.extract_strided_slice %1197 {offsets = [0, 96], sizes = [2, 32], strides = [1, 1]} : vector<2x128xf32> to vector<2x32xf32>
    %1201 = vector.shape_cast %1200 : vector<2x32xf32> to vector<2x1x32xf32>
    %1202 = vector.broadcast %1201 : vector<2x1x32xf32> to vector<2x8x32xf32>
    %1203 = arith.addf %1202, %720 : vector<2x8x32xf32>
    %1204 = math.tanh %1203 : vector<2x8x32xf32>
    %1205 = vector.broadcast %737 : vector<1x1x32xf32> to vector<2x8x32xf32>
    %1206 = arith.mulf %1204, %1205 : vector<2x8x32xf32>
    %cst_262 = arith.constant dense<0.000000e+00> : vector<2x8xf32>
    %1207 = vector.multi_reduction <add>, %1206, %cst_262 [2] : vector<2x8x32xf32> to vector<2x8xf32>
    %1208 = arith.addf %1207, %741 : vector<2x8xf32>
    %cst_263 = arith.constant dense<0xFF800000> : vector<2xf32>
    %1209 = vector.multi_reduction <maximumf>, %1208, %cst_263 [1] : vector<2x8xf32> to vector<2xf32>
    %1210 = vector.shape_cast %1209 : vector<2xf32> to vector<2x1xf32>
    %1211 = vector.broadcast %1210 : vector<2x1xf32> to vector<2x8xf32>
    %1212 = arith.subf %1208, %1211 : vector<2x8xf32>
    %1213 = math.exp %1212 : vector<2x8xf32>
    %cst_264 = arith.constant dense<0.000000e+00> : vector<2xf32>
    %1214 = vector.multi_reduction <add>, %1213, %cst_264 [1] : vector<2x8xf32> to vector<2xf32>
    %1215 = vector.shape_cast %1214 : vector<2xf32> to vector<2x1xf32>
    %1216 = vector.broadcast %1215 : vector<2x1xf32> to vector<2x8xf32>
    %1217 = arith.divf %1213, %1216 : vector<2x8xf32>
    %1218 = vector.shape_cast %1217 : vector<2x8xf32> to vector<2x8x1xf32>
    %1219 = vector.broadcast %1218 : vector<2x8x1xf32> to vector<2x8x64xf32>
    %1220 = arith.mulf %1219, %709 : vector<2x8x64xf32>
    %cst_265 = arith.constant dense<0.000000e+00> : vector<2x64xf32>
    %1221 = vector.multi_reduction <add>, %1220, %cst_265 [1] : vector<2x8x64xf32> to vector<2x64xf32>
    %cst_266 = arith.constant dense<0.000000e+00> : vector<2x128xf32>
    %1222 = tpu.matmul %1221, %732, %cst_266 {dimension_numbers = #tpu.dot_dimension_numbers<[1], [0], [0], [1], [0, 0, 1, 1], [], []>} : vector<2x64xf32>, vector<64x128xf32>, vector<2x128xf32> -> vector<2x128xf32>
    %1223 = vector.extract_strided_slice %729 {offsets = [0, 7, 0], sizes = [2, 1, 96], strides = [1, 1, 1]} : vector<2x8x96xf32> to vector<2x1x96xf32>
    %1224 = vector.shape_cast %1223 : vector<2x1x96xf32> to vector<2x96xf32>
    %1225 = vector.extract_strided_slice %1222 {offsets = [0, 0], sizes = [2, 96], strides = [1, 1]} : vector<2x128xf32> to vector<2x96xf32>
    %1226 = arith.addf %1224, %1225 : vector<2x96xf32>
    %1227 = vector.extract_strided_slice %1226 {offsets = [0, 0], sizes = [2, 32], strides = [1, 1]} : vector<2x96xf32> to vector<2x32xf32>
    %1228 = vector.extract_strided_slice %1199 {offsets = [0, 0], sizes = [2, 32], strides = [1, 1]} : vector<2x96xf32> to vector<2x32xf32>
    %1229 = arith.addf %1227, %1228 : vector<2x32xf32>
    %1230 = arith.negf %1229 : vector<2x32xf32>
    %1231 = math.exp %1230 : vector<2x32xf32>
    %cst_267 = arith.constant 1.000000e+00 : f32
    %1232 = vector.broadcast %cst_267 : f32 to vector<2x32xf32>
    %1233 = arith.addf %1232, %1231 : vector<2x32xf32>
    %1234 = arith.divf %1232, %1233 : vector<2x32xf32>
    %1235 = vector.extract_strided_slice %1226 {offsets = [0, 32], sizes = [2, 32], strides = [1, 1]} : vector<2x96xf32> to vector<2x32xf32>
    %1236 = vector.extract_strided_slice %1199 {offsets = [0, 32], sizes = [2, 32], strides = [1, 1]} : vector<2x96xf32> to vector<2x32xf32>
    %1237 = arith.addf %1235, %1236 : vector<2x32xf32>
    %1238 = arith.negf %1237 : vector<2x32xf32>
    %1239 = math.exp %1238 : vector<2x32xf32>
    %cst_268 = arith.constant 1.000000e+00 : f32
    %1240 = vector.broadcast %cst_268 : f32 to vector<2x32xf32>
    %1241 = arith.addf %1240, %1239 : vector<2x32xf32>
    %1242 = arith.divf %1240, %1241 : vector<2x32xf32>
    %1243 = vector.extract_strided_slice %1226 {offsets = [0, 64], sizes = [2, 32], strides = [1, 1]} : vector<2x96xf32> to vector<2x32xf32>
    %1244 = vector.extract_strided_slice %1199 {offsets = [0, 64], sizes = [2, 32], strides = [1, 1]} : vector<2x96xf32> to vector<2x32xf32>
    %1245 = arith.mulf %1234, %1244 : vector<2x32xf32>
    %1246 = arith.addf %1243, %1245 : vector<2x32xf32>
    %1247 = math.tanh %1246 : vector<2x32xf32>
    %cst_269 = arith.constant 1.000000e+00 : f32
    %1248 = vector.broadcast %cst_269 : f32 to vector<2x32xf32>
    %1249 = arith.subf %1248, %1242 : vector<2x32xf32>
    %1250 = arith.mulf %1249, %1247 : vector<2x32xf32>
    %1251 = arith.mulf %1242, %1187 : vector<2x32xf32>
    %1252 = arith.addf %1250, %1251 : vector<2x32xf32>
    %1253 = vector.extract_strided_slice %730 {offsets = [0, 7, 0], sizes = [2, 1, 32], strides = [1, 1, 1]} : vector<2x8x32xf32> to vector<2x1x32xf32>
    %1254 = vector.shape_cast %1253 : vector<2x1x32xf32> to vector<2x32xf32>
    %cst_270 = arith.constant dense<0.000000e+00> : vector<2x32xf32>
    %1255 = tpu.matmul %1252, %733, %cst_270 {dimension_numbers = #tpu.dot_dimension_numbers<[1], [0], [0], [1], [0, 0, 1, 1], [], []>} : vector<2x32xf32>, vector<32x32xf32>, vector<2x32xf32> -> vector<2x32xf32>
    %1256 = arith.addf %1254, %1255 : vector<2x32xf32>
    %1257 = vector.extract_strided_slice %1222 {offsets = [0, 96], sizes = [2, 32], strides = [1, 1]} : vector<2x128xf32> to vector<2x32xf32>
    %1258 = arith.addf %1256, %1257 : vector<2x32xf32>
    %c0_271 = arith.constant 0 : index
    %c7_272 = arith.constant 7 : index
    %c0_273 = arith.constant 0 : index
    %1259 = vector.load %arg19[%c0_271, %c7_272, %c0_273] : memref<2x8x32xf32, #tpu.memory_space<vmem>>, vector<2x1x32xf32>
    %1260 = vector.shape_cast %1259 : vector<2x1x32xf32> to vector<2x32xf32>
    %1261 = vector.shape_cast %1258 : vector<2x32xf32> to vector<2x1x32xf32>
    tpu.vector_store %arg19[%c0_271, %c7_272, %c0_273], %1261 {strides = array<i32>} : memref<2x8x32xf32, #tpu.memory_space<vmem>>, vector<2x1x32xf32>,
    %c0_274 = arith.constant 0 : index
    %c0_275 = arith.constant 0 : index
    %1262 = vector.load %arg20[%c0_274, %c0_275] : memref<2x32xf32, #tpu.memory_space<vmem>>, vector<2x32xf32>
    tpu.vector_store %arg20[%c0_274, %c0_275], %1252 {strides = array<i32>} : memref<2x32xf32, #tpu.memory_space<vmem>>, vector<2x32xf32>,
    return
  }
}

</mosaic_0001>

<bundles_post_ra>
// kernel: encoder_decoder_forward.1
= control target key start
LH: loop header
LB: loop body
LE: loop exit
PB: predicated region body
PF: predicated region fallthrough
CT: control target
= control target key end

     0   :  { %s8141_s0 = inlined_call_operand.vmem [shape: f32[2,8,32], index: 0, kind: input, shape index: {}]   ;;  %s8142_s1 = inlined_call_operand.vmem [shape: f32[2,8,32], index: 1, kind: input, shape index: {}]   ;;  %s8143_s2 = inlined_call_operand.vmem [shape: f32[2,8], index: 2, kind: input, shape index: {}]   ;;  %s8144_s3 = inlined_call_operand.vmem [shape: f32[32,192], index: 3, kind: input, shape index: {}]   ;;  %s8145_s4 = inlined_call_operand.vmem [shape: f32[1,192], index: 4, kind: input, shape index: {}]   ;;  %s8146_s5 = inlined_call_operand.vmem [shape: f32[32,96], index: 5, kind: input, shape index: {}]   ;;  %s8147_s6 = inlined_call_operand.vmem [shape: f32[1,96], index: 6, kind: input, shape index: {}]   ;;  %s8148_s7 = inlined_call_operand.vmem [shape: f32[32,96], index: 7, kind: input, shape index: {}]   ;;  %s8149_s8 = inlined_call_operand.vmem [shape: f32[1,96], index: 8, kind: input, shape index: {}]   ;;  %s8150_s9 = inlined_call_operand.vmem [shape: f32[64,32], index: 9, kind: input, shape index: {}]   ;;  %s8151_s10 = inlined_call_operand.vmem [shape: f32[1,32], index: 10, kind: input, shape index: {}]   ;;  %s8152_s11 = inlined_call_operand.vmem [shape: f32[64,32], index: 11, kind: input, shape index: {}]   ;;  %s8153_s12 = inlined_call_operand.vmem [shape: f32[32,128], index: 12, kind: input, shape index: {}]   ;;  %s8154_s13 = inlined_call_operand.vmem [shape: f32[1,1,32], index: 13, kind: input, shape index: {}]   ;;  %s8155_s14 = inlined_call_operand.vmem [shape: f32[32,128], index: 14, kind: input, shape index: {}]   ;;  %s8156_s15 = inlined_call_operand.vmem [shape: f32[1,128], index: 15, kind: input, shape index: {}]   ;;  %s8157_s16 = inlined_call_operand.vmem [shape: f32[64,128], index: 16, kind: input, shape index: {}]   ;;  %s8158_s17 = inlined_call_operand.vmem [shape: f32[1,96], index: 17, kind: input, shape index: {}]   ;;  %s8159_s18 = inlined_call_operand.vmem [shape: f32[32,32], index: 18, kind: input, shape index: {}]   ;;  %s8160_s19 = inlined_call_operand.hbm [shape: f32[2,8,32], index: 19, kind: output, shape index: {0}]   ;;  %s8161_s20 = inlined_call_operand.hbm [shape: f32[2,32], index: 20, kind: output, shape index: {1}]  }
   0x1   :  { %8166 = sst [smem:[#allocation9_spill]] %s8141_s0 }
   0x2   :  { %8167 = sst [smem:[#allocation10_spill]] %s8142_s1 }
   0x3   :  { %8168 = sst [smem:[#allocation11_spill]] %s8143_s2 }
   0x4   :  { %8169 = sst [smem:[#allocation12_spill]] %s8144_s3 }
   0x5   :  { %8170 = sst [smem:[#allocation13_spill]] %s8145_s4 }
   0x6   :  { %26 = vsyncpa [#allocation4], 0  ;;  %s8171_s23 = sld [smem:[#allocation12_spill]]  ;;  %v6225_v1 = vld [vmem:[%s8146_s5 + $0x18] sm:$0xff]  ;;  %v6239_v4 = vld [vmem:[%s8146_s5 + $0x10] sm:$0xff]  ;;  %vm83_vm0 = vcmask 261120  }
   0x7   :  { %v6230_v2 = vld [vmem:[%s8148_s7 + $0x18] sm:$0xff]  ;;  %167 = vmatpush.msra.mxu2 %v6225_v1  ;;  %v6244_v5 = vld [vmem:[%s8148_s7 + $0x10] sm:$0xff]  ;;  %v6253_v7 = vld [vmem:[%s8146_s5 + $0x8] sm:$0xff]  ;;  %s8172_s0 = sld [smem:[#allocation9_spill]] }
   0x8   :  { %187 = vmatpush.msra.mxu3 %v6230_v2  ;;  %v6259_v8 = vld [vmem:[%s8148_s7 + $0x8] sm:$0xff]  ;;  %v6268_v10 = vld [vmem:[%s8146_s5] sm:$0xff] }
   0x9   :  { %168 = vmatpush.msra.mxu2 %v6239_v4  ;;  %v6273_v11 = vld [vmem:[%s8148_s7] sm:$0xff] }
   0xa   :  { %188 = vmatpush.msra.mxu3 %v6244_v5 }
   0xb   :  { %169 = vmatpush.msra.mxu2 %v6253_v7 }
   0xc   :  { %v75_v0 = vld [vmem:[%s8171_s23 + $0x30] sm:$0xff]  ;;  %v73_v3 = vld [vmem:[%s8171_s23 + $0x20] sm:$0xff]  ;;  %189 = vmatpush.msra.mxu3 %v6259_v8 }
   0xd   :  { %102 = vmatpush.msra.mxu0 %v75_v0  ;;  %v71_v6 = vld [vmem:[%s8171_s23 + $0x10] sm:$0xff]  ;;  %v69_v9 = vld [vmem:[%s8171_s23] sm:$0xff]  ;;  %170 = vmatpush.msra.mxu2 %v6268_v10 }
   0xe   :  { %v6279_v12 = vld [vmem:[%s8172_s0] sm:$0xff] }
   0xf   :  { %103 = vmatpush.msra.mxu0 %v73_v3 }
  0x11   :  { %104 = vmatpush.msra.mxu0 %v71_v6 }
  0x13   :  { %105 = vmatpush.msra.mxu0 %v69_v9 }
  0x14   :  { %27 = vsyncpa [#allocation6], 0  ;;  %190 = vmatpush.msra.mxu3 %v6273_v11  ;;  %5403 = vmatmul.msk.f32.vlgmr.msra.gmra.mxu0 %vm83_vm0, %v6279_v12  ;;  %v6098_v13 = vmov 0.0   ;;  %v6294_v14 = vld [vmem:[%s8172_s0 + $0x8] sm:$0xff]  ;;  %v6320_v15 = vld [vmem:[%s8147_s6] ss:$0 sm:$0xff] }
  0x15   :  { %171 = vmatmul.f32.vlgmr.msra.gmra.mxu2 %v6098_v13  ;;  %191 = vmatmul.f32.vlgmr.msra.gmra.mxu3 %v6098_v13  ;;  %v6325_v16 = vld [vmem:[%s8149_s8] ss:$0 sm:$0xff]  ;;  %s6099_s3 = smov 96   ;;  %s6100_s26 = smov 64   ;;  %v76_v40 = vld [vmem:[%s8171_s23 + $0x38] sm:$0xff]  ;;  %v74_v41 = vld [vmem:[%s8171_s23 + $0x28] sm:$0xff] }
  0x16   :  { %475 = vmatpush.msrb.mxu2 %v6225_v1  ;;  %498 = vmatpush.msrb.mxu3 %v6230_v2  ;;  %s6101_s27 = smov 32   ;;  %s8173_s29 = sld [smem:[#allocation13_spill]]  ;;  %v72_v43 = vld [vmem:[%s8171_s23 + $0x18] sm:$0xff]  ;;  %v70_v45 = vld [vmem:[%s8171_s23 + $0x8] sm:$0xff] }
  0x17   :  { %791 = vmatpush.msrb.mxu0 %v6225_v1  ;;  %125 = vmatpush.msra.mxu1 %v76_v40  ;;  %s8174_s4 = sld [smem:[#allocation11_spill]]  ;;  %s5375_s24 = sshll.u32 %s8160_s19, 4  ;;  %s5376_s24 = int_to_ptr.hbm [resolvable:$true] %s5375_s24 }
  0x18   :  { %476 = vmatpush.msrb.mxu2 %v6239_v4  ;;  %499 = vmatpush.msrb.mxu3 %v6244_v5  ;;  %s6111_s2 = smov 128  }
  0x19   :  { %792 = vmatpush.msrb.mxu0 %v6239_v4  ;;  %126 = vmatpush.msra.mxu1 %v74_v41 }
  0x1a   :  { %477 = vmatpush.msrb.mxu2 %v6253_v7  ;;  %500 = vmatpush.msrb.mxu3 %v6259_v8 }
  0x1b   :  { %793 = vmatpush.msrb.mxu0 %v6253_v7  ;;  %127 = vmatpush.msra.mxu1 %v72_v43 }
  0x1c   :  { %5404 = vmatmul.msk.f32.gmra.mxu0 %vm83_vm0, %v6294_v14  ;;  %478 = vmatpush.msrb.mxu2 %v6268_v10  ;;  %v6338_v25 = vld [vmem:[%s8173_s29] sm:$0x3] }
  0x1d   :  { %501 = vmatpush.msrb.mxu3 %v6273_v11  ;;  %794 = vmatpush.msrb.mxu0 %v6268_v10  ;;  %v79_v27 = vperm.slane %v6338_v25, 0 }
  0x1e   :  { %1110 = vmatpush.msra.mxu2 %v6225_v1  ;;  %128 = vmatpush.msra.mxu1 %v70_v45 }
  0x1f   :  { %1133 = vmatpush.msra.mxu3 %v6230_v2  ;;  %1429 = vmatpush.msra.mxu0 %v6225_v1 }
  0x20   :  { %1111 = vmatpush.msra.mxu2 %v6239_v4  ;;  %5405 = vmatmul.msk.f32.vlgmr.msra.gmra.mxu1 %vm83_vm0, %v6279_v12 }
  0x21   :  { %1134 = vmatpush.msra.mxu3 %v6244_v5  ;;  %1430 = vmatpush.msra.mxu0 %v6239_v4 }
  0x22   :  { %1112 = vmatpush.msra.mxu2 %v6253_v7  ;;  %814 = vmatpush.msrb.mxu1 %v6230_v2 }
  0x23   :  { %1135 = vmatpush.msra.mxu3 %v6259_v8  ;;  %1431 = vmatpush.msra.mxu0 %v6253_v7 }
  0x24   :  { %1113 = vmatpush.msra.mxu2 %v6268_v10  ;;  %815 = vmatpush.msrb.mxu1 %v6244_v5 }
  0x25   :  { %1136 = vmatpush.msra.mxu3 %v6273_v11  ;;  %1432 = vmatpush.msra.mxu0 %v6268_v10 }
  0x26   :  { %816 = vmatpush.msrb.mxu1 %v6259_v8 }
  0x28   :  { %817 = vmatpush.msrb.mxu1 %v6273_v11 }
  0x29   :  { %5406 = vmatmul.msk.f32.gmra.mxu1 %vm83_vm0, %v6294_v14 }
  0x2a   :  { %1452 = vmatpush.msra.mxu1 %v6230_v2 }
  0x2c   :  { %1453 = vmatpush.msra.mxu1 %v6244_v5 }
  0x2e   :  { %1454 = vmatpush.msra.mxu1 %v6259_v8 }
  0x30   :  { %1455 = vmatpush.msra.mxu1 %v6273_v11 }
  0x91   :  { %v107_v24 = vpop.f32.mrf.mxu0 }
  0x92   :  { %v6344_v30 = vadd.f32 %v107_v24, %v79_v27 }
  0x98   :  { %v172_v17 = vpop.f32.mrf.mxu2  ;;  %v192_v18 = vpop.f32.mrf.mxu3 }
  0x99   :  { %v173_v19 = vadd.f32 %v6320_v15, %v172_v17  ;;  %v193_v20 = vadd.f32 %v6325_v16, %v192_v18  ;;  %v110_v26 = vpop.f32.mrf.mxu0 }
  0x9a   :  { %v6341_v28 = vadd.f32 %v110_v26, %v79_v27 }
  0x9b   :  { %v276_v21 = vrot.slane %v193_v20, 1  ;;  %v196_v22 = vrot.slane %v173_v19, 1  ;;  %v277_v23 = vrot.slane %v193_v20, 2  ;;  %v199_v32 = vadd.f32 %v173_v19, %v6344_v30 }
  0x9d   :  { %278 = vrot.lane.b32.xlu1 %v276_v21, %s6099_s3  ;;  %241 = vrot.lane.b32.xlu0 %v196_v22, %s6100_s26  ;;  %v200_v29 = vadd.f32 %v196_v22, %v6341_v28  ;;  %v5407_v33 = vmul.f32 -1.442695, %v199_v32 }
  0x9f   :  { %v5408_v31 = vmul.f32 -1.442695, %v200_v29 }
  0xa1   :  { %5556 = vpow2.f32 %v5408_v31 }
  0xa2   :  { %5558 = vpow2.f32 %v5407_v33 }
  0xa5   :  { %280 = vrot.lane.b32.xlu1 %v277_v23, %s6099_s3  ;;  %239 = vrot.lane.b32.xlu0 %v173_v19, %s6100_s26 }
  0xa7   :  { %v5557_v34 = vpop.eup %5556 }
  0xa8   :  { %v208_v35 = vadd.f32 1.0, %v5557_v34  ;;  %v5559_v36 = vpop.eup %5558 }
  0xa9   :  { %v207_v37 = vadd.f32 1.0, %v5559_v36 }
  0xaa   :  { %5560 = vrcp.f32 %v208_v35  ;;  %v235_v50 = vand.u32 2147483648, %v208_v35  ;;  %vm229_vm2 = vweird.f32 %v208_v35  ;;  %v233_v51 = vand.u32 2147483647, %v208_v35 }
  0xab   :  { %5562 = vrcp.f32 %v207_v37  ;;  %v220_v61 = vand.u32 2147483648, %v207_v37  ;;  %vm214_vm6 = vweird.f32 %v207_v37  ;;  %v218_v63 = vand.u32 2147483647, %v207_v37 }
  0xac   :  { %v236_v54 = vor.u32 1.1754944e-38, %v235_v50  ;;  %vm234_vm4 = vcmp.eq.f32.partialorder %v233_v51, 8.507059e+37 }
  0xad   :  { %364 = vrot.lane.b32.xlu0 %v276_v21, %s6101_s27  ;;  %366 = vrot.lane.b32.xlu1 %v277_v23, %s6101_s27  ;;  %v221_v3 = vor.u32 1.1754944e-38, %v220_v61  ;;  %vm219_vm8 = vcmp.eq.f32.partialorder %v218_v63, 8.507059e+37  ;;  %v80_v63 = vperm.slane %v6338_v25, 1 }
  0xb0   :  { %v5561_v38 = vpop.eup %5560 }
  0xb1   :  { %v225_v39 = vmul.f32 %v5561_v38, %v208_v35  ;;  %v5563_v44 = vpop.eup %5562  ;;  %vm230_vm1 = vweird.f32 %v5561_v38 }
  0xb2   :  { %v210_v47 = vmul.f32 %v5563_v44, %v207_v37  ;;  %vm231_vm3 = vmor %vm229_vm2, %vm230_vm1  ;;  %vm215_vm5 = vweird.f32 %v5563_v44  ;;  %vm408_vm2 = vcmask 1041409  }
  0xb3   :  { %v226_v42 = vsub.f32 1.0, %v225_v39  ;;  %vm216_vm7 = vmor %vm214_vm6, %vm215_vm5 }
  0xb4   :  { %v211_v49 = vsub.f32 1.0, %v210_v47 }
  0xb5   :  { %v227_v46 = vmul.f32 %v5561_v38, %v226_v42 }
  0xb6   :  { %v212_v53 = vmul.f32 %v5563_v44, %v211_v49 }
  0xb7   :  { %v228_v48 = vadd.f32 %v5561_v38, %v227_v46 }
  0xb8   :  { %v213_v60 = vadd.f32 %v5563_v44, %v212_v53 }
  0xb9   :  { %v232_v52 = vsel %vm231_vm3, %v5561_v38, %v228_v48 }
  0xba   :  { %v6370_v57 = vsel %vm234_vm4, %v236_v54, %v232_v52  ;;  %v217_v0 = vsel %vm216_vm7, %v5563_v44, %v213_v60  ;;  %v130_v60 = vpop.f32.mrf.mxu1 }
  0xbb   :  { %v6379_v9 = vsel %vm219_vm8, %v221_v3, %v217_v0  ;;  %v6413_v25 = vadd.f32 %v130_v60, %v80_v63 }
 0x10f   :  { %v6368_v55 = vpop.permute.xlu1 %278  ;;  %v242_v56 = vpop.permute.xlu0 %241 }
 0x110   :  { %v284_v58 = vadd.f32 %v6368_v55, %v6344_v30  ;;  %v246_v59 = vmul.f32 %v242_v56, %v6370_v57  ;;  %v6396_v56 = vld [vmem:[%s8174_s4] sm:$0x3] }
 0x112   :  { %v5409_v62 = vmul.f32 -1.442695, %v284_v58  ;;  %251 = vrot.lane.b32.xlu2 %v246_v59, %s6100_s26  ;;  %v6399_v58 = vsub.f32 1.0, %v6396_v56  ;;  %v6102_v59 = vmov 0  }
 0x113   :  { %5532 = vset.pattern.permute.xlu2 %v6102_v59  ;;  %5531 = vset.pattern.permute.xlu0 %v6102_v59 }
 0x114   :  { %5564 = vpow2.f32 %v5409_v62  ;;  %v133_v62 = vpop.f32.mrf.mxu1 }
 0x115   :  { %v6406_v0 = vadd.f32 %v133_v62, %v80_v63 }
 0x117   :  { %v240_v6 = vpop.permute.xlu0 %239  ;;  %v6384_v32 = vpop.permute.xlu1 %280 }
 0x118   :  { %v245_v12 = vmul.f32 %v240_v6, %v6379_v9  ;;  %v285_v33 = vadd.f32 %v6384_v32, %v6341_v28 }
 0x11a   :  { %v5565_v13 = vpop.eup %5564  ;;  %249 = vrot.lane.b32.xlu2 %v245_v12, %s6100_s26  ;;  %v5410_v34 = vmul.f32 -1.442695, %v285_v33  ;;  %v6103_v12 = vmov 7   ;;  %v325_v33 = vadd.f32 %v6384_v32, %v6406_v0 }
 0x11b   :  { %v292_v14 = vadd.f32 1.0, %v5565_v13  ;;  %5534 = vset.pattern.permute.xlu1 %v6103_v12 }
 0x11d   :  { %5566 = vrcp.f32 %v292_v14  ;;  %v305_v20 = vand.u32 2147483648, %v292_v14  ;;  %v303_v22 = vand.u32 2147483647, %v292_v14  ;;  %vm299_vm10 = vweird.f32 %v292_v14 }
 0x11e   :  { %5568 = vpow2.f32 %v5410_v34  ;;  %v324_v34 = vadd.f32 %v6368_v55, %v6413_v25 }
 0x11f   :  { %v365_v24 = vpop.permute.xlu0 %364  ;;  %v306_v26 = vor.u32 1.1754944e-38, %v305_v20  ;;  %vm304_vm12 = vcmp.eq.f32.partialorder %v303_v22, 8.507059e+37  ;;  %v367_v51 = vpop.permute.xlu1 %366  ;;  %v259_v20 = vsub.f32 1.0, %v6379_v9 }
 0x123   :  { %v5567_v17 = vpop.eup %5566 }
 0x124   :  { %v295_v18 = vmul.f32 %v5567_v17, %v292_v14  ;;  %vm300_vm9 = vweird.f32 %v5567_v17  ;;  %v5569_v35 = vpop.eup %5568  ;;  %v260_v14 = vsub.f32 1.0, %v6370_v57 }
 0x125   :  { %vm301_vm11 = vmor %vm299_vm10, %vm300_vm9  ;;  %v293_v36 = vadd.f32 1.0, %v5569_v35  ;;  %v5411_v35 = vmul.f32 -1.442695, %v324_v34 }
 0x126   :  { %v296_v19 = vsub.f32 1.0, %v295_v18  ;;  %v272_v18 = vmul.f32 0.0, %v6370_v57 }
 0x127   :  { %5570 = vrcp.f32 %v293_v36  ;;  %v320_v44 = vand.u32 2147483648, %v293_v36  ;;  %vm314_vm14 = vweird.f32 %v293_v36  ;;  %v318_v45 = vand.u32 2147483647, %v293_v36 }
 0x128   :  { %v297_v21 = vmul.f32 %v5567_v17, %v296_v19 }
 0x129   :  { %v321_v50 = vor.u32 1.1754944e-38, %v320_v44  ;;  %vm319_vm1 = vcmp.eq.f32.partialorder %v318_v45, 8.507059e+37 }
 0x12a   :  { %v298_v23 = vadd.f32 %v5567_v17, %v297_v21 }
 0x12c   :  { %v302_v27 = vsel %vm301_vm11, %v5567_v17, %v298_v23  ;;  %v271_v23 = vmul.f32 0.0, %v6379_v9  ;;  %v5412_v9 = vmul.f32 -1.442695, %v325_v33  ;;  %vm443_vm11 = vcmask 253952  }
 0x12d   :  { %v307_v29 = vsel %vm304_vm12, %v306_v26, %v302_v27  ;;  %v5571_v37 = vpop.eup %5570 }
 0x12e   :  { %v370_v31 = vmul.f32 %v365_v24, %v307_v29  ;;  %v310_v38 = vmul.f32 %v5571_v37, %v293_v36  ;;  %vm315_vm13 = vweird.f32 %v5571_v37 }
 0x12f   :  { %vm316_vm15 = vmor %vm314_vm14, %vm315_vm13 }
 0x130   :  { %374 = vrot.lane.b32.xlu1 %v370_v31, %s6100_s26  ;;  %v311_v39 = vsub.f32 1.0, %v310_v38 }
 0x132   :  { %v312_v42 = vmul.f32 %v5571_v37, %v311_v39 }
 0x134   :  { %v313_v43 = vadd.f32 %v5571_v37, %v312_v42 }
 0x136   :  { %v317_v49 = vsel %vm316_vm15, %v5571_v37, %v313_v43 }
 0x137   :  { %v322_v52 = vsel %vm319_vm1, %v321_v50, %v317_v49 }
 0x138   :  { %v371_v53 = vmul.f32 %v367_v51, %v322_v52 }
 0x16c   :  { %v252_v40 = vpop.permute.xlu2 %251 }
 0x16d   :  { %v256_v41 = vadd.f32 %v252_v40, %v6341_v28 }
 0x16f   :  { %5572 = vtanh.f32 %v256_v41 }
 0x174   :  { %v250_v46 = vpop.permute.xlu2 %249 }
 0x175   :  { %v5573_v47 = vpop.eup %5572  ;;  %v255_v48 = vadd.f32 %v250_v46, %v6344_v30 }
 0x176   :  { %265 = vrot.lane.b32.xlu2 %v5573_v47, %s6099_s3 }
 0x177   :  { %5574 = vtanh.f32 %v255_v48 }
 0x17d   :  { %v5575_v54 = vpop.eup %5574 }
 0x17e   :  { %376 = vrot.lane.b32.xlu2 %v371_v53, %s6100_s26  ;;  %263 = vrot.lane.b32.xlu0 %v5575_v54, %s6099_s3 }
 0x186   :  { %417 = vperm.xlu2 %5532, %v6399_v58   ;;  %402 = vperm.xlu0 %5531, %v6396_v56  }
 0x18e   :  { %5533 = vset.pattern.permute.xlu0 %v6103_v12 }
 0x18f   :  { %423 = vperm.xlu0 %5533, %v6396_v56  }
 0x1a2   :  { %v375_v21 = vpop.permute.xlu1 %374 }
 0x1a3   :  { %v380_v26 = vadd.f32 %v375_v21, %v6413_v25 }
 0x1d0   :  { %v266_v61 = vpop.permute.xlu2 %265 }
 0x1d1   :  { %v270_v17 = vmul.f32 %v266_v61, %v260_v14 }
 0x1d3   :  { %v274_v19 = vadd.f32 %v272_v18, %v270_v17 }
 0x1d5   :  { %v407_v27 = vrot.slane %v274_v19, 7 }
 0x1d8   :  { %v377_v3 = vpop.permute.xlu2 %376 }
 0x1d9   :  { %v381_v6 = vadd.f32 %v377_v3, %v6406_v0 }
 0x1db   :  { %5576 = vtanh.f32 %v381_v6 }
 0x1dc   :  { %5578 = vtanh.f32 %v380_v26 }
 0x1dd   :  { %5580 = vpow2.f32 %v5412_v9 }
 0x1de   :  { %5582 = vpow2.f32 %v5411_v35 }
 0x1e0   :  { %v6426_v46 = vpop.permute.xlu2 %417 }
 0x1e1   :  { %v5577_v13 = vpop.eup %5576  ;;  %v420_v61 = vmul.f32 0.0, %v6426_v46 }
 0x1e2   :  { %390 = vrot.lane.b32.xlu2 %v5577_v13, %s6099_s3  ;;  %v5579_v57 = vpop.eup %5578 }
 0x1e3   :  { %v5581_v36 = vpop.eup %5580 }
 0x1e4   :  { %v333_v37 = vadd.f32 1.0, %v5581_v36  ;;  %v5583_v38 = vpop.eup %5582 }
 0x1e5   :  { %v332_v39 = vadd.f32 1.0, %v5583_v38 }
 0x1e6   :  { %5584 = vrcp.f32 %v333_v37  ;;  %vm354_vm3 = vweird.f32 %v333_v37  ;;  %v360_v55 = vand.u32 2147483648, %v333_v37  ;;  %v358_v48 = vand.u32 2147483647, %v333_v37 }
 0x1e7   :  { %5586 = vrcp.f32 %v332_v39  ;;  %vm339_vm6 = vweird.f32 %v332_v39  ;;  %v345_v51 = vand.u32 2147483648, %v332_v39  ;;  %v343_v54 = vand.u32 2147483647, %v332_v39 }
 0x1e8   :  { %v361_v50 = vor.u32 1.1754944e-38, %v360_v55  ;;  %vm359_vm8 = vcmp.eq.f32.partialorder %v358_v48, 8.507059e+37 }
 0x1e9   :  { %v346_v3 = vor.u32 1.1754944e-38, %v345_v51  ;;  %vm344_vm10 = vcmp.eq.f32.partialorder %v343_v54, 8.507059e+37 }
 0x1ec   :  { %v5585_v40 = vpop.eup %5584 }
 0x1ed   :  { %v350_v41 = vmul.f32 %v5585_v40, %v333_v37  ;;  %v5587_v42 = vpop.eup %5586  ;;  %vm355_vm4 = vweird.f32 %v5585_v40 }
 0x1ee   :  { %v335_v44 = vmul.f32 %v5587_v42, %v332_v39  ;;  %vm356_vm5 = vmor %vm354_vm3, %vm355_vm4  ;;  %vm340_vm7 = vweird.f32 %v5587_v42 }
 0x1ef   :  { %v351_v43 = vsub.f32 1.0, %v350_v41  ;;  %vm341_vm9 = vmor %vm339_vm6, %vm340_vm7 }
 0x1f0   :  { %v264_v22 = vpop.permute.xlu0 %263  ;;  %v336_v32 = vsub.f32 1.0, %v335_v44 }
 0x1f1   :  { %v269_v24 = vmul.f32 %v264_v22, %v259_v20  ;;  %v352_v45 = vmul.f32 %v5585_v40, %v351_v43 }
 0x1f2   :  { %v337_v49 = vmul.f32 %v5587_v42, %v336_v32 }
 0x1f3   :  { %v273_v29 = vadd.f32 %v271_v23, %v269_v24  ;;  %v353_v47 = vadd.f32 %v5585_v40, %v352_v45 }
 0x1f4   :  { %v338_v53 = vadd.f32 %v5587_v42, %v337_v49 }
 0x1f5   :  { %v409_v31 = vsel %vm408_vm2, %v407_v27, %v273_v29  ;;  %v357_v52 = vsel %vm356_vm5, %v5585_v40, %v353_v47 }
 0x1f6   :  { %410 = vrot.lane.b32.xlu1 %v409_v31, %s6099_s3  ;;  %v362_v62 = vsel %vm359_vm8, %v361_v50, %v357_v52  ;;  %v342_v12 = vsel %vm341_vm9, %v5587_v42, %v338_v53 }
 0x1f7   :  { %v385_v14 = vsub.f32 1.0, %v362_v62  ;;  %v347_v18 = vsel %vm344_vm10, %v346_v3, %v342_v12  ;;  %v397_v21 = vmul.f32 0.0, %v362_v62 }
 0x1f8   :  { %v6428_v60 = vpop.permute.xlu0 %402  ;;  %v384_v22 = vsub.f32 1.0, %v347_v18  ;;  %v396_v27 = vmul.f32 0.0, %v347_v18 }
 0x1fe   :  { %388 = vrot.lane.b32.xlu1 %v5579_v57, %s6099_s3 }
 0x201   :  { %v6444_v33 = vpop.permute.xlu0 %423 }
 0x206   :  { %434 = vperm.xlu1 %5534, %v6399_v58  }
 0x23c   :  { %v391_v13 = vpop.permute.xlu2 %390 }
 0x23d   :  { %v395_v19 = vmul.f32 %v391_v13, %v385_v14 }
 0x23f   :  { %v399_v26 = vadd.f32 %v397_v21, %v395_v19 }
 0x241   :  { %v429_v57 = vrot.slane %v399_v26, 6 }
 0x268   :  { %v411_v63 = vpop.permute.xlu1 %410 }
 0x269   :  { %v413_v6 = vmul.f32 %v411_v63, %v6428_v60 }
 0x26b   :  { %v6432_v17 = vadd.f32 %v420_v61, %v413_v6 }
 0x26d   :  { %5413 = vmatmul.msk.f32.vlgmr.msrb.gmra.mxu2 %vm83_vm0, %v6432_v17  ;;  %v439_v20 = vmul.f32 %v6432_v17, %v6428_v60 }
 0x26e   :  { %1732 = vmatpush.msrb.mxu2 %v6225_v1 }
 0x26f   :  { %v441_v23 = vrot.slane %v439_v20, 1  ;;  %444 = vst.msk [vmem:[#allocation2] sm:$0x1] %vm443_vm11, %v439_v20 }
 0x270   :  { %v389_v24 = vpop.permute.xlu1 %388  ;;  %1733 = vmatpush.msrb.mxu2 %v6239_v4 }
 0x271   :  { %v394_v29 = vmul.f32 %v389_v24, %v384_v22  ;;  %445 = vst.msk [vmem:[#allocation2 + $0x8] sm:$0x1] %vm443_vm11, %v441_v23 }
 0x272   :  { %1734 = vmatpush.msrb.mxu2 %v6253_v7 }
 0x273   :  { %v398_v31 = vadd.f32 %v396_v27, %v394_v29 }
 0x274   :  { %1735 = vmatpush.msrb.mxu2 %v6268_v10 }
 0x275   :  { %v428_v1 = vrot.slane %v398_v31, 7 }
 0x277   :  { %v430_v9 = vsel %vm408_vm2, %v429_v57, %v428_v1 }
 0x278   :  { %v6447_v34 = vpop.permute.xlu1 %434  ;;  %v432_v4 = vmul.f32 %v430_v9, %v6444_v33 }
 0x279   :  { %v437_v35 = vmul.f32 0.0, %v6447_v34 }
 0x27b   :  { %v6451_v36 = vadd.f32 %v437_v35, %v432_v4 }
 0x27d   :  { %5414 = vmatmul.msk.f32.vlgmr.msrb.gmra.mxu3 %vm83_vm0, %v6451_v36 }
 0x27e   :  { %1755 = vmatpush.msrb.mxu3 %v6230_v2  ;;  %v582_v2 = vrot.slane %v6432_v17, 7 }
 0x280   :  { %1756 = vmatpush.msrb.mxu3 %v6244_v5 }
 0x282   :  { %1757 = vmatpush.msrb.mxu3 %v6259_v8 }
 0x284   :  { %1758 = vmatpush.msrb.mxu3 %v6273_v11 }
 0x2f0   :  { %v480_v7 = vpop.f32.mrf.mxu2 }
 0x2f1   :  { %v481_v10 = vadd.f32 %v6320_v15, %v480_v7 }
 0x2f3   :  { %552 = vrot.lane.b32.xlu1 %v481_v10, %s6100_s26  ;;  %v507_v37 = vrot.slane %v481_v10, 7  ;;  %v511_v43 = vadd.f32 %v481_v10, %v6341_v28 }
 0x2f5   :  { %550 = vrot.lane.b32.xlu2 %v507_v37, %s6100_s26  ;;  %v510_v5 = vadd.f32 %v507_v37, %v6344_v30  ;;  %v5416_v44 = vmul.f32 -1.442695, %v511_v43 }
 0x2f7   :  { %v5415_v8 = vmul.f32 -1.442695, %v510_v5 }
 0x2f9   :  { %5588 = vpow2.f32 %v5415_v8 }
 0x2ff   :  { %v5589_v11 = vpop.eup %5588 }
 0x300   :  { %v503_v38 = vpop.f32.mrf.mxu3  ;;  %v518_v42 = vadd.f32 1.0, %v5589_v11 }
 0x301   :  { %v504_v39 = vadd.f32 %v6325_v16, %v503_v38 }
 0x302   :  { %5590 = vrcp.f32 %v518_v42  ;;  %v531_v51 = vand.u32 2147483648, %v518_v42  ;;  %vm525_vm13 = vweird.f32 %v518_v42  ;;  %v529_v52 = vand.u32 2147483647, %v518_v42 }
 0x303   :  { %v594_v40 = vrot.slane %v504_v39, 2  ;;  %v595_v41 = vrot.slane %v504_v39, 3  ;;  %5592 = vpow2.f32 %v5416_v44  ;;  %v6104_v44 = vmov 1  }
 0x304   :  { %v532_v54 = vor.u32 1.1754944e-38, %v531_v51  ;;  %vm530_vm15 = vcmp.eq.f32.partialorder %v529_v52, 8.507059e+37  ;;  %5536 = vset.pattern.permute.xlu1 %v6104_v44  ;;  %5535 = vset.pattern.permute.xlu2 %v6104_v44 }
 0x305   :  { %598 = vrot.lane.b32.xlu0 %v595_v41, %s6099_s3  ;;  %596 = vrot.lane.b32.xlu2 %v594_v40, %s6099_s3 }
 0x308   :  { %v5591_v45 = vpop.eup %5590 }
 0x309   :  { %v521_v32 = vmul.f32 %v5591_v45, %v518_v42  ;;  %v5593_v47 = vpop.eup %5592  ;;  %vm526_vm12 = vweird.f32 %v5591_v45 }
 0x30a   :  { %v519_v49 = vadd.f32 1.0, %v5593_v47  ;;  %vm527_vm14 = vmor %vm525_vm13, %vm526_vm12 }
 0x30b   :  { %v522_v55 = vsub.f32 1.0, %v521_v32 }
 0x30c   :  { %5594 = vrcp.f32 %v519_v49  ;;  %v546_v19 = vand.u32 2147483648, %v519_v49  ;;  %vm540_vm3 = vweird.f32 %v519_v49  ;;  %v544_v21 = vand.u32 2147483647, %v519_v49 }
 0x30d   :  { %682 = vrot.lane.b32.xlu0 %v594_v40, %s6101_s27  ;;  %v523_v48 = vmul.f32 %v5591_v45, %v522_v55 }
 0x30e   :  { %v547_v24 = vor.u32 1.1754944e-38, %v546_v19  ;;  %vm545_vm5 = vcmp.eq.f32.partialorder %v544_v21, 8.507059e+37  ;;  %v6105_v19 = vmov 6  }
 0x30f   :  { %v524_v50 = vadd.f32 %v5591_v45, %v523_v48 }
 0x311   :  { %v528_v53 = vsel %vm527_vm14, %v5591_v45, %v524_v50 }
 0x312   :  { %v5595_v61 = vpop.eup %5594  ;;  %v6470_v62 = vsel %vm530_vm15, %v532_v54, %v528_v53 }
 0x313   :  { %v536_v6 = vmul.f32 %v5595_v61, %v519_v49  ;;  %vm541_vm1 = vweird.f32 %v5595_v61 }
 0x314   :  { %vm542_vm4 = vmor %vm540_vm3, %vm541_vm1 }
 0x315   :  { %583 = vrot.lane.b32.xlu0 %v582_v2, %s6101_s27  ;;  %v537_v12 = vsub.f32 1.0, %v536_v6 }
 0x317   :  { %v538_v13 = vmul.f32 %v5595_v61, %v537_v12 }
 0x319   :  { %v539_v14 = vadd.f32 %v5595_v61, %v538_v13 }
 0x31b   :  { %v543_v23 = vsel %vm542_vm4, %v5595_v61, %v539_v14 }
 0x31c   :  { %v6479_v27 = vsel %vm545_vm5, %v547_v24, %v543_v23 }
 0x34f   :  { %v551_v63 = vpop.permute.xlu2 %550 }
 0x350   :  { %v556_v3 = vmul.f32 %v551_v63, %v6470_v62 }
 0x352   :  { %560 = vrot.lane.b32.xlu1 %v556_v3, %s6100_s26 }
 0x35a   :  { %684 = vrot.lane.b32.xlu1 %v595_v41, %s6101_s27 }
 0x35f   :  { %v6475_v18 = vpop.permute.xlu2 %596 }
 0x360   :  { %v602_v20 = vadd.f32 %v6475_v18, %v6344_v30 }
 0x362   :  { %v5417_v22 = vmul.f32 -1.442695, %v602_v20 }
 0x364   :  { %5596 = vpow2.f32 %v5417_v22 }
 0x365   :  { %v553_v26 = vpop.permute.xlu1 %552 }
 0x366   :  { %v557_v29 = vmul.f32 %v553_v26, %v6479_v27  ;;  %v570_v26 = vsub.f32 1.0, %v6470_v62 }
 0x368   :  { %562 = vrot.lane.b32.xlu2 %v557_v29, %s6100_s26 }
 0x36a   :  { %v5597_v31 = vpop.eup %5596 }
 0x36b   :  { %v610_v57 = vadd.f32 1.0, %v5597_v31 }
 0x36d   :  { %5598 = vrcp.f32 %v610_v57  ;;  %v623_v10 = vand.u32 2147483648, %v610_v57  ;;  %vm617_vm7 = vweird.f32 %v610_v57  ;;  %v621_v38 = vand.u32 2147483647, %v610_v57 }
 0x36f   :  { %v624_v40 = vor.u32 1.1754944e-38, %v623_v10  ;;  %vm622_vm9 = vcmp.eq.f32.partialorder %v621_v38, 8.507059e+37 }
 0x373   :  { %v5599_v1 = vpop.eup %5598 }
 0x374   :  { %v613_v9 = vmul.f32 %v5599_v1, %v610_v57  ;;  %vm618_vm6 = vweird.f32 %v5599_v1 }
 0x375   :  { %vm619_vm8 = vmor %vm617_vm7, %vm618_vm6 }
 0x376   :  { %v614_v4 = vsub.f32 1.0, %v613_v9  ;;  %v571_v9 = vsub.f32 1.0, %v6479_v27 }
 0x377   :  { %v6483_v35 = vpop.permute.xlu0 %598 }
 0x378   :  { %v615_v7 = vmul.f32 %v5599_v1, %v614_v4  ;;  %v603_v8 = vadd.f32 %v6483_v35, %v6341_v28 }
 0x37a   :  { %v616_v37 = vadd.f32 %v5599_v1, %v615_v7  ;;  %v5418_v11 = vmul.f32 -1.442695, %v603_v8 }
 0x37c   :  { %v620_v39 = vsel %vm619_vm8, %v5599_v1, %v616_v37  ;;  %5600 = vpow2.f32 %v5418_v11 }
 0x37d   :  { %v625_v2 = vsel %vm622_vm9, %v624_v40, %v620_v39 }
 0x37f   :  { %v683_v41 = vpop.permute.xlu0 %682 }
 0x380   :  { %v688_v5 = vmul.f32 %v683_v41, %v625_v2 }
 0x382   :  { %692 = vrot.lane.b32.xlu0 %v688_v5, %s6100_s26  ;;  %v5601_v42 = vpop.eup %5600 }
 0x383   :  { %v611_v43 = vadd.f32 1.0, %v5601_v42 }
 0x385   :  { %5602 = vrcp.f32 %v611_v43  ;;  %v638_v54 = vand.u32 2147483648, %v611_v43  ;;  %vm632_vm12 = vweird.f32 %v611_v43  ;;  %v636_v61 = vand.u32 2147483647, %v611_v43 }
 0x387   :  { %v639_v6 = vor.u32 1.1754944e-38, %v638_v54  ;;  %vm637_vm14 = vcmp.eq.f32.partialorder %v636_v61, 8.507059e+37  ;;  %v584_v20 = vpop.permute.xlu0 %583 }
 0x388   :  { %v589_v31 = vmul.f32 %v584_v20, %v6470_v62  ;;  %v642_v62 = vadd.f32 %v6475_v18, %v6413_v25 }
 0x38a   :  { %v5419_v5 = vmul.f32 -1.442695, %v642_v62 }
 0x38b   :  { %v5603_v45 = vpop.eup %5602 }
 0x38c   :  { %v628_v32 = vmul.f32 %v5603_v45, %v611_v43  ;;  %vm633_vm10 = vweird.f32 %v5603_v45 }
 0x38d   :  { %vm634_vm13 = vmor %vm632_vm12, %vm633_vm10 }
 0x38e   :  { %v629_v47 = vsub.f32 1.0, %v628_v32 }
 0x390   :  { %v630_v51 = vmul.f32 %v5603_v45, %v629_v47 }
 0x392   :  { %v631_v52 = vadd.f32 %v5603_v45, %v630_v51 }
 0x394   :  { %v635_v3 = vsel %vm634_vm13, %v5603_v45, %v631_v52 }
 0x395   :  { %v640_v13 = vsel %vm637_vm14, %v639_v6, %v635_v3 }
 0x3c2   :  { %v563_v55 = vpop.permute.xlu2 %562 }
 0x3c3   :  { %v567_v48 = vadd.f32 %v563_v55, %v6341_v28 }
 0x3c4   :  { %v561_v49 = vpop.permute.xlu1 %560 }
 0x3c5   :  { %5604 = vtanh.f32 %v567_v48  ;;  %v566_v50 = vadd.f32 %v561_v49, %v6344_v30 }
 0x3c7   :  { %5606 = vtanh.f32 %v566_v50 }
 0x3cb   :  { %v5605_v53 = vpop.eup %5604 }
 0x3cc   :  { %576 = vrot.lane.b32.xlu1 %v5605_v53, %s6099_s3  ;;  %v685_v12 = vpop.permute.xlu1 %684 }
 0x3cd   :  { %v5607_v63 = vpop.eup %5606  ;;  %v689_v14 = vmul.f32 %v685_v12, %v640_v13 }
 0x3ce   :  { %574 = vrot.lane.b32.xlu2 %v5607_v63, %s6099_s3 }
 0x3d4   :  { %694 = vrot.lane.b32.xlu1 %v689_v14, %s6100_s26 }
 0x3d6   :  { %585 = vrot.lane.b32.xlu2 %v6432_v17, %s6101_s27 }
 0x3dc   :  { %735 = vperm.xlu1 %5536, %v6399_v58  }
 0x3de   :  { %723 = vperm.xlu2 %5535, %v6396_v56  }
 0x3e4   :  { %5537 = vset.pattern.permute.xlu1 %v6105_v19 }
 0x3e5   :  { %741 = vperm.xlu1 %5537, %v6396_v56  }
 0x3e6   :  { %5538 = vset.pattern.permute.xlu2 %v6105_v19 }
 0x3f4   :  { %v693_v21 = vpop.permute.xlu0 %692 }
 0x3f5   :  { %v698_v22 = vadd.f32 %v693_v21, %v6413_v25 }
 0x3f7   :  { %5608 = vtanh.f32 %v698_v22 }
 0x3fd   :  { %v5609_v23 = vpop.eup %5608 }
 0x3fe   :  { %706 = vrot.lane.b32.xlu2 %v5609_v23, %s6099_s3 }
 0x406   :  { %752 = vperm.xlu2 %5538, %v6399_v58  }
 0x428   :  { %v575_v24 = vpop.permute.xlu2 %574 }
 0x429   :  { %v580_v29 = vmul.f32 %v575_v24, %v570_v26  ;;  %v6529_v26 = vld [vmem:[%s8146_s5 + $0x18] sm:$0xff] }
 0x42b   :  { %v591_v1 = vadd.f32 %v589_v31, %v580_v29 }
 0x42d   :  { %v728_v37 = vrot.slane %v591_v1, 1  ;;  %v6536_v1 = vld [vmem:[%s8146_s5 + $0x10] sm:$0xff] }
 0x430   :  { %v586_v57 = vpop.permute.xlu2 %585 }
 0x431   :  { %v590_v7 = vmul.f32 %v586_v57, %v6479_v27  ;;  %v643_v27 = vadd.f32 %v6483_v35, %v6406_v0 }
 0x433   :  { %v5420_v8 = vmul.f32 -1.442695, %v643_v27 }
 0x438   :  { %v6513_v50 = vpop.permute.xlu2 %723 }
 0x43e   :  { %v577_v4 = vpop.permute.xlu1 %576 }
 0x43f   :  { %v581_v10 = vmul.f32 %v577_v4, %v571_v9  ;;  %v714_v9 = vrot.slane %v6451_v36, 2 }
 0x441   :  { %v592_v38 = vadd.f32 %v590_v7, %v581_v10  ;;  %v6544_v7 = vld [vmem:[%s8146_s5 + $0x8] sm:$0xff] }
 0x443   :  { %v729_v39 = vsel %vm408_vm2, %v592_v38, %v728_v37  ;;  %v715_v38 = vrot.slane %v6451_v36, 3 }
 0x444   :  { %730 = vrot.lane.b32.xlu0 %v729_v39, %s6099_s3 }
 0x446   :  { %v695_v40 = vpop.permute.xlu1 %694 }
 0x447   :  { %v699_v41 = vadd.f32 %v695_v40, %v6406_v0  ;;  %v6551_v40 = vld [vmem:[%s8146_s5] sm:$0xff]  ;;  %s6112_s5 = smov 8  }
 0x449   :  { %5610 = vtanh.f32 %v699_v41 }
 0x44a   :  { %5612 = vpow2.f32 %v5419_v5 }
 0x44b   :  { %5614 = vpow2.f32 %v5420_v8 }
 0x44e   :  { %v6515_v52 = vpop.permute.xlu1 %735 }
 0x44f   :  { %v5611_v2 = vpop.eup %5610  ;;  %v738_v3 = vmul.f32 %v6515_v52, %v6432_v17 }
 0x450   :  { %708 = vrot.lane.b32.xlu0 %v5611_v2, %s6099_s3  ;;  %v5613_v11 = vpop.eup %5612 }
 0x451   :  { %v650_v42 = vadd.f32 1.0, %v5613_v11  ;;  %v5615_v43 = vpop.eup %5614 }
 0x452   :  { %v651_v44 = vadd.f32 1.0, %v5615_v43 }
 0x453   :  { %5616 = vrcp.f32 %v650_v42  ;;  %vm657_vm1 = vweird.f32 %v650_v42  ;;  %v663_v53 = vand.u32 2147483648, %v650_v42  ;;  %v661_v54 = vand.u32 2147483647, %v650_v42 }
 0x454   :  { %5618 = vrcp.f32 %v651_v44  ;;  %v678_v14 = vand.u32 2147483648, %v651_v44  ;;  %vm672_vm6 = vweird.f32 %v651_v44  ;;  %v676_v20 = vand.u32 2147483647, %v651_v44 }
 0x455   :  { %v664_v13 = vor.u32 1.1754944e-38, %v663_v53  ;;  %vm662_vm5 = vcmp.eq.f32.partialorder %v661_v54, 8.507059e+37 }
 0x456   :  { %v679_v24 = vor.u32 1.1754944e-38, %v678_v14  ;;  %vm677_vm8 = vcmp.eq.f32.partialorder %v676_v20, 8.507059e+37 }
 0x458   :  { %v707_v23 = vpop.permute.xlu2 %706 }
 0x459   :  { %v5617_v45 = vpop.eup %5616 }
 0x45a   :  { %v653_v32 = vmul.f32 %v5617_v45, %v650_v42  ;;  %v5619_v55 = vpop.eup %5618  ;;  %vm658_vm15 = vweird.f32 %v5617_v45  ;;  %v6556_v42 = vpop.permute.xlu1 %741 }
 0x45b   :  { %v668_v48 = vmul.f32 %v5619_v55, %v651_v44  ;;  %vm659_vm3 = vmor %vm657_vm1, %vm658_vm15  ;;  %vm673_vm4 = vweird.f32 %v5619_v55 }
 0x45c   :  { %v654_v47 = vsub.f32 1.0, %v653_v32  ;;  %vm674_vm7 = vmor %vm672_vm6, %vm673_vm4 }
 0x45d   :  { %v669_v18 = vsub.f32 1.0, %v668_v48  ;;  %v6581_v48 = vld [vmem:[%s8148_s7 + $0x8] sm:$0xff] }
 0x45e   :  { %v655_v49 = vmul.f32 %v5617_v45, %v654_v47  ;;  %v6575_v47 = vld [vmem:[%s8148_s7 + $0x10] sm:$0xff] }
 0x45f   :  { %v670_v35 = vmul.f32 %v5619_v55, %v669_v18 }
 0x460   :  { %v656_v51 = vadd.f32 %v5617_v45, %v655_v49  ;;  %v6554_v8 = vpop.permute.xlu2 %752  ;;  %v6587_v49 = vld [vmem:[%s8148_s7] sm:$0xff] }
 0x461   :  { %v671_v12 = vadd.f32 %v5619_v55, %v670_v35  ;;  %v755_v44 = vmul.f32 %v6554_v8, %v6451_v36 }
 0x462   :  { %v660_v61 = vsel %vm659_vm3, %v5617_v45, %v656_v51 }
 0x463   :  { %v665_v21 = vsel %vm662_vm5, %v664_v13, %v660_v61  ;;  %v675_v22 = vsel %vm674_vm7, %v5619_v55, %v671_v12  ;;  %v6569_v55 = vld [vmem:[%s8148_s7 + $0x18] sm:$0xff]  ;;  %s8179_s7 = sld [smem:[#allocation10_spill]] }
 0x464   :  { %v702_v29 = vsub.f32 1.0, %v665_v21  ;;  %v680_v57 = vsel %vm677_vm8, %v679_v24, %v675_v22  ;;  %v718_v10 = vmul.f32 %v714_v9, %v665_v21 }
 0x465   :  { %v703_v37 = vsub.f32 1.0, %v680_v57  ;;  %v719_v2 = vmul.f32 %v715_v38, %v680_v57 }
 0x466   :  { %v712_v4 = vmul.f32 %v707_v23, %v702_v29 }
 0x468   :  { %v720_v41 = vadd.f32 %v718_v10, %v712_v4 }
 0x46a   :  { %v746_v27 = vrot.slane %v720_v41, 6 }
 0x4b6   :  { %v731_v63 = vpop.permute.xlu0 %730 }
 0x4b7   :  { %v733_v6 = vmul.f32 %v731_v63, %v6513_v50 }
 0x4b9   :  { %v6520_v19 = vadd.f32 %v738_v3, %v733_v6 }
 0x4bb   :  { %5421 = vmatmul.msk.f32.vlgmr.msrb.gmra.mxu0 %vm83_vm0, %v6520_v19  ;;  %v757_v17 = vmul.f32 %v6520_v19, %v6513_v50 }
 0x4bc   :  { %2035 = vmatpush.msrb.mxu0 %v6529_v26 }
 0x4bd   :  { %761 = vst.msk [vmem:[#allocation2 + $0x1] sm:$0x1] %vm443_vm11, %v757_v17  ;;  %v759_v31 = vrot.slane %v757_v17, 1 }
 0x4be   :  { %2036 = vmatpush.msrb.mxu0 %v6536_v1 }
 0x4bf   :  { %762 = vst.msk [vmem:[#allocation2 + $0x9] sm:$0x1] %vm443_vm11, %v759_v31 }
 0x4c0   :  { %2037 = vmatpush.msrb.mxu0 %v6544_v7 }
 0x4c2   :  { %v709_v39 = vpop.permute.xlu0 %708  ;;  %2038 = vmatpush.msrb.mxu0 %v6551_v40 }
 0x4c3   :  { %v713_v62 = vmul.f32 %v709_v39, %v703_v37 }
 0x4c5   :  { %v721_v5 = vadd.f32 %v719_v2, %v713_v62 }
 0x4c7   :  { %v747_v11 = vrot.slane %v721_v5, 5 }
 0x4c9   :  { %v748_v43 = vsel %vm408_vm2, %v747_v11, %v746_v27 }
 0x4ca   :  { %v750_v45 = vmul.f32 %v748_v43, %v6556_v42 }
 0x4cc   :  { %v6562_v32 = vadd.f32 %v755_v44, %v750_v45 }
 0x4ce   :  { %5422 = vmatmul.msk.f32.vlgmr.msrb.gmra.mxu1 %vm83_vm0, %v6562_v32 }
 0x4cf   :  { %2058 = vmatpush.msrb.mxu1 %v6569_v55 }
 0x4d1   :  { %2059 = vmatpush.msrb.mxu1 %v6575_v47 }
 0x4d3   :  { %2060 = vmatpush.msrb.mxu1 %v6581_v48 }
 0x4d5   :  { %2061 = vmatpush.msrb.mxu1 %v6587_v49 }
 0x538   :  { %v796_v18 = vpop.f32.mrf.mxu0 }
 0x539   :  { %v797_v51 = vadd.f32 %v6320_v15, %v796_v18 }
 0x53b   :  { %v823_v35 = vrot.slane %v797_v51, 6  ;;  %v824_v53 = vrot.slane %v797_v51, 7 }
 0x53d   :  { %869 = vrot.lane.b32.xlu1 %v824_v53, %s6100_s26  ;;  %867 = vrot.lane.b32.xlu0 %v823_v35, %s6100_s26  ;;  %v827_v6 = vadd.f32 %v823_v35, %v6344_v30  ;;  %v828_v15 = vadd.f32 %v824_v53, %v6341_v28 }
 0x53f   :  { %v5423_v12 = vmul.f32 -1.442695, %v827_v6  ;;  %v5424_v13 = vmul.f32 -1.442695, %v828_v15 }
 0x541   :  { %5620 = vpow2.f32 %v5423_v12 }
 0x542   :  { %5622 = vpow2.f32 %v5424_v13 }
 0x547   :  { %v5621_v14 = vpop.eup %5620 }
 0x548   :  { %v5623_v20 = vpop.eup %5622  ;;  %v835_v21 = vadd.f32 1.0, %v5621_v14 }
 0x54a   :  { %5624 = vrcp.f32 %v835_v21  ;;  %vm842_vm12 = vweird.f32 %v835_v21  ;;  %v848_v38 = vand.u32 2147483648, %v835_v21  ;;  %v846_v62 = vand.u32 2147483647, %v835_v21 }
 0x54b   :  { %v819_v54 = vpop.f32.mrf.mxu1 }
 0x54c   :  { %v820_v61 = vadd.f32 %v6325_v16, %v819_v54  ;;  %v836_v16 = vadd.f32 1.0, %v5623_v20  ;;  %v849_v45 = vor.u32 1.1754944e-38, %v848_v38  ;;  %vm847_vm3 = vcmp.eq.f32.partialorder %v846_v62, 8.507059e+37 }
 0x54e   :  { %v912_v63 = vrot.slane %v820_v61, 3  ;;  %v913_v3 = vrot.slane %v820_v61, 4  ;;  %5626 = vrcp.f32 %v836_v16  ;;  %v863_v37 = vand.u32 2147483648, %v836_v16 }
 0x54f   :  { %vm857_vm13 = vweird.f32 %v836_v16  ;;  %v861_v41 = vand.u32 2147483647, %v836_v16 }
 0x550   :  { %916 = vrot.lane.b32.xlu0 %v913_v3, %s6099_s3  ;;  %914 = vrot.lane.b32.xlu2 %v912_v63, %s6099_s3  ;;  %v5625_v22 = vpop.eup %5624  ;;  %v864_v44 = vor.u32 1.1754944e-38, %v863_v37 }
 0x551   :  { %v838_v24 = vmul.f32 %v5625_v22, %v835_v21  ;;  %vm843_vm9 = vweird.f32 %v5625_v22  ;;  %vm862_vm1 = vcmp.eq.f32.partialorder %v861_v41, 8.507059e+37 }
 0x552   :  { %vm6601_vm14 = vmor %vm842_vm12, %vm843_vm9 }
 0x553   :  { %v839_v31 = vsub.f32 1.0, %v838_v24 }
 0x554   :  { %v5627_v17 = vpop.eup %5626 }
 0x555   :  { %v853_v23 = vmul.f32 %v5627_v17, %v836_v16  ;;  %v840_v9 = vmul.f32 %v5625_v22, %v839_v31  ;;  %vm858_vm10 = vweird.f32 %v5627_v17 }
 0x556   :  { %vm859_vm15 = vmor %vm857_vm13, %vm858_vm10 }
 0x557   :  { %v854_v29 = vsub.f32 1.0, %v853_v23  ;;  %v841_v10 = vadd.f32 %v5625_v22, %v840_v9 }
 0x558   :  { %1000 = vrot.lane.b32.xlu0 %v912_v63, %s6101_s27 }
 0x559   :  { %v855_v57 = vmul.f32 %v5627_v17, %v854_v29  ;;  %v845_v11 = vsel %vm6601_vm14, %v5625_v22, %v841_v10 }
 0x55a   :  { %v6611_v53 = vsel %vm847_vm3, %v849_v45, %v845_v11 }
 0x55b   :  { %v856_v4 = vadd.f32 %v5627_v17, %v855_v57 }
 0x55d   :  { %v860_v27 = vsel %vm859_vm15, %v5627_v17, %v856_v4 }
 0x55e   :  { %v6609_v51 = vsel %vm862_vm1, %v864_v44, %v860_v27 }
 0x5aa   :  { %v6599_v39 = vpop.permute.xlu2 %914 }
 0x5ab   :  { %v920_v5 = vadd.f32 %v6599_v39, %v6344_v30 }
 0x5ad   :  { %v5425_v43 = vmul.f32 -1.442695, %v920_v5 }
 0x5af   :  { %5628 = vpow2.f32 %v5425_v43  ;;  %v870_v18 = vpop.permute.xlu1 %869  ;;  %v868_v35 = vpop.permute.xlu0 %867 }
 0x5b0   :  { %v874_v54 = vmul.f32 %v870_v18, %v6609_v51  ;;  %v873_v61 = vmul.f32 %v868_v35, %v6611_v53 }
 0x5b2   :  { %877 = vrot.lane.b32.xlu1 %v873_v61, %s6100_s26  ;;  %879 = vrot.lane.b32.xlu2 %v874_v54, %s6100_s26 }
 0x5b5   :  { %v5629_v63 = vpop.eup %5628 }
 0x5b6   :  { %v928_v6 = vadd.f32 1.0, %v5629_v63 }
 0x5b8   :  { %5630 = vrcp.f32 %v928_v6  ;;  %v941_v21 = vand.u32 2147483648, %v928_v6  ;;  %vm935_vm5 = vweird.f32 %v928_v6  ;;  %v939_v22 = vand.u32 2147483647, %v928_v6 }
 0x5ba   :  { %1002 = vrot.lane.b32.xlu1 %v913_v3, %s6101_s27  ;;  %v942_v23 = vor.u32 1.1754944e-38, %v941_v21  ;;  %vm940_vm7 = vcmp.eq.f32.partialorder %v939_v22, 8.507059e+37  ;;  %v899_v21 = vrot.slane %v6520_v19, 6  ;;  %v6107_v22 = vmov 5  }
 0x5bb   :  { %5542 = vset.pattern.permute.xlu2 %v6107_v22 }
 0x5be   :  { %v5631_v15 = vpop.eup %5630 }
 0x5bf   :  { %v931_v12 = vmul.f32 %v5631_v15, %v928_v6  ;;  %vm936_vm4 = vweird.f32 %v5631_v15 }
 0x5c0   :  { %vm937_vm6 = vmor %vm935_vm5, %vm936_vm4 }
 0x5c1   :  { %v932_v13 = vsub.f32 1.0, %v931_v12 }
 0x5c2   :  { %v6618_v14 = vpop.permute.xlu0 %916 }
 0x5c3   :  { %v933_v20 = vmul.f32 %v5631_v15, %v932_v13  ;;  %v921_v3 = vadd.f32 %v6618_v14, %v6341_v28 }
 0x5c5   :  { %v934_v16 = vadd.f32 %v5631_v15, %v933_v20  ;;  %v5426_v57 = vmul.f32 -1.442695, %v921_v3  ;;  %v900_v20 = vrot.slane %v6520_v19, 7  ;;  %v887_v3 = vsub.f32 1.0, %v6611_v53 }
 0x5c7   :  { %v938_v17 = vsel %vm937_vm6, %v5631_v15, %v934_v16  ;;  %5632 = vpow2.f32 %v5426_v57  ;;  %v6106_v16 = vmov 2  }
 0x5c8   :  { %v943_v29 = vsel %vm940_vm7, %v942_v23, %v938_v17  ;;  %5539 = vset.pattern.permute.xlu1 %v6106_v16  ;;  %5540 = vset.pattern.permute.xlu0 %v6106_v16 }
 0x5ca   :  { %v1001_v24 = vpop.permute.xlu0 %1000 }
 0x5cb   :  { %v1006_v31 = vmul.f32 %v1001_v24, %v943_v29 }
 0x5cd   :  { %1010 = vrot.lane.b32.xlu2 %v1006_v31, %s6100_s26  ;;  %v5633_v9 = vpop.eup %5632  ;;  %v888_v31 = vsub.f32 1.0, %v6609_v51 }
 0x5ce   :  { %v929_v4 = vadd.f32 1.0, %v5633_v9 }
 0x5d0   :  { %v956_v44 = vand.u32 2147483648, %v929_v4  ;;  %vm950_vm9 = vweird.f32 %v929_v4  ;;  %v954_v18 = vand.u32 2147483647, %v929_v4 }
 0x5d2   :  { %v957_v61 = vor.u32 1.1754944e-38, %v956_v44  ;;  %vm955_vm12 = vcmp.eq.f32.partialorder %v954_v18, 8.507059e+37 }
 0x60c   :  { %v880_v10 = vpop.permute.xlu2 %879 }
 0x60d   :  { %v884_v37 = vadd.f32 %v880_v10, %v6341_v28 }
 0x60f   :  { %5634 = vtanh.f32 %v884_v37 }
 0x610   :  { %5636 = vrcp.f32 %v929_v4 }
 0x615   :  { %v5635_v38 = vpop.eup %5634 }
 0x616   :  { %v5637_v41 = vpop.eup %5636  ;;  %893 = vrot.lane.b32.xlu2 %v5635_v38, %s6099_s3 }
 0x617   :  { %v946_v2 = vmul.f32 %v5637_v41, %v929_v4  ;;  %vm951_vm8 = vweird.f32 %v5637_v41 }
 0x618   :  { %vm952_vm10 = vmor %vm950_vm9, %vm951_vm8 }
 0x619   :  { %v947_v62 = vsub.f32 1.0, %v946_v2 }
 0x61b   :  { %v948_v5 = vmul.f32 %v5637_v41, %v947_v62 }
 0x61d   :  { %v949_v43 = vadd.f32 %v5637_v41, %v948_v5 }
 0x61f   :  { %v953_v54 = vsel %vm952_vm10, %v5637_v41, %v949_v43 }
 0x620   :  { %v958_v6 = vsel %vm955_vm12, %v957_v61, %v953_v54 }
 0x624   :  { %v878_v27 = vpop.permute.xlu1 %877 }
 0x625   :  { %v883_v11 = vadd.f32 %v878_v27, %v6344_v30 }
 0x627   :  { %5638 = vtanh.f32 %v883_v11  ;;  %v1011_v45 = vpop.permute.xlu2 %1010 }
 0x628   :  { %v1016_v35 = vadd.f32 %v1011_v45, %v6413_v25 }
 0x62a   :  { %5640 = vtanh.f32 %v1016_v35 }
 0x62c   :  { %v1003_v63 = vpop.permute.xlu1 %1002 }
 0x62d   :  { %v5639_v15 = vpop.eup %5638  ;;  %v1007_v12 = vmul.f32 %v1003_v63, %v958_v6 }
 0x62e   :  { %891 = vrot.lane.b32.xlu1 %v5639_v15, %s6099_s3 }
 0x62f   :  { %1012 = vrot.lane.b32.xlu0 %v1007_v12, %s6100_s26 }
 0x630   :  { %v5641_v13 = vpop.eup %5640 }
 0x631   :  { %1024 = vrot.lane.b32.xlu2 %v5641_v13, %s6099_s3 }
 0x636   :  { %903 = vrot.lane.b32.xlu1 %v900_v20, %s6101_s27 }
 0x637   :  { %901 = vrot.lane.b32.xlu0 %v899_v21, %s6101_s27 }
 0x63e   :  { %1041 = vperm.xlu1 %5539, %v6396_v56  }
 0x646   :  { %5541 = vset.pattern.permute.xlu1 %v6107_v22 }
 0x647   :  { %1060 = vperm.xlu1 %5541, %v6396_v56  }
 0x670   :  { %v894_v29 = vpop.permute.xlu2 %893 }
 0x671   :  { %v898_v9 = vmul.f32 %v894_v29, %v888_v31 }
 0x68b   :  { %v1025_v16 = vpop.permute.xlu2 %1024 }
 0x6a0   :  { %v892_v17 = vpop.permute.xlu1 %891 }
 0x6a1   :  { %v1013_v23 = vpop.permute.xlu0 %1012  ;;  %v897_v38 = vmul.f32 %v892_v17, %v887_v3 }
 0x6a2   :  { %v1017_v24 = vadd.f32 %v1013_v23, %v6406_v0 }
 0x6a4   :  { %5642 = vtanh.f32 %v1017_v24 }
 0x6a8   :  { %v904_v57 = vpop.permute.xlu1 %903 }
 0x6a9   :  { %v908_v4 = vmul.f32 %v904_v57, %v6609_v51  ;;  %v902_v10 = vpop.permute.xlu0 %901  ;;  %v960_v51 = vadd.f32 %v6599_v39, %v6413_v25 }
 0x6aa   :  { %v5643_v37 = vpop.eup %5642  ;;  %v907_v41 = vmul.f32 %v902_v10, %v6611_v53  ;;  %v961_v53 = vadd.f32 %v6618_v14, %v6406_v0 }
 0x6ab   :  { %v910_v56 = vadd.f32 %v908_v4, %v898_v9  ;;  %1026 = vrot.lane.b32.xlu0 %v5643_v37, %s6099_s3  ;;  %v5427_v11 = vmul.f32 -1.442695, %v960_v51  ;;  %v1032_v37 = vrot.slane %v6562_v32, 3 }
 0x6ac   :  { %v909_v2 = vadd.f32 %v907_v41, %v897_v38  ;;  %v5428_v43 = vmul.f32 -1.442695, %v961_v53 }
 0x6ad   :  { %v1047_v62 = vrot.slane %v910_v56, 1  ;;  %5644 = vpow2.f32 %v5427_v11 }
 0x6ae   :  { %v1046_v5 = vrot.slane %v909_v2, 2  ;;  %5646 = vpow2.f32 %v5428_v43 }
 0x6b0   :  { %v1048_v27 = vsel %vm408_vm2, %v1047_v62, %v1046_v5  ;;  %v6651_v41 = vpop.permute.xlu1 %1041  ;;  %v1033_v62 = vrot.slane %v6562_v32, 4 }
 0x6b1   :  { %1049 = vrot.lane.b32.xlu2 %v1048_v27, %s6099_s3 }
 0x6b3   :  { %1054 = vperm.xlu0 %5540, %v6399_v58   ;;  %v5645_v44 = vpop.eup %5644 }
 0x6b4   :  { %v968_v45 = vadd.f32 1.0, %v5645_v44  ;;  %v5647_v18 = vpop.eup %5646 }
 0x6b5   :  { %v969_v35 = vadd.f32 1.0, %v5647_v18 }
 0x6b6   :  { %5648 = vrcp.f32 %v968_v45  ;;  %v981_v14 = vand.u32 2147483648, %v968_v45  ;;  %vm975_vm14 = vweird.f32 %v968_v45  ;;  %v979_v21 = vand.u32 2147483647, %v968_v45 }
 0x6b7   :  { %5650 = vrcp.f32 %v969_v35  ;;  %v996_v24 = vand.u32 2147483648, %v969_v35  ;;  %vm990_vm4 = vweird.f32 %v969_v35  ;;  %v994_v29 = vand.u32 2147483647, %v969_v35 }
 0x6b8   :  { %v982_v23 = vor.u32 1.1754944e-38, %v981_v14  ;;  %vm980_vm3 = vcmp.eq.f32.partialorder %v979_v21, 8.507059e+37 }
 0x6b9   :  { %1071 = vperm.xlu2 %5542, %v6399_v58   ;;  %v997_v57 = vor.u32 1.1754944e-38, %v996_v24  ;;  %vm995_vm6 = vcmp.eq.f32.partialorder %v994_v29, 8.507059e+37  ;;  %v6656_v18 = vpop.permute.xlu1 %1060 }
 0x6bc   :  { %v5649_v54 = vpop.eup %5648 }
 0x6bd   :  { %v971_v61 = vmul.f32 %v5649_v54, %v968_v45  ;;  %v5651_v63 = vpop.eup %5650  ;;  %vm976_vm13 = vweird.f32 %v5649_v54 }
 0x6be   :  { %v986_v15 = vmul.f32 %v5651_v63, %v969_v35  ;;  %vm977_vm15 = vmor %vm975_vm14, %vm976_vm13  ;;  %vm991_vm1 = vweird.f32 %v5651_v63 }
 0x6bf   :  { %v972_v6 = vsub.f32 1.0, %v971_v61  ;;  %vm992_vm5 = vmor %vm990_vm4, %vm991_vm1 }
 0x6c0   :  { %v987_v39 = vsub.f32 1.0, %v986_v15 }
 0x6c1   :  { %v973_v12 = vmul.f32 %v5649_v54, %v972_v6 }
 0x6c2   :  { %v988_v20 = vmul.f32 %v5651_v63, %v987_v39 }
 0x6c3   :  { %v974_v13 = vadd.f32 %v5649_v54, %v973_v12 }
 0x6c4   :  { %v989_v17 = vadd.f32 %v5651_v63, %v988_v20 }
 0x6c5   :  { %v978_v22 = vsel %vm977_vm15, %v5649_v54, %v974_v13 }
 0x6c6   :  { %v983_v31 = vsel %vm980_vm3, %v982_v23, %v978_v22  ;;  %v993_v3 = vsel %vm992_vm5, %v5651_v63, %v989_v17 }
 0x6c7   :  { %v1020_v9 = vsub.f32 1.0, %v983_v31  ;;  %v998_v10 = vsel %vm995_vm6, %v997_v57, %v993_v3  ;;  %v1036_v56 = vmul.f32 %v1032_v37, %v983_v31 }
 0x6c8   :  { %v1021_v2 = vsub.f32 1.0, %v998_v10  ;;  %v1037_v51 = vmul.f32 %v1033_v62, %v998_v10 }
 0x6c9   :  { %v1030_v38 = vmul.f32 %v1025_v16, %v1020_v9 }
 0x6cb   :  { %v1038_v27 = vadd.f32 %v1036_v56, %v1030_v38 }
 0x6cd   :  { %v1065_v43 = vrot.slane %v1038_v27, 5 }
 0x70b   :  { %v1050_v4 = vpop.permute.xlu2 %1049 }
 0x70c   :  { %v1052_v6 = vmul.f32 %v1050_v4, %v6651_v41 }
 0x713   :  { %v6654_v44 = vpop.permute.xlu2 %1071 }
 0x714   :  { %v1074_v54 = vmul.f32 %v6654_v44, %v6562_v32 }
 0x71d   :  { %v1027_v5 = vpop.permute.xlu0 %1026 }
 0x71e   :  { %v1031_v11 = vmul.f32 %v1027_v5, %v1021_v2 }
 0x720   :  { %v1039_v53 = vadd.f32 %v1037_v51, %v1031_v11 }
 0x722   :  { %v1066_v45 = vrot.slane %v1039_v53, 4 }
 0x724   :  { %v1067_v35 = vsel %vm408_vm2, %v1066_v45, %v1065_v43 }
 0x725   :  { %v1069_v61 = vmul.f32 %v1067_v35, %v6656_v18  ;;  %v6662_v63 = vpop.permute.xlu0 %1054 }
 0x726   :  { %v1057_v15 = vmul.f32 %v6662_v63, %v6520_v19 }
 0x727   :  { %v6667_v12 = vadd.f32 %v1074_v54, %v1069_v61 }
 0x728   :  { %v6669_v39 = vadd.f32 %v1057_v15, %v1052_v6 }
 0x729   :  { %5430 = vmatmul.msk.f32.vlgmr.msra.gmra.mxu3 %vm83_vm0, %v6667_v12 }
 0x72a   :  { %5429 = vmatmul.msk.f32.vlgmr.msra.gmra.mxu2 %vm83_vm0, %v6669_v39  ;;  %2358 = vmatpush.msra.mxu3 %v6569_v55  ;;  %v1076_v13 = vmul.f32 %v6669_v39, %v6651_v41 }
 0x72b   :  { %2335 = vmatpush.msra.mxu2 %v6529_v26  ;;  %v6690_v26 = vld [vmem:[%s8149_s8] ss:$0 sm:$0xff] }
 0x72c   :  { %2359 = vmatpush.msra.mxu3 %v6575_v47  ;;  %1080 = vst.msk [vmem:[#allocation2 + $0x2] sm:$0x1] %vm443_vm11, %v1076_v13  ;;  %v1078_v19 = vrot.slane %v1076_v13, 1 }
 0x72d   :  { %2336 = vmatpush.msra.mxu2 %v6536_v1  ;;  %v6696_v1 = vld [vmem:[%s8147_s6] ss:$0 sm:$0xff] }
 0x72e   :  { %2360 = vmatpush.msra.mxu3 %v6581_v48  ;;  %1081 = vst.msk [vmem:[#allocation2 + $0xa] sm:$0x1] %vm443_vm11, %v1078_v19 }
 0x72f   :  { %2337 = vmatpush.msra.mxu2 %v6544_v7 }
 0x730   :  { %2361 = vmatpush.msra.mxu3 %v6587_v49 }
 0x731   :  { %2338 = vmatpush.msra.mxu2 %v6551_v40 }
 0x7ac   :  { %v1138_v55 = vpop.f32.mrf.mxu3 }
 0x7ad   :  { %v1139_v47 = vadd.f32 %v6690_v26, %v1138_v55  ;;  %v1115_v20 = vpop.f32.mrf.mxu2 }
 0x7ae   :  { %v1116_v7 = vadd.f32 %v6696_v1, %v1115_v20 }
 0x7af   :  { %v1231_v48 = vrot.slane %v1139_v47, 4  ;;  %v1232_v40 = vrot.slane %v1139_v47, 5 }
 0x7b0   :  { %v1142_v49 = vrot.slane %v1116_v7, 5  ;;  %v1143_v14 = vrot.slane %v1116_v7, 6 }
 0x7b1   :  { %1233 = vrot.lane.b32.xlu0 %v1231_v48, %s6099_s3 }
 0x7b2   :  { %1188 = vrot.lane.b32.xlu2 %v1143_v14, %s6100_s26  ;;  %1186 = vrot.lane.b32.xlu1 %v1142_v49, %s6100_s26  ;;  %v1147_v21 = vadd.f32 %v1143_v14, %v6341_v28  ;;  %v1146_v23 = vadd.f32 %v1142_v49, %v6344_v30 }
 0x7b4   :  { %v5432_v16 = vmul.f32 -1.442695, %v1147_v21  ;;  %v5431_v29 = vmul.f32 -1.442695, %v1146_v23 }
 0x7b6   :  { %5652 = vpow2.f32 %v5432_v16 }
 0x7b9   :  { %1321 = vrot.lane.b32.xlu0 %v1232_v40, %s6101_s27 }
 0x7ba   :  { %1235 = vrot.lane.b32.xlu1 %v1232_v40, %s6099_s3  ;;  %1319 = vrot.lane.b32.xlu2 %v1231_v48, %s6101_s27 }
 0x7bc   :  { %v5653_v22 = vpop.eup %5652 }
 0x7bd   :  { %v1155_v17 = vadd.f32 1.0, %v5653_v22 }
 0x7bf   :  { %5654 = vrcp.f32 %v1155_v17  ;;  %v1182_v37 = vand.u32 2147483648, %v1155_v17  ;;  %vm1176_vm8 = vweird.f32 %v1155_v17  ;;  %v1180_v38 = vand.u32 2147483647, %v1155_v17 }
 0x7c0   :  { %5656 = vpow2.f32 %v5431_v29 }
 0x7c1   :  { %v1183_v2 = vor.u32 1.1754944e-38, %v1182_v37  ;;  %vm1181_vm10 = vcmp.eq.f32.partialorder %v1180_v38, 8.507059e+37 }
 0x7c5   :  { %v5655_v24 = vpop.eup %5654 }
 0x7c6   :  { %v1172_v31 = vmul.f32 %v5655_v24, %v1155_v17  ;;  %v5657_v57 = vpop.eup %5656  ;;  %vm1177_vm7 = vweird.f32 %v5655_v24 }
 0x7c7   :  { %v1154_v4 = vadd.f32 1.0, %v5657_v57  ;;  %vm1178_vm9 = vmor %vm1176_vm8, %vm1177_vm7 }
 0x7c8   :  { %v1173_v3 = vsub.f32 1.0, %v1172_v31 }
 0x7c9   :  { %5658 = vrcp.f32 %v1154_v4  ;;  %v1167_v35 = vand.u32 2147483648, %v1154_v4  ;;  %vm1161_vm13 = vweird.f32 %v1154_v4  ;;  %v1165_v54 = vand.u32 2147483647, %v1154_v4 }
 0x7ca   :  { %v1174_v9 = vmul.f32 %v5655_v24, %v1173_v3 }
 0x7cb   :  { %v1168_v6 = vor.u32 1.1754944e-38, %v1167_v35  ;;  %vm1166_vm15 = vcmp.eq.f32.partialorder %v1165_v54, 8.507059e+37 }
 0x7cc   :  { %v1175_v10 = vadd.f32 %v5655_v24, %v1174_v9 }
 0x7ce   :  { %v1179_v56 = vsel %vm1178_vm9, %v5655_v24, %v1175_v10 }
 0x7cf   :  { %v6707_v62 = vsel %vm1181_vm10, %v1183_v2, %v1179_v56  ;;  %v5659_v51 = vpop.eup %5658 }
 0x7d0   :  { %v1157_v11 = vmul.f32 %v5659_v51, %v1154_v4  ;;  %vm1162_vm12 = vweird.f32 %v5659_v51 }
 0x7d1   :  { %vm1163_vm14 = vmor %vm1161_vm13, %vm1162_vm12 }
 0x7d2   :  { %v1158_v53 = vsub.f32 1.0, %v1157_v11 }
 0x7d4   :  { %v1159_v43 = vmul.f32 %v5659_v51, %v1158_v53 }
 0x7d6   :  { %v1160_v45 = vadd.f32 %v5659_v51, %v1159_v43 }
 0x7d8   :  { %v1164_v61 = vsel %vm1163_vm14, %v5659_v51, %v1160_v45 }
 0x7d9   :  { %v6715_v55 = vsel %vm1166_vm15, %v1168_v6, %v1164_v61  ;;  %v1218_v61 = vrot.slane %v6669_v39, 5 }
 0x80c   :  { %v1189_v5 = vpop.permute.xlu2 %1188 }
 0x80d   :  { %v1193_v27 = vmul.f32 %v1189_v5, %v6707_v62 }
 0x80f   :  { %1198 = vrot.lane.b32.xlu2 %v1193_v27, %s6100_s26 }
 0x814   :  { %v1320_v4 = vpop.permute.xlu2 %1319 }
 0x823   :  { %v6711_v15 = vpop.permute.xlu0 %1233 }
 0x824   :  { %v1239_v13 = vadd.f32 %v6711_v15, %v6344_v30  ;;  %v1187_v19 = vpop.permute.xlu1 %1186 }
 0x825   :  { %v1192_v47 = vmul.f32 %v1187_v19, %v6715_v55 }
 0x826   :  { %v5433_v20 = vmul.f32 -1.442695, %v1239_v13 }
 0x827   :  { %1196 = vrot.lane.b32.xlu1 %v1192_v47, %s6100_s26 }
 0x828   :  { %5660 = vpow2.f32 %v5433_v20 }
 0x82b   :  { %v1322_v45 = vpop.permute.xlu0 %1321 }
 0x82c   :  { %v6719_v7 = vpop.permute.xlu1 %1235 }
 0x82d   :  { %v1240_v48 = vadd.f32 %v6719_v7, %v6341_v28 }
 0x82e   :  { %v5661_v49 = vpop.eup %5660 }
 0x82f   :  { %v1247_v14 = vadd.f32 1.0, %v5661_v49  ;;  %v5434_v40 = vmul.f32 -1.442695, %v1240_v48  ;;  %v6108_v49 = vmov 4  }
 0x830   :  { %5544 = vset.pattern.permute.xlu0 %v6108_v49  ;;  %5543 = vset.pattern.permute.xlu2 %v6108_v49 }
 0x831   :  { %5662 = vrcp.f32 %v1247_v14  ;;  %v1260_v24 = vand.u32 2147483648, %v1247_v14  ;;  %v1258_v31 = vand.u32 2147483647, %v1247_v14  ;;  %vm1254_vm3 = vweird.f32 %v1247_v14 }
 0x832   :  { %5664 = vpow2.f32 %v5434_v40  ;;  %v6109_v40 = vmov 3  }
 0x833   :  { %v1261_v57 = vor.u32 1.1754944e-38, %v1260_v24  ;;  %vm1259_vm5 = vcmp.eq.f32.partialorder %v1258_v31, 8.507059e+37  ;;  %5545 = vset.pattern.permute.xlu1 %v6109_v40 }
 0x837   :  { %v5663_v21 = vpop.eup %5662 }
 0x838   :  { %v1250_v16 = vmul.f32 %v5663_v21, %v1247_v14  ;;  %v5665_v22 = vpop.eup %5664  ;;  %vm1255_vm1 = vweird.f32 %v5663_v21  ;;  %v1219_v14 = vrot.slane %v6669_v39, 6 }
 0x839   :  { %v1248_v17 = vadd.f32 1.0, %v5665_v22  ;;  %vm1256_vm4 = vmor %vm1254_vm3, %vm1255_vm1 }
 0x83a   :  { %v1251_v23 = vsub.f32 1.0, %v1250_v16 }
 0x83b   :  { %5666 = vrcp.f32 %v1248_v17  ;;  %v1275_v5 = vand.u32 2147483648, %v1248_v17  ;;  %v1273_v51 = vand.u32 2147483647, %v1248_v17  ;;  %vm1269_vm7 = vweird.f32 %v1248_v17 }
 0x83c   :  { %v1252_v29 = vmul.f32 %v5663_v21, %v1251_v23 }
 0x83d   :  { %v1276_v53 = vor.u32 1.1754944e-38, %v1275_v5  ;;  %vm1274_vm9 = vcmp.eq.f32.partialorder %v1273_v51, 8.507059e+37 }
 0x83e   :  { %v1253_v3 = vadd.f32 %v5663_v21, %v1252_v29 }
 0x840   :  { %v1257_v9 = vsel %vm1256_vm4, %v5663_v21, %v1253_v3  ;;  %v6016_v21 = vld [vmem:[%s8174_s4] sm:$0x3]  ;;  %v1206_v3 = vsub.f32 1.0, %v6715_v55 }
 0x841   :  { %v1262_v10 = vsel %vm1259_vm5, %v1261_v57, %v1257_v9  ;;  %v5667_v37 = vpop.eup %5666 }
 0x842   :  { %v1325_v38 = vmul.f32 %v1320_v4, %v1262_v10  ;;  %v1265_v56 = vmul.f32 %v5667_v37, %v1248_v17  ;;  %vm1270_vm6 = vweird.f32 %v5667_v37  ;;  %v1279_v10 = vadd.f32 %v6711_v15, %v6413_v25 }
 0x843   :  { %vm1271_vm8 = vmor %vm1269_vm7, %vm1270_vm6 }
 0x844   :  { %1329 = vrot.lane.b32.xlu0 %v1325_v38, %s6100_s26  ;;  %v1266_v2 = vsub.f32 1.0, %v1265_v56  ;;  %v1207_v38 = vsub.f32 1.0, %v6707_v62  ;;  %v5435_v51 = vmul.f32 -1.442695, %v1279_v10 }
 0x846   :  { %v1267_v27 = vmul.f32 %v5667_v37, %v1266_v2 }
 0x848   :  { %v1268_v11 = vadd.f32 %v5667_v37, %v1267_v27 }
 0x84a   :  { %v1272_v43 = vsel %vm1271_vm8, %v5667_v37, %v1268_v11 }
 0x84b   :  { %v1277_v35 = vsel %vm1274_vm9, %v1276_v53, %v1272_v43 }
 0x84c   :  { %v1326_v54 = vmul.f32 %v1322_v45, %v1277_v35 }
 0x84e   :  { %1331 = vrot.lane.b32.xlu1 %v1326_v54, %s6100_s26 }
 0x856   :  { %1220 = vrot.lane.b32.xlu1 %v1218_v61, %s6101_s27 }
 0x869   :  { %v1199_v6 = vpop.permute.xlu2 %1198 }
 0x86a   :  { %v1203_v13 = vadd.f32 %v1199_v6, %v6341_v28 }
 0x86c   :  { %5668 = vtanh.f32 %v1203_v13 }
 0x872   :  { %v5669_v19 = vpop.eup %5668 }
 0x873   :  { %1212 = vrot.lane.b32.xlu0 %v5669_v19, %s6099_s3 }
 0x899   :  { %v1197_v47 = vpop.permute.xlu1 %1196 }
 0x89a   :  { %v1202_v20 = vadd.f32 %v1197_v47, %v6344_v30 }
 0x89c   :  { %5670 = vtanh.f32 %v1202_v20 }
 0x8a2   :  { %v5671_v48 = vpop.eup %5670 }
 0x8a3   :  { %1210 = vrot.lane.b32.xlu2 %v5671_v48, %s6099_s3 }
 0x8ab   :  { %1222 = vrot.lane.b32.xlu2 %v1219_v14, %s6101_s27 }
 0x8b3   :  { %1379 = vperm.xlu2 %5543, %v6016_v21  }
 0x8b6   :  { %v1330_v16 = vpop.permute.xlu0 %1329 }
 0x8b7   :  { %v1335_v22 = vadd.f32 %v1330_v16, %v6413_v25 }
 0x8b9   :  { %5672 = vtanh.f32 %v1335_v22 }
 0x8bb   :  { %5548 = vset.pattern.permute.xlu2 %v6102_v59 }
 0x8bf   :  { %v5673_v17 = vpop.eup %5672 }
 0x8c0   :  { %1343 = vrot.lane.b32.xlu0 %v5673_v17, %s6099_s3  ;;  %v1332_v23 = vpop.permute.xlu1 %1331 }
 0x8c1   :  { %v1336_v24 = vadd.f32 %v1332_v23, %v6406_v0 }
 0x8c3   :  { %5674 = vtanh.f32 %v1336_v24 }
 0x8c4   :  { %5676 = vpow2.f32 %v5435_v51 }
 0x8c8   :  { %1390 = vperm.xlu0 %5544, %v6399_v58   ;;  %v1221_v57 = vpop.permute.xlu1 %1220 }
 0x8c9   :  { %v5675_v29 = vpop.eup %5674  ;;  %v1226_v37 = vmul.f32 %v1221_v57, %v6715_v55 }
 0x8ca   :  { %1345 = vrot.lane.b32.xlu1 %v5675_v29, %s6099_s3  ;;  %v5677_v55 = vpop.eup %5676 }
 0x8cb   :  { %v1287_v35 = vadd.f32 1.0, %v5677_v55 }
 0x8cd   :  { %v1300_v14 = vand.u32 2147483648, %v1287_v35  ;;  %vm1294_vm12 = vweird.f32 %v1287_v35  ;;  %v1298_v40 = vand.u32 2147483647, %v1287_v35 }
 0x8cf   :  { %v1301_v22 = vor.u32 1.1754944e-38, %v1300_v14  ;;  %vm1299_vm15 = vcmp.eq.f32.partialorder %v1298_v40, 8.507059e+37 }
 0x8d0   :  { %5549 = vset.pattern.permute.xlu0 %v6102_v59 }
 0x8d2   :  { %1360 = vperm.xlu1 %5545, %v6016_v21  }
 0x8da   :  { %1373 = vperm.xlu1 %5545, %v6399_v58   ;;  %v1280_v58 = vadd.f32 %v6719_v7, %v6406_v0 }
 0x8dc   :  { %v5436_v45 = vmul.f32 -1.442695, %v1280_v58 }
 0x8de   :  { %5678 = vpow2.f32 %v5436_v45 }
 0x8df   :  { %5680 = vrcp.f32 %v1287_v35 }
 0x8e4   :  { %v5679_v54 = vpop.eup %5678 }
 0x8e5   :  { %v1213_v4 = vpop.permute.xlu0 %1212  ;;  %v1288_v61 = vadd.f32 1.0, %v5679_v54 }
 0x8e6   :  { %v1217_v2 = vmul.f32 %v1213_v4, %v1207_v38  ;;  %v1351_v4 = vrot.slane %v6667_v12, 4 }
 0x8e7   :  { %5682 = vrcp.f32 %v1288_v61  ;;  %v1315_v17 = vand.u32 2147483648, %v1288_v61  ;;  %vm1309_vm1 = vweird.f32 %v1288_v61  ;;  %v1313_v23 = vand.u32 2147483647, %v1288_v61 }
 0x8e9   :  { %vm1314_vm4 = vcmp.eq.f32.partialorder %v1313_v23, 8.507059e+37 }
 0x8fd   :  { %v1211_v31 = vpop.permute.xlu2 %1210 }
 0x8fe   :  { %v1216_v9 = vmul.f32 %v1211_v31, %v1206_v3  ;;  %v1316_v3 = vor.u32 1.1754944e-38, %v1315_v17 }
 0x900   :  { %v1228_v5 = vadd.f32 %v1226_v37, %v1216_v9 }
 0x902   :  { %v1365_v53 = vrot.slane %v1228_v5, 3 }
 0x905   :  { %v1223_v56 = vpop.permute.xlu2 %1222 }
 0x906   :  { %v1227_v27 = vmul.f32 %v1223_v56, %v6707_v62  ;;  %v5681_v62 = vpop.eup %5680  ;;  %v1352_v56 = vrot.slane %v6667_v12, 5 }
 0x907   :  { %v1290_v6 = vmul.f32 %v5681_v62, %v1287_v35  ;;  %v5683_v13 = vpop.eup %5682  ;;  %vm1295_vm10 = vweird.f32 %v5681_v62 }
 0x908   :  { %v1229_v11 = vadd.f32 %v1227_v27, %v1217_v2  ;;  %v1305_v19 = vmul.f32 %v5683_v13, %v1288_v61  ;;  %vm1296_vm13 = vmor %vm1294_vm12, %vm1295_vm10  ;;  %vm1310_vm14 = vweird.f32 %v5683_v13 }
 0x909   :  { %v1291_v7 = vsub.f32 1.0, %v1290_v6  ;;  %vm1311_vm3 = vmor %vm1309_vm1, %vm1310_vm14 }
 0x90a   :  { %v1366_v43 = vrot.slane %v1229_v11, 2  ;;  %v1306_v20 = vsub.f32 1.0, %v1305_v19 }
 0x90b   :  { %v1292_v47 = vmul.f32 %v5681_v62, %v1291_v7 }
 0x90c   :  { %v1367_v15 = vsel %vm408_vm2, %v1366_v43, %v1365_v53  ;;  %v1307_v49 = vmul.f32 %v5683_v13, %v1306_v20 }
 0x90d   :  { %1368 = vrot.lane.b32.xlu2 %v1367_v15, %s6099_s3  ;;  %v1293_v48 = vadd.f32 %v5681_v62, %v1292_v47  ;;  %v6758_v45 = vpop.permute.xlu2 %1379 }
 0x90e   :  { %v1308_v16 = vadd.f32 %v5683_v13, %v1307_v49 }
 0x90f   :  { %v1297_v21 = vsel %vm1296_vm13, %v5681_v62, %v1293_v48 }
 0x910   :  { %v1302_v24 = vsel %vm1299_vm15, %v1301_v22, %v1297_v21  ;;  %v1312_v29 = vsel %vm1311_vm3, %v5683_v13, %v1308_v16 }
 0x911   :  { %v1339_v57 = vsub.f32 1.0, %v1302_v24  ;;  %v1317_v9 = vsel %vm1314_vm4, %v1316_v3, %v1312_v29  ;;  %v1355_v37 = vmul.f32 %v1351_v4, %v1302_v24 }
 0x912   :  { %v1340_v38 = vsub.f32 1.0, %v1317_v9  ;;  %v1356_v27 = vmul.f32 %v1352_v56, %v1317_v9 }
 0x932   :  { %v1344_v31 = vpop.permute.xlu0 %1343 }
 0x933   :  { %v1349_v10 = vmul.f32 %v1344_v31, %v1339_v57 }
 0x935   :  { %v1357_v5 = vadd.f32 %v1355_v37, %v1349_v10 }
 0x937   :  { %v1384_v11 = vrot.slane %v1357_v5, 4 }
 0x93a   :  { %v6756_v53 = vpop.permute.xlu0 %1390 }
 0x93b   :  { %v1393_v55 = vmul.f32 %v6756_v53, %v6667_v12 }
 0x93c   :  { %v1346_v2 = vpop.permute.xlu1 %1345 }
 0x93d   :  { %v1350_v51 = vmul.f32 %v1346_v2, %v1340_v38 }
 0x93f   :  { %v1358_v58 = vadd.f32 %v1356_v27, %v1350_v51 }
 0x941   :  { %v1385_v43 = vrot.slane %v1358_v58, 3 }
 0x943   :  { %v1386_v15 = vsel %vm408_vm2, %v1385_v43, %v1384_v11 }
 0x944   :  { %v1388_v35 = vmul.f32 %v1386_v15, %v6758_v45  ;;  %v6768_v61 = vpop.permute.xlu1 %1360 }
 0x946   :  { %v6764_v54 = vadd.f32 %v1393_v55, %v1388_v35 }
 0x948   :  { %5438 = vmatmul.msk.f32.vlgmr.msra.gmra.mxu1 %vm83_vm0, %v6764_v54 }
 0x94c   :  { %v6770_v62 = vpop.permute.xlu1 %1373 }
 0x94d   :  { %v1376_v13 = vmul.f32 %v6770_v62, %v6669_v39 }
 0x967   :  { %v1369_v6 = vpop.permute.xlu2 %1368 }
 0x968   :  { %v1371_v7 = vmul.f32 %v1369_v6, %v6768_v61 }
 0x96a   :  { %v6775_v19 = vadd.f32 %v1376_v13, %v1371_v7 }
 0x96c   :  { %5437 = vmatmul.msk.f32.vlgmr.msra.gmra.mxu0 %vm83_vm0, %v6775_v19  ;;  %v1395_v47 = vmul.f32 %v6775_v19, %v6768_v61 }
 0x96e   :  { %v1397_v20 = vrot.slane %v1395_v47, 1  ;;  %1399 = vst.msk [vmem:[#allocation2 + $0x3] sm:$0x1] %vm443_vm11, %v1395_v47 }
 0x970   :  { %1400 = vst.msk [vmem:[#allocation2 + $0xb] sm:$0x1] %vm443_vm11, %v1397_v20 }
 0x9c5   :  { %v1457_v48 = vpop.f32.mrf.mxu1 }
 0x9c6   :  { %v1458_v49 = vadd.f32 %v6690_v26, %v1457_v48 }
 0x9c8   :  { %v1550_v14 = vrot.slane %v1458_v49, 5  ;;  %v1551_v39 = vrot.slane %v1458_v49, 6 }
 0x9ca   :  { %1554 = vrot.lane.b32.xlu0 %v1551_v39, %s6099_s3  ;;  %1552 = vrot.lane.b32.xlu2 %v1550_v14, %s6099_s3 }
 0x9d2   :  { %1638 = vrot.lane.b32.xlu0 %v1550_v14, %s6101_s27 }
 0x9e9   :  { %v1434_v40 = vpop.f32.mrf.mxu0 }
 0x9ea   :  { %v1435_v21 = vadd.f32 %v6696_v1, %v1434_v40 }
 0x9ec   :  { %v1461_v16 = vrot.slane %v1435_v21, 4  ;;  %v1462_v22 = vrot.slane %v1435_v21, 5 }
 0x9ee   :  { %1507 = vrot.lane.b32.xlu2 %v1462_v22, %s6100_s26  ;;  %1505 = vrot.lane.b32.xlu1 %v1461_v16, %s6100_s26  ;;  %v1466_v17 = vadd.f32 %v1462_v22, %v6341_v28  ;;  %v1465_v9 = vadd.f32 %v1461_v16, %v6344_v30 }
 0x9f0   :  { %v5440_v23 = vmul.f32 -1.442695, %v1466_v17  ;;  %v5439_v38 = vmul.f32 -1.442695, %v1465_v9 }
 0x9f2   :  { %5684 = vpow2.f32 %v5440_v23 }
 0x9f6   :  { %1640 = vrot.lane.b32.xlu1 %v1551_v39, %s6101_s27 }
 0x9f8   :  { %v5685_v24 = vpop.eup %5684 }
 0x9f9   :  { %v1474_v3 = vadd.f32 1.0, %v5685_v24 }
 0x9fb   :  { %v1501_v49 = vand.u32 2147483648, %v1474_v3  ;;  %vm1495_vm9 = vweird.f32 %v1474_v3  ;;  %v1499_v39 = vand.u32 2147483647, %v1474_v3 }
 0x9fd   :  { %v1502_v17 = vor.u32 1.1754944e-38, %v1501_v49  ;;  %vm1500_vm13 = vcmp.eq.f32.partialorder %v1499_v39, 8.507059e+37 }
 0xa24   :  { %v6792_v29 = vpop.permute.xlu2 %1552 }
 0xa25   :  { %v1558_v31 = vadd.f32 %v6792_v29, %v6344_v30 }
 0xa27   :  { %v5441_v57 = vmul.f32 -1.442695, %v1558_v31 }
 0xa29   :  { %5686 = vpow2.f32 %v5441_v57 }
 0xa2a   :  { %5688 = vrcp.f32 %v1474_v3 }
 0xa2f   :  { %v5687_v4 = vpop.eup %5686 }
 0xa30   :  { %v1566_v10 = vadd.f32 1.0, %v5687_v4  ;;  %v5689_v37 = vpop.eup %5688 }
 0xa31   :  { %v1491_v56 = vmul.f32 %v5689_v37, %v1474_v3  ;;  %vm1496_vm8 = vweird.f32 %v5689_v37 }
 0xa32   :  { %5690 = vrcp.f32 %v1566_v10  ;;  %v1579_v6 = vand.u32 2147483648, %v1566_v10  ;;  %vm1573_vm6 = vweird.f32 %v1566_v10  ;;  %v1577_v47 = vand.u32 2147483647, %v1566_v10  ;;  %vm1497_vm12 = vmor %vm1495_vm9, %vm1496_vm8 }
 0xa33   :  { %5692 = vpow2.f32 %v5439_v38  ;;  %v1492_v5 = vsub.f32 1.0, %v1491_v56 }
 0xa34   :  { %v1580_v14 = vor.u32 1.1754944e-38, %v1579_v6  ;;  %vm1578_vm10 = vcmp.eq.f32.partialorder %v1577_v47, 8.507059e+37 }
 0xa35   :  { %v1493_v43 = vmul.f32 %v5689_v37, %v1492_v5 }
 0xa37   :  { %v1494_v20 = vadd.f32 %v5689_v37, %v1493_v43 }
 0xa38   :  { %v5691_v2 = vpop.eup %5690 }
 0xa39   :  { %v1569_v27 = vmul.f32 %v5691_v2, %v1566_v10  ;;  %v5693_v51 = vpop.eup %5692  ;;  %vm1574_vm5 = vweird.f32 %v5691_v2  ;;  %v1498_v16 = vsel %vm1497_vm12, %v5689_v37, %v1494_v20 }
 0xa3a   :  { %v1473_v35 = vadd.f32 1.0, %v5693_v51  ;;  %vm1575_vm7 = vmor %vm1573_vm6, %vm1574_vm5  ;;  %v6802_v24 = vsel %vm1500_vm13, %v1502_v17, %v1498_v16 }
 0xa3b   :  { %v1570_v58 = vsub.f32 1.0, %v1569_v27 }
 0xa3c   :  { %v6797_v11 = vpop.permute.xlu0 %1554  ;;  %v1486_v27 = vand.u32 2147483648, %v1473_v35  ;;  %vm1480_vm15 = vweird.f32 %v1473_v35  ;;  %v1484_v51 = vand.u32 2147483647, %v1473_v35 }
 0xa3d   :  { %v1559_v15 = vadd.f32 %v6797_v11, %v6341_v28  ;;  %v1571_v55 = vmul.f32 %v5691_v2, %v1570_v58 }
 0xa3e   :  { %vm1485_vm3 = vcmp.eq.f32.partialorder %v1484_v51, 8.507059e+37 }
 0xa3f   :  { %v5442_v13 = vmul.f32 -1.442695, %v1559_v15  ;;  %v1572_v7 = vadd.f32 %v5691_v2, %v1571_v55  ;;  %v1487_v15 = vor.u32 1.1754944e-38, %v1486_v27 }
 0xa41   :  { %5694 = vpow2.f32 %v5442_v13  ;;  %v1576_v48 = vsel %vm1575_vm7, %v5691_v2, %v1572_v7 }
 0xa42   :  { %5696 = vrcp.f32 %v1473_v35  ;;  %v1581_v21 = vsel %vm1578_vm10, %v1580_v14, %v1576_v48 }
 0xa44   :  { %v1639_v40 = vpop.permute.xlu0 %1638 }
 0xa45   :  { %v1644_v22 = vmul.f32 %v1639_v40, %v1581_v21  ;;  %v1537_v40 = vrot.slane %v6775_v19, 4 }
 0xa47   :  { %v5695_v23 = vpop.eup %5694  ;;  %1648 = vrot.lane.b32.xlu1 %v1644_v22, %s6100_s26 }
 0xa48   :  { %v1508_v31 = vpop.permute.xlu2 %1507  ;;  %v1567_v57 = vadd.f32 1.0, %v5695_v23  ;;  %v5697_v4 = vpop.eup %5696 }
 0xa49   :  { %v1512_v9 = vmul.f32 %v1508_v31, %v6802_v24  ;;  %v1476_v3 = vmul.f32 %v5697_v4, %v1473_v35  ;;  %vm1481_vm14 = vweird.f32 %v5697_v4 }
 0xa4a   :  { %5698 = vrcp.f32 %v1567_v57  ;;  %vm1482_vm1 = vmor %vm1480_vm15, %vm1481_vm14  ;;  %v1594_v47 = vand.u32 2147483648, %v1567_v57  ;;  %vm1588_vm5 = vweird.f32 %v1567_v57  ;;  %v1592_v20 = vand.u32 2147483647, %v1567_v57 }
 0xa4b   :  { %1517 = vrot.lane.b32.xlu0 %v1512_v9, %s6100_s26  ;;  %v1477_v10 = vsub.f32 1.0, %v1476_v3 }
 0xa4c   :  { %v1595_v35 = vor.u32 1.1754944e-38, %v1594_v47  ;;  %vm1593_vm7 = vcmp.eq.f32.partialorder %v1592_v20, 8.507059e+37 }
 0xa4d   :  { %v1478_v37 = vmul.f32 %v5697_v4, %v1477_v10 }
 0xa4f   :  { %v1479_v2 = vadd.f32 %v5697_v4, %v1478_v37  ;;  %v1538_v37 = vrot.slane %v6775_v19, 5 }
 0xa50   :  { %v5699_v38 = vpop.eup %5698 }
 0xa51   :  { %v1584_v56 = vmul.f32 %v5699_v38, %v1567_v57  ;;  %v1483_v58 = vsel %vm1482_vm1, %v5697_v4, %v1479_v2  ;;  %vm1589_vm4 = vweird.f32 %v5699_v38  ;;  %v1598_v2 = vadd.f32 %v6792_v29, %v6413_v25 }
 0xa52   :  { %v6806_v6 = vsel %vm1485_vm3, %v1487_v15, %v1483_v58  ;;  %vm1590_vm6 = vmor %vm1588_vm5, %vm1589_vm4 }
 0xa53   :  { %v1585_v5 = vsub.f32 1.0, %v1584_v56  ;;  %v1599_v56 = vadd.f32 %v6797_v11, %v6406_v0  ;;  %v5443_v27 = vmul.f32 -1.442695, %v1598_v2 }
 0xa55   :  { %v1586_v43 = vmul.f32 %v5699_v38, %v1585_v5  ;;  %v5444_v5 = vmul.f32 -1.442695, %v1599_v56  ;;  %v1671_v56 = vrot.slane %v6764_v54, 6 }
 0xa57   :  { %v1587_v7 = vadd.f32 %v5699_v38, %v1586_v43 }
 0xa59   :  { %v1591_v48 = vsel %vm1590_vm6, %v5699_v38, %v1587_v7 }
 0xa5a   :  { %v1596_v49 = vsel %vm1593_vm7, %v1595_v35, %v1591_v48 }
 0xa60   :  { %v1506_v55 = vpop.permute.xlu1 %1505 }
 0xa61   :  { %v1511_v13 = vmul.f32 %v1506_v55, %v6806_v6 }
 0xa63   :  { %1515 = vrot.lane.b32.xlu2 %v1511_v13, %s6100_s26 }
 0xa68   :  { %v1641_v14 = vpop.permute.xlu1 %1640 }
 0xa69   :  { %v1645_v39 = vmul.f32 %v1641_v14, %v1596_v49 }
 0xa6b   :  { %1650 = vrot.lane.b32.xlu2 %v1645_v39, %s6100_s26 }
 0xa73   :  { %1539 = vrot.lane.b32.xlu2 %v1537_v40, %s6101_s27 }
 0xab9   :  { %v1649_v23 = vpop.permute.xlu1 %1648 }
 0xaba   :  { %v1654_v31 = vadd.f32 %v1649_v23, %v6413_v25 }
 0xabd   :  { %v1518_v21 = vpop.permute.xlu0 %1517  ;;  %v1516_v16 = vpop.permute.xlu2 %1515 }
 0xabe   :  { %v1522_v22 = vadd.f32 %v1518_v21, %v6341_v28  ;;  %v1521_v17 = vadd.f32 %v1516_v16, %v6344_v30 }
 0xac0   :  { %5700 = vtanh.f32 %v1522_v22 }
 0xac1   :  { %5702 = vtanh.f32 %v1521_v17 }
 0xac2   :  { %5704 = vtanh.f32 %v1654_v31 }
 0xac5   :  { %v1651_v57 = vpop.permute.xlu2 %1650 }
 0xac6   :  { %v5701_v9 = vpop.eup %5700  ;;  %v1655_v4 = vadd.f32 %v1651_v57, %v6406_v0 }
 0xac7   :  { %v5703_v3 = vpop.eup %5702  ;;  %1531 = vrot.lane.b32.xlu1 %v5701_v9, %s6099_s3 }
 0xac8   :  { %5706 = vtanh.f32 %v1655_v4  ;;  %1529 = vrot.lane.b32.xlu0 %v5703_v3, %s6099_s3  ;;  %v5705_v10 = vpop.eup %5704 }
 0xac9   :  { %5708 = vpow2.f32 %v5444_v5 }
 0xaca   :  { %5710 = vpow2.f32 %v5443_v27 }
 0xacd   :  { %v1540_v49 = vpop.permute.xlu2 %1539 }
 0xace   :  { %v5707_v38 = vpop.eup %5706 }
 0xacf   :  { %1662 = vrot.lane.b32.xlu1 %v5705_v10, %s6099_s3  ;;  %1664 = vrot.lane.b32.xlu2 %v5707_v38, %s6099_s3  ;;  %v5709_v51 = vpop.eup %5708  ;;  %v1525_v38 = vsub.f32 1.0, %v6806_v6 }
 0xad0   :  { %1541 = vrot.lane.b32.xlu0 %v1538_v37, %s6101_s27  ;;  %v1607_v58 = vadd.f32 1.0, %v5709_v51  ;;  %v5711_v43 = vpop.eup %5710 }
 0xad1   :  { %v1606_v15 = vadd.f32 1.0, %v5711_v43  ;;  %v1545_v43 = vmul.f32 %v1540_v49, %v6806_v6  ;;  %v1696_v6 = vmul.f32 %v6764_v54, %v6770_v62 }
 0xad2   :  { %5712 = vrcp.f32 %v1607_v58  ;;  %v1634_v14 = vand.u32 2147483648, %v1607_v58  ;;  %vm1628_vm9 = vweird.f32 %v1607_v58  ;;  %v1632_v39 = vand.u32 2147483647, %v1607_v58 }
 0xad3   :  { %5714 = vrcp.f32 %v1606_v15  ;;  %v1619_v22 = vand.u32 2147483648, %v1606_v15  ;;  %vm1613_vm14 = vweird.f32 %v1606_v15  ;;  %v1617_v17 = vand.u32 2147483647, %v1606_v15 }
 0xad4   :  { %v1635_v16 = vor.u32 1.1754944e-38, %v1634_v14  ;;  %vm1633_vm13 = vcmp.eq.f32.partialorder %v1632_v39, 8.507059e+37 }
 0xad5   :  { %v1620_v3 = vor.u32 1.1754944e-38, %v1619_v22  ;;  %vm1618_vm1 = vcmp.eq.f32.partialorder %v1617_v17, 8.507059e+37 }
 0xad8   :  { %v5713_v55 = vpop.eup %5712 }
 0xad9   :  { %v1624_v13 = vmul.f32 %v5713_v55, %v1607_v58  ;;  %v5715_v7 = vpop.eup %5714  ;;  %vm1629_vm8 = vweird.f32 %v5713_v55  ;;  %v1670_v58 = vrot.slane %v6764_v54, 5 }
 0xada   :  { %v1609_v20 = vmul.f32 %v5715_v7, %v1606_v15  ;;  %vm1630_vm10 = vmor %vm1628_vm9, %vm1629_vm8  ;;  %vm1614_vm12 = vweird.f32 %v5715_v7  ;;  %v1526_v15 = vsub.f32 1.0, %v6802_v24 }
 0xadb   :  { %v1625_v47 = vsub.f32 1.0, %v1624_v13  ;;  %vm1615_vm15 = vmor %vm1613_vm14, %vm1614_vm12 }
 0xadc   :  { %v1610_v11 = vsub.f32 1.0, %v1609_v20 }
 0xadd   :  { %v1626_v48 = vmul.f32 %v5713_v55, %v1625_v47 }
 0xade   :  { %v1611_v29 = vmul.f32 %v5715_v7, %v1610_v11 }
 0xadf   :  { %v1627_v35 = vadd.f32 %v5713_v55, %v1626_v48 }
 0xae0   :  { %v1612_v21 = vadd.f32 %v5715_v7, %v1611_v29 }
 0xae1   :  { %v1631_v40 = vsel %vm1630_vm10, %v5713_v55, %v1627_v35 }
 0xae2   :  { %v1636_v23 = vsel %vm1633_vm13, %v1635_v16, %v1631_v40  ;;  %v1616_v9 = vsel %vm1615_vm15, %v5715_v7, %v1612_v21 }
 0xae3   :  { %v1659_v10 = vsub.f32 1.0, %v1636_v23  ;;  %v1621_v37 = vsel %vm1618_vm1, %v1620_v3, %v1616_v9  ;;  %v1675_v27 = vmul.f32 %v1671_v56, %v1636_v23 }
 0xae4   :  { %v1658_v51 = vsub.f32 1.0, %v1621_v37  ;;  %v1674_v7 = vmul.f32 %v1670_v58, %v1621_v37 }
 0xb29   :  { %v1665_v4 = vpop.permute.xlu2 %1664 }
 0xb2a   :  { %v1669_v2 = vmul.f32 %v1665_v4, %v1659_v10 }
 0xb2c   :  { %v1677_v13 = vadd.f32 %v1675_v27, %v1669_v2 }
 0xb2e   :  { %v1692_v39 = vrot.slane %v1677_v13, 2 }
 0xb39   :  { %v1532_v31 = vpop.permute.xlu1 %1531 }
 0xb3a   :  { %v1530_v57 = vpop.permute.xlu0 %1529  ;;  %v1536_v48 = vmul.f32 %v1532_v31, %v1526_v15  ;;  %v1687_v31 = vmul.f32 %v6756_v53, %v6775_v19 }
 0xb3b   :  { %v1535_v5 = vmul.f32 %v1530_v57, %v1525_v38 }
 0xb3d   :  { %v1547_v11 = vadd.f32 %v1545_v43, %v1535_v5 }
 0xb3f   :  { %v1680_v21 = vrot.slane %v1547_v11, 4 }
 0xb41   :  { %v1663_v55 = vpop.permute.xlu1 %1662 }
 0xb42   :  { %v1668_v47 = vmul.f32 %v1663_v55, %v1658_v51  ;;  %v1542_v20 = vpop.permute.xlu0 %1541 }
 0xb43   :  { %v1546_v35 = vmul.f32 %v1542_v20, %v6802_v24 }
 0xb44   :  { %v1676_v29 = vadd.f32 %v1674_v7, %v1668_v47 }
 0xb45   :  { %v1548_v14 = vadd.f32 %v1546_v35, %v1536_v48 }
 0xb46   :  { %v1691_v40 = vrot.slane %v1676_v29, 3 }
 0xb47   :  { %v1681_v16 = vrot.slane %v1548_v14, 3 }
 0xb48   :  { %v1693_v22 = vsel %vm408_vm2, %v1692_v39, %v1691_v40 }
 0xb49   :  { %v1695_v49 = vmul.f32 %v1693_v22, %v6768_v61  ;;  %v1682_v17 = vsel %vm408_vm2, %v1681_v16, %v1680_v21 }
 0xb4a   :  { %1683 = vrot.lane.b32.xlu0 %v1682_v17, %s6099_s3 }
 0xb4b   :  { %v6839_v23 = vadd.f32 %v1696_v6, %v1695_v49 }
 0xb4d   :  { %5446 = vmatmul.msk.f32.vlgmr.msrb.gmra.mxu3 %vm83_vm0, %v6839_v23 }
 0xbbc   :  { %v1684_v24 = vpop.permute.xlu0 %1683 }
 0xbbd   :  { %v1686_v57 = vmul.f32 %v1684_v24, %v6758_v45 }
 0xbbf   :  { %v6846_v9 = vadd.f32 %v1687_v31, %v1686_v57 }
 0xbc1   :  { %5445 = vmatmul.msk.f32.vlgmr.msrb.gmra.mxu2 %vm83_vm0, %v6846_v9 }
 0xbd0   :  { %v1760_v62 = vpop.f32.mrf.mxu3 }
 0xbd1   :  { %v1761_v4 = vadd.f32 %v6690_v26, %v1760_v62 }
 0xbd3   :  { %v1853_v3 = vrot.slane %v1761_v4, 6  ;;  %v1854_v10 = vrot.slane %v1761_v4, 7 }
 0xbd5   :  { %1857 = vrot.lane.b32.xlu2 %v1854_v10, %s6099_s3  ;;  %1855 = vrot.lane.b32.xlu1 %v1853_v3, %s6099_s3 }
 0xbdd   :  { %1941 = vrot.lane.b32.xlu2 %v1853_v3, %s6101_s27 }
 0xc44   :  { %v1737_v38 = vpop.f32.mrf.mxu2 }
 0xc45   :  { %v1738_v53 = vadd.f32 %v6696_v1, %v1737_v38  ;;  %v6862_v1 = vpop.permute.xlu2 %1857 }
 0xc46   :  { %v1862_v21 = vadd.f32 %v6862_v1, %v6341_v28 }
 0xc47   :  { %v1764_v19 = vrot.slane %v1738_v53, 3  ;;  %v1765_v37 = vrot.slane %v1738_v53, 4  ;;  %v6855_v56 = vpop.permute.xlu1 %1855 }
 0xc48   :  { %v1861_v2 = vadd.f32 %v6855_v56, %v6344_v30  ;;  %v5450_v16 = vmul.f32 -1.442695, %v1862_v21 }
 0xc49   :  { %1808 = vrot.lane.b32.xlu0 %v1764_v19, %s6100_s26  ;;  %1810 = vrot.lane.b32.xlu1 %v1765_v37, %s6100_s26  ;;  %v1768_v29 = vadd.f32 %v1764_v19, %v6344_v30  ;;  %v1769_v14 = vadd.f32 %v1765_v37, %v6341_v28 }
 0xc4a   :  { %v5449_v26 = vmul.f32 -1.442695, %v1861_v2 }
 0xc4b   :  { %v5447_v39 = vmul.f32 -1.442695, %v1768_v29  ;;  %v5448_v40 = vmul.f32 -1.442695, %v1769_v14 }
 0xc4c   :  { %5716 = vpow2.f32 %v5449_v26 }
 0xc4d   :  { %v1942_v48 = vpop.permute.xlu2 %1941 }
 0xc51   :  { %1943 = vrot.lane.b32.xlu0 %v1854_v10, %s6101_s27 }
 0xc52   :  { %v5717_v5 = vpop.eup %5716 }
 0xc53   :  { %v1869_v27 = vadd.f32 1.0, %v5717_v5 }
 0xc55   :  { %5718 = vrcp.f32 %v1869_v27  ;;  %v1882_v15 = vand.u32 2147483648, %v1869_v27  ;;  %v1880_v13 = vand.u32 2147483647, %v1869_v27  ;;  %vm1876_vm4 = vweird.f32 %v1869_v27 }
 0xc56   :  { %5720 = vpow2.f32 %v5447_v39 }
 0xc57   :  { %v1883_v47 = vor.u32 1.1754944e-38, %v1882_v15  ;;  %vm1881_vm6 = vcmp.eq.f32.partialorder %v1880_v13, 8.507059e+37  ;;  %5722 = vpow2.f32 %v5448_v40 }
 0xc58   :  { %5724 = vpow2.f32 %v5450_v16 }
 0xc5b   :  { %v5719_v51 = vpop.eup %5718 }
 0xc5c   :  { %v1872_v58 = vmul.f32 %v5719_v51, %v1869_v27  ;;  %vm1877_vm3 = vweird.f32 %v5719_v51  ;;  %v5721_v22 = vpop.eup %5720 }
 0xc5d   :  { %vm1878_vm5 = vmor %vm1876_vm4, %vm1877_vm3  ;;  %v5723_v6 = vpop.eup %5722  ;;  %v1776_v49 = vadd.f32 1.0, %v5721_v22 }
 0xc5e   :  { %v1873_v43 = vsub.f32 1.0, %v1872_v58  ;;  %v1777_v17 = vadd.f32 1.0, %v5723_v6  ;;  %v5725_v24 = vpop.eup %5724 }
 0xc5f   :  { %5726 = vrcp.f32 %v1776_v49  ;;  %v1870_v31 = vadd.f32 1.0, %v5725_v24  ;;  %vm1783_vm9 = vweird.f32 %v1776_v49 }
 0xc60   :  { %v1874_v55 = vmul.f32 %v5719_v51, %v1873_v43  ;;  %5728 = vrcp.f32 %v1777_v17  ;;  %v1804_v58 = vand.u32 2147483648, %v1777_v17  ;;  %v1787_v43 = vand.u32 2147483647, %v1776_v49 }
 0xc61   :  { %5730 = vrcp.f32 %v1870_v31  ;;  %vm1798_vm12 = vweird.f32 %v1777_v17  ;;  %v1802_v15 = vand.u32 2147483647, %v1777_v17  ;;  %v1897_v21 = vand.u32 2147483648, %v1870_v31 }
 0xc62   :  { %v1875_v7 = vadd.f32 %v5719_v51, %v1874_v55  ;;  %vm1788_vm14 = vcmp.eq.f32.partialorder %v1787_v43, 8.507059e+37  ;;  %vm1891_vm3 = vweird.f32 %v1870_v31  ;;  %v1895_v16 = vand.u32 2147483647, %v1870_v31 }
 0xc63   :  { %vm1803_vm15 = vcmp.eq.f32.partialorder %v1802_v15, 8.507059e+37  ;;  %v1898_v6 = vor.u32 1.1754944e-38, %v1897_v21 }
 0xc64   :  { %v1879_v20 = vsel %vm1878_vm5, %v5719_v51, %v1875_v7  ;;  %v1789_v51 = vand.u32 2147483648, %v1776_v49  ;;  %vm1896_vm5 = vcmp.eq.f32.partialorder %v1895_v16, 8.507059e+37 }
 0xc65   :  { %v1884_v11 = vsel %vm1881_vm6, %v1883_v47, %v1879_v20  ;;  %v5727_v57 = vpop.eup %5726  ;;  %v1805_v20 = vor.u32 1.1754944e-38, %v1804_v58  ;;  %v1902_v58 = vadd.f32 %v6862_v1, %v6406_v0 }
 0xc66   :  { %v1947_v35 = vmul.f32 %v1942_v48, %v1884_v11  ;;  %v5729_v62 = vpop.eup %5728  ;;  %v1779_v4 = vmul.f32 %v5727_v57, %v1776_v49  ;;  %vm1784_vm7 = vweird.f32 %v5727_v57  ;;  %v1790_v47 = vor.u32 1.1754944e-38, %v1789_v51 }
 0xc67   :  { %v1794_v3 = vmul.f32 %v5729_v62, %v1777_v17  ;;  %v5731_v53 = vpop.eup %5730  ;;  %vm1799_vm8 = vweird.f32 %v5729_v62  ;;  %vm1785_vm10 = vmor %vm1783_vm9, %vm1784_vm7  ;;  %v1901_v51 = vadd.f32 %v6855_v56, %v6413_v25  ;;  %v5452_v15 = vmul.f32 -1.442695, %v1902_v58 }
 0xc68   :  { %1951 = vrot.lane.b32.xlu0 %v1947_v35, %s6100_s26  ;;  %v1780_v10 = vsub.f32 1.0, %v1779_v4  ;;  %v1887_v2 = vmul.f32 %v5731_v53, %v1870_v31  ;;  %vm1800_vm13 = vmor %vm1798_vm12, %vm1799_vm8  ;;  %vm1892_vm1 = vweird.f32 %v5731_v53 }
 0xc69   :  { %v1795_v38 = vsub.f32 1.0, %v1794_v3  ;;  %vm1893_vm4 = vmor %vm1891_vm3, %vm1892_vm1  ;;  %v5451_v43 = vmul.f32 -1.442695, %v1901_v51 }
 0xc6a   :  { %v1781_v19 = vmul.f32 %v5727_v57, %v1780_v10  ;;  %v1888_v27 = vsub.f32 1.0, %v1887_v2 }
 0xc6b   :  { %v1796_v37 = vmul.f32 %v5729_v62, %v1795_v38 }
 0xc6c   :  { %v1782_v26 = vadd.f32 %v5727_v57, %v1781_v19  ;;  %v1889_v7 = vmul.f32 %v5731_v53, %v1888_v27 }
 0xc6d   :  { %v1797_v5 = vadd.f32 %v5729_v62, %v1796_v37 }
 0xc6e   :  { %v1786_v55 = vsel %vm1785_vm10, %v5727_v57, %v1782_v26  ;;  %v1890_v40 = vadd.f32 %v5731_v53, %v1889_v7  ;;  %v1840_v57 = vrot.slane %v6846_v9, 3 }
 0xc6f   :  { %v1801_v13 = vsel %vm1800_vm13, %v5729_v62, %v1797_v5  ;;  %v6869_v11 = vsel %vm1788_vm14, %v1790_v47, %v1786_v55  ;;  %v1841_v5 = vrot.slane %v6846_v9, 4 }
 0xc70   :  { %v6871_v35 = vsel %vm1803_vm15, %v1805_v20, %v1801_v13  ;;  %v1894_v22 = vsel %vm1893_vm4, %v5731_v53, %v1890_v40 }
 0xc71   :  { %v1899_v17 = vsel %vm1896_vm5, %v1898_v6, %v1894_v22  ;;  %v1829_v16 = vsub.f32 1.0, %v6871_v35 }
 0xcbb   :  { %v1809_v48 = vpop.permute.xlu0 %1808  ;;  %v1811_v29 = vpop.permute.xlu1 %1810 }
 0xcbc   :  { %v1814_v14 = vmul.f32 %v1809_v48, %v6869_v11  ;;  %v1815_v39 = vmul.f32 %v1811_v29, %v6871_v35  ;;  %v1828_v29 = vsub.f32 1.0, %v6869_v11 }
 0xcbe   :  { %1818 = vrot.lane.b32.xlu1 %v1814_v14, %s6100_s26  ;;  %1820 = vrot.lane.b32.xlu2 %v1815_v39, %s6100_s26 }
 0xcc3   :  { %v1944_v49 = vpop.permute.xlu0 %1943 }
 0xcc4   :  { %v1948_v24 = vmul.f32 %v1944_v49, %v1899_v17 }
 0xcc6   :  { %1953 = vrot.lane.b32.xlu1 %v1948_v24, %s6100_s26 }
 0xcce   :  { %1842 = vrot.lane.b32.xlu1 %v1840_v57, %s6101_s27 }
 0xcda   :  { %v1952_v3 = vpop.permute.xlu0 %1951 }
 0xcdb   :  { %v1957_v31 = vadd.f32 %v1952_v3, %v6413_v25 }
 0xd18   :  { %v1821_v62 = vpop.permute.xlu2 %1820 }
 0xd19   :  { %v1825_v4 = vadd.f32 %v1821_v62, %v6341_v28 }
 0xd1b   :  { %5732 = vtanh.f32 %v1825_v4 }
 0xd1c   :  { %5734 = vtanh.f32 %v1957_v31 }
 0xd21   :  { %v5733_v10 = vpop.eup %5732 }
 0xd22   :  { %1834 = vrot.lane.b32.xlu0 %v5733_v10, %s6099_s3  ;;  %v5735_v38 = vpop.eup %5734 }
 0xd2a   :  { %1965 = vrot.lane.b32.xlu0 %v5735_v38, %s6099_s3 }
 0xd30   :  { %v1819_v53 = vpop.permute.xlu1 %1818 }
 0xd31   :  { %v1824_v19 = vadd.f32 %v1819_v53, %v6344_v30 }
 0xd33   :  { %5736 = vtanh.f32 %v1824_v19 }
 0xd38   :  { %v1954_v37 = vpop.permute.xlu1 %1953 }
 0xd39   :  { %v5737_v2 = vpop.eup %5736  ;;  %v1958_v26 = vadd.f32 %v1954_v37, %v6406_v0 }
 0xd3a   :  { %1832 = vrot.lane.b32.xlu2 %v5737_v2, %s6099_s3 }
 0xd3b   :  { %5738 = vtanh.f32 %v1958_v26 }
 0xd3c   :  { %5740 = vpow2.f32 %v5451_v43 }
 0xd3d   :  { %5742 = vpow2.f32 %v5452_v15 }
 0xd40   :  { %v1843_v14 = vpop.permute.xlu1 %1842 }
 0xd41   :  { %v5739_v27 = vpop.eup %5738  ;;  %v1848_v1 = vmul.f32 %v1843_v14, %v6869_v11  ;;  %v1974_v14 = vrot.slane %v6839_v23, 7 }
 0xd42   :  { %1844 = vrot.lane.b32.xlu2 %v1841_v5, %s6101_s27  ;;  %1967 = vrot.lane.b32.xlu1 %v5739_v27, %s6099_s3  ;;  %v5741_v55 = vpop.eup %5740 }
 0xd43   :  { %v5743_v13 = vpop.eup %5742  ;;  %v1909_v7 = vadd.f32 1.0, %v5741_v55 }
 0xd44   :  { %v1910_v47 = vadd.f32 1.0, %v5743_v13 }
 0xd45   :  { %5744 = vrcp.f32 %v1909_v7  ;;  %v1922_v19 = vand.u32 2147483648, %v1909_v7  ;;  %vm1916_vm7 = vweird.f32 %v1909_v7  ;;  %v1920_v37 = vand.u32 2147483647, %v1909_v7 }
 0xd46   :  { %5746 = vrcp.f32 %v1910_v47  ;;  %v1937_v5 = vand.u32 2147483648, %v1910_v47  ;;  %vm1931_vm12 = vweird.f32 %v1910_v47  ;;  %v1935_v27 = vand.u32 2147483647, %v1910_v47 }
 0xd47   :  { %vm1921_vm10 = vcmp.eq.f32.partialorder %v1920_v37, 8.507059e+37 }
 0xd48   :  { %v1938_v15 = vor.u32 1.1754944e-38, %v1937_v5  ;;  %vm1936_vm14 = vcmp.eq.f32.partialorder %v1935_v27, 8.507059e+37 }
 0xd4b   :  { %v5745_v48 = vpop.eup %5744 }
 0xd4c   :  { %v5747_v39 = vpop.eup %5746  ;;  %v1912_v40 = vmul.f32 %v5745_v48, %v1909_v7  ;;  %vm1917_vm6 = vweird.f32 %v5745_v48 }
 0xd4d   :  { %v1927_v6 = vmul.f32 %v5747_v39, %v1910_v47  ;;  %vm1918_vm8 = vmor %vm1916_vm7, %vm1917_vm6  ;;  %vm1932_vm9 = vweird.f32 %v5747_v39 }
 0xd4e   :  { %v1913_v24 = vsub.f32 1.0, %v1912_v40  ;;  %vm1933_vm13 = vmor %vm1931_vm12, %vm1932_vm9 }
 0xd4f   :  { %v1928_v10 = vsub.f32 1.0, %v1927_v6  ;;  %v1999_v6 = vmul.f32 %v6839_v23, %v6662_v63  ;;  %v6920_v63 = vld [vmem:[%s8149_s8] ss:$0 sm:$0xff] }
 0xd50   :  { %v1914_v3 = vmul.f32 %v5745_v48, %v1913_v24 }
 0xd51   :  { %v1929_v11 = vmul.f32 %v5747_v39, %v1928_v10 }
 0xd52   :  { %v1915_v53 = vadd.f32 %v5745_v48, %v1914_v3 }
 0xd53   :  { %v1930_v26 = vadd.f32 %v5747_v39, %v1929_v11 }
 0xd54   :  { %v1919_v2 = vsel %vm1918_vm8, %v5745_v48, %v1915_v53 }
 0xd55   :  { %v1934_v58 = vsel %vm1933_vm13, %v5747_v39, %v1930_v26 }
 0xd56   :  { %v1939_v13 = vsel %vm1936_vm14, %v1938_v15, %v1934_v58 }
 0xd57   :  { %v1962_v48 = vsub.f32 1.0, %v1939_v13 }
 0xd94   :  { %v1833_v20 = vpop.permute.xlu2 %1832  ;;  %v1835_v21 = vpop.permute.xlu0 %1834 }
 0xd95   :  { %v1838_v56 = vmul.f32 %v1833_v20, %v1828_v29  ;;  %v1839_v49 = vmul.f32 %v1835_v21, %v1829_v16  ;;  %v1973_v20 = vrot.slane %v6839_v23, 6  ;;  %v1978_v21 = vmul.f32 %v1974_v14, %v1939_v13 }
 0xd97   :  { %v1850_v17 = vadd.f32 %v1848_v1, %v1838_v56 }
 0xd99   :  { %v1983_v4 = vrot.slane %v1850_v17, 5 }
 0xd9c   :  { %v1845_v22 = vpop.permute.xlu2 %1844  ;;  %v1966_v43 = vpop.permute.xlu0 %1965 }
 0xd9d   :  { %v1849_v57 = vmul.f32 %v1845_v22, %v6871_v35  ;;  %v1923_v35 = vor.u32 1.1754944e-38, %v1922_v19 }
 0xd9f   :  { %v1851_v62 = vadd.f32 %v1849_v57, %v1839_v49  ;;  %v1924_v51 = vsel %vm1921_vm10, %v1923_v35, %v1919_v2  ;;  %v1990_v57 = vmul.f32 %v6846_v9, %v6654_v44 }
 0xda0   :  { %v1961_v55 = vsub.f32 1.0, %v1924_v51  ;;  %v1977_v29 = vmul.f32 %v1973_v20, %v1924_v51 }
 0xda1   :  { %v1984_v31 = vrot.slane %v1851_v62, 4 }
 0xda2   :  { %v1971_v7 = vmul.f32 %v1966_v43, %v1961_v55 }
 0xda3   :  { %v1985_v38 = vsel %vm408_vm2, %v1984_v31, %v1983_v4 }
 0xda4   :  { %1986 = vrot.lane.b32.xlu2 %v1985_v38, %s6099_s3  ;;  %v1979_v40 = vadd.f32 %v1977_v29, %v1971_v7  ;;  %v6929_v38 = vld [vmem:[%s8147_s6] ss:$0 sm:$0xff] }
 0xda6   :  { %v1994_v16 = vrot.slane %v1979_v40, 2 }
 0xdb4   :  { %v1968_v56 = vpop.permute.xlu1 %1967 }
 0xdb5   :  { %v1972_v1 = vmul.f32 %v1968_v56, %v1962_v48 }
 0xdb7   :  { %v1980_v47 = vadd.f32 %v1978_v21, %v1972_v1 }
 0xdb9   :  { %v1995_v22 = vrot.slane %v1980_v47, 1 }
 0xdbb   :  { %v1996_v39 = vsel %vm408_vm2, %v1995_v22, %v1994_v16 }
 0xdbc   :  { %v1998_v49 = vmul.f32 %v1996_v39, %v6651_v41 }
 0xdbe   :  { %v6906_v17 = vadd.f32 %v1999_v6, %v1998_v49 }
 0xdc0   :  { %5454 = vmatmul.msk.f32.vlgmr.msrb.gmra.mxu1 %vm83_vm0, %v6906_v17 }
 0xdfe   :  { %v1987_v24 = vpop.permute.xlu2 %1986 }
 0xdff   :  { %v1989_v62 = vmul.f32 %v1987_v24, %v6656_v18 }
 0xe01   :  { %v6913_v4 = vadd.f32 %v1990_v57, %v1989_v62 }
 0xe03   :  { %5453 = vmatmul.msk.f32.vlgmr.msrb.gmra.mxu0 %vm83_vm0, %v6913_v4 }
 0xe3d   :  { %v2063_v3 = vpop.f32.mrf.mxu1 }
 0xe3e   :  { %v2064_v31 = vadd.f32 %v6920_v63, %v2063_v3 }
 0xe40   :  { %2159 = vrot.lane.b32.xlu1 %v2064_v31, %s6099_s3  ;;  %v2156_v10 = vrot.slane %v2064_v31, 7 }
 0xe42   :  { %2157 = vrot.lane.b32.xlu0 %v2156_v10, %s6099_s3 }
 0xe48   :  { %2243 = vrot.lane.b32.xlu1 %v2156_v10, %s6101_s27 }
 0xe80   :  { %v2040_v44 = vpop.f32.mrf.mxu0 }
 0xe81   :  { %v2041_v53 = vadd.f32 %v6929_v38, %v2040_v44 }
 0xe83   :  { %v2067_v11 = vrot.slane %v2041_v53, 2  ;;  %v2068_v19 = vrot.slane %v2041_v53, 3 }
 0xe85   :  { %2111 = vrot.lane.b32.xlu2 %v2067_v11, %s6100_s26  ;;  %2113 = vrot.lane.b32.xlu0 %v2068_v19, %s6100_s26  ;;  %v2071_v37 = vadd.f32 %v2067_v11, %v6344_v30  ;;  %v2072_v7 = vadd.f32 %v2068_v19, %v6341_v28 }
 0xe87   :  { %v5455_v2 = vmul.f32 -1.442695, %v2071_v37  ;;  %v5456_v40 = vmul.f32 -1.442695, %v2072_v7 }
 0xe89   :  { %5748 = vpow2.f32 %v5455_v2 }
 0xe8d   :  { %2245 = vrot.lane.b32.xlu2 %v2064_v31, %s6101_s27 }
 0xe8f   :  { %v5749_v43 = vpop.eup %5748 }
 0xe90   :  { %v2079_v55 = vadd.f32 1.0, %v5749_v43 }
 0xe92   :  { %v2092_v2 = vand.u32 2147483648, %v2079_v55  ;;  %vm2086_vm6 = vweird.f32 %v2079_v55 }
 0xeb2   :  { %v6936_v26 = vpop.permute.xlu1 %2159 }
 0xeb3   :  { %v2164_v27 = vadd.f32 %v6936_v26, %v6341_v28 }
 0xeb4   :  { %v6938_v35 = vpop.permute.xlu0 %2157 }
 0xeb5   :  { %v2163_v5 = vadd.f32 %v6938_v35, %v6344_v30  ;;  %v5458_v58 = vmul.f32 -1.442695, %v2164_v27 }
 0xeb7   :  { %v5457_v51 = vmul.f32 -1.442695, %v2163_v5  ;;  %v2090_v5 = vand.u32 2147483647, %v2079_v55 }
 0xeb9   :  { %5750 = vpow2.f32 %v5457_v51  ;;  %vm2091_vm8 = vcmp.eq.f32.partialorder %v2090_v5, 8.507059e+37 }
 0xeba   :  { %5752 = vpow2.f32 %v5458_v58  ;;  %v2244_v62 = vpop.permute.xlu1 %2243  ;;  %v2093_v58 = vor.u32 1.1754944e-38, %v2092_v2 }
 0xebf   :  { %v5751_v15 = vpop.eup %5750 }
 0xec0   :  { %v2171_v13 = vadd.f32 1.0, %v5751_v15  ;;  %v5753_v20 = vpop.eup %5752 }
 0xec1   :  { %v2172_v29 = vadd.f32 1.0, %v5753_v20 }
 0xec2   :  { %5754 = vrcp.f32 %v2171_v13  ;;  %v2184_v1 = vand.u32 2147483648, %v2171_v13  ;;  %v2182_v22 = vand.u32 2147483647, %v2171_v13  ;;  %vm2178_vm1 = vweird.f32 %v2171_v13 }
 0xec3   :  { %5756 = vrcp.f32 %v2079_v55  ;;  %vm2193_vm10 = vweird.f32 %v2172_v29 }
 0xec4   :  { %5758 = vrcp.f32 %v2172_v29  ;;  %v2185_v6 = vor.u32 1.1754944e-38, %v2184_v1  ;;  %vm2183_vm4 = vcmp.eq.f32.partialorder %v2182_v22, 8.507059e+37 }
 0xec5   :  { %5760 = vpow2.f32 %v5456_v40 }
 0xec8   :  { %v5755_v48 = vpop.eup %5754 }
 0xec9   :  { %v5757_v14 = vpop.eup %5756  ;;  %v2174_v56 = vmul.f32 %v5755_v48, %v2171_v13  ;;  %vm2179_vm15 = vweird.f32 %v5755_v48 }
 0xeca   :  { %v2082_v47 = vmul.f32 %v5757_v14, %v2079_v55  ;;  %vm2180_vm3 = vmor %vm2178_vm1, %vm2179_vm15  ;;  %v5759_v24 = vpop.eup %5758  ;;  %vm2087_vm5 = vweird.f32 %v5757_v14 }
 0xecb   :  { %v2175_v21 = vsub.f32 1.0, %v2174_v56  ;;  %v5761_v10 = vpop.eup %5760  ;;  %v2189_v53 = vmul.f32 %v5759_v24, %v2172_v29  ;;  %vm2088_vm7 = vmor %vm2086_vm6, %vm2087_vm5  ;;  %vm2194_vm9 = vweird.f32 %v5759_v24  ;;  %v2197_v56 = vand.u32 2147483647, %v2172_v29 }
 0xecc   :  { %v2083_v49 = vsub.f32 1.0, %v2082_v47  ;;  %v2080_v11 = vadd.f32 1.0, %v5761_v10  ;;  %vm2195_vm12 = vmor %vm2193_vm10, %vm2194_vm9 }
 0xecd   :  { %v2176_v16 = vmul.f32 %v5755_v48, %v2175_v21  ;;  %v2190_v37 = vsub.f32 1.0, %v2189_v53  ;;  %vm2198_vm13 = vcmp.eq.f32.partialorder %v2197_v56, 8.507059e+37 }
 0xece   :  { %v2084_v44 = vmul.f32 %v5757_v14, %v2083_v49  ;;  %5762 = vrcp.f32 %v2080_v11  ;;  %v2107_v49 = vand.u32 2147483648, %v2080_v11  ;;  %vm2101_vm15 = vweird.f32 %v2080_v11 }
 0xecf   :  { %v2177_v39 = vadd.f32 %v5755_v48, %v2176_v16  ;;  %v2191_v51 = vmul.f32 %v5759_v24, %v2190_v37 }
 0xed0   :  { %v2085_v19 = vadd.f32 %v5757_v14, %v2084_v44 }
 0xed1   :  { %v2181_v57 = vsel %vm2180_vm3, %v5755_v48, %v2177_v39  ;;  %v2192_v20 = vadd.f32 %v5759_v24, %v2191_v51  ;;  %v2199_v48 = vand.u32 2147483648, %v2172_v29  ;;  %v2143_v39 = vrot.slane %v6913_v4, 2 }
 0xed2   :  { %v2186_v3 = vsel %vm2183_vm4, %v2185_v6, %v2181_v57  ;;  %v2089_v27 = vsel %vm2088_vm7, %v5757_v14, %v2085_v19  ;;  %v2105_v29 = vand.u32 2147483647, %v2080_v11  ;;  %v2108_v57 = vor.u32 1.1754944e-38, %v2107_v49 }
 0xed3   :  { %v2249_v31 = vmul.f32 %v2244_v62, %v2186_v3  ;;  %v6946_v15 = vsel %vm2091_vm8, %v2093_v58, %v2089_v27  ;;  %v2196_v55 = vsel %vm2195_vm12, %v5759_v24, %v2192_v20  ;;  %v2200_v14 = vor.u32 1.1754944e-38, %v2199_v48 }
 0xed4   :  { %v5763_v7 = vpop.eup %5762  ;;  %vm2106_vm3 = vcmp.eq.f32.partialorder %v2105_v29, 8.507059e+37  ;;  %v2203_v20 = vadd.f32 %v6938_v35, %v6413_v25 }
 0xed5   :  { %2253 = vrot.lane.b32.xlu2 %v2249_v31, %s6100_s26  ;;  %v2097_v40 = vmul.f32 %v5763_v7, %v2080_v11  ;;  %v2201_v1 = vsel %vm2198_vm13, %v2200_v14, %v2196_v55  ;;  %vm2102_vm14 = vweird.f32 %v5763_v7  ;;  %v2144_v11 = vrot.slane %v6913_v4, 3 }
 0xed6   :  { %vm2103_vm1 = vmor %vm2101_vm15, %vm2102_vm14  ;;  %v5459_v48 = vmul.f32 -1.442695, %v2203_v20 }
 0xed7   :  { %v2098_v16 = vsub.f32 1.0, %v2097_v40 }
 0xed9   :  { %v2099_v22 = vmul.f32 %v5763_v7, %v2098_v16 }
 0xedb   :  { %v2100_v6 = vadd.f32 %v5763_v7, %v2099_v22 }
 0xedd   :  { %v2104_v24 = vsel %vm2103_vm1, %v5763_v7, %v2100_v6  ;;  %v2204_v7 = vadd.f32 %v6936_v26, %v6406_v0 }
 0xede   :  { %v6953_v62 = vsel %vm2106_vm3, %v2108_v57, %v2104_v24 }
 0xedf   :  { %v2112_v43 = vpop.permute.xlu2 %2111  ;;  %v5460_v56 = vmul.f32 -1.442695, %v2204_v7  ;;  %v2132_v20 = vsub.f32 1.0, %v6953_v62 }
 0xee0   :  { %v2117_v13 = vmul.f32 %v2112_v43, %v6946_v15 }
 0xee2   :  { %2121 = vrot.lane.b32.xlu0 %v2117_v13, %s6100_s26 }
 0xee7   :  { %v2246_v21 = vpop.permute.xlu2 %2245 }
 0xee8   :  { %v2250_v47 = vmul.f32 %v2246_v21, %v2201_v1 }
 0xeea   :  { %2255 = vrot.lane.b32.xlu0 %v2250_v47, %s6100_s26 }
 0xef2   :  { %2145 = vrot.lane.b32.xlu0 %v2143_v39, %s6101_s27 }
 0xef7   :  { %v2114_v3 = vpop.permute.xlu0 %2113 }
 0xef8   :  { %v2118_v31 = vmul.f32 %v2114_v3, %v6953_v62 }
 0xefa   :  { %2123 = vrot.lane.b32.xlu1 %v2118_v31, %s6100_s26 }
 0xf2f   :  { %v2254_v51 = vpop.permute.xlu2 %2253 }
 0xf30   :  { %v2259_v58 = vadd.f32 %v2254_v51, %v6413_v25 }
 0xf54   :  { %v2122_v10 = vpop.permute.xlu0 %2121 }
 0xf55   :  { %v2127_v44 = vadd.f32 %v2122_v10, %v6344_v30 }
 0xf57   :  { %5764 = vtanh.f32 %v2127_v44 }
 0xf5c   :  { %v2256_v53 = vpop.permute.xlu0 %2255 }
 0xf5d   :  { %v5765_v19 = vpop.eup %5764  ;;  %v2260_v37 = vadd.f32 %v2256_v53, %v6406_v0 }
 0xf5e   :  { %2135 = vrot.lane.b32.xlu1 %v5765_v19, %s6099_s3 }
 0xf5f   :  { %5766 = vtanh.f32 %v2260_v37 }
 0xf64   :  { %v2146_v53 = vpop.permute.xlu0 %2145 }
 0xf65   :  { %v5767_v2 = vpop.eup %5766 }
 0xf66   :  { %2147 = vrot.lane.b32.xlu1 %v2144_v11, %s6101_s27  ;;  %2269 = vrot.lane.b32.xlu0 %v5767_v2, %s6099_s3  ;;  %v2131_v2 = vsub.f32 1.0, %v6946_v15 }
 0xf6c   :  { %v2124_v5 = vpop.permute.xlu1 %2123 }
 0xf6d   :  { %v2128_v27 = vadd.f32 %v2124_v5, %v6341_v28 }
 0xf6f   :  { %5768 = vtanh.f32 %v2128_v27 }
 0xf70   :  { %5770 = vtanh.f32 %v2259_v58 }
 0xf71   :  { %5772 = vpow2.f32 %v5459_v48 }
 0xf72   :  { %5774 = vpow2.f32 %v5460_v56 }
 0xf75   :  { %v5769_v43 = vpop.eup %5768 }
 0xf76   :  { %2137 = vrot.lane.b32.xlu2 %v5769_v43, %s6099_s3  ;;  %v5771_v13 = vpop.eup %5770  ;;  %v2275_v43 = vrot.slane %v6906_v17, 7 }
 0xf77   :  { %v5773_v55 = vpop.eup %5772 }
 0xf78   :  { %v5775_v40 = vpop.eup %5774  ;;  %v2211_v14 = vadd.f32 1.0, %v5773_v55 }
 0xf79   :  { %v2212_v21 = vadd.f32 1.0, %v5775_v40 }
 0xf7a   :  { %5776 = vrcp.f32 %v2211_v14  ;;  %v2224_v26 = vand.u32 2147483648, %v2211_v14  ;;  %vm2218_vm6 = vweird.f32 %v2211_v14  ;;  %v2222_v57 = vand.u32 2147483647, %v2211_v14 }
 0xf7b   :  { %5778 = vrcp.f32 %v2212_v21  ;;  %v2239_v3 = vand.u32 2147483648, %v2212_v21  ;;  %vm2233_vm8 = vweird.f32 %v2212_v21  ;;  %v2237_v44 = vand.u32 2147483647, %v2212_v21 }
 0xf7c   :  { %v2225_v37 = vor.u32 1.1754944e-38, %v2224_v26  ;;  %vm2223_vm10 = vcmp.eq.f32.partialorder %v2222_v57, 8.507059e+37 }
 0xf7d   :  { %v2240_v5 = vor.u32 1.1754944e-38, %v2239_v3  ;;  %vm2238_vm12 = vcmp.eq.f32.partialorder %v2237_v44, 8.507059e+37  ;;  %v2299_v3 = vmul.f32 %v6906_v17, %v6515_v52  ;;  %v2291_v44 = vmul.f32 %v6913_v4, %v6554_v8 }
 0xf7e   :  { %2267 = vrot.lane.b32.xlu2 %v5771_v13, %s6099_s3  ;;  %v2151_v13 = vmul.f32 %v2146_v53, %v6946_v15 }
 0xf80   :  { %v5777_v1 = vpop.eup %5776 }
 0xf81   :  { %v5779_v47 = vpop.eup %5778  ;;  %v2214_v16 = vmul.f32 %v5777_v1, %v2211_v14  ;;  %vm2219_vm4 = vweird.f32 %v5777_v1 }
 0xf82   :  { %v2229_v22 = vmul.f32 %v5779_v47, %v2212_v21  ;;  %vm2234_vm5 = vweird.f32 %v5779_v47  ;;  %vm2220_vm7 = vmor %vm2218_vm6, %vm2219_vm4 }
 0xf83   :  { %v2215_v39 = vsub.f32 1.0, %v2214_v16  ;;  %vm2235_vm9 = vmor %vm2233_vm8, %vm2234_vm5 }
 0xf84   :  { %v2230_v6 = vsub.f32 1.0, %v2229_v22 }
 0xf85   :  { %v2216_v35 = vmul.f32 %v5777_v1, %v2215_v39 }
 0xf86   :  { %v2231_v49 = vmul.f32 %v5779_v47, %v2230_v6 }
 0xf87   :  { %v2217_v29 = vadd.f32 %v5777_v1, %v2216_v35 }
 0xf88   :  { %v2232_v24 = vadd.f32 %v5779_v47, %v2231_v49 }
 0xf89   :  { %v2221_v19 = vsel %vm2220_vm7, %v5777_v1, %v2217_v29 }
 0xf8a   :  { %v2236_v11 = vsel %vm2235_vm9, %v5779_v47, %v2232_v24  ;;  %v2226_v27 = vsel %vm2223_vm10, %v2225_v37, %v2221_v19 }
 0xf8b   :  { %v2241_v58 = vsel %vm2238_vm12, %v2240_v5, %v2236_v11  ;;  %v2263_v7 = vsub.f32 1.0, %v2226_v27  ;;  %v2278_v48 = vmul.f32 %v2275_v43, %v2226_v27 }
 0xf8c   :  { %v2264_v40 = vsub.f32 1.0, %v2241_v58  ;;  %v2279_v35 = vmul.f32 %v2241_v58, %v6906_v17 }
 0xfd0   :  { %v2138_v31 = vpop.permute.xlu2 %2137  ;;  %v2136_v10 = vpop.permute.xlu1 %2135 }
 0xfd1   :  { %v2141_v51 = vmul.f32 %v2136_v10, %v2131_v2  ;;  %v2142_v14 = vmul.f32 %v2138_v31, %v2132_v20 }
 0xfd3   :  { %v2153_v21 = vadd.f32 %v2151_v13, %v2141_v51 }
 0xfd5   :  { %v2284_v49 = vrot.slane %v2153_v21, 6 }
 0xfd8   :  { %v2268_v56 = vpop.permute.xlu2 %2267  ;;  %v2148_v55 = vpop.permute.xlu1 %2147 }
 0xfd9   :  { %v2273_v1 = vmul.f32 %v2268_v56, %v2263_v7  ;;  %v2152_v47 = vmul.f32 %v2148_v55, %v6953_v62  ;;  %v2270_v16 = vpop.permute.xlu0 %2269 }
 0xfda   :  { %v2274_v22 = vmul.f32 %v2270_v16, %v2264_v40 }
 0xfdb   :  { %v2280_v39 = vadd.f32 %v2278_v48, %v2273_v1  ;;  %v2154_v6 = vadd.f32 %v2152_v47, %v2142_v14 }
 0xfdc   :  { %v2281_v26 = vadd.f32 %v2279_v35, %v2274_v22 }
 0xfdd   :  { %v2295_v15 = vrot.slane %v2280_v39, 1  ;;  %v2285_v29 = vrot.slane %v2154_v6, 5 }
 0xfdf   :  { %v2296_v24 = vsel %vm408_vm2, %v2281_v26, %v2295_v15  ;;  %v2286_v57 = vsel %vm408_vm2, %v2285_v29, %v2284_v49 }
 0xfe0   :  { %v2298_v31 = vmul.f32 %v2296_v24, %v6513_v50  ;;  %2287 = vrot.lane.b32.xlu1 %v2286_v57, %s6099_s3 }
 0xfe2   :  { %v6983_v62 = vadd.f32 %v2299_v3, %v2298_v31 }
 0xfe4   :  { %5462 = vmatmul.msk.f32.vlgmr.msra.gmra.mxu3 %vm83_vm0, %v6983_v62 }
0x1052   :  { %v2288_v10 = vpop.permute.xlu1 %2287 }
0x1053   :  { %v2290_v53 = vmul.f32 %v2288_v10, %v6556_v42 }
0x1055   :  { %v6990_v19 = vadd.f32 %v2291_v44, %v2290_v53 }
0x1057   :  { %5461 = vmatmul.msk.f32.vlgmr.msra.gmra.mxu2 %vm83_vm0, %v6990_v19 }
0x1067   :  { %v2363_v52 = vpop.f32.mrf.mxu3 }
0x1068   :  { %v2364_v37 = vadd.f32 %v6920_v63, %v2363_v52 }
0x106a   :  { %2457 = vrot.lane.b32.xlu0 %v2364_v37, %s6099_s3  ;;  %v2456_v11 = vrot.slane %v2364_v37, 1 }
0x106c   :  { %2459 = vrot.lane.b32.xlu2 %v2456_v11, %s6099_s3 }
0x1072   :  { %2545 = vrot.lane.b32.xlu0 %v2456_v11, %s6101_s27 }
0x10c6   :  { %v6998_v2 = vpop.permute.xlu2 %2459 }
0x10c7   :  { %v2464_v8 = vadd.f32 %v6998_v2, %v6341_v28 }
0x10c9   :  { %v5466_v5 = vmul.f32 -1.442695, %v2464_v8 }
0x10cb   :  { %5780 = vpow2.f32 %v5466_v5 }
0x10d1   :  { %v5781_v27 = vpop.eup %5780 }
0x10d2   :  { %v2472_v51 = vadd.f32 1.0, %v5781_v27 }
0x10d4   :  { %5782 = vrcp.f32 %v2472_v51  ;;  %v2499_v14 = vand.u32 2147483648, %v2472_v51  ;;  %vm2493_vm14 = vweird.f32 %v2472_v51  ;;  %v2497_v21 = vand.u32 2147483647, %v2472_v51 }
0x10d6   :  { %vm2498_vm1 = vcmp.eq.f32.partialorder %v2497_v21, 8.507059e+37 }
0x10da   :  { %v5783_v58 = vpop.eup %5782  ;;  %v2340_v43 = vpop.f32.mrf.mxu2 }
0x10db   :  { %v2341_v63 = vadd.f32 %v6929_v38, %v2340_v43  ;;  %v2489_v13 = vmul.f32 %v5783_v58, %v2472_v51  ;;  %vm2494_vm13 = vweird.f32 %v5783_v58  ;;  %v2500_v38 = vor.u32 1.1754944e-38, %v2499_v14 }
0x10dc   :  { %v7005_v56 = vpop.permute.xlu0 %2457  ;;  %vm2495_vm15 = vmor %vm2493_vm14, %vm2494_vm13 }
0x10dd   :  { %v2367_v20 = vrot.slane %v2341_v63, 1  ;;  %v2368_v7 = vrot.slane %v2341_v63, 2  ;;  %v2490_v48 = vsub.f32 1.0, %v2489_v13  ;;  %v2463_v57 = vadd.f32 %v7005_v56, %v6344_v30 }
0x10df   :  { %2411 = vrot.lane.b32.xlu1 %v2367_v20, %s6100_s26  ;;  %2413 = vrot.lane.b32.xlu2 %v2368_v7, %s6100_s26  ;;  %v2491_v55 = vmul.f32 %v5783_v58, %v2490_v48  ;;  %v2372_v39 = vadd.f32 %v2368_v7, %v6341_v28  ;;  %v2371_v15 = vadd.f32 %v2367_v20, %v6344_v30  ;;  %v5465_v31 = vmul.f32 -1.442695, %v2463_v57 }
0x10e1   :  { %v2492_v40 = vadd.f32 %v5783_v58, %v2491_v55  ;;  %v5464_v6 = vmul.f32 -1.442695, %v2372_v39  ;;  %v5463_v26 = vmul.f32 -1.442695, %v2371_v15 }
0x10e3   :  { %v2496_v1 = vsel %vm2495_vm15, %v5783_v58, %v2492_v40  ;;  %5784 = vpow2.f32 %v5464_v6 }
0x10e4   :  { %v2546_v47 = vpop.permute.xlu0 %2545  ;;  %v2501_v16 = vsel %vm2498_vm1, %v2500_v38, %v2496_v1  ;;  %vm457_vm1 = vcmask 516352  }
0x10e5   :  { %v2550_v22 = vmul.f32 %v2546_v47, %v2501_v16 }
0x10e7   :  { %2543 = vrot.lane.b32.xlu1 %v2364_v37, %s6101_s27 }
0x10e9   :  { %v5785_v35 = vpop.eup %5784 }
0x10ea   :  { %v2380_v49 = vadd.f32 1.0, %v5785_v35 }
0x10ec   :  { %5786 = vrcp.f32 %v2380_v49  ;;  %v2407_v37 = vand.u32 2147483648, %v2380_v49  ;;  %vm2401_vm4 = vweird.f32 %v2380_v49  ;;  %v2405_v11 = vand.u32 2147483647, %v2380_v49 }
0x10ed   :  { %5788 = vpow2.f32 %v5463_v26 }
0x10ee   :  { %5790 = vpow2.f32 %v5465_v31  ;;  %v2408_v27 = vor.u32 1.1754944e-38, %v2407_v37  ;;  %vm2406_vm6 = vcmp.eq.f32.partialorder %v2405_v11, 8.507059e+37 }
0x10ef   :  { %2555 = vrot.lane.b32.xlu1 %v2550_v22, %s6100_s26 }
0x10f2   :  { %v5787_v29 = vpop.eup %5786 }
0x10f3   :  { %v2397_v24 = vmul.f32 %v5787_v29, %v2380_v49  ;;  %v5789_v10 = vpop.eup %5788  ;;  %vm2402_vm3 = vweird.f32 %v5787_v29 }
0x10f4   :  { %v2379_v53 = vadd.f32 1.0, %v5789_v10  ;;  %vm2403_vm5 = vmor %vm2401_vm4, %vm2402_vm3  ;;  %v5791_v8 = vpop.eup %5790  ;;  %v2443_v10 = vrot.slane %v6990_v19, 1 }
0x10f5   :  { %v2398_v3 = vsub.f32 1.0, %v2397_v24  ;;  %v2471_v51 = vadd.f32 1.0, %v5791_v8 }
0x10f6   :  { %5792 = vrcp.f32 %v2379_v53  ;;  %v2392_v1 = vand.u32 2147483648, %v2379_v53  ;;  %vm2386_vm8 = vweird.f32 %v2379_v53  ;;  %v2390_v38 = vand.u32 2147483647, %v2379_v53 }
0x10f7   :  { %v2399_v44 = vmul.f32 %v5787_v29, %v2398_v3  ;;  %5794 = vrcp.f32 %v2471_v51  ;;  %v2484_v15 = vand.u32 2147483648, %v2471_v51  ;;  %vm2478_vm13 = vweird.f32 %v2471_v51 }
0x10f8   :  { %v2393_v22 = vor.u32 1.1754944e-38, %v2392_v1  ;;  %vm2391_vm10 = vcmp.eq.f32.partialorder %v2390_v38, 8.507059e+37  ;;  %v2503_v38 = vadd.f32 %v7005_v56, %v6413_v25 }
0x10f9   :  { %v2400_v52 = vadd.f32 %v5787_v29, %v2399_v44  ;;  %v2485_v24 = vor.u32 1.1754944e-38, %v2484_v15 }
0x10fb   :  { %v2404_v5 = vsel %vm2403_vm5, %v5787_v29, %v2400_v52  ;;  %v2482_v29 = vand.u32 2147483647, %v2471_v51 }
0x10fc   :  { %v7013_v58 = vsel %vm2406_vm6, %v2408_v27, %v2404_v5  ;;  %v5793_v13 = vpop.eup %5792 }
0x10fd   :  { %v2382_v20 = vmul.f32 %v5793_v13, %v2379_v53  ;;  %v5795_v48 = vpop.eup %5794  ;;  %vm2387_vm7 = vweird.f32 %v5793_v13  ;;  %vm2483_vm15 = vcmp.eq.f32.partialorder %v2482_v29, 8.507059e+37 }
0x10fe   :  { %v2474_v40 = vmul.f32 %v5795_v48, %v2471_v51  ;;  %vm2388_vm9 = vmor %vm2386_vm8, %vm2387_vm7  ;;  %vm2479_vm12 = vweird.f32 %v5795_v48 }
0x10ff   :  { %v2383_v7 = vsub.f32 1.0, %v2382_v20  ;;  %vm2480_vm14 = vmor %vm2478_vm13, %vm2479_vm12  ;;  %vm2639_vm12 = vcmask 523264   ;;  %vm2859_vm13 = vcmask 58368  }
0x1100   :  { %v2475_v21 = vsub.f32 1.0, %v2474_v40 }
0x1101   :  { %v2384_v55 = vmul.f32 %v5793_v13, %v2383_v7  ;;  %v7042_v7 = vmul.f32 %v6764_v54, %v6758_v45 }
0x1102   :  { %v2476_v16 = vmul.f32 %v5795_v48, %v2475_v21  ;;  %v7059_v21 = vmul.f32 %v6839_v23, %v6768_v61 }
0x1103   :  { %v2385_v14 = vadd.f32 %v5793_v13, %v2384_v55  ;;  %v7048_v55 = vmul.f32 %v6983_v62, %v6513_v50 }
0x1104   :  { %v2477_v49 = vadd.f32 %v5795_v48, %v2476_v16  ;;  %v1706_v50 = vrot.slane %v7059_v21, 1  ;;  %v5467_v16 = vmul.f32 -1.442695, %v2503_v38 }
0x1105   :  { %v2389_v47 = vsel %vm2388_vm9, %v5793_v13, %v2385_v14  ;;  %v7036_v13 = vmul.f32 %v6451_v36, %v6444_v33  ;;  %v7052_v36 = vmul.f32 %v6562_v32, %v6556_v42  ;;  %v2310_v40 = vperm.slane %v7048_v55, 0 }
0x1106   :  { %v7017_v6 = vsel %vm2391_vm10, %v2393_v22, %v2389_v47  ;;  %v2481_v26 = vsel %vm2480_vm14, %v5795_v48, %v2477_v49  ;;  %v1404_v48 = vperm.slane %v7042_v7, 0  ;;  %v1708_v1 = vperm.slane %v1706_v50, 0 }
0x1107   :  { %v2486_v3 = vsel %vm2483_vm15, %v2485_v24, %v2481_v26  ;;  %v449_v20 = vperm.slane %v7036_v13, 0  ;;  %v765_v14 = vrot.slane %v7052_v36, 1  ;;  %v2504_v32 = vadd.f32 %v6998_v2, %v6406_v0 }
0x1108   :  { %v2432_v50 = vsub.f32 1.0, %v7013_v58 }
0x1109   :  { %v767_v54 = vperm.slane %v765_v14, 0  ;;  %v5468_v47 = vmul.f32 -1.442695, %v2504_v32  ;;  %v2575_v14 = vrot.slane %v6983_v62, 1 }
0x1139   :  { %v2414_v43 = vpop.permute.xlu2 %2413 }
0x113a   :  { %v2418_v63 = vmul.f32 %v2414_v43, %v7013_v58 }
0x113c   :  { %2423 = vrot.lane.b32.xlu0 %v2418_v63, %s6100_s26 }
0x1151   :  { %v2412_v39 = vpop.permute.xlu1 %2411 }
0x1152   :  { %v2417_v35 = vmul.f32 %v2412_v39, %v7017_v6 }
0x1154   :  { %2421 = vrot.lane.b32.xlu2 %v2417_v35, %s6100_s26 }
0x1159   :  { %v2544_v57 = vpop.permute.xlu1 %2543 }
0x115a   :  { %v2549_v31 = vmul.f32 %v2544_v57, %v2486_v3 }
0x115c   :  { %2553 = vrot.lane.b32.xlu2 %v2549_v31, %s6100_s26 }
0x1161   :  { %v2556_v11 = vpop.permute.xlu1 %2555 }
0x1162   :  { %v2560_v8 = vadd.f32 %v2556_v11, %v6406_v0 }
0x1164   :  { %2445 = vrot.lane.b32.xlu2 %v2443_v10, %s6101_s27 }
0x11ae   :  { %v2424_v44 = vpop.permute.xlu0 %2423  ;;  %v2422_v53 = vpop.permute.xlu2 %2421 }
0x11af   :  { %v2428_v52 = vadd.f32 %v2424_v44, %v6341_v28  ;;  %v2427_v37 = vadd.f32 %v2422_v53, %v6344_v30  ;;  %v2444_v30 = vrot.slane %v6990_v19, 2 }
0x11b1   :  { %5796 = vtanh.f32 %v2428_v52 }
0x11b2   :  { %5798 = vtanh.f32 %v2427_v37 }
0x11b3   :  { %5800 = vtanh.f32 %v2560_v8  ;;  %v7075_v8 = vmul.f32 %v6846_v9, %v6758_v45 }
0x11b6   :  { %v2554_v5 = vpop.permute.xlu2 %2553 }
0x11b7   :  { %v5797_v27 = vpop.eup %5796  ;;  %v2559_v51 = vadd.f32 %v2554_v5, %v6413_v25 }
0x11b8   :  { %v5799_v43 = vpop.eup %5798  ;;  %2437 = vrot.lane.b32.xlu1 %v5797_v27, %s6099_s3 }
0x11b9   :  { %5802 = vtanh.f32 %v2559_v51  ;;  %2435 = vrot.lane.b32.xlu0 %v5799_v43, %s6099_s3  ;;  %v5801_v63 = vpop.eup %5800 }
0x11ba   :  { %5804 = vpow2.f32 %v5468_v47 }
0x11bb   :  { %5806 = vpow2.f32 %v5467_v16 }
0x11be   :  { %v2446_v35 = vpop.permute.xlu2 %2445 }
0x11bf   :  { %v5803_v28 = vpop.eup %5802 }
0x11c0   :  { %2569 = vrot.lane.b32.xlu1 %v5801_v63, %s6099_s3  ;;  %2567 = vrot.lane.b32.xlu2 %v5803_v28, %s6099_s3  ;;  %v5805_v22 = vpop.eup %5804 }
0x11c1   :  { %2447 = vrot.lane.b32.xlu0 %v2444_v30, %s6101_s27  ;;  %v5807_v61 = vpop.eup %5806  ;;  %v2512_v23 = vadd.f32 1.0, %v5805_v22 }
0x11c2   :  { %v2511_v39 = vadd.f32 1.0, %v5807_v61 }
0x11c3   :  { %5808 = vrcp.f32 %v2512_v23  ;;  %vm2533_vm5 = vweird.f32 %v2512_v23  ;;  %v2539_v44 = vand.u32 2147483648, %v2512_v23  ;;  %v2537_v37 = vand.u32 2147483647, %v2512_v23 }
0x11c4   :  { %5810 = vrcp.f32 %v2511_v39  ;;  %v2524_v10 = vand.u32 2147483648, %v2511_v39  ;;  %vm2518_vm6 = vweird.f32 %v2511_v39  ;;  %v2522_v53 = vand.u32 2147483647, %v2511_v39 }
0x11c5   :  { %v2540_v28 = vor.u32 1.1754944e-38, %v2539_v44  ;;  %vm2538_vm10 = vcmp.eq.f32.partialorder %v2537_v37, 8.507059e+37 }
0x11c6   :  { %v2525_v63 = vor.u32 1.1754944e-38, %v2524_v10  ;;  %vm2523_vm9 = vcmp.eq.f32.partialorder %v2522_v53, 8.507059e+37  ;;  %v1082_v10 = vmul.f32 %v6667_v12, %v6656_v18  ;;  %v766_v53 = vperm.slane %v7052_v36, 0 }
0x11c7   :  { %v448_v36 = vrot.slane %v7036_v13, 1 }
0x11c8   :  { %451 = vrot.lane.b32.xlu2 %v449_v20, %s6101_s27  ;;  %v2431_v20 = vsub.f32 1.0, %v7017_v6 }
0x11c9   :  { %v5809_v49 = vpop.eup %5808 }
0x11ca   :  { %v5811_v15 = vpop.eup %5810  ;;  %v2529_v24 = vmul.f32 %v5809_v49, %v2512_v23  ;;  %vm2534_vm3 = vweird.f32 %v5809_v49 }
0x11cb   :  { %v2514_v26 = vmul.f32 %v5811_v15, %v2511_v39  ;;  %vm2519_vm4 = vweird.f32 %v5811_v15  ;;  %vm7069_vm7 = vmor %vm2533_vm5, %vm2534_vm3 }
0x11cc   :  { %v2530_v2 = vsub.f32 1.0, %v2529_v24  ;;  %vm2520_vm8 = vmor %vm2518_vm6, %vm2519_vm4 }
0x11cd   :  { %v2515_v0 = vsub.f32 1.0, %v2514_v26 }
0x11ce   :  { %v2531_v57 = vmul.f32 %v5809_v49, %v2530_v2 }
0x11cf   :  { %v2516_v56 = vmul.f32 %v5811_v15, %v2515_v0 }
0x11d0   :  { %1406 = vrot.lane.b32.xlu2 %v1404_v48, %s6101_s27  ;;  %v2532_v31 = vadd.f32 %v5809_v49, %v2531_v57 }
0x11d1   :  { %v2517_v3 = vadd.f32 %v5811_v15, %v2516_v56 }
0x11d2   :  { %v2536_v43 = vsel %vm7069_vm7, %v5809_v49, %v2532_v31 }
0x11d3   :  { %v2521_v27 = vsel %vm2520_vm8, %v5811_v15, %v2517_v3  ;;  %v2541_v45 = vsel %vm2538_vm10, %v2540_v28, %v2536_v43  ;;  %v2599_v3 = vmul.f32 %v6983_v62, %v6426_v46  ;;  %v1085_v46 = vperm.slane %v1082_v10, 0  ;;  %v2634_v28 = vld [vmem:[%s8150_s9 + $0x38] sm:$0xff] }
0x11d4   :  { %v2526_v30 = vsel %vm2523_vm9, %v2525_v63, %v2521_v27  ;;  %v2579_v47 = vmul.f32 %v2575_v14, %v2541_v45  ;;  %v1084_v27 = vrot.slane %v1082_v10, 1  ;;  %2651 = vmatpush.msra.mxu0 %v2634_v28  ;;  %v2671_v14 = vld [vmem:[%s8152_s11 + $0x38] sm:$0xff]  ;;  %v7230_v10 = vld [vmem:[%s8153_s12] sm:$0xff] }
0x11d5   :  { %v2563_v48 = vsub.f32 1.0, %v2526_v30  ;;  %v2578_v49 = vmul.f32 %v2526_v30, %v6983_v62  ;;  %v1707_v62 = vperm.slane %v7059_v21, 0  ;;  %v2309_v21 = vrot.slane %v7048_v55, 1  ;;  %v2632_v30 = vld [vmem:[%s8150_s9 + $0x28] sm:$0xff]  ;;  %v2631_v55 = vld [vmem:[%s8150_s9 + $0x20] sm:$0xff]  ;;  %2686 = vmatpush.msra.mxu1 %v2671_v14 }
0x11d6   :  { %v1086_v43 = vperm.slane %v1084_v27, 0 }
0x11d7   :  { %v2311_v13 = vperm.slane %v2309_v21, 0 }
0x11d8   :  { %2312 = vrot.lane.b32.xlu2 %v2310_v40, %s6101_s27  ;;  %v2564_v40 = vsub.f32 1.0, %v2541_v45  ;;  %v2629_v45 = vld [vmem:[%s8150_s9 + $0x10] sm:$0xff] }
0x11e0   :  { %770 = vrot.lane.b32.xlu2 %v767_v54, %s6101_s27  ;;  %v2451_v54 = vmul.f32 %v2446_v35, %v7017_v6  ;;  %v7091_v6 = vmul.f32 %v6990_v19, %v6556_v42 }
0x11e2   :  { %v2303_v56 = vrot.slane %v7091_v6, 1 }
0x11e8   :  { %1711 = vrot.lane.b32.xlu2 %v1708_v1, %s6101_s27 }
0x121a   :  { %v2568_v29 = vpop.permute.xlu2 %2567 }
0x121b   :  { %v2573_v38 = vmul.f32 %v2568_v29, %v2563_v48  ;;  %v2627_v48 = vld [vmem:[%s8150_s9] sm:$0xff] }
0x121d   :  { %v2580_v35 = vadd.f32 %v2578_v49, %v2573_v38  ;;  %v2666_v38 = vld [vmem:[%s8152_s11 + $0x10] sm:$0xff] }
0x1222   :  { %v452_v25 = vpop.permute.xlu2 %451 }
0x1223   :  { %458 = vst.msk [vmem:[#allocation2 + $0x7] sm:$0x1] %vm457_vm1, %v452_v25 }
0x122a   :  { %v2438_v11 = vpop.permute.xlu1 %2437  ;;  %v1407_v5 = vpop.permute.xlu2 %1406 }
0x122b   :  { %v2436_v51 = vpop.permute.xlu0 %2435  ;;  %1412 = vst.msk [vmem:[#allocation2 + $0x4] sm:$0x1] %vm457_vm1, %v1407_v5  ;;  %v2442_v61 = vmul.f32 %v2438_v11, %v2432_v50  ;;  %v450_v5 = vperm.slane %v448_v36, 0  ;;  %v2669_v50 = vld [vmem:[%s8152_s11 + $0x28] sm:$0xff]  ;;  %v2828_v36 = vlaneseq }
0x122c   :  { %1702 = vst.msk [vmem:[#allocation2 + $0x4] sm:$0x1] %vm443_vm11, %v7075_v8  ;;  %v2441_v9 = vmul.f32 %v2436_v51, %v2431_v20  ;;  %v1403_v51 = vrot.slane %v7042_v7, 1  ;;  %v2633_v7 = vld [vmem:[%s8150_s9 + $0x30] sm:$0xff]  ;;  %v2630_v20 = vld [vmem:[%s8150_s9 + $0x18] sm:$0xff] }
0x122d   :  { %2652 = vmatpush.msra.mxu0 %v2633_v7  ;;  %v2829_v27 = vshrl.u32 %v2828_v36, 7 }
0x122e   :  { %v2453_v23 = vadd.f32 %v2451_v54, %v2441_v9  ;;  %v2628_v9 = vld [vmem:[%s8150_s9 + $0x8] sm:$0xff]  ;;  %v2670_v54 = vld [vmem:[%s8152_s11 + $0x30] sm:$0xff] }
0x122f   :  { %2653 = vmatpush.msra.mxu0 %v2632_v30  ;;  %2687 = vmatpush.msra.mxu1 %v2670_v54 }
0x1230   :  { %v2584_v29 = vrot.slane %v2453_v23, 7  ;;  %5546 = vset.pattern.permute.xlu1 %v2829_v27 }
0x1231   :  { %2654 = vmatpush.msra.mxu0 %v2631_v55  ;;  %2688 = vmatpush.msra.mxu1 %v2669_v50  ;;  %v6019_v55 = vld [vmem:[%s8174_s4] sm:$0x3] }
0x1232   :  { %v2570_v1 = vpop.permute.xlu1 %2569  ;;  %v2313_v32 = vpop.permute.xlu2 %2312 }
0x1233   :  { %v2574_v16 = vmul.f32 %v2570_v1, %v2564_v40  ;;  %v2448_v22 = vpop.permute.xlu0 %2447  ;;  %2318 = vst.msk [vmem:[#allocation2 + $0x1] sm:$0x1] %vm457_vm1, %v2313_v32  ;;  %2655 = vmatpush.msra.mxu0 %v2630_v20  ;;  %v2668_v1 = vld [vmem:[%s8152_s11 + $0x20] sm:$0xff]  ;;  %v2667_v32 = vld [vmem:[%s8152_s11 + $0x18] sm:$0xff]  ;;  %v5474_v20 = vadd.f32 -1.0, %v6019_v55 }
0x1234   :  { %v2452_v39 = vmul.f32 %v2448_v22, %v7013_v58  ;;  %2689 = vmatpush.msra.mxu1 %v2668_v1 }
0x1235   :  { %v2581_v15 = vadd.f32 %v2579_v47, %v2574_v16  ;;  %2656 = vmatpush.msra.mxu0 %v2629_v45  ;;  %v2665_v47 = vld [vmem:[%s8152_s11 + $0x8] sm:$0xff]  ;;  %v2664_v16 = vld [vmem:[%s8152_s11] sm:$0xff]  ;;  %v2762_v45 = vmul.f32 1e+09, %v5474_v20 }
0x1236   :  { %v2454_v26 = vadd.f32 %v2452_v39, %v2442_v61  ;;  %2690 = vmatpush.msra.mxu1 %v2667_v32  ;;  %v2591_v61 = vmul.f32 %v6990_v19, %v6447_v34  ;;  %v2001_v34 = vmul.f32 %v6913_v4, %v6656_v18 }
0x1237   :  { %v2595_v24 = vrot.slane %v2581_v15, 7  ;;  %2657 = vmatpush.msra.mxu0 %v2628_v9  ;;  %v2827_v9 = vperm.slane %v2762_v45, 0 }
0x1238   :  { %v2585_v0 = vrot.slane %v2454_v26, 6  ;;  %2691 = vmatpush.msra.mxu1 %v2666_v38  ;;  %v2003_v18 = vrot.slane %v2001_v34, 1 }
0x1239   :  { %v2596_v2 = vsel %vm408_vm2, %v2595_v24, %v2580_v35  ;;  %2658 = vmatpush.msra.mxu0 %v2627_v48  ;;  %v2834_v48 = vperm.slane %v2762_v45, 1 }
0x123a   :  { %v2586_v25 = vsel %vm408_vm2, %v2585_v0, %v2584_v29  ;;  %v771_v57 = vpop.permute.xlu2 %770  ;;  %v2598_v58 = vmul.f32 %v2596_v2, %v6428_v60  ;;  %2692 = vmatpush.msra.mxu1 %v2665_v47 }
0x123b   :  { %2587 = vrot.lane.b32.xlu0 %v2586_v25, %s6099_s3  ;;  %775 = vst.msk [vmem:[#allocation2 + $0xe] sm:$0x1] %vm457_vm1, %v771_v57  ;;  %v1700_v25 = vrot.slane %v7075_v8, 1  ;;  %v7211_v8 = vld [vmem:[%s8153_s12 + $0x18] sm:$0xff] }
0x123c   :  { %2306 = vst.msk [vmem:[#allocation2 + $0xe] sm:$0x1] %vm443_vm11, %v2303_v56  ;;  %v2600_v42 = vadd.f32 %v2599_v3, %v2598_v58  ;;  %2693 = vmatpush.msra.mxu1 %v2664_v16  ;;  %2778 = vmatpush.msrb.mxu3 %v7211_v8 }
0x123d   :  { %3130 = vmatpush.msrb.mxu0 %v7211_v8 }
0x123e   :  { %2623 = vrot.lane.b32.xlu1 %v2600_v42, %s6101_s27  ;;  %v2607_v31 = vmul.f32 %v2600_v42, %v6428_v60  ;;  %v2007_v60 = vmul.f32 %v6906_v17, %v6651_v41  ;;  %v1405_v41 = vperm.slane %v1403_v51, 0  ;;  %v7216_v42 = vld [vmem:[%s8153_s12 + $0x10] sm:$0xff] }
0x123f   :  { %2779 = vmatpush.msrb.mxu3 %v7216_v42  ;;  %3131 = vmatpush.msrb.mxu0 %v7216_v42 }
0x1240   :  { %v2609_v44 = vrot.slane %v2607_v31, 1  ;;  %v2010_v12 = vperm.slane %v2007_v60, 0  ;;  %v2610_v11 = vperm.slane %v2607_v31, 0  ;;  %v2009_v17 = vrot.slane %v2007_v60, 1  ;;  %v7223_v31 = vld [vmem:[%s8153_s12 + $0x8] sm:$0xff] }
0x1241   :  { %2780 = vmatpush.msrb.mxu3 %v7223_v31  ;;  %3132 = vmatpush.msrb.mxu0 %v7223_v31 }
0x1242   :  { %v1712_v52 = vpop.permute.xlu2 %1711  ;;  %v2611_v37 = vperm.slane %v2609_v44, 0  ;;  %v2011_v63 = vperm.slane %v2009_v17, 0  ;;  %v5552_v44 = vld [vmem:[%s8151_s10] ss:$0 sm:$0xff]  ;;  %s6113_s10 = smov [#allocation5]  }
0x1243   :  { %768 = vrot.lane.b32.xlu0 %v766_v53, %s6101_s27  ;;  %1716 = vst.msk [vmem:[#allocation2 + $0xb] sm:$0x1] %vm457_vm1, %v1712_v52  ;;  %2781 = vmatpush.msrb.mxu3 %v7230_v10 }
0x1244   :  { %2614 = vrot.lane.b32.xlu2 %v2611_v37, %s6101_s27  ;;  %3133 = vmatpush.msrb.mxu0 %v7230_v10 }
0x1246   :  { %1087 = vrot.lane.b32.xlu1 %v1085_v46, %s6101_s27  ;;  %v5553_v46 = vld [vmem:[%s8154_s13] ss:$0 sm:$0xff]  ;;  %s5387_s13 = sshll.u32 %s6113_s10, 4  ;;  %s5388_s13 = int_to_ptr.vmem [resolvable:$true] %s5387_s13 }
0x124b   :  { %1709 = vrot.lane.b32.xlu0 %v1707_v62, %s6101_s27 }
0x124c   :  { %2807 = vrot.lane.b32.xlu2 %v5553_v46, %s6099_s3 }
0x124e   :  { %2012 = vrot.lane.b32.xlu1 %v2010_v12, %s6101_s27 }
0x1253   :  { %2612 = vrot.lane.b32.xlu0 %v2610_v11, %s6101_s27 }
0x1256   :  { %453 = vrot.lane.b32.xlu1 %v450_v5, %s6101_s27 }
0x125b   :  { %1089 = vrot.lane.b32.xlu0 %v1086_v43, %s6101_s27 }
0x125e   :  { %1408 = vrot.lane.b32.xlu1 %v1405_v41, %s6101_s27 }
0x1263   :  { %2014 = vrot.lane.b32.xlu0 %v2011_v63, %s6101_s27 }
0x1266   :  { %2314 = vrot.lane.b32.xlu1 %v2311_v13, %s6101_s27 }
0x129e   :  { %v2615_v40 = vpop.permute.xlu2 %2614 }
0x129f   :  { %2619 = vst.msk [vmem:[#allocation2 + $0x8] sm:$0x1] %vm457_vm1, %v2615_v40 }
0x12a6   :  { %v7259_v43 = vpop.permute.xlu2 %2807 }
0x12ad   :  { %v2588_v22 = vpop.permute.xlu0 %2587 }
0x12ae   :  { %v2590_v23 = vmul.f32 %v2588_v22, %v6444_v33 }
0x12b0   :  { %v2592_v39 = vadd.f32 %v2591_v61, %v2590_v23  ;;  %v2624_v49 = vpop.permute.xlu1 %2623  ;;  %v7281_v61 = vand.u32 127, %v2828_v36 }
0x12b2   :  { %v2601_v15 = vmul.f32 %v2592_v39, %v6444_v33  ;;  %v2626_v26 = vsel %vm83_vm0, %v2592_v39, %v2624_v49 }
0x12b3   :  { %5469 = vmatmul.msk.f32.vlgmr.msra.gmra.mxu0 %vm2639_vm12, %v2626_v26 }
0x12b4   :  { %2605 = vst.msk [vmem:[#allocation2 + $0x7] sm:$0x1] %vm443_vm11, %v2601_v15  ;;  %v2603_v0 = vrot.slane %v2601_v15, 1  ;;  %3446 = vmatpush.msra.mxu0 %v7211_v8 }
0x12b5   :  { %v769_v35 = vpop.permute.xlu0 %768 }
0x12b6   :  { %774 = vst.msk [vmem:[#allocation2 + $0x6] sm:$0x1] %vm457_vm1, %v769_v35  ;;  %3447 = vmatpush.msra.mxu0 %v7216_v42 }
0x12b7   :  { %2305 = vst.msk [vmem:[#allocation2 + $0x6] sm:$0x1] %vm443_vm11, %v7091_v6 }
0x12b8   :  { %v1088_v19 = vpop.permute.xlu1 %1087  ;;  %3448 = vmatpush.msra.mxu0 %v7223_v31 }
0x12b9   :  { %1093 = vst.msk [vmem:[#allocation2 + $0x5] sm:$0x1] %vm457_vm1, %v1088_v19 }
0x12ba   :  { %2005 = vst.msk [vmem:[#allocation2 + $0x5] sm:$0x1] %vm443_vm11, %v2001_v34  ;;  %3449 = vmatpush.msra.mxu0 %v7230_v10 }
0x12bd   :  { %v1710_v33 = vpop.permute.xlu0 %1709 }
0x12be   :  { %1715 = vst.msk [vmem:[#allocation2 + $0x3] sm:$0x1] %vm457_vm1, %v1710_v33 }
0x12c0   :  { %v2013_v24 = vpop.permute.xlu1 %2012 }
0x12c1   :  { %2018 = vst.msk [vmem:[#allocation2 + $0x2] sm:$0x1] %vm457_vm1, %v2013_v24 }
0x12c5   :  { %v2613_v29 = vpop.permute.xlu0 %2612 }
0x12c6   :  { %2618 = vst.msk [vmem:[#allocation2] sm:$0x1] %vm457_vm1, %v2613_v29 }
0x12c8   :  { %v454_v2 = vpop.permute.xlu1 %453 }
0x12c9   :  { %459 = vst.msk [vmem:[#allocation2 + $0xf] sm:$0x1] %vm457_vm1, %v454_v2 }
0x12ca   :  { %2606 = vst.msk [vmem:[#allocation2 + $0xf] sm:$0x1] %vm443_vm11, %v2603_v0 }
0x12cd   :  { %v1090_v4 = vpop.permute.xlu0 %1089  ;;  %v7193_v6 = vld [vmem:[#allocation2] sm:$0xff] }
0x12ce   :  { %1094 = vst.msk [vmem:[#allocation2 + $0xd] sm:$0x1] %vm457_vm1, %v1090_v4  ;;  %5470 = vmatmul.msk.f32.vlgmr.msra.gmra.mxu1 %vm2639_vm12, %v7193_v6 }
0x12cf   :  { %2006 = vst.msk [vmem:[#allocation2 + $0xd] sm:$0x1] %vm443_vm11, %v2003_v18 }
0x12d0   :  { %v1409_v56 = vpop.permute.xlu1 %1408 }
0x12d1   :  { %1413 = vst.msk [vmem:[#allocation2 + $0xc] sm:$0x1] %vm457_vm1, %v1409_v56 }
0x12d2   :  { %1703 = vst.msk [vmem:[#allocation2 + $0xc] sm:$0x1] %vm443_vm11, %v1700_v25 }
0x12d5   :  { %v2015_v57 = vpop.permute.xlu0 %2014 }
0x12d6   :  { %2019 = vst.msk [vmem:[#allocation2 + $0xa] sm:$0x1] %vm457_vm1, %v2015_v57 }
0x12d8   :  { %v2315_v58 = vpop.permute.xlu1 %2314 }
0x12d9   :  { %2319 = vst.msk [vmem:[#allocation2 + $0x9] sm:$0x1] %vm457_vm1, %v2315_v58 }
0x12e0   :  { %v7204_v3 = vld [vmem:[#allocation2 + $0x8] sm:$0xff] }
0x12e1   :  { %5471 = vmatmul.msk.f32.gmra.mxu1 %vm2639_vm12, %v7204_v3 }
0x1330   :  { %v2660_v53 = vpop.f32.mrf.mxu0 }
0x1331   :  { %v2661_v52 = vadd.f32 %v5552_v44, %v2660_v53 }
0x1333   :  { %5812 = vtanh.f32 %v2661_v52 }
0x1339   :  { %v7243_v37 = vpop.eup %5812 }
0x133a   :  { %5475 = vmatmul.msk.f32.vlgmr.msrb.gmra.mxu3 %vm83_vm0, %v7243_v37 }
0x134b   :  { %v2695_v60 = vpop.f32.mrf.mxu1 }
0x134c   :  { %2795 = vrot.lane.b32.xlu0 %v2695_v60, %s6099_s3  ;;  %v2706_v60 = vld [vmem:[%s8155_s14 + $0x18] sm:$0xff] }
0x134d   :  { %2729 = vmatpush.msrb.mxu2 %v2706_v60 }
0x135e   :  { %v2698_v62 = vpop.f32.mrf.mxu1 }
0x135f   :  { %2797 = vrot.lane.b32.xlu1 %v2698_v62, %s6099_s3  ;;  %v2705_v62 = vld [vmem:[%s8155_s14 + $0x10] sm:$0xff] }
0x1360   :  { %2730 = vmatpush.msrb.mxu2 %v2705_v62 }
0x13bd   :  { %v7253_v12 = vpop.f32.mrf.mxu3 }
0x13be   :  { %v2789_v11 = vperm.slane %v7253_v12, 0  ;;  %v7256_v5 = vpop.permute.xlu0 %2795  ;;  %v2788_v21 = vrot.slane %v7253_v12, 1 }
0x13c0   :  { %v2801_v51 = vadd.f32 %v7256_v5, %v2789_v11  ;;  %v2790_v63 = vperm.slane %v2788_v21, 0  ;;  %v2704_v11 = vld [vmem:[%s8155_s14 + $0x8] sm:$0xff] }
0x13c1   :  { %2731 = vmatpush.msrb.mxu2 %v2704_v11 }
0x13c2   :  { %5814 = vtanh.f32 %v2801_v51 }
0x13c8   :  { %v5815_v41 = vpop.eup %5814 }
0x13c9   :  { %v2810_v17 = vmul.f32 %v5815_v41, %v7259_v43 }
0x13cb   :  { %2814 = vrot.lane.b32.xlu0 %v2810_v17, %s6101_s27  ;;  %v2703_v17 = vld [vmem:[%s8155_s14] sm:$0xff] }
0x13cc   :  { %2732 = vmatpush.msrb.mxu2 %v2703_v17 }
0x13d1   :  { %v7264_v13 = vpop.permute.xlu1 %2797 }
0x13d2   :  { %v2802_v28 = vadd.f32 %v7264_v13, %v2790_v63 }
0x13d4   :  { %5816 = vtanh.f32 %v2802_v28 }
0x13da   :  { %v5817_v7 = vpop.eup %5816 }
0x13db   :  { %v2811_v30 = vmul.f32 %v5817_v7, %v7259_v43 }
0x13dd   :  { %2816 = vrot.lane.b32.xlu1 %v2811_v30, %s6101_s27 }
0x13e5   :  { %2832 = vperm.xlu1 %5546, %v2827_v9  }
0x13ed   :  { %2839 = vperm.xlu1 %5546, %v2834_v48  }
0x13f5   :  { %5547 = vset.pattern.permute.xlu1 %v6102_v59 }
0x143d   :  { %v2815_v40 = vpop.permute.xlu0 %2814 }
0x143e   :  { %v2820_v14 = vsel %vm83_vm0, %v2815_v40, 0.0 }
0x143f   :  { %2821 = vadd.xlane.f32.xlu2 %v2820_v14 }
0x144f   :  { %v2817_v54 = vpop.permute.xlu1 %2816 }
0x1450   :  { %v2823_v50 = vsel %vm83_vm0, %v2817_v54, 0.0 }
0x1451   :  { %2824 = vadd.xlane.f32.xlu0 %v2823_v50 }
0x1457   :  { %v7275_v1 = vpop.permute.xlu1 %2832 }
0x145f   :  { %v7278_v47 = vpop.permute.xlu1 %2839 }
0x14b2   :  { %v2822_v32 = vpop.xlane.xlu2 %2821 }
0x14b3   :  { %v2843_v38 = vadd.f32 %v7275_v1, %v2822_v32 }
0x14b5   :  { %2848 = vperm.xlu1 %5547, %v2843_v38  }
0x14c4   :  { %v2825_v16 = vpop.xlane.xlu0 %2824 }
0x14c5   :  { %v2844_v22 = vadd.f32 %v7278_v47, %v2825_v16 }
0x14c7   :  { %2851 = vperm.xlu1 %5547, %v2844_v22  }
0x1527   :  { %v2849_v59 = vpop.permute.xlu1 %2848 }
0x1528   :  { %v2855_v39 = vperm.slane %v2849_v59, %v7281_v61 }
0x1539   :  { %v2852_v23 = vpop.permute.xlu1 %2851 }
0x153a   :  { %v2856_v49 = vperm.slane %v2852_v23, %v7281_v61 }
0x153c   :  { %v2857_v15 = vsel %vm408_vm2, %v2856_v49, %v2855_v39  ;;  %v2701_v49 = vld [vmem:[%s8179_s7] sm:$0xff] }
0x153d   :  { %v2860_v26 = vsel %vm2859_vm13, %v2857_v15, -inf  ;;  %5472 = vmatmul.msk.f32.vlgmr.msrb.gmra.mxu2 %vm83_vm0, %v2701_v49  ;;  %v7332_v15 = vld [vmem:[%s8157_s16 + $0x30] sm:$0xff] }
0x153e   :  { %2861 = vmax.xlane.f32.xlu1 %v2860_v26  ;;  %v7339_v26 = vld [vmem:[%s8157_s16 + $0x28] sm:$0xff] }
0x15b1   :  { %v2862_v35 = vpop.xlane.xlu1 %2861 }
0x15b2   :  { %v2864_v34 = vperm.slane %v2862_v35, 0  ;;  %v2865_v19 = vperm.slane %v2862_v35, 1  ;;  %v7346_v35 = vld [vmem:[%s8157_s16 + $0x20] sm:$0xff] }
0x15b4   :  { %v2868_v33 = vsub.f32 %v2843_v38, %v2864_v34  ;;  %v2869_v24 = vsub.f32 %v2844_v22, %v2865_v19  ;;  %v7306_v22 = vld [vmem:[%s8158_s17] ss:$0 sm:$0xff]  ;;  %v2702_v34 = vld [vmem:[%s8179_s7 + $0x8] sm:$0xff]  ;;  %v7357_v19 = vld [vmem:[%s8157_s16 + $0x18] sm:$0xff] }
0x15b5   :  { %v7310_v23 = vadd.f32 %v7306_v22, %v7253_v12  ;;  %v7325_v12 = vld [vmem:[%s8157_s16 + $0x38] sm:$0xff]  ;;  %5473 = vmatmul.msk.f32.gmra.mxu2 %vm83_vm0, %v2702_v34 }
0x15b6   :  { %v2870_v29 = vmul.f32 1.442695, %v2868_v33  ;;  %v2872_v0 = vmul.f32 1.442695, %v2869_v24  ;;  %2963 = vmatpush.msra.mxu2 %v7325_v12  ;;  %3282 = vmatpush.msrb.mxu1 %v7325_v12  ;;  %v7364_v33 = vld [vmem:[%s8157_s16 + $0x10] sm:$0xff]  ;;  %v7369_v24 = vld [vmem:[%s8157_s16 + $0x8] sm:$0xff] }
0x15b7   :  { %v2982_v39 = vrot.slane %v7310_v23, 1 }
0x15b8   :  { %5818 = vpow2.f32 %v2870_v29  ;;  %2964 = vmatpush.msra.mxu2 %v7332_v15  ;;  %3283 = vmatpush.msrb.mxu1 %v7332_v15  ;;  %v7376_v29 = vld [vmem:[%s8157_s16] sm:$0xff] }
0x15b9   :  { %5820 = vpow2.f32 %v2872_v0 }
0x15ba   :  { %2965 = vmatpush.msra.mxu2 %v7339_v26  ;;  %3284 = vmatpush.msrb.mxu1 %v7339_v26 }
0x15bc   :  { %2966 = vmatpush.msra.mxu2 %v7346_v35  ;;  %3285 = vmatpush.msrb.mxu1 %v7346_v35 }
0x15be   :  { %v5819_v2 = vpop.eup %5818  ;;  %2967 = vmatpush.msra.mxu2 %v7357_v19  ;;  %3286 = vmatpush.msrb.mxu1 %v7357_v19 }
0x15bf   :  { %v5821_v18 = vpop.eup %5820  ;;  %2877 = vperm.xlu2 %5548, %v5819_v2  }
0x15c0   :  { %2880 = vperm.xlu0 %5549, %v5821_v18   ;;  %2968 = vmatpush.msra.mxu2 %v7364_v33  ;;  %v2734_v17 = vpop.f32.mrf.mxu2 }
0x15c1   :  { %3287 = vmatpush.msrb.mxu1 %v7364_v33 }
0x15c2   :  { %2969 = vmatpush.msra.mxu2 %v7369_v24 }
0x15c3   :  { %3288 = vmatpush.msrb.mxu1 %v7369_v24 }
0x15c4   :  { %2970 = vmatpush.msra.mxu2 %v7376_v29 }
0x15c5   :  { %3289 = vmatpush.msrb.mxu1 %v7376_v29 }
0x15c6   :  { %3598 = vmatpush.msrb.mxu2 %v7325_v12 }
0x15c7   :  { %3919 = vmatpush.msra.mxu1 %v7325_v12 }
0x15c8   :  { %3599 = vmatpush.msrb.mxu2 %v7332_v15 }
0x15c9   :  { %3920 = vmatpush.msra.mxu1 %v7332_v15 }
0x15ca   :  { %3600 = vmatpush.msrb.mxu2 %v7339_v26 }
0x15cb   :  { %3921 = vmatpush.msra.mxu1 %v7339_v26 }
0x15cc   :  { %3601 = vmatpush.msrb.mxu2 %v7346_v35 }
0x15cd   :  { %3922 = vmatpush.msra.mxu1 %v7346_v35 }
0x15ce   :  { %3602 = vmatpush.msrb.mxu2 %v7357_v19 }
0x15cf   :  { %3923 = vmatpush.msra.mxu1 %v7357_v19 }
0x15d0   :  { %3603 = vmatpush.msrb.mxu2 %v7364_v33 }
0x15d1   :  { %3924 = vmatpush.msra.mxu1 %v7364_v33 }
0x15d2   :  { %3604 = vmatpush.msrb.mxu2 %v7369_v24 }
0x15d3   :  { %3925 = vmatpush.msra.mxu1 %v7369_v24 }
0x15d4   :  { %3605 = vmatpush.msrb.mxu2 %v7376_v29 }
0x15d5   :  { %3926 = vmatpush.msra.mxu1 %v7376_v29 }
0x1619   :  { %v2878_v4 = vpop.permute.xlu2 %2877 }
0x161a   :  { %v2882_v56 = vperm.slane %v2878_v4, %v7281_v61 }
0x1632   :  { %v2881_v25 = vpop.permute.xlu0 %2880 }
0x1633   :  { %v2883_v57 = vperm.slane %v2881_v25, %v7281_v61 }
0x1635   :  { %v2884_v58 = vsel %vm408_vm2, %v2883_v57, %v2882_v56 }
0x1636   :  { %v2886_v44 = vsel %vm2859_vm13, %v2884_v58, 0.0 }
0x1637   :  { %2887 = vadd.xlane.f32.xlu2 %v2886_v44 }
0x16aa   :  { %v2888_v53 = vpop.xlane.xlu2 %2887 }
0x16ab   :  { %v2890_v52 = vperm.slane %v2888_v53, 0  ;;  %v2891_v46 = vperm.slane %v2888_v53, 1 }
0x16ad   :  { %5822 = vrcp.f32 %v2890_v52  ;;  %v2905_v28 = vand.u32 2147483648, %v2890_v52  ;;  %v2920_v7 = vand.u32 2147483648, %v2891_v46  ;;  %v2903_v55 = vand.u32 2147483647, %v2890_v52 }
0x16ae   :  { %5824 = vrcp.f32 %v2891_v46  ;;  %v2918_v45 = vand.u32 2147483647, %v2891_v46  ;;  %vm2899_vm1 = vweird.f32 %v2890_v52  ;;  %vm2914_vm3 = vweird.f32 %v2891_v46 }
0x16af   :  { %v2906_v40 = vor.u32 1.1754944e-38, %v2905_v28  ;;  %v2921_v14 = vor.u32 1.1754944e-38, %v2920_v7  ;;  %vm2904_vm6 = vcmp.eq.f32.partialorder %v2903_v55, 8.507059e+37 }
0x16b0   :  { %vm2919_vm7 = vcmp.eq.f32.partialorder %v2918_v45, 8.507059e+37 }
0x16b3   :  { %v5823_v36 = vpop.eup %5822 }
0x16b4   :  { %v5825_v27 = vpop.eup %5824  ;;  %v2895_v51 = vmul.f32 %v5823_v36, %v2890_v52  ;;  %vm2900_vm14 = vweird.f32 %v5823_v36 }
0x16b5   :  { %v2910_v41 = vmul.f32 %v5825_v27, %v2891_v46  ;;  %vm2915_vm15 = vweird.f32 %v5825_v27  ;;  %vm2901_vm4 = vmor %vm2899_vm1, %vm2900_vm14 }
0x16b6   :  { %v2896_v21 = vsub.f32 1.0, %v2895_v51  ;;  %vm2916_vm5 = vmor %vm2914_vm3, %vm2915_vm15 }
0x16b7   :  { %v2911_v63 = vsub.f32 1.0, %v2910_v41 }
0x16b8   :  { %v2897_v30 = vmul.f32 %v5823_v36, %v2896_v21  ;;  %v2737_v21 = vpop.f32.mrf.mxu2 }
0x16b9   :  { %v2912_v20 = vmul.f32 %v5825_v27, %v2911_v63  ;;  %v5555_v63 = vld [vmem:[%s8156_s15] ss:$0 sm:$0xff] }
0x16ba   :  { %v2898_v9 = vadd.f32 %v5823_v36, %v2897_v30  ;;  %v7415_v28 = vadd.f32 %v5555_v63, %v2734_v17  ;;  %v7419_v30 = vadd.f32 %v5555_v63, %v2737_v21 }
0x16bb   :  { %v2913_v48 = vadd.f32 %v5825_v27, %v2912_v20 }
0x16bc   :  { %v2902_v54 = vsel %vm2901_vm4, %v5823_v36, %v2898_v9 }
0x16bd   :  { %v2917_v50 = vsel %vm2916_vm5, %v5825_v27, %v2913_v48  ;;  %v2907_v32 = vsel %vm2904_vm6, %v2906_v40, %v2902_v54 }
0x16be   :  { %v2922_v38 = vsel %vm2919_vm7, %v2921_v14, %v2917_v50  ;;  %v2908_v16 = vmul.f32 %v5819_v2, %v2907_v32 }
0x16bf   :  { %v2923_v59 = vmul.f32 %v5821_v18, %v2922_v38 }
0x16c0   :  { %2926 = vperm.xlu1 %5547, %v2908_v16  }
0x16c1   :  { %2931 = vperm.xlu0 %5549, %v2923_v59  }
0x16c9   :  { %3027 = vrot.lane.b32.xlu0 %v2982_v39, %s6100_s26 }
0x16d1   :  { %3025 = vrot.lane.b32.xlu0 %v7310_v23, %s6100_s26 }
0x1732   :  { %v2927_v0 = vpop.permute.xlu1 %2926 }
0x1733   :  { %v2932_v2 = vpop.permute.xlu0 %2931  ;;  %v2934_v18 = vmul.f32 %v2927_v0, %v7193_v6 }
0x1734   :  { %v2935_v4 = vmul.f32 %v2932_v2, %v7204_v3 }
0x1735   :  { %v2936_v25 = vsel %vm2639_vm12, %v2934_v18, 0.0 }
0x1736   :  { %v2943_v56 = vsel %vm2639_vm12, %v2935_v4, 0.0  ;;  %v2937_v57 = vrot.slane %v2936_v25, 4 }
0x1737   :  { %v2944_v58 = vrot.slane %v2943_v56, 4 }
0x1738   :  { %v2938_v44 = vadd.f32 %v2937_v57, %v2936_v25 }
0x1739   :  { %v2945_v53 = vadd.f32 %v2944_v58, %v2943_v56 }
0x173a   :  { %v2939_v52 = vrot.slane %v2938_v44, 2 }
0x173b   :  { %v2946_v46 = vrot.slane %v2945_v53, 2  ;;  %v3028_v59 = vpop.permute.xlu0 %3027 }
0x173c   :  { %v2940_v60 = vadd.f32 %v2939_v52, %v2938_v44 }
0x173d   :  { %v2947_v62 = vadd.f32 %v2946_v46, %v2945_v53 }
0x173e   :  { %v2941_v36 = vrot.slane %v2940_v60, 1 }
0x173f   :  { %v2948_v11 = vrot.slane %v2947_v62, 1 }
0x1740   :  { %v2942_v27 = vadd.f32 %v2941_v36, %v2940_v60 }
0x1741   :  { %v2949_v51 = vadd.f32 %v2948_v11, %v2947_v62 }
0x1743   :  { %v2952_v41 = vsel %vm408_vm2, %v2949_v51, %v2942_v27  ;;  %v3026_v46 = vpop.permute.xlu0 %3025 }
0x1744   :  { %5476 = vmatmul.msk.f32.vlgmr.msra.gmra.mxu2 %vm2639_vm12, %v2952_v41  ;;  %v3057_v41 = vrot.slane %v7243_v37, 1 }
0x1745   :  { %4240 = vmatpush.msra.mxu2 %v7325_v12 }
0x1747   :  { %4241 = vmatpush.msra.mxu2 %v7332_v15 }
0x1749   :  { %4242 = vmatpush.msra.mxu2 %v7339_v26 }
0x174b   :  { %4243 = vmatpush.msra.mxu2 %v7346_v35 }
0x174d   :  { %4244 = vmatpush.msra.mxu2 %v7357_v19 }
0x174f   :  { %4245 = vmatpush.msra.mxu2 %v7364_v33 }
0x1751   :  { %4246 = vmatpush.msra.mxu2 %v7369_v24 }
0x1753   :  { %4247 = vmatpush.msra.mxu2 %v7376_v29 }
0x17c7   :  { %v7417_v7 = vpop.f32.mrf.mxu2 }
0x17c8   :  { %v2976_v55 = vrot.slane %v7417_v7, 1  ;;  %v2979_v20 = vadd.f32 %v7417_v7, %v7415_v28 }
0x17ca   :  { %v2980_v45 = vadd.f32 %v2976_v55, %v7419_v30  ;;  %v2985_v9 = vadd.f32 %v2979_v20, %v7310_v23 }
0x17cc   :  { %v2986_v48 = vadd.f32 %v2982_v39, %v2980_v45  ;;  %v5477_v40 = vmul.f32 -1.442695, %v2985_v9 }
0x17ce   :  { %5826 = vpow2.f32 %v5477_v40  ;;  %v5478_v14 = vmul.f32 -1.442695, %v2986_v48 }
0x17d0   :  { %5828 = vpow2.f32 %v5478_v14  ;;  %v7441_v14 = vld [vmem:[%s8159_s18 + $0x18] sm:$0xff] }
0x17d1   :  { %3088 = vmatpush.msra.mxu3 %v7441_v14 }
0x17d4   :  { %v5827_v54 = vpop.eup %5826 }
0x17d5   :  { %v2993_v50 = vadd.f32 1.0, %v5827_v54 }
0x17d6   :  { %v5829_v32 = vpop.eup %5828 }
0x17d7   :  { %v2994_v38 = vadd.f32 1.0, %v5829_v32  ;;  %5830 = vrcp.f32 %v2993_v50  ;;  %v3006_v18 = vand.u32 2147483648, %v2993_v50  ;;  %v3004_v23 = vand.u32 2147483647, %v2993_v50 }
0x17d8   :  { %vm3000_vm9 = vweird.f32 %v2993_v50 }
0x17d9   :  { %5832 = vrcp.f32 %v2994_v38  ;;  %v3021_v25 = vand.u32 2147483648, %v2994_v38  ;;  %v3019_v58 = vand.u32 2147483647, %v2994_v38  ;;  %v3007_v44 = vor.u32 1.1754944e-38, %v3006_v18 }
0x17da   :  { %vm3005_vm15 = vcmp.eq.f32.partialorder %v3004_v23, 8.507059e+37  ;;  %vm3015_vm1 = vweird.f32 %v2994_v38 }
0x17db   :  { %v3022_v62 = vor.u32 1.1754944e-38, %v3021_v25  ;;  %vm3020_vm4 = vcmp.eq.f32.partialorder %v3019_v58, 8.507059e+37 }
0x17dd   :  { %v5831_v16 = vpop.eup %5830 }
0x17de   :  { %v2996_v49 = vmul.f32 %v5831_v16, %v2993_v50  ;;  %vm3001_vm8 = vweird.f32 %v5831_v16 }
0x17df   :  { %v5833_v34 = vpop.eup %5832  ;;  %vm3002_vm14 = vmor %vm3000_vm9, %vm3001_vm8 }
0x17e0   :  { %v2997_v0 = vsub.f32 1.0, %v2996_v49  ;;  %v3011_v2 = vmul.f32 %v5833_v34, %v2994_v38  ;;  %vm3016_vm10 = vweird.f32 %v5833_v34 }
0x17e1   :  { %vm3017_vm3 = vmor %vm3015_vm1, %vm3016_vm10 }
0x17e2   :  { %v2998_v4 = vmul.f32 %v5831_v16, %v2997_v0  ;;  %v3012_v39 = vsub.f32 1.0, %v3011_v2 }
0x17e4   :  { %v2999_v56 = vadd.f32 %v5831_v16, %v2998_v4  ;;  %v3013_v57 = vmul.f32 %v5833_v34, %v3012_v39 }
0x17e6   :  { %v3003_v53 = vsel %vm3002_vm14, %v5831_v16, %v2999_v56  ;;  %v3014_v52 = vadd.f32 %v5833_v34, %v3013_v57 }
0x17e7   :  { %v3008_v60 = vsel %vm3005_vm15, %v3007_v44, %v3003_v53 }
0x17e8   :  { %v3031_v36 = vmul.f32 %v3026_v46, %v3008_v60  ;;  %v3018_v11 = vsel %vm3017_vm3, %v5833_v34, %v3014_v52  ;;  %v3045_v34 = vsub.f32 1.0, %v3008_v60 }
0x17e9   :  { %v3023_v27 = vsel %vm3020_vm4, %v3022_v62, %v3018_v11 }
0x17ea   :  { %3035 = vrot.lane.b32.xlu1 %v3031_v36, %s6100_s26  ;;  %v3032_v51 = vmul.f32 %v3028_v59, %v3023_v27  ;;  %v3046_v32 = vsub.f32 1.0, %v3023_v27 }
0x17ec   :  { %3037 = vrot.lane.b32.xlu2 %v3032_v51, %s6100_s26 }
0x17f2   :  { %3060 = vrot.lane.b32.xlu1 %v3057_v41, %s6101_s27 }
0x17fa   :  { %3058 = vrot.lane.b32.xlu1 %v7243_v37, %s6101_s27  ;;  %v7446_v37 = vld [vmem:[%s8159_s18 + $0x10] sm:$0xff] }
0x17fb   :  { %3089 = vmatpush.msra.mxu3 %v7446_v37 }
0x1846   :  { %v3038_v17 = vpop.permute.xlu2 %3037 }
0x1847   :  { %v3042_v21 = vadd.f32 %v3038_v17, %v2980_v45  ;;  %v7458_v45 = vld [vmem:[%s8159_s18] sm:$0xff] }
0x1849   :  { %5834 = vtanh.f32 %v3042_v21 }
0x184f   :  { %v5835_v63 = vpop.eup %5834 }
0x1850   :  { %3051 = vrot.lane.b32.xlu0 %v5835_v63, %s6099_s3 }
0x185c   :  { %v3036_v9 = vpop.permute.xlu1 %3035 }
0x185d   :  { %v3041_v48 = vadd.f32 %v3036_v9, %v2979_v20  ;;  %v7452_v20 = vld [vmem:[%s8159_s18 + $0x8] sm:$0xff] }
0x185e   :  { %3090 = vmatpush.msra.mxu3 %v7452_v20 }
0x185f   :  { %5836 = vtanh.f32 %v3041_v48 }
0x1860   :  { %3091 = vmatpush.msra.mxu3 %v7458_v45 }
0x1862   :  { %3403 = vmatpush.msrb.mxu3 %v7441_v14 }
0x1864   :  { %3404 = vmatpush.msrb.mxu3 %v7446_v37  ;;  %v3061_v54 = vpop.permute.xlu1 %3060 }
0x1865   :  { %v5837_v40 = vpop.eup %5836  ;;  %v3065_v16 = vmul.f32 %v3061_v54, %v3023_v27 }
0x1866   :  { %3049 = vrot.lane.b32.xlu0 %v5837_v40, %s6099_s3  ;;  %3405 = vmatpush.msrb.mxu3 %v7452_v20 }
0x1868   :  { %3406 = vmatpush.msrb.mxu3 %v7458_v45 }
0x186c   :  { %v3059_v59 = vpop.permute.xlu1 %3058 }
0x186d   :  { %v3064_v2 = vmul.f32 %v3059_v59, %v3008_v60 }
0x18c2   :  { %v3052_v50 = vpop.permute.xlu0 %3051 }
0x18c3   :  { %v3056_v38 = vmul.f32 %v3052_v50, %v3046_v32 }
0x18c5   :  { %v7466_v49 = vadd.f32 %v3065_v16, %v3056_v38 }
0x18c7   :  { %v3070_v4 = vrot.slane %v7466_v49, 7  ;;  %v7558_v49 = vld [vmem:[%s8153_s12 + $0x18] sm:$0xff] }
0x18d8   :  { %v3050_v0 = vpop.permute.xlu0 %3049 }
0x18d9   :  { %v3055_v18 = vmul.f32 %v3050_v0, %v3045_v34 }
0x18db   :  { %v7469_v23 = vadd.f32 %v3064_v2, %v3055_v18 }
0x18dd   :  { %v3071_v39 = vsel %vm408_vm2, %v3070_v4, %v7469_v23 }
0x18de   :  { %3072 = vrot.lane.b32.xlu0 %v3071_v39, %s6099_s3 }
0x1950   :  { %v3073_v25 = vpop.permute.xlu0 %3072 }
0x1951   :  { %5479 = vmatmul.msk.f32.vlgmr.msra.gmra.mxu3 %vm83_vm0, %v3073_v25  ;;  %5480 = vmatmul.msk.f32.vlgmr.msrb.gmra.mxu0 %vm83_vm0, %v3073_v25 }
0x1952   :  { %3767 = vmatpush.msrb.mxu0 %v7211_v8  ;;  %3723 = vmatpush.msra.mxu3 %v7441_v14 }
0x1954   :  { %3768 = vmatpush.msrb.mxu0 %v7216_v42  ;;  %3724 = vmatpush.msra.mxu3 %v7446_v37 }
0x1956   :  { %3769 = vmatpush.msrb.mxu0 %v7223_v31  ;;  %3725 = vmatpush.msra.mxu3 %v7452_v20 }
0x1958   :  { %3770 = vmatpush.msrb.mxu0 %v7230_v10  ;;  %3726 = vmatpush.msra.mxu3 %v7458_v45 }
0x19ce   :  { %v3135_v56 = vpop.f32.mrf.mxu0 }
0x19cf   :  { %v3140_v57 = vrot.slane %v3135_v56, 1  ;;  %v3141_v58 = vperm.slane %v3135_v56, 0 }
0x19d1   :  { %v3142_v44 = vperm.slane %v3140_v57, 0  ;;  %v3145_v8 = vadd.f32 %v3141_v58, %v7256_v5 }
0x19d3   :  { %v3146_v53 = vadd.f32 %v3142_v44, %v7264_v13  ;;  %5838 = vtanh.f32 %v3145_v8  ;;  %v7505_v8 = vadd.f32 %v7306_v22, %v3135_v56 }
0x19d5   :  { %5840 = vtanh.f32 %v3146_v53  ;;  %v3301_v53 = vrot.slane %v7505_v8, 7 }
0x19d9   :  { %v5839_v42 = vpop.eup %5838 }
0x19da   :  { %v3149_v52 = vmul.f32 %v5839_v42, %v7259_v43 }
0x19db   :  { %v5841_v31 = vpop.eup %5840 }
0x19dc   :  { %3153 = vrot.lane.b32.xlu2 %v3149_v52, %s6101_s27  ;;  %v3150_v10 = vmul.f32 %v5841_v31, %v7259_v43 }
0x19de   :  { %3155 = vrot.lane.b32.xlu1 %v3150_v10, %s6101_s27 }
0x1a36   :  { %v3154_v46 = vpop.permute.xlu2 %3153 }
0x1a37   :  { %v3159_v60 = vsel %vm83_vm0, %v3154_v46, 0.0 }
0x1a38   :  { %3160 = vadd.xlane.f32.xlu0 %v3159_v60 }
0x1a50   :  { %v3156_v62 = vpop.permute.xlu1 %3155 }
0x1a51   :  { %v3162_v36 = vsel %vm83_vm0, %v3156_v62, 0.0 }
0x1a52   :  { %3163 = vadd.xlane.f32.xlu2 %v3162_v36 }
0x1aab   :  { %v3161_v11 = vpop.xlane.xlu0 %3160 }
0x1aac   :  { %v3165_v27 = vadd.f32 %v3161_v11, %v7275_v1 }
0x1aae   :  { %3170 = vperm.xlu1 %5547, %v3165_v27  }
0x1ac5   :  { %v3164_v51 = vpop.xlane.xlu2 %3163 }
0x1ac6   :  { %v3166_v41 = vadd.f32 %v3164_v51, %v7278_v47 }
0x1ac8   :  { %3173 = vperm.xlu1 %5547, %v3166_v41  }
0x1b20   :  { %v3171_v17 = vpop.permute.xlu1 %3170 }
0x1b21   :  { %v3175_v63 = vperm.slane %v3171_v17, %v7281_v61 }
0x1b3a   :  { %v3174_v21 = vpop.permute.xlu1 %3173 }
0x1b3b   :  { %v3176_v9 = vperm.slane %v3174_v21, %v7281_v61 }
0x1b3d   :  { %v3177_v48 = vsel %vm408_vm2, %v3176_v9, %v3175_v63 }
0x1b3e   :  { %v3179_v40 = vsel %vm2859_vm13, %v3177_v48, -inf }
0x1b3f   :  { %3180 = vmax.xlane.f32.xlu1 %v3179_v40 }
0x1bb2   :  { %v3181_v54 = vpop.xlane.xlu1 %3180 }
0x1bb3   :  { %v3183_v50 = vperm.slane %v3181_v54, 0  ;;  %v3184_v32 = vperm.slane %v3181_v54, 1 }
0x1bb5   :  { %v3187_v38 = vsub.f32 %v3165_v27, %v3183_v50  ;;  %v3188_v16 = vsub.f32 %v3166_v41, %v3184_v32 }
0x1bb7   :  { %v3189_v59 = vmul.f32 1.442695, %v3187_v38  ;;  %v3191_v34 = vmul.f32 1.442695, %v3188_v16 }
0x1bb9   :  { %5842 = vpow2.f32 %v3189_v59 }
0x1bba   :  { %5844 = vpow2.f32 %v3191_v34 }
0x1bbf   :  { %v5843_v0 = vpop.eup %5842 }
0x1bc0   :  { %v5845_v2 = vpop.eup %5844  ;;  %3196 = vperm.xlu2 %5548, %v5843_v0  }
0x1bc1   :  { %3199 = vperm.xlu0 %5549, %v5845_v2  }
0x1c1a   :  { %v3197_v18 = vpop.permute.xlu2 %3196 }
0x1c1b   :  { %v3201_v25 = vperm.slane %v3197_v18, %v7281_v61 }
0x1c33   :  { %v3200_v39 = vpop.permute.xlu0 %3199 }
0x1c34   :  { %v3202_v57 = vperm.slane %v3200_v39, %v7281_v61 }
0x1c36   :  { %v3203_v58 = vsel %vm408_vm2, %v3202_v57, %v3201_v25 }
0x1c37   :  { %v3205_v44 = vsel %vm2859_vm13, %v3203_v58, 0.0 }
0x1c38   :  { %3206 = vadd.xlane.f32.xlu1 %v3205_v44 }
0x1c51   :  { %3344 = vrot.lane.b32.xlu1 %v3301_v53, %s6100_s26 }
0x1cab   :  { %v3207_v42 = vpop.xlane.xlu1 %3206 }
0x1cac   :  { %v3209_v52 = vperm.slane %v3207_v42, 0  ;;  %v3210_v31 = vperm.slane %v3207_v42, 1 }
0x1cae   :  { %5846 = vrcp.f32 %v3209_v52  ;;  %v3224_v27 = vand.u32 2147483648, %v3209_v52  ;;  %v3239_v56 = vand.u32 2147483648, %v3210_v31  ;;  %v3222_v41 = vand.u32 2147483647, %v3209_v52 }
0x1caf   :  { %5848 = vrcp.f32 %v3210_v31  ;;  %v3237_v21 = vand.u32 2147483647, %v3210_v31  ;;  %vm3218_vm7 = vweird.f32 %v3209_v52  ;;  %vm3233_vm8 = vweird.f32 %v3210_v31 }
0x1cb0   :  { %v3225_v48 = vor.u32 1.1754944e-38, %v3224_v27  ;;  %v3240_v40 = vor.u32 1.1754944e-38, %v3239_v56  ;;  %vm3223_vm14 = vcmp.eq.f32.partialorder %v3222_v41, 8.507059e+37 }
0x1cb1   :  { %vm3238_vm15 = vcmp.eq.f32.partialorder %v3237_v21, 8.507059e+37 }
0x1cb4   :  { %v5847_v10 = vpop.eup %5846 }
0x1cb5   :  { %v5849_v46 = vpop.eup %5848  ;;  %v3214_v60 = vmul.f32 %v5847_v10, %v3209_v52  ;;  %vm3219_vm5 = vweird.f32 %v5847_v10 }
0x1cb6   :  { %v3229_v62 = vmul.f32 %v5849_v46, %v3210_v31  ;;  %vm3234_vm6 = vweird.f32 %v5849_v46  ;;  %vm3220_vm9 = vmor %vm3218_vm7, %vm3219_vm5 }
0x1cb7   :  { %v3215_v36 = vsub.f32 1.0, %v3214_v60  ;;  %vm3235_vm10 = vmor %vm3233_vm8, %vm3234_vm6 }
0x1cb8   :  { %v3230_v11 = vsub.f32 1.0, %v3229_v62 }
0x1cb9   :  { %v3216_v51 = vmul.f32 %v5847_v10, %v3215_v36 }
0x1cba   :  { %v3231_v17 = vmul.f32 %v5849_v46, %v3230_v11 }
0x1cbb   :  { %v3217_v63 = vadd.f32 %v5847_v10, %v3216_v51 }
0x1cbc   :  { %v3232_v9 = vadd.f32 %v5849_v46, %v3231_v17 }
0x1cbd   :  { %v3221_v54 = vsel %vm3220_vm9, %v5847_v10, %v3217_v63 }
0x1cbe   :  { %v3236_v50 = vsel %vm3235_vm10, %v5849_v46, %v3232_v9  ;;  %v3226_v32 = vsel %vm3223_vm14, %v3225_v48, %v3221_v54 }
0x1cbf   :  { %v3241_v38 = vsel %vm3238_vm15, %v3240_v40, %v3236_v50  ;;  %v3227_v16 = vmul.f32 %v5843_v0, %v3226_v32 }
0x1cc0   :  { %v3242_v59 = vmul.f32 %v5845_v2, %v3241_v38 }
0x1cc1   :  { %3245 = vperm.xlu0 %5549, %v3227_v16  }
0x1cc2   :  { %3250 = vperm.xlu2 %5548, %v3242_v59  }
0x1cc9   :  { %3346 = vrot.lane.b32.xlu0 %v7505_v8, %s6100_s26 }
0x1d1c   :  { %v3251_v34 = vpop.permute.xlu2 %3250 }
0x1d1d   :  { %v3254_v18 = vmul.f32 %v3251_v34, %v7204_v3 }
0x1d1f   :  { %v3262_v39 = vsel %vm2639_vm12, %v3254_v18, 0.0 }
0x1d20   :  { %v3263_v25 = vrot.slane %v3262_v39, 4 }
0x1d22   :  { %v3264_v57 = vadd.f32 %v3263_v25, %v3262_v39 }
0x1d24   :  { %v3265_v42 = vrot.slane %v3264_v57, 2 }
0x1d26   :  { %v3266_v2 = vadd.f32 %v3265_v42, %v3264_v57 }
0x1d28   :  { %v3267_v46 = vrot.slane %v3266_v2, 1 }
0x1d2a   :  { %v3268_v36 = vadd.f32 %v3267_v46, %v3266_v2 }
0x1d33   :  { %v3246_v58 = vpop.permute.xlu0 %3245 }
0x1d34   :  { %v3253_v44 = vmul.f32 %v3246_v58, %v7193_v6 }
0x1d36   :  { %v3255_v52 = vsel %vm2639_vm12, %v3253_v44, 0.0 }
0x1d37   :  { %v3256_v0 = vrot.slane %v3255_v52, 4 }
0x1d39   :  { %v3257_v31 = vadd.f32 %v3256_v0, %v3255_v52 }
0x1d3b   :  { %v3258_v10 = vrot.slane %v3257_v31, 2  ;;  %v3347_v0 = vpop.permute.xlu0 %3346 }
0x1d3d   :  { %v3259_v60 = vadd.f32 %v3258_v10, %v3257_v31  ;;  %v3376_v10 = vrot.slane %v7469_v23, 7 }
0x1d3f   :  { %v3260_v62 = vrot.slane %v3259_v60, 1 }
0x1d41   :  { %v3261_v11 = vadd.f32 %v3260_v62, %v3259_v60  ;;  %v3345_v62 = vpop.permute.xlu1 %3344 }
0x1d43   :  { %v3271_v3 = vsel %vm408_vm2, %v3268_v36, %v3261_v11 }
0x1d44   :  { %5481 = vmatmul.msk.f32.vlgmr.msrb.gmra.mxu1 %vm2639_vm12, %v3271_v3 }
0x1d45   :  { %4561 = vmatpush.msrb.mxu1 %v7325_v12 }
0x1d47   :  { %4562 = vmatpush.msrb.mxu1 %v7332_v15 }
0x1d49   :  { %4563 = vmatpush.msrb.mxu1 %v7339_v26 }
0x1d4b   :  { %4564 = vmatpush.msrb.mxu1 %v7346_v35 }
0x1d4d   :  { %4565 = vmatpush.msrb.mxu1 %v7357_v19 }
0x1d4f   :  { %4566 = vmatpush.msrb.mxu1 %v7364_v33 }
0x1d51   :  { %4567 = vmatpush.msrb.mxu1 %v7369_v24 }
0x1d53   :  { %4568 = vmatpush.msrb.mxu1 %v7376_v29 }
0x1dc1   :  { %v7527_v6 = vpop.f32.mrf.mxu1 }
0x1dc2   :  { %v3295_v27 = vrot.slane %v7527_v6, 7  ;;  %v3299_v56 = vadd.f32 %v7527_v6, %v7419_v30 }
0x1dc4   :  { %v3298_v51 = vadd.f32 %v3295_v27, %v7415_v28  ;;  %v3305_v41 = vadd.f32 %v3299_v56, %v7505_v8 }
0x1dc6   :  { %v3304_v17 = vadd.f32 %v3301_v53, %v3298_v51  ;;  %v5483_v21 = vmul.f32 -1.442695, %v3305_v41 }
0x1dc8   :  { %v5482_v63 = vmul.f32 -1.442695, %v3304_v17  ;;  %5850 = vpow2.f32 %v5483_v21 }
0x1dca   :  { %5852 = vpow2.f32 %v5482_v63 }
0x1dce   :  { %v5851_v9 = vpop.eup %5850 }
0x1dcf   :  { %v3313_v48 = vadd.f32 1.0, %v5851_v9 }
0x1dd0   :  { %v5853_v40 = vpop.eup %5852 }
0x1dd1   :  { %v3312_v54 = vadd.f32 1.0, %v5853_v40  ;;  %5854 = vrcp.f32 %v3313_v48  ;;  %v3340_v34 = vand.u32 2147483648, %v3313_v48  ;;  %v3338_v8 = vand.u32 2147483647, %v3313_v48 }
0x1dd2   :  { %vm3334_vm3 = vweird.f32 %v3313_v48 }
0x1dd3   :  { %5856 = vrcp.f32 %v3312_v54  ;;  %v3325_v39 = vand.u32 2147483648, %v3312_v54  ;;  %v3323_v58 = vand.u32 2147483647, %v3312_v54  ;;  %v3341_v44 = vor.u32 1.1754944e-38, %v3340_v34 }
0x1dd4   :  { %vm3339_vm6 = vcmp.eq.f32.partialorder %v3338_v8, 8.507059e+37  ;;  %vm3319_vm7 = vweird.f32 %v3312_v54  ;;  %v7572_v8 = vld [vmem:[%s8153_s12 + $0x8] sm:$0xff] }
0x1dd5   :  { %v3326_v31 = vor.u32 1.1754944e-38, %v3325_v39  ;;  %vm3324_vm9 = vcmp.eq.f32.partialorder %v3323_v58, 8.507059e+37 }
0x1dd7   :  { %v5855_v50 = vpop.eup %5854 }
0x1dd8   :  { %v3330_v32 = vmul.f32 %v5855_v50, %v3313_v48  ;;  %vm3335_vm1 = vweird.f32 %v5855_v50 }
0x1dd9   :  { %v5857_v38 = vpop.eup %5856  ;;  %vm3336_vm5 = vmor %vm3334_vm3, %vm3335_vm1 }
0x1dda   :  { %v3331_v16 = vsub.f32 1.0, %v3330_v32  ;;  %v3315_v59 = vmul.f32 %v5857_v38, %v3312_v54  ;;  %vm3320_vm4 = vweird.f32 %v5857_v38 }
0x1ddb   :  { %vm3321_vm8 = vmor %vm3319_vm7, %vm3320_vm4 }
0x1ddc   :  { %v3332_v18 = vmul.f32 %v5855_v50, %v3331_v16  ;;  %v3316_v53 = vsub.f32 1.0, %v3315_v59 }
0x1dde   :  { %v3333_v25 = vadd.f32 %v5855_v50, %v3332_v18  ;;  %v3317_v57 = vmul.f32 %v5857_v38, %v3316_v53  ;;  %v7579_v53 = vld [vmem:[%s8153_s12] sm:$0xff] }
0x1de0   :  { %v3337_v42 = vsel %vm3336_vm5, %v5855_v50, %v3333_v25  ;;  %v3318_v52 = vadd.f32 %v5857_v38, %v3317_v57 }
0x1de1   :  { %v3342_v2 = vsel %vm3339_vm6, %v3341_v44, %v3337_v42 }
0x1de2   :  { %v3351_v46 = vmul.f32 %v3347_v0, %v3342_v2  ;;  %v3322_v60 = vsel %vm3321_vm8, %v5857_v38, %v3318_v52  ;;  %v3365_v32 = vsub.f32 1.0, %v3342_v2 }
0x1de3   :  { %v3327_v36 = vsel %vm3324_vm9, %v3326_v31, %v3322_v60 }
0x1de4   :  { %3356 = vrot.lane.b32.xlu0 %v3351_v46, %s6100_s26  ;;  %v3350_v11 = vmul.f32 %v3345_v62, %v3327_v36  ;;  %v3379_v3 = vmul.f32 %v3376_v10, %v3327_v36  ;;  %v3364_v48 = vsub.f32 1.0, %v3327_v36 }
0x1de6   :  { %3354 = vrot.lane.b32.xlu2 %v3350_v11, %s6100_s26 }
0x1e40   :  { %v3355_v41 = vpop.permute.xlu2 %3354 }
0x1e41   :  { %v3360_v17 = vadd.f32 %v3355_v41, %v3298_v51  ;;  %v3380_v51 = vmul.f32 %v3342_v2, %v3070_v4  ;;  %v7565_v4 = vld [vmem:[%s8153_s12 + $0x10] sm:$0xff] }
0x1e43   :  { %5858 = vtanh.f32 %v3360_v17 }
0x1e49   :  { %v5859_v21 = vpop.eup %5858 }
0x1e4a   :  { %3368 = vrot.lane.b32.xlu2 %v5859_v21, %s6099_s3 }
0x1e56   :  { %v3357_v63 = vpop.permute.xlu0 %3356 }
0x1e57   :  { %v3361_v9 = vadd.f32 %v3357_v63, %v3299_v56 }
0x1e59   :  { %5860 = vtanh.f32 %v3361_v9 }
0x1e5f   :  { %v5861_v23 = vpop.eup %5860 }
0x1e60   :  { %3370 = vrot.lane.b32.xlu0 %v5861_v23, %s6099_s3 }
0x1ea4   :  { %v3369_v40 = vpop.permute.xlu2 %3368 }
0x1ea5   :  { %v3374_v54 = vmul.f32 %v3369_v40, %v3364_v48 }
0x1ea7   :  { %v7543_v50 = vadd.f32 %v3379_v3, %v3374_v54 }
0x1ea9   :  { %v3385_v59 = vrot.slane %v7543_v50, 1 }
0x1ed2   :  { %v3371_v38 = vpop.permute.xlu0 %3370 }
0x1ed3   :  { %v3375_v16 = vmul.f32 %v3371_v38, %v3365_v32 }
0x1ed5   :  { %v7548_v34 = vadd.f32 %v3380_v51, %v3375_v16 }
0x1ed7   :  { %v3386_v56 = vsel %vm408_vm2, %v7548_v34, %v3385_v59 }
0x1ed8   :  { %3387 = vrot.lane.b32.xlu2 %v3386_v56, %s6099_s3 }
0x1f32   :  { %v3388_v18 = vpop.permute.xlu2 %3387 }
0x1f33   :  { %5484 = vmatmul.msk.f32.vlgmr.msrb.gmra.mxu3 %vm83_vm0, %v3388_v18  ;;  %5485 = vmatmul.msk.f32.vlgmr.msra.gmra.mxu0 %vm83_vm0, %v3388_v18 }
0x1f34   :  { %4088 = vmatpush.msra.mxu0 %v7558_v49  ;;  %4044 = vmatpush.msrb.mxu3 %v7441_v14 }
0x1f36   :  { %4089 = vmatpush.msra.mxu0 %v7565_v4  ;;  %4045 = vmatpush.msrb.mxu3 %v7446_v37 }
0x1f38   :  { %4090 = vmatpush.msra.mxu0 %v7572_v8  ;;  %4046 = vmatpush.msrb.mxu3 %v7452_v20 }
0x1f3a   :  { %4091 = vmatpush.msra.mxu0 %v7579_v53  ;;  %4047 = vmatpush.msrb.mxu3 %v7458_v45 }
0x1fb0   :  { %v3451_v39 = vpop.f32.mrf.mxu0 }
0x1fb1   :  { %v3456_v25 = vrot.slane %v3451_v39, 1  ;;  %v3457_v57 = vperm.slane %v3451_v39, 0 }
0x1fb3   :  { %v3458_v58 = vperm.slane %v3456_v25, 0  ;;  %v3461_v44 = vadd.f32 %v3457_v57, %v7256_v5 }
0x1fb5   :  { %v3462_v42 = vadd.f32 %v3458_v58, %v7264_v13  ;;  %5862 = vtanh.f32 %v3461_v44 }
0x1fb7   :  { %5864 = vtanh.f32 %v3462_v42 }
0x1fbb   :  { %v5863_v52 = vpop.eup %5862 }
0x1fbc   :  { %v3465_v0 = vmul.f32 %v5863_v52, %v7259_v43 }
0x1fbd   :  { %v5865_v2 = vpop.eup %5864 }
0x1fbe   :  { %3469 = vrot.lane.b32.xlu1 %v3465_v0, %s6101_s27  ;;  %v3466_v31 = vmul.f32 %v5865_v2, %v7259_v43  ;;  %v7602_v0 = vadd.f32 %v7306_v22, %v3451_v39 }
0x1fc0   :  { %3471 = vrot.lane.b32.xlu0 %v3466_v31, %s6101_s27  ;;  %v3618_v2 = vrot.slane %v7602_v0, 6 }
0x2030   :  { %v3470_v10 = vpop.permute.xlu1 %3469 }
0x2031   :  { %v3475_v46 = vsel %vm83_vm0, %v3470_v10, 0.0 }
0x2032   :  { %3476 = vadd.xlane.f32.xlu2 %v3475_v46  ;;  %v3472_v60 = vpop.permute.xlu0 %3471 }
0x2033   :  { %v3478_v62 = vsel %vm83_vm0, %v3472_v60, 0.0 }
0x2034   :  { %3479 = vadd.xlane.f32.xlu1 %v3478_v62 }
0x20a5   :  { %v3477_v36 = vpop.xlane.xlu2 %3476 }
0x20a6   :  { %v3481_v11 = vadd.f32 %v3477_v36, %v7275_v1 }
0x20a7   :  { %v3480_v3 = vpop.xlane.xlu1 %3479 }
0x20a8   :  { %3486 = vperm.xlu0 %5549, %v3481_v11   ;;  %v3482_v41 = vadd.f32 %v3480_v3, %v7278_v47 }
0x20b0   :  { %3489 = vperm.xlu0 %5549, %v3482_v41  }
0x211a   :  { %v3487_v17 = vpop.permute.xlu0 %3486 }
0x211b   :  { %v3491_v63 = vperm.slane %v3487_v17, %v7281_v61 }
0x2122   :  { %v3490_v21 = vpop.permute.xlu0 %3489 }
0x2123   :  { %v3492_v9 = vperm.slane %v3490_v21, %v7281_v61 }
0x2125   :  { %v3493_v23 = vsel %vm408_vm2, %v3492_v9, %v3491_v63 }
0x2126   :  { %v3495_v48 = vsel %vm2859_vm13, %v3493_v23, -inf }
0x2127   :  { %3496 = vmax.xlane.f32.xlu0 %v3495_v48 }
0x219a   :  { %v3497_v40 = vpop.xlane.xlu0 %3496 }
0x219b   :  { %v3499_v54 = vperm.slane %v3497_v40, 0  ;;  %v3500_v32 = vperm.slane %v3497_v40, 1 }
0x219d   :  { %v3503_v38 = vsub.f32 %v3481_v11, %v3499_v54  ;;  %v3504_v51 = vsub.f32 %v3482_v41, %v3500_v32 }
0x219f   :  { %v3505_v16 = vmul.f32 1.442695, %v3503_v38  ;;  %v3507_v59 = vmul.f32 1.442695, %v3504_v51 }
0x21a1   :  { %5866 = vpow2.f32 %v3505_v16 }
0x21a2   :  { %5868 = vpow2.f32 %v3507_v59 }
0x21a7   :  { %v5867_v56 = vpop.eup %5866 }
0x21a8   :  { %v5869_v18 = vpop.eup %5868  ;;  %3512 = vperm.xlu2 %5548, %v5867_v56  }
0x21a9   :  { %3515 = vperm.xlu1 %5547, %v5869_v18  }
0x2202   :  { %v3513_v25 = vpop.permute.xlu2 %3512 }
0x2203   :  { %v3517_v58 = vperm.slane %v3513_v25, %v7281_v61 }
0x221b   :  { %v3516_v57 = vpop.permute.xlu1 %3515 }
0x221c   :  { %v3518_v44 = vperm.slane %v3516_v57, %v7281_v61  ;;  %v3619_v57 = vrot.slane %v7602_v0, 7 }
0x221e   :  { %v3519_v42 = vsel %vm408_vm2, %v3518_v44, %v3517_v58  ;;  %v7610_v44 = vld [vmem:[#allocation2] sm:$0xff] }
0x221f   :  { %v3521_v52 = vsel %vm2859_vm13, %v3519_v42, 0.0 }
0x2220   :  { %3522 = vadd.xlane.f32.xlu0 %v3521_v52 }
0x2234   :  { %3662 = vrot.lane.b32.xlu0 %v3618_v2, %s6100_s26 }
0x2293   :  { %v3523_v31 = vpop.xlane.xlu0 %3522 }
0x2294   :  { %v3525_v10 = vperm.slane %v3523_v31, 0  ;;  %v3526_v46 = vperm.slane %v3523_v31, 1 }
0x2296   :  { %5870 = vrcp.f32 %v3525_v10  ;;  %v3540_v17 = vand.u32 2147483648, %v3525_v10  ;;  %v3555_v39 = vand.u32 2147483648, %v3526_v46  ;;  %v3538_v21 = vand.u32 2147483647, %v3525_v10 }
0x2297   :  { %5872 = vrcp.f32 %v3526_v46  ;;  %v3553_v9 = vand.u32 2147483647, %v3526_v46  ;;  %vm3534_vm15 = vweird.f32 %v3525_v10  ;;  %vm3549_vm1 = vweird.f32 %v3526_v46 }
0x2298   :  { %v3541_v40 = vor.u32 1.1754944e-38, %v3540_v17  ;;  %v3556_v54 = vor.u32 1.1754944e-38, %v3555_v39  ;;  %vm3539_vm5 = vcmp.eq.f32.partialorder %v3538_v21, 8.507059e+37 }
0x2299   :  { %vm3554_vm6 = vcmp.eq.f32.partialorder %v3553_v9, 8.507059e+37 }
0x229c   :  { %v5871_v60 = vpop.eup %5870 }
0x229d   :  { %v5873_v62 = vpop.eup %5872  ;;  %v3530_v36 = vmul.f32 %v5871_v60, %v3525_v10  ;;  %vm3535_vm10 = vweird.f32 %v5871_v60 }
0x229e   :  { %v3545_v11 = vmul.f32 %v5873_v62, %v3526_v46  ;;  %vm3550_vm14 = vweird.f32 %v5873_v62  ;;  %vm3536_vm3 = vmor %vm3534_vm15, %vm3535_vm10 }
0x229f   :  { %v3531_v3 = vsub.f32 1.0, %v3530_v36  ;;  %vm3551_vm4 = vmor %vm3549_vm1, %vm3550_vm14 }
0x22a0   :  { %v3546_v41 = vsub.f32 1.0, %v3545_v11 }
0x22a1   :  { %v3532_v22 = vmul.f32 %v5871_v60, %v3531_v3 }
0x22a2   :  { %v3547_v63 = vmul.f32 %v5873_v62, %v3546_v41 }
0x22a3   :  { %v3533_v23 = vadd.f32 %v5871_v60, %v3532_v22 }
0x22a4   :  { %v3548_v48 = vadd.f32 %v5873_v62, %v3547_v63 }
0x22a5   :  { %v3537_v32 = vsel %vm3536_vm3, %v5871_v60, %v3533_v23  ;;  %v7614_v60 = vld [vmem:[#allocation2 + $0x8] sm:$0xff] }
0x22a6   :  { %v3552_v38 = vsel %vm3551_vm4, %v5873_v62, %v3548_v48  ;;  %v3542_v51 = vsel %vm3539_vm5, %v3541_v40, %v3537_v32 }
0x22a7   :  { %v3557_v16 = vsel %vm3554_vm6, %v3556_v54, %v3552_v38  ;;  %v3543_v59 = vmul.f32 %v5867_v56, %v3542_v51 }
0x22a8   :  { %v3558_v25 = vmul.f32 %v5869_v18, %v3557_v16 }
0x22a9   :  { %3561 = vperm.xlu2 %5548, %v3543_v59  }
0x22aa   :  { %3566 = vperm.xlu1 %5547, %v3558_v25  }
0x22b1   :  { %3664 = vrot.lane.b32.xlu2 %v3619_v57, %s6100_s26 }
0x2303   :  { %v3562_v58 = vpop.permute.xlu2 %3561 }
0x2304   :  { %v3569_v42 = vmul.f32 %v7610_v44, %v3562_v58 }
0x2306   :  { %v3571_v52 = vsel %vm2639_vm12, %v3569_v42, 0.0 }
0x2307   :  { %v3572_v31 = vrot.slane %v3571_v52, 4 }
0x2309   :  { %v3573_v10 = vadd.f32 %v3572_v31, %v3571_v52 }
0x230b   :  { %v3574_v18 = vrot.slane %v3573_v10, 2 }
0x230d   :  { %v3575_v11 = vadd.f32 %v3574_v18, %v3573_v10  ;;  %v3694_v18 = vrot.slane %v7543_v50, 7 }
0x230f   :  { %v3576_v17 = vrot.slane %v3575_v11, 1 }
0x2311   :  { %v3577_v21 = vadd.f32 %v3576_v17, %v3575_v11  ;;  %v3695_v11 = vrot.slane %v7548_v34, 7 }
0x231c   :  { %v3567_v46 = vpop.permute.xlu1 %3566 }
0x231d   :  { %v3570_v56 = vmul.f32 %v7614_v60, %v3567_v46 }
0x231f   :  { %v3578_v62 = vsel %vm2639_vm12, %v3570_v56, 0.0 }
0x2320   :  { %v3579_v36 = vrot.slane %v3578_v62, 4 }
0x2322   :  { %v3580_v3 = vadd.f32 %v3579_v36, %v3578_v62 }
0x2324   :  { %v3581_v41 = vrot.slane %v3580_v3, 2 }
0x2326   :  { %v3582_v22 = vadd.f32 %v3581_v41, %v3580_v3  ;;  %v3663_v3 = vpop.permute.xlu0 %3662 }
0x2328   :  { %v3583_v39 = vrot.slane %v3582_v22, 1 }
0x232a   :  { %v3584_v63 = vadd.f32 %v3583_v39, %v3582_v22  ;;  %v3665_v22 = vpop.permute.xlu2 %3664 }
0x232c   :  { %v3587_v9 = vsel %vm408_vm2, %v3584_v63, %v3577_v21 }
0x232d   :  { %5486 = vmatmul.msk.f32.vlgmr.msrb.gmra.mxu2 %vm2639_vm12, %v3587_v9 }
0x232e   :  { %4882 = vmatpush.msrb.mxu2 %v7325_v12 }
0x2330   :  { %4883 = vmatpush.msrb.mxu2 %v7332_v15 }
0x2332   :  { %4884 = vmatpush.msrb.mxu2 %v7339_v26 }
0x2334   :  { %4885 = vmatpush.msrb.mxu2 %v7346_v35 }
0x2336   :  { %4886 = vmatpush.msrb.mxu2 %v7357_v19 }
0x2338   :  { %4887 = vmatpush.msrb.mxu2 %v7364_v33 }
0x233a   :  { %4888 = vmatpush.msrb.mxu2 %v7369_v24 }
0x233c   :  { %4889 = vmatpush.msrb.mxu2 %v7376_v29 }
0x23b0   :  { %v7628_v23 = vpop.f32.mrf.mxu2 }
0x23b1   :  { %v3611_v48 = vrot.slane %v7628_v23, 6  ;;  %v3612_v12 = vrot.slane %v7628_v23, 7 }
0x23b3   :  { %v3615_v15 = vadd.f32 %v3611_v48, %v7415_v28  ;;  %v3616_v26 = vadd.f32 %v3612_v12, %v7419_v30 }
0x23b5   :  { %v3622_v35 = vadd.f32 %v3618_v2, %v3615_v15  ;;  %v3623_v19 = vadd.f32 %v3619_v57, %v3616_v26 }
0x23b7   :  { %v5487_v33 = vmul.f32 -1.442695, %v3622_v35  ;;  %v5488_v24 = vmul.f32 -1.442695, %v3623_v19 }
0x23b9   :  { %5874 = vpow2.f32 %v5487_v33 }
0x23ba   :  { %5876 = vpow2.f32 %v5488_v24 }
0x23bf   :  { %v5875_v29 = vpop.eup %5874 }
0x23c0   :  { %v5877_v40 = vpop.eup %5876  ;;  %v3630_v54 = vadd.f32 1.0, %v5875_v29 }
0x23c1   :  { %v3631_v32 = vadd.f32 1.0, %v5877_v40 }
0x23c2   :  { %5878 = vrcp.f32 %v3630_v54  ;;  %v3643_v42 = vand.u32 2147483648, %v3630_v54  ;;  %v3641_v57 = vand.u32 2147483647, %v3630_v54  ;;  %vm3637_vm9 = vweird.f32 %v3630_v54 }
0x23c3   :  { %5880 = vrcp.f32 %v3631_v32  ;;  %v3658_v0 = vand.u32 2147483648, %v3631_v32  ;;  %v3656_v31 = vand.u32 2147483647, %v3631_v32  ;;  %vm3652_vm10 = vweird.f32 %v3631_v32 }
0x23c4   :  { %v3644_v56 = vor.u32 1.1754944e-38, %v3643_v42  ;;  %vm3642_vm1 = vcmp.eq.f32.partialorder %v3641_v57, 8.507059e+37 }
0x23c5   :  { %v3659_v62 = vor.u32 1.1754944e-38, %v3658_v0  ;;  %vm3657_vm3 = vcmp.eq.f32.partialorder %v3656_v31, 8.507059e+37 }
0x23c8   :  { %v5879_v38 = vpop.eup %5878 }
0x23c9   :  { %v5881_v51 = vpop.eup %5880  ;;  %v3633_v16 = vmul.f32 %v5879_v38, %v3630_v54  ;;  %vm3638_vm7 = vweird.f32 %v5879_v38 }
0x23ca   :  { %v3648_v59 = vmul.f32 %v5881_v51, %v3631_v32  ;;  %vm3653_vm8 = vweird.f32 %v5881_v51  ;;  %vm3639_vm14 = vmor %vm3637_vm9, %vm3638_vm7 }
0x23cb   :  { %v3634_v25 = vsub.f32 1.0, %v3633_v16  ;;  %vm3654_vm15 = vmor %vm3652_vm10, %vm3653_vm8 }
0x23cc   :  { %v3649_v58 = vsub.f32 1.0, %v3648_v59 }
0x23cd   :  { %v3635_v2 = vmul.f32 %v5879_v38, %v3634_v25 }
0x23ce   :  { %v3650_v52 = vmul.f32 %v5881_v51, %v3649_v58 }
0x23cf   :  { %v3636_v10 = vadd.f32 %v5879_v38, %v3635_v2 }
0x23d0   :  { %v3651_v46 = vadd.f32 %v5881_v51, %v3650_v52 }
0x23d1   :  { %v3640_v36 = vsel %vm3639_vm14, %v5879_v38, %v3636_v10 }
0x23d2   :  { %v3655_v41 = vsel %vm3654_vm15, %v5881_v51, %v3651_v46  ;;  %v3645_v17 = vsel %vm3642_vm1, %v3644_v56, %v3640_v36 }
0x23d3   :  { %v3660_v39 = vsel %vm3657_vm3, %v3659_v62, %v3655_v41  ;;  %v3668_v21 = vmul.f32 %v3663_v3, %v3645_v17  ;;  %v3698_v63 = vmul.f32 %v3694_v18, %v3645_v17  ;;  %v3682_v51 = vsub.f32 1.0, %v3645_v17 }
0x23d4   :  { %v3669_v9 = vmul.f32 %v3665_v22, %v3660_v39  ;;  %v3699_v35 = vmul.f32 %v3695_v11, %v3660_v39  ;;  %v3683_v40 = vsub.f32 1.0, %v3660_v39 }
0x23d5   :  { %3672 = vrot.lane.b32.xlu1 %v3668_v21, %s6100_s26 }
0x23d6   :  { %3674 = vrot.lane.b32.xlu2 %v3669_v9, %s6100_s26 }
0x2430   :  { %v3675_v50 = vpop.permute.xlu2 %3674 }
0x2431   :  { %v3679_v19 = vadd.f32 %v3675_v50, %v3616_v26 }
0x2433   :  { %5882 = vtanh.f32 %v3679_v19 }
0x2439   :  { %v5883_v33 = vpop.eup %5882 }
0x243a   :  { %3688 = vrot.lane.b32.xlu2 %v5883_v33, %s6099_s3 }
0x2447   :  { %v3673_v34 = vpop.permute.xlu1 %3672 }
0x2448   :  { %v3678_v24 = vadd.f32 %v3673_v34, %v3615_v15 }
0x244a   :  { %5884 = vtanh.f32 %v3678_v24 }
0x2450   :  { %v5885_v29 = vpop.eup %5884 }
0x2451   :  { %3686 = vrot.lane.b32.xlu1 %v5885_v29, %s6099_s3 }
0x2494   :  { %v3689_v54 = vpop.permute.xlu2 %3688 }
0x2495   :  { %v3693_v32 = vmul.f32 %v3689_v54, %v3683_v40 }
0x2497   :  { %v7646_v38 = vadd.f32 %v3699_v35, %v3693_v32 }
0x2499   :  { %v3705_v26 = vrot.slane %v7646_v38, 1 }
0x24c3   :  { %v3687_v16 = vpop.permute.xlu1 %3686 }
0x24c4   :  { %v3692_v59 = vmul.f32 %v3687_v16, %v3682_v51 }
0x24c6   :  { %v7648_v25 = vadd.f32 %v3698_v63, %v3692_v59 }
0x24c8   :  { %v3704_v58 = vrot.slane %v7648_v25, 2 }
0x24ca   :  { %v3706_v15 = vsel %vm408_vm2, %v3705_v26, %v3704_v58 }
0x24cb   :  { %3707 = vrot.lane.b32.xlu0 %v3706_v15, %s6099_s3 }
0x253d   :  { %v3708_v42 = vpop.permute.xlu0 %3707 }
0x253e   :  { %5489 = vmatmul.msk.f32.vlgmr.msra.gmra.mxu3 %vm83_vm0, %v3708_v42  ;;  %5490 = vmatmul.msk.f32.vlgmr.msrb.gmra.mxu0 %vm83_vm0, %v3708_v42 }
0x253f   :  { %4409 = vmatpush.msrb.mxu0 %v7558_v49  ;;  %4365 = vmatpush.msra.mxu3 %v7441_v14 }
0x2541   :  { %4410 = vmatpush.msrb.mxu0 %v7565_v4  ;;  %4366 = vmatpush.msra.mxu3 %v7446_v37 }
0x2543   :  { %4411 = vmatpush.msrb.mxu0 %v7572_v8  ;;  %4367 = vmatpush.msra.mxu3 %v7452_v20 }
0x2545   :  { %4412 = vmatpush.msrb.mxu0 %v7579_v53  ;;  %4368 = vmatpush.msra.mxu3 %v7458_v45 }
0x25bb   :  { %v7664_v0 = vpop.f32.mrf.mxu0 }
0x25bc   :  { %v3777_v2 = vrot.slane %v7664_v0, 1  ;;  %v3778_v57 = vperm.slane %v7664_v0, 0 }
0x25be   :  { %v3779_v52 = vperm.slane %v3777_v2, 0  ;;  %v3782_v14 = vadd.f32 %v3778_v57, %v7256_v5 }
0x25c0   :  { %v3783_v31 = vadd.f32 %v3779_v52, %v7264_v13  ;;  %5886 = vtanh.f32 %v3782_v14 }
0x25c2   :  { %5888 = vtanh.f32 %v3783_v31 }
0x25c6   :  { %v5887_v37 = vpop.eup %5886 }
0x25c7   :  { %v3786_v20 = vmul.f32 %v5887_v37, %v7259_v43 }
0x25c8   :  { %v5889_v10 = vpop.eup %5888 }
0x25c9   :  { %3790 = vrot.lane.b32.xlu1 %v3786_v20, %s6101_s27  ;;  %v3787_v45 = vmul.f32 %v5889_v10, %v7259_v43 }
0x25cb   :  { %3792 = vrot.lane.b32.xlu2 %v3787_v45, %s6101_s27 }
0x2625   :  { %v3793_v46 = vpop.permute.xlu2 %3792 }
0x2626   :  { %v3799_v56 = vsel %vm83_vm0, %v3793_v46, 0.0 }
0x2627   :  { %3800 = vadd.xlane.f32.xlu1 %v3799_v56 }
0x263b   :  { %v3791_v18 = vpop.permute.xlu1 %3790 }
0x263c   :  { %v3796_v62 = vsel %vm83_vm0, %v3791_v18, 0.0 }
0x263d   :  { %3797 = vadd.xlane.f32.xlu0 %v3796_v62 }
0x269a   :  { %v3801_v3 = vpop.xlane.xlu1 %3800 }
0x269b   :  { %v3803_v41 = vadd.f32 %v3801_v3, %v7278_v47 }
0x26b0   :  { %v3798_v36 = vpop.xlane.xlu0 %3797 }
0x26b1   :  { %v3802_v11 = vadd.f32 %v3798_v36, %v7275_v1 }
0x26b3   :  { %3807 = vperm.xlu2 %5548, %v3802_v11  }
0x26bb   :  { %3810 = vperm.xlu2 %5548, %v3803_v41  }
0x270d   :  { %v3808_v17 = vpop.permute.xlu2 %3807 }
0x270e   :  { %v3812_v39 = vperm.slane %v3808_v17, %v7281_v61 }
0x2715   :  { %v3811_v22 = vpop.permute.xlu2 %3810 }
0x2716   :  { %v3813_v21 = vperm.slane %v3811_v22, %v7281_v61 }
0x2718   :  { %v3814_v63 = vsel %vm408_vm2, %v3813_v21, %v3812_v39 }
0x2719   :  { %v3816_v9 = vsel %vm2859_vm13, %v3814_v63, -inf }
0x271a   :  { %3817 = vmax.xlane.f32.xlu2 %v3816_v9 }
0x278d   :  { %v3818_v35 = vpop.xlane.xlu2 %3817 }
0x278e   :  { %v3820_v50 = vperm.slane %v3818_v35, 0  ;;  %v3821_v19 = vperm.slane %v3818_v35, 1  ;;  %v7689_v35 = vld [vmem:[%s8158_s17] ss:$0 sm:$0xff] }
0x2790   :  { %v3824_v33 = vsub.f32 %v3802_v11, %v3820_v50  ;;  %v3825_v34 = vsub.f32 %v3803_v41, %v3821_v19  ;;  %v3775_v50 = vadd.f32 %v7689_v35, %v7664_v0 }
0x2792   :  { %v3826_v24 = vmul.f32 1.442695, %v3824_v33  ;;  %v3828_v29 = vmul.f32 1.442695, %v3825_v34  ;;  %v3939_v19 = vrot.slane %v3775_v50, 5  ;;  %v3940_v33 = vrot.slane %v3775_v50, 6 }
0x2794   :  { %5890 = vpow2.f32 %v3826_v24 }
0x2795   :  { %5892 = vpow2.f32 %v3828_v29 }
0x279a   :  { %v5891_v40 = vpop.eup %5890 }
0x279b   :  { %v5893_v54 = vpop.eup %5892  ;;  %3833 = vperm.xlu0 %5549, %v5891_v40  }
0x279c   :  { %3836 = vperm.xlu1 %5547, %v5893_v54  }
0x280d   :  { %v3834_v32 = vpop.permute.xlu0 %3833 }
0x280e   :  { %v3837_v51 = vpop.permute.xlu1 %3836  ;;  %v3838_v16 = vperm.slane %v3834_v32, %v7281_v61 }
0x280f   :  { %v3839_v59 = vperm.slane %v3837_v51, %v7281_v61 }
0x2811   :  { %v3840_v26 = vsel %vm408_vm2, %v3839_v59, %v3838_v16 }
0x2812   :  { %v3842_v58 = vsel %vm2859_vm13, %v3840_v26, 0.0 }
0x2813   :  { %3843 = vadd.xlane.f32.xlu0 %v3842_v58 }
0x2886   :  { %v3844_v15 = vpop.xlane.xlu0 %3843 }
0x2887   :  { %v3846_v42 = vperm.slane %v3844_v15, 0  ;;  %v3847_v2 = vperm.slane %v3844_v15, 1 }
0x2889   :  { %5894 = vrcp.f32 %v3846_v42  ;;  %v3861_v10 = vand.u32 2147483648, %v3846_v42  ;;  %v3876_v46 = vand.u32 2147483648, %v3847_v2  ;;  %v3859_v56 = vand.u32 2147483647, %v3846_v42 }
0x288a   :  { %5896 = vrcp.f32 %v3847_v2  ;;  %v3874_v62 = vand.u32 2147483647, %v3847_v2  ;;  %vm3855_vm6 = vweird.f32 %v3846_v42  ;;  %vm3870_vm7 = vweird.f32 %v3847_v2 }
0x288b   :  { %v3862_v3 = vor.u32 1.1754944e-38, %v3861_v10  ;;  %v3877_v41 = vor.u32 1.1754944e-38, %v3876_v46  ;;  %vm3860_vm10 = vcmp.eq.f32.partialorder %v3859_v56, 8.507059e+37  ;;  %v6029_v10 = vld [vmem:[%s8157_s16 + $0x28] sm:$0xff]  ;;  %v6031_v46 = vld [vmem:[%s8157_s16 + $0x18] sm:$0xff]  ;;  %v6032_v56 = vld [vmem:[%s8157_s16 + $0x10] sm:$0xff] }
0x288c   :  { %vm3875_vm14 = vcmp.eq.f32.partialorder %v3874_v62, 8.507059e+37  ;;  %v6034_v62 = vld [vmem:[%s8157_s16] sm:$0xff] }
0x288f   :  { %v5895_v57 = vpop.eup %5894 }
0x2890   :  { %v5897_v52 = vpop.eup %5896  ;;  %v3851_v14 = vmul.f32 %v5895_v57, %v3846_v42  ;;  %vm3856_vm4 = vweird.f32 %v5895_v57 }
0x2891   :  { %v3866_v31 = vmul.f32 %v5897_v52, %v3847_v2  ;;  %vm3871_vm5 = vweird.f32 %v5897_v52  ;;  %vm3857_vm8 = vmor %vm3855_vm6, %vm3856_vm4 }
0x2892   :  { %v3852_v37 = vsub.f32 1.0, %v3851_v14  ;;  %vm3872_vm9 = vmor %vm3870_vm7, %vm3871_vm5 }
0x2893   :  { %v3867_v20 = vsub.f32 1.0, %v3866_v31 }
0x2894   :  { %v3853_v45 = vmul.f32 %v5895_v57, %v3852_v37  ;;  %v6027_v37 = vld [vmem:[%s8157_s16 + $0x38] sm:$0xff] }
0x2895   :  { %v3868_v18 = vmul.f32 %v5897_v52, %v3867_v20  ;;  %v6028_v20 = vld [vmem:[%s8157_s16 + $0x30] sm:$0xff] }
0x2896   :  { %v3854_v36 = vadd.f32 %v5895_v57, %v3853_v45  ;;  %v6030_v45 = vld [vmem:[%s8157_s16 + $0x20] sm:$0xff] }
0x2897   :  { %v3869_v11 = vadd.f32 %v5897_v52, %v3868_v18  ;;  %v6033_v18 = vld [vmem:[%s8157_s16 + $0x8] sm:$0xff]  ;;  %s5389_s16 = sshll.u32 %s8161_s20, 4  ;;  %s5390_s16 = int_to_ptr.hbm [resolvable:$true] %s5389_s16 }
0x2898   :  { %v3858_v17 = vsel %vm3857_vm8, %v5895_v57, %v3854_v36 }
0x2899   :  { %v3873_v22 = vsel %vm3872_vm9, %v5897_v52, %v3869_v11  ;;  %v3863_v39 = vsel %vm3860_vm10, %v3862_v3, %v3858_v17 }
0x289a   :  { %v3878_v21 = vsel %vm3875_vm14, %v3877_v41, %v3873_v22  ;;  %v3864_v63 = vmul.f32 %v5891_v40, %v3863_v39 }
0x289b   :  { %v3879_v9 = vmul.f32 %v5893_v54, %v3878_v21 }
0x289c   :  { %3882 = vperm.xlu2 %5548, %v3864_v63  }
0x289d   :  { %3887 = vperm.xlu1 %5547, %v3879_v9  }
0x28a5   :  { %3983 = vrot.lane.b32.xlu1 %v3939_v19, %s6100_s26 }
0x28ad   :  { %3985 = vrot.lane.b32.xlu1 %v3940_v33, %s6100_s26 }
0x28f6   :  { %v3883_v34 = vpop.permute.xlu2 %3882 }
0x28f7   :  { %v3890_v24 = vmul.f32 %v7610_v44, %v3883_v34 }
0x28f9   :  { %v3892_v29 = vsel %vm2639_vm12, %v3890_v24, 0.0 }
0x28fa   :  { %v3893_v40 = vrot.slane %v3892_v29, 4 }
0x28fc   :  { %v3894_v54 = vadd.f32 %v3893_v40, %v3892_v29 }
0x28fe   :  { %v3895_v16 = vrot.slane %v3894_v54, 2 }
0x2900   :  { %v3896_v26 = vadd.f32 %v3895_v16, %v3894_v54 }
0x2902   :  { %v3897_v42 = vrot.slane %v3896_v26, 1 }
0x2904   :  { %v3898_v52 = vadd.f32 %v3897_v42, %v3896_v26 }
0x290f   :  { %v3888_v32 = vpop.permute.xlu1 %3887 }
0x2910   :  { %v3891_v51 = vmul.f32 %v7614_v60, %v3888_v32 }
0x2912   :  { %v3899_v59 = vsel %vm2639_vm12, %v3891_v51, 0.0 }
0x2913   :  { %v3900_v0 = vrot.slane %v3899_v59, 4 }
0x2915   :  { %v3901_v58 = vadd.f32 %v3900_v0, %v3899_v59 }
0x2917   :  { %v3902_v15 = vrot.slane %v3901_v58, 2  ;;  %v3984_v54 = vpop.permute.xlu1 %3983 }
0x2919   :  { %v3903_v2 = vadd.f32 %v3902_v15, %v3901_v58 }
0x291b   :  { %v3904_v57 = vrot.slane %v3903_v2, 1 }
0x291d   :  { %v3905_v14 = vadd.f32 %v3904_v57, %v3903_v2 }
0x291f   :  { %v3908_v31 = vsel %vm408_vm2, %v3905_v14, %v3898_v52  ;;  %v4015_v52 = vrot.slane %v7648_v25, 7 }
0x2920   :  { %5491 = vmatmul.msk.f32.vlgmr.msra.gmra.mxu1 %vm2639_vm12, %v3908_v31 }
0x2921   :  { %5203 = vmatpush.msra.mxu1 %v6027_v37  ;;  %v4016_v37 = vrot.slane %v7646_v38, 7 }
0x2923   :  { %5204 = vmatpush.msra.mxu1 %v6028_v20 }
0x2925   :  { %5205 = vmatpush.msra.mxu1 %v6029_v10 }
0x2927   :  { %5206 = vmatpush.msra.mxu1 %v6030_v45  ;;  %v3986_v45 = vpop.permute.xlu1 %3985 }
0x2929   :  { %5207 = vmatpush.msra.mxu1 %v6031_v46 }
0x292b   :  { %5208 = vmatpush.msra.mxu1 %v6032_v56 }
0x292d   :  { %5209 = vmatpush.msra.mxu1 %v6033_v18 }
0x292f   :  { %5210 = vmatpush.msra.mxu1 %v6034_v62 }
0x299d   :  { %v7725_v36 = vpop.f32.mrf.mxu1 }
0x299e   :  { %v3932_v11 = vrot.slane %v7725_v36, 5  ;;  %v3933_v3 = vrot.slane %v7725_v36, 6 }
0x29a0   :  { %v3936_v41 = vadd.f32 %v3932_v11, %v7415_v28  ;;  %v3937_v17 = vadd.f32 %v3933_v3, %v7419_v30 }
0x29a2   :  { %v3943_v22 = vadd.f32 %v3939_v19, %v3936_v41  ;;  %v3944_v39 = vadd.f32 %v3940_v33, %v3937_v17 }
0x29a4   :  { %v5492_v21 = vmul.f32 -1.442695, %v3943_v22  ;;  %v5493_v63 = vmul.f32 -1.442695, %v3944_v39 }
0x29a6   :  { %5898 = vpow2.f32 %v5492_v21 }
0x29a7   :  { %5900 = vpow2.f32 %v5493_v63 }
0x29ac   :  { %v5899_v9 = vpop.eup %5898 }
0x29ad   :  { %v5901_v50 = vpop.eup %5900  ;;  %v3951_v34 = vadd.f32 1.0, %v5899_v9 }
0x29ae   :  { %v3952_v24 = vadd.f32 1.0, %v5901_v50 }
0x29af   :  { %5902 = vrcp.f32 %v3951_v34  ;;  %v3964_v0 = vand.u32 2147483648, %v3951_v34  ;;  %v3962_v26 = vand.u32 2147483647, %v3951_v34  ;;  %vm3958_vm3 = vweird.f32 %v3951_v34 }
0x29b0   :  { %5904 = vrcp.f32 %v3952_v24  ;;  %v3979_v19 = vand.u32 2147483648, %v3952_v24  ;;  %v3977_v15 = vand.u32 2147483647, %v3952_v24  ;;  %vm3973_vm4 = vweird.f32 %v3952_v24 }
0x29b1   :  { %v3965_v57 = vor.u32 1.1754944e-38, %v3964_v0  ;;  %vm3963_vm7 = vcmp.eq.f32.partialorder %v3962_v26, 8.507059e+37  ;;  %v7755_v0 = vld [vmem:[%s8159_s18 + $0x18] sm:$0xff] }
0x29b2   :  { %v3980_v14 = vor.u32 1.1754944e-38, %v3979_v19  ;;  %vm3978_vm8 = vcmp.eq.f32.partialorder %v3977_v15, 8.507059e+37  ;;  %v7762_v19 = vld [vmem:[%s8159_s18 + $0x10] sm:$0xff] }
0x29b5   :  { %v5903_v29 = vpop.eup %5902 }
0x29b6   :  { %v5905_v40 = vpop.eup %5904  ;;  %v3954_v32 = vmul.f32 %v5903_v29, %v3951_v34  ;;  %vm3959_vm15 = vweird.f32 %v5903_v29 }
0x29b7   :  { %v3969_v51 = vmul.f32 %v5905_v40, %v3952_v24  ;;  %vm3974_vm1 = vweird.f32 %v5905_v40  ;;  %vm3960_vm5 = vmor %vm3958_vm3, %vm3959_vm15 }
0x29b8   :  { %v3955_v16 = vsub.f32 1.0, %v3954_v32  ;;  %vm3975_vm6 = vmor %vm3973_vm4, %vm3974_vm1 }
0x29b9   :  { %v3970_v59 = vsub.f32 1.0, %v3969_v51 }
0x29ba   :  { %v3956_v33 = vmul.f32 %v5903_v29, %v3955_v16 }
0x29bb   :  { %v3971_v58 = vmul.f32 %v5905_v40, %v3970_v59 }
0x29bc   :  { %v3957_v42 = vadd.f32 %v5903_v29, %v3956_v33 }
0x29bd   :  { %v3972_v2 = vadd.f32 %v5905_v40, %v3971_v58 }
0x29be   :  { %v3961_v31 = vsel %vm3960_vm5, %v5903_v29, %v3957_v42 }
0x29bf   :  { %v3976_v20 = vsel %vm3975_vm6, %v5905_v40, %v3972_v2  ;;  %v3966_v10 = vsel %vm3963_vm7, %v3965_v57, %v3961_v31 }
0x29c0   :  { %v3981_v46 = vsel %vm3978_vm8, %v3980_v14, %v3976_v20  ;;  %v3989_v56 = vmul.f32 %v3984_v54, %v3966_v10  ;;  %v4019_v18 = vmul.f32 %v4015_v52, %v3966_v10  ;;  %v4003_v50 = vsub.f32 1.0, %v3966_v10 }
0x29c1   :  { %v3990_v62 = vmul.f32 %v3986_v45, %v3981_v46  ;;  %v4020_v22 = vmul.f32 %v4016_v37, %v3981_v46  ;;  %v4004_v40 = vsub.f32 1.0, %v3981_v46 }
0x29c2   :  { %3993 = vrot.lane.b32.xlu2 %v3989_v56, %s6100_s26 }
0x29c3   :  { %3995 = vrot.lane.b32.xlu1 %v3990_v62, %s6100_s26 }
0x2a1c   :  { %v3994_v25 = vpop.permute.xlu2 %3993 }
0x2a1d   :  { %v3999_v39 = vadd.f32 %v3994_v25, %v3936_v41 }
0x2a1f   :  { %5906 = vtanh.f32 %v3999_v39 }
0x2a25   :  { %v5907_v21 = vpop.eup %5906 }
0x2a26   :  { %4007 = vrot.lane.b32.xlu2 %v5907_v21, %s6099_s3 }
0x2a35   :  { %v3996_v38 = vpop.permute.xlu1 %3995 }
0x2a36   :  { %v4000_v63 = vadd.f32 %v3996_v38, %v3937_v17 }
0x2a38   :  { %5908 = vtanh.f32 %v4000_v63 }
0x2a3e   :  { %v5909_v9 = vpop.eup %5908 }
0x2a3f   :  { %4009 = vrot.lane.b32.xlu1 %v5909_v9, %s6099_s3 }
0x2a80   :  { %v4008_v34 = vpop.permute.xlu2 %4007 }
0x2a81   :  { %v4013_v24 = vmul.f32 %v4008_v34, %v4003_v50 }
0x2a83   :  { %v7741_v29 = vadd.f32 %v4019_v18, %v4013_v24 }
0x2a85   :  { %v4025_v41 = vrot.slane %v7741_v29, 3 }
0x2ab1   :  { %v4010_v54 = vpop.permute.xlu1 %4009 }
0x2ab2   :  { %v4014_v32 = vmul.f32 %v4010_v54, %v4004_v40 }
0x2ab4   :  { %v7743_v51 = vadd.f32 %v4020_v22, %v4014_v32 }
0x2ab6   :  { %v4026_v16 = vrot.slane %v7743_v51, 2 }
0x2ab8   :  { %v4027_v17 = vsel %vm408_vm2, %v4026_v16, %v4025_v41 }
0x2ab9   :  { %4028 = vrot.lane.b32.xlu2 %v4027_v17, %s6099_s3 }
0x2b13   :  { %v4029_v59 = vpop.permute.xlu2 %4028 }
0x2b14   :  { %5494 = vmatmul.msk.f32.vlgmr.msrb.gmra.mxu3 %vm83_vm0, %v4029_v59  ;;  %5495 = vmatmul.msk.f32.vlgmr.msra.gmra.mxu0 %vm83_vm0, %v4029_v59 }
0x2b15   :  { %4730 = vmatpush.msra.mxu0 %v7558_v49  ;;  %4686 = vmatpush.msrb.mxu3 %v7755_v0  ;;  %v7769_v49 = vld [vmem:[%s8159_s18 + $0x8] sm:$0xff] }
0x2b17   :  { %4731 = vmatpush.msra.mxu0 %v7565_v4  ;;  %4687 = vmatpush.msrb.mxu3 %v7762_v19  ;;  %v7776_v4 = vld [vmem:[%s8159_s18] sm:$0xff] }
0x2b19   :  { %4732 = vmatpush.msra.mxu0 %v7572_v8  ;;  %4688 = vmatpush.msrb.mxu3 %v7769_v49 }
0x2b1b   :  { %4733 = vmatpush.msra.mxu0 %v7579_v53  ;;  %4689 = vmatpush.msrb.mxu3 %v7776_v4 }
0x2b91   :  { %v7779_v33 = vpop.f32.mrf.mxu0 }
0x2b92   :  { %v4098_v8 = vrot.slane %v7779_v33, 1  ;;  %v4099_v26 = vperm.slane %v7779_v33, 0 }
0x2b94   :  { %v4100_v58 = vperm.slane %v4098_v8, 0  ;;  %v4103_v15 = vadd.f32 %v4099_v26, %v7256_v5 }
0x2b96   :  { %v4104_v42 = vadd.f32 %v4100_v58, %v7264_v13  ;;  %5910 = vtanh.f32 %v4103_v15 }
0x2b98   :  { %5912 = vtanh.f32 %v4104_v42 }
0x2b9c   :  { %v5911_v53 = vpop.eup %5910 }
0x2b9d   :  { %v4107_v2 = vmul.f32 %v5911_v53, %v7259_v43 }
0x2b9e   :  { %v5913_v57 = vpop.eup %5912 }
0x2b9f   :  { %4111 = vrot.lane.b32.xlu0 %v4107_v2, %s6101_s27  ;;  %v4108_v52 = vmul.f32 %v5913_v57, %v7259_v43 }
0x2ba1   :  { %4113 = vrot.lane.b32.xlu1 %v4108_v52, %s6101_s27 }
0x2c11   :  { %v4112_v14 = vpop.permute.xlu0 %4111 }
0x2c12   :  { %v4117_v31 = vsel %vm83_vm0, %v4112_v14, 0.0 }
0x2c13   :  { %4118 = vadd.xlane.f32.xlu2 %v4117_v31  ;;  %v4114_v37 = vpop.permute.xlu1 %4113 }
0x2c14   :  { %v4120_v20 = vsel %vm83_vm0, %v4114_v37, 0.0 }
0x2c15   :  { %4121 = vadd.xlane.f32.xlu1 %v4120_v20 }
0x2c86   :  { %v4119_v10 = vpop.xlane.xlu2 %4118 }
0x2c87   :  { %v4123_v45 = vadd.f32 %v4119_v10, %v7275_v1 }
0x2c88   :  { %v4122_v46 = vpop.xlane.xlu1 %4121 }
0x2c89   :  { %4128 = vperm.xlu0 %5549, %v4123_v45   ;;  %v4124_v56 = vadd.f32 %v4122_v46, %v7278_v47 }
0x2c91   :  { %4131 = vperm.xlu0 %5549, %v4124_v56  }
0x2cfb   :  { %v4129_v18 = vpop.permute.xlu0 %4128 }
0x2cfc   :  { %v4133_v22 = vperm.slane %v4129_v18, %v7281_v61 }
0x2d03   :  { %v4132_v62 = vpop.permute.xlu0 %4131 }
0x2d04   :  { %v4134_v25 = vperm.slane %v4132_v62, %v7281_v61 }
0x2d06   :  { %v4135_v39 = vsel %vm408_vm2, %v4134_v25, %v4133_v22 }
0x2d07   :  { %v4137_v21 = vsel %vm2859_vm13, %v4135_v39, -inf }
0x2d08   :  { %4138 = vmax.xlane.f32.xlu0 %v4137_v21 }
0x2d7b   :  { %v4139_v38 = vpop.xlane.xlu0 %4138 }
0x2d7c   :  { %v4141_v63 = vperm.slane %v4139_v38, 0  ;;  %v4142_v9 = vperm.slane %v4139_v38, 1 }
0x2d7e   :  { %v4145_v50 = vsub.f32 %v4123_v45, %v4141_v63  ;;  %v4146_v34 = vsub.f32 %v4124_v56, %v4142_v9 }
0x2d80   :  { %v4147_v24 = vmul.f32 1.442695, %v4145_v50  ;;  %v4149_v40 = vmul.f32 1.442695, %v4146_v34  ;;  %v4096_v34 = vadd.f32 %v7689_v35, %v7779_v33 }
0x2d82   :  { %5914 = vpow2.f32 %v4147_v24  ;;  %v4260_v24 = vrot.slane %v4096_v34, 4 }
0x2d83   :  { %5916 = vpow2.f32 %v4149_v40  ;;  %v4261_v40 = vrot.slane %v4096_v34, 5 }
0x2d88   :  { %v5915_v54 = vpop.eup %5914 }
0x2d89   :  { %v5917_v32 = vpop.eup %5916  ;;  %4154 = vperm.xlu2 %5548, %v5915_v54  }
0x2d8a   :  { %4157 = vperm.xlu1 %5547, %v5917_v32  }
0x2de3   :  { %v4155_v41 = vpop.permute.xlu2 %4154 }
0x2de4   :  { %v4159_v17 = vperm.slane %v4155_v41, %v7281_v61 }
0x2dfc   :  { %v4158_v16 = vpop.permute.xlu1 %4157 }
0x2dfd   :  { %v4160_v59 = vperm.slane %v4158_v16, %v7281_v61 }
0x2dff   :  { %v4161_v8 = vsel %vm408_vm2, %v4160_v59, %v4159_v17 }
0x2e00   :  { %v4163_v26 = vsel %vm2859_vm13, %v4161_v8, 0.0 }
0x2e01   :  { %4164 = vadd.xlane.f32.xlu2 %v4163_v26 }
0x2e74   :  { %v4165_v58 = vpop.xlane.xlu2 %4164 }
0x2e75   :  { %v4167_v15 = vperm.slane %v4165_v58, 0  ;;  %v4168_v42 = vperm.slane %v4165_v58, 1 }
0x2e77   :  { %5918 = vrcp.f32 %v4167_v15  ;;  %v4182_v37 = vand.u32 2147483648, %v4167_v15  ;;  %v4197_v10 = vand.u32 2147483648, %v4168_v42  ;;  %v4180_v45 = vand.u32 2147483647, %v4167_v15 }
0x2e78   :  { %5920 = vrcp.f32 %v4168_v42  ;;  %v4195_v56 = vand.u32 2147483647, %v4168_v42  ;;  %vm4176_vm14 = vweird.f32 %v4167_v15  ;;  %vm4191_vm15 = vweird.f32 %v4168_v42 }
0x2e79   :  { %v4183_v22 = vor.u32 1.1754944e-38, %v4182_v37  ;;  %v4198_v25 = vor.u32 1.1754944e-38, %v4197_v10  ;;  %vm4181_vm4 = vcmp.eq.f32.partialorder %v4180_v45, 8.507059e+37 }
0x2e7a   :  { %vm4196_vm5 = vcmp.eq.f32.partialorder %v4195_v56, 8.507059e+37 }
0x2e7d   :  { %v5919_v53 = vpop.eup %5918 }
0x2e7e   :  { %v5921_v2 = vpop.eup %5920  ;;  %v4172_v57 = vmul.f32 %v5919_v53, %v4167_v15  ;;  %vm4177_vm9 = vweird.f32 %v5919_v53 }
0x2e7f   :  { %v4187_v52 = vmul.f32 %v5921_v2, %v4168_v42  ;;  %vm4192_vm10 = vweird.f32 %v5921_v2  ;;  %vm4178_vm1 = vmor %vm4176_vm14, %vm4177_vm9 }
0x2e80   :  { %v4173_v14 = vsub.f32 1.0, %v4172_v57  ;;  %vm4193_vm3 = vmor %vm4191_vm15, %vm4192_vm10 }
0x2e81   :  { %v4188_v31 = vsub.f32 1.0, %v4187_v52 }
0x2e82   :  { %v4174_v20 = vmul.f32 %v5919_v53, %v4173_v14 }
0x2e83   :  { %v4189_v46 = vmul.f32 %v5921_v2, %v4188_v31 }
0x2e84   :  { %v4175_v18 = vadd.f32 %v5919_v53, %v4174_v20 }
0x2e85   :  { %v4190_v62 = vadd.f32 %v5921_v2, %v4189_v46 }
0x2e86   :  { %v4179_v39 = vsel %vm4178_vm1, %v5919_v53, %v4175_v18 }
0x2e87   :  { %v4194_v21 = vsel %vm4193_vm3, %v5921_v2, %v4190_v62  ;;  %v4184_v38 = vsel %vm4181_vm4, %v4183_v22, %v4179_v39 }
0x2e88   :  { %v4199_v63 = vsel %vm4196_vm5, %v4198_v25, %v4194_v21  ;;  %v4185_v9 = vmul.f32 %v5915_v54, %v4184_v38 }
0x2e89   :  { %v4200_v50 = vmul.f32 %v5917_v32, %v4199_v63 }
0x2e8a   :  { %4203 = vperm.xlu0 %5549, %v4185_v9  }
0x2e8b   :  { %4208 = vperm.xlu1 %5547, %v4200_v50  }
0x2e93   :  { %4304 = vrot.lane.b32.xlu1 %v4260_v24, %s6100_s26 }
0x2e9b   :  { %4306 = vrot.lane.b32.xlu1 %v4261_v40, %s6100_s26 }
0x2efc   :  { %v4204_v41 = vpop.permute.xlu0 %4203 }
0x2efd   :  { %v4209_v16 = vpop.permute.xlu1 %4208  ;;  %v4211_v17 = vmul.f32 %v7610_v44, %v4204_v41 }
0x2efe   :  { %v4212_v59 = vmul.f32 %v7614_v60, %v4209_v16 }
0x2eff   :  { %v4213_v54 = vsel %vm2639_vm12, %v4211_v17, 0.0 }
0x2f00   :  { %v4220_v32 = vsel %vm2639_vm12, %v4212_v59, 0.0  ;;  %v4214_v8 = vrot.slane %v4213_v54, 4 }
0x2f01   :  { %v4221_v26 = vrot.slane %v4220_v32, 4 }
0x2f02   :  { %v4215_v58 = vadd.f32 %v4214_v8, %v4213_v54 }
0x2f03   :  { %v4222_v33 = vadd.f32 %v4221_v26, %v4220_v32 }
0x2f04   :  { %v4216_v15 = vrot.slane %v4215_v58, 2 }
0x2f05   :  { %v4223_v42 = vrot.slane %v4222_v33, 2  ;;  %v4305_v9 = vpop.permute.xlu1 %4304 }
0x2f06   :  { %v4217_v53 = vadd.f32 %v4216_v15, %v4215_v58 }
0x2f07   :  { %v4224_v2 = vadd.f32 %v4223_v42, %v4222_v33  ;;  %v4336_v33 = vrot.slane %v7741_v29, 7 }
0x2f08   :  { %v4218_v57 = vrot.slane %v4217_v53, 1 }
0x2f09   :  { %v4225_v52 = vrot.slane %v4224_v2, 1 }
0x2f0a   :  { %v4219_v14 = vadd.f32 %v4218_v57, %v4217_v53  ;;  %v4337_v53 = vrot.slane %v7743_v51, 7 }
0x2f0b   :  { %v4226_v31 = vadd.f32 %v4225_v52, %v4224_v2 }
0x2f0d   :  { %v4229_v44 = vsel %vm408_vm2, %v4226_v31, %v4219_v14  ;;  %v4307_v52 = vpop.permute.xlu1 %4306 }
0x2f0e   :  { %5496 = vmatmul.msk.f32.vlgmr.msra.gmra.mxu2 %vm2639_vm12, %v4229_v44 }
0x2f91   :  { %v7811_v60 = vpop.f32.mrf.mxu2 }
0x2f92   :  { %v4253_v37 = vrot.slane %v7811_v60, 4  ;;  %v4254_v20 = vrot.slane %v7811_v60, 5 }
0x2f94   :  { %v4257_v10 = vadd.f32 %v4253_v37, %v7415_v28  ;;  %v4258_v45 = vadd.f32 %v4254_v20, %v7419_v30 }
0x2f96   :  { %v4264_v46 = vadd.f32 %v4260_v24, %v4257_v10  ;;  %v4265_v56 = vadd.f32 %v4261_v40, %v4258_v45 }
0x2f98   :  { %v5497_v18 = vmul.f32 -1.442695, %v4264_v46  ;;  %v5498_v62 = vmul.f32 -1.442695, %v4265_v56 }
0x2f9a   :  { %5922 = vpow2.f32 %v5497_v18 }
0x2f9b   :  { %5924 = vpow2.f32 %v5498_v62 }
0x2fa0   :  { %v5923_v22 = vpop.eup %5922 }
0x2fa1   :  { %v5925_v25 = vpop.eup %5924  ;;  %v4272_v39 = vadd.f32 1.0, %v5923_v22 }
0x2fa2   :  { %v4273_v21 = vadd.f32 1.0, %v5925_v25 }
0x2fa3   :  { %5926 = vrcp.f32 %v4272_v39  ;;  %v4285_v17 = vand.u32 2147483648, %v4272_v39  ;;  %v4283_v59 = vand.u32 2147483647, %v4272_v39  ;;  %vm4279_vm8 = vweird.f32 %v4272_v39 }
0x2fa4   :  { %5928 = vrcp.f32 %v4273_v21  ;;  %v4300_v24 = vand.u32 2147483648, %v4273_v21  ;;  %v4298_v32 = vand.u32 2147483647, %v4273_v21  ;;  %vm4294_vm9 = vweird.f32 %v4273_v21 }
0x2fa5   :  { %v4286_v58 = vor.u32 1.1754944e-38, %v4285_v17  ;;  %vm4284_vm15 = vcmp.eq.f32.partialorder %v4283_v59, 8.507059e+37  ;;  %v6041_v59 = vld [vmem:[%s8153_s12 + $0x8] sm:$0xff] }
0x2fa6   :  { %v4301_v15 = vor.u32 1.1754944e-38, %v4300_v24  ;;  %vm4299_vm1 = vcmp.eq.f32.partialorder %v4298_v32, 8.507059e+37  ;;  %v6039_v24 = vld [vmem:[%s8153_s12 + $0x18] sm:$0xff] }
0x2fa9   :  { %v5927_v38 = vpop.eup %5926 }
0x2faa   :  { %v5929_v63 = vpop.eup %5928  ;;  %v4275_v50 = vmul.f32 %v5927_v38, %v4272_v39  ;;  %vm4280_vm6 = vweird.f32 %v5927_v38 }
0x2fab   :  { %v4290_v34 = vmul.f32 %v5929_v63, %v4273_v21  ;;  %vm4295_vm7 = vweird.f32 %v5929_v63  ;;  %vm4281_vm10 = vmor %vm4279_vm8, %vm4280_vm6 }
0x2fac   :  { %v4276_v41 = vsub.f32 1.0, %v4275_v50  ;;  %vm4296_vm14 = vmor %vm4294_vm9, %vm4295_vm7 }
0x2fad   :  { %v4291_v16 = vsub.f32 1.0, %v4290_v34 }
0x2fae   :  { %v4277_v40 = vmul.f32 %v5927_v38, %v4276_v41 }
0x2faf   :  { %v4292_v54 = vmul.f32 %v5929_v63, %v4291_v16 }
0x2fb0   :  { %v4278_v8 = vadd.f32 %v5927_v38, %v4277_v40  ;;  %v6040_v40 = vld [vmem:[%s8153_s12 + $0x10] sm:$0xff] }
0x2fb1   :  { %v4293_v26 = vadd.f32 %v5929_v63, %v4292_v54  ;;  %v6042_v54 = vld [vmem:[%s8153_s12] sm:$0xff] }
0x2fb2   :  { %v4282_v42 = vsel %vm4281_vm10, %v5927_v38, %v4278_v8 }
0x2fb3   :  { %v4297_v2 = vsel %vm4296_vm14, %v5929_v63, %v4293_v26  ;;  %v4287_v57 = vsel %vm4284_vm15, %v4286_v58, %v4282_v42 }
0x2fb4   :  { %v4302_v14 = vsel %vm4299_vm1, %v4301_v15, %v4297_v2  ;;  %v4310_v31 = vmul.f32 %v4305_v9, %v4287_v57  ;;  %v4340_v44 = vmul.f32 %v4336_v33, %v4287_v57  ;;  %v4324_v39 = vsub.f32 1.0, %v4287_v57 }
0x2fb5   :  { %v4311_v46 = vmul.f32 %v4307_v52, %v4302_v14  ;;  %v4341_v56 = vmul.f32 %v4337_v53, %v4302_v14  ;;  %v4325_v21 = vsub.f32 1.0, %v4302_v14 }
0x2fb6   :  { %4314 = vrot.lane.b32.xlu0 %v4310_v31, %s6100_s26 }
0x2fb7   :  { %4316 = vrot.lane.b32.xlu1 %v4311_v46, %s6100_s26 }
0x3028   :  { %v4315_v29 = vpop.permute.xlu0 %4314 }
0x3029   :  { %v4317_v18 = vpop.permute.xlu1 %4316  ;;  %v4320_v62 = vadd.f32 %v4315_v29, %v4257_v10 }
0x302a   :  { %v4321_v22 = vadd.f32 %v4317_v18, %v4258_v45 }
0x302b   :  { %5930 = vtanh.f32 %v4320_v62 }
0x302c   :  { %5932 = vtanh.f32 %v4321_v22 }
0x3031   :  { %v5931_v51 = vpop.eup %5930 }
0x3032   :  { %v5933_v25 = vpop.eup %5932  ;;  %4328 = vrot.lane.b32.xlu0 %v5931_v51, %s6099_s3 }
0x3033   :  { %4330 = vrot.lane.b32.xlu1 %v5933_v25, %s6099_s3 }
0x30a4   :  { %v4329_v38 = vpop.permute.xlu0 %4328 }
0x30a5   :  { %v4331_v63 = vpop.permute.xlu1 %4330  ;;  %v4334_v9 = vmul.f32 %v4329_v38, %v4324_v39 }
0x30a6   :  { %v4335_v50 = vmul.f32 %v4331_v63, %v4325_v21 }
0x30a7   :  { %v7827_v34 = vadd.f32 %v4340_v44, %v4334_v9 }
0x30a8   :  { %v7829_v41 = vadd.f32 %v4341_v56, %v4335_v50 }
0x30a9   :  { %v4346_v10 = vrot.slane %v7827_v34, 4 }
0x30aa   :  { %v4347_v45 = vrot.slane %v7829_v41, 3 }
0x30ac   :  { %v4348_v16 = vsel %vm408_vm2, %v4347_v45, %v4346_v10 }
0x30ad   :  { %4349 = vrot.lane.b32.xlu2 %v4348_v16, %s6099_s3 }
0x3107   :  { %v4350_v17 = vpop.permute.xlu2 %4349 }
0x3108   :  { %5499 = vmatmul.msk.f32.vlgmr.msra.gmra.mxu3 %vm83_vm0, %v4350_v17  ;;  %5500 = vmatmul.msk.f32.vlgmr.msrb.gmra.mxu0 %vm83_vm0, %v4350_v17 }
0x3109   :  { %5051 = vmatpush.msrb.mxu0 %v6039_v24  ;;  %5007 = vmatpush.msra.mxu3 %v7755_v0 }
0x310b   :  { %5052 = vmatpush.msrb.mxu0 %v6040_v40  ;;  %5008 = vmatpush.msra.mxu3 %v7762_v19 }
0x310d   :  { %5053 = vmatpush.msrb.mxu0 %v6041_v59  ;;  %5009 = vmatpush.msra.mxu3 %v7769_v49 }
0x310f   :  { %5054 = vmatpush.msrb.mxu0 %v6042_v54  ;;  %5010 = vmatpush.msra.mxu3 %v7776_v4 }
0x3185   :  { %v7853_v32 = vpop.f32.mrf.mxu0 }
0x3186   :  { %v4419_v8 = vrot.slane %v7853_v32, 1  ;;  %v4420_v26 = vperm.slane %v7853_v32, 0 }
0x3188   :  { %v4421_v58 = vperm.slane %v4419_v8, 0  ;;  %v4424_v33 = vadd.f32 %v4420_v26, %v7256_v5 }
0x318a   :  { %v4425_v15 = vadd.f32 %v4421_v58, %v7264_v13  ;;  %5934 = vtanh.f32 %v4424_v33 }
0x318c   :  { %5936 = vtanh.f32 %v4425_v15 }
0x3190   :  { %v5935_v42 = vpop.eup %5934 }
0x3191   :  { %v4428_v53 = vmul.f32 %v5935_v42, %v7259_v43 }
0x3192   :  { %v5937_v2 = vpop.eup %5936 }
0x3193   :  { %4432 = vrot.lane.b32.xlu0 %v4428_v53, %s6101_s27  ;;  %v4429_v57 = vmul.f32 %v5937_v2, %v7259_v43 }
0x3195   :  { %4434 = vrot.lane.b32.xlu1 %v4429_v57, %s6101_s27 }
0x3205   :  { %v4433_v52 = vpop.permute.xlu0 %4432 }
0x3206   :  { %v4438_v14 = vsel %vm83_vm0, %v4433_v52, 0.0 }
0x3207   :  { %4439 = vadd.xlane.f32.xlu0 %v4438_v14  ;;  %v4435_v31 = vpop.permute.xlu1 %4434 }
0x3208   :  { %v4441_v44 = vsel %vm83_vm0, %v4435_v31, 0.0 }
0x3209   :  { %4442 = vadd.xlane.f32.xlu1 %v4441_v44 }
0x327a   :  { %v4440_v46 = vpop.xlane.xlu0 %4439 }
0x327b   :  { %v4444_v56 = vadd.f32 %v4440_v46, %v7275_v1 }
0x327c   :  { %v4443_v29 = vpop.xlane.xlu1 %4442 }
0x327d   :  { %4449 = vperm.xlu2 %5548, %v4444_v56   ;;  %v4445_v18 = vadd.f32 %v4443_v29, %v7278_v47 }
0x3285   :  { %4452 = vperm.xlu2 %5548, %v4445_v18  }
0x32d7   :  { %v4450_v62 = vpop.permute.xlu2 %4449 }
0x32d8   :  { %v4454_v51 = vperm.slane %v4450_v62, %v7281_v61 }
0x32df   :  { %v4453_v22 = vpop.permute.xlu2 %4452 }
0x32e0   :  { %v4455_v25 = vperm.slane %v4453_v22, %v7281_v61 }
0x32e2   :  { %v4456_v39 = vsel %vm408_vm2, %v4455_v25, %v4454_v51 }
0x32e3   :  { %v4458_v21 = vsel %vm2859_vm13, %v4456_v39, -inf }
0x32e4   :  { %4459 = vmax.xlane.f32.xlu2 %v4458_v21 }
0x3357   :  { %v4460_v38 = vpop.xlane.xlu2 %4459 }
0x3358   :  { %v4462_v63 = vperm.slane %v4460_v38, 0  ;;  %v4463_v9 = vperm.slane %v4460_v38, 1 }
0x335a   :  { %v4466_v50 = vsub.f32 %v4444_v56, %v4462_v63  ;;  %v4467_v10 = vsub.f32 %v4445_v18, %v4463_v9 }
0x335c   :  { %v4468_v45 = vmul.f32 1.442695, %v4466_v50  ;;  %v4470_v16 = vmul.f32 1.442695, %v4467_v10 }
0x335e   :  { %5938 = vpow2.f32 %v4468_v45  ;;  %v4417_v45 = vadd.f32 %v7689_v35, %v7853_v32 }
0x335f   :  { %5940 = vpow2.f32 %v4470_v16 }
0x3360   :  { %v4581_v16 = vrot.slane %v4417_v45, 3 }
0x3364   :  { %v5939_v17 = vpop.eup %5938 }
0x3365   :  { %v5941_v24 = vpop.eup %5940  ;;  %4475 = vperm.xlu0 %5549, %v5939_v17  }
0x3366   :  { %4478 = vperm.xlu1 %5547, %v5941_v24  }
0x33d7   :  { %v4476_v40 = vpop.permute.xlu0 %4475 }
0x33d8   :  { %v4479_v59 = vpop.permute.xlu1 %4478  ;;  %v4480_v54 = vperm.slane %v4476_v40, %v7281_v61  ;;  %v4582_v40 = vrot.slane %v4417_v45, 4 }
0x33d9   :  { %v4481_v8 = vperm.slane %v4479_v59, %v7281_v61 }
0x33db   :  { %v4482_v26 = vsel %vm408_vm2, %v4481_v8, %v4480_v54  ;;  %v7879_v54 = vld [vmem:[#allocation2] sm:$0xff] }
0x33dc   :  { %v4484_v58 = vsel %vm2859_vm13, %v4482_v26, 0.0 }
0x33dd   :  { %4485 = vadd.xlane.f32.xlu0 %v4484_v58 }
0x3450   :  { %v4486_v33 = vpop.xlane.xlu0 %4485 }
0x3451   :  { %v4488_v15 = vperm.slane %v4486_v33, 0  ;;  %v4489_v42 = vperm.slane %v4486_v33, 1  ;;  %v7883_v33 = vld [vmem:[#allocation2 + $0x8] sm:$0xff] }
0x3453   :  { %5942 = vrcp.f32 %v4488_v15  ;;  %v4503_v44 = vand.u32 2147483648, %v4488_v15  ;;  %v4518_v56 = vand.u32 2147483648, %v4489_v42  ;;  %v4501_v29 = vand.u32 2147483647, %v4488_v15 }
0x3454   :  { %5944 = vrcp.f32 %v4489_v42  ;;  %v4516_v62 = vand.u32 2147483647, %v4489_v42  ;;  %vm4497_vm5 = vweird.f32 %v4488_v15  ;;  %vm4512_vm6 = vweird.f32 %v4489_v42 }
0x3455   :  { %v4504_v25 = vor.u32 1.1754944e-38, %v4503_v44  ;;  %v4519_v39 = vor.u32 1.1754944e-38, %v4518_v56  ;;  %vm4502_vm9 = vcmp.eq.f32.partialorder %v4501_v29, 8.507059e+37 }
0x3456   :  { %vm4517_vm10 = vcmp.eq.f32.partialorder %v4516_v62, 8.507059e+37 }
0x3459   :  { %v5943_v53 = vpop.eup %5942 }
0x345a   :  { %v5945_v2 = vpop.eup %5944  ;;  %v4493_v57 = vmul.f32 %v5943_v53, %v4488_v15  ;;  %vm4498_vm3 = vweird.f32 %v5943_v53 }
0x345b   :  { %v4508_v52 = vmul.f32 %v5945_v2, %v4489_v42  ;;  %vm4513_vm4 = vweird.f32 %v5945_v2  ;;  %vm4499_vm7 = vmor %vm4497_vm5, %vm4498_vm3 }
0x345c   :  { %v4494_v14 = vsub.f32 1.0, %v4493_v57  ;;  %vm4514_vm8 = vmor %vm4512_vm6, %vm4513_vm4 }
0x345d   :  { %v4509_v31 = vsub.f32 1.0, %v4508_v52 }
0x345e   :  { %v4495_v46 = vmul.f32 %v5943_v53, %v4494_v14 }
0x345f   :  { %v4510_v18 = vmul.f32 %v5945_v2, %v4509_v31 }
0x3460   :  { %v4496_v22 = vadd.f32 %v5943_v53, %v4495_v46 }
0x3461   :  { %v4511_v51 = vadd.f32 %v5945_v2, %v4510_v18 }
0x3462   :  { %v4500_v21 = vsel %vm4499_vm7, %v5943_v53, %v4496_v22 }
0x3463   :  { %v4515_v38 = vsel %vm4514_vm8, %v5945_v2, %v4511_v51  ;;  %v4505_v63 = vsel %vm4502_vm9, %v4504_v25, %v4500_v21 }
0x3464   :  { %v4520_v9 = vsel %vm4517_vm10, %v4519_v39, %v4515_v38  ;;  %v4506_v50 = vmul.f32 %v5939_v17, %v4505_v63 }
0x3465   :  { %v4521_v10 = vmul.f32 %v5941_v24, %v4520_v9 }
0x3466   :  { %4524 = vperm.xlu2 %5548, %v4506_v50  }
0x3467   :  { %4529 = vperm.xlu1 %5547, %v4521_v10  }
0x346f   :  { %4625 = vrot.lane.b32.xlu1 %v4581_v16, %s6100_s26 }
0x3477   :  { %4627 = vrot.lane.b32.xlu1 %v4582_v40, %s6100_s26 }
0x34c0   :  { %v4525_v59 = vpop.permute.xlu2 %4524 }
0x34c1   :  { %v4532_v8 = vmul.f32 %v7879_v54, %v4525_v59 }
0x34c3   :  { %v4534_v26 = vsel %vm2639_vm12, %v4532_v8, 0.0 }
0x34c4   :  { %v4535_v17 = vrot.slane %v4534_v26, 4 }
0x34c6   :  { %v4536_v24 = vadd.f32 %v4535_v17, %v4534_v26 }
0x34c8   :  { %v4537_v32 = vrot.slane %v4536_v24, 2 }
0x34ca   :  { %v4538_v53 = vadd.f32 %v4537_v32, %v4536_v24 }
0x34cc   :  { %v4539_v52 = vrot.slane %v4538_v53, 1 }
0x34ce   :  { %v4540_v44 = vadd.f32 %v4539_v52, %v4538_v53  ;;  %v4657_v52 = vrot.slane %v7827_v34, 7 }
0x34d9   :  { %v4530_v58 = vpop.permute.xlu1 %4529 }
0x34da   :  { %v4533_v35 = vmul.f32 %v7883_v33, %v4530_v58 }
0x34dc   :  { %v4541_v15 = vsel %vm2639_vm12, %v4533_v35, 0.0 }
0x34dd   :  { %v4542_v42 = vrot.slane %v4541_v15, 4 }
0x34df   :  { %v4543_v2 = vadd.f32 %v4542_v42, %v4541_v15 }
0x34e1   :  { %v4544_v57 = vrot.slane %v4543_v2, 2  ;;  %v4626_v8 = vpop.permute.xlu1 %4625 }
0x34e3   :  { %v4545_v14 = vadd.f32 %v4544_v57, %v4543_v2 }
0x34e5   :  { %v4546_v31 = vrot.slane %v4545_v14, 1 }
0x34e7   :  { %v4547_v46 = vadd.f32 %v4546_v31, %v4545_v14 }
0x34e9   :  { %v4550_v56 = vsel %vm408_vm2, %v4547_v46, %v4540_v44  ;;  %v4658_v44 = vrot.slane %v7829_v41, 7 }
0x34ea   :  { %5501 = vmatmul.msk.f32.vlgmr.msrb.gmra.mxu1 %vm2639_vm12, %v4550_v56 }
0x3567   :  { %v7889_v29 = vpop.f32.mrf.mxu1 }
0x3568   :  { %v4574_v18 = vrot.slane %v7889_v29, 3  ;;  %v4575_v62 = vrot.slane %v7889_v29, 4 }
0x356a   :  { %v4578_v22 = vadd.f32 %v4574_v18, %v7415_v28  ;;  %v4579_v51 = vadd.f32 %v4575_v62, %v7419_v30 }
0x356c   :  { %v4585_v25 = vadd.f32 %v4581_v16, %v4578_v22  ;;  %v4586_v39 = vadd.f32 %v4582_v40, %v4579_v51 }
0x356e   :  { %v5502_v21 = vmul.f32 -1.442695, %v4585_v25  ;;  %v5503_v38 = vmul.f32 -1.442695, %v4586_v39  ;;  %v4628_v25 = vpop.permute.xlu1 %4627 }
0x3570   :  { %5946 = vpow2.f32 %v5502_v21 }
0x3571   :  { %5948 = vpow2.f32 %v5503_v38 }
0x3576   :  { %v5947_v63 = vpop.eup %5946 }
0x3577   :  { %v5949_v9 = vpop.eup %5948  ;;  %v4593_v50 = vadd.f32 1.0, %v5947_v63 }
0x3578   :  { %v4594_v10 = vadd.f32 1.0, %v5949_v9 }
0x3579   :  { %5950 = vrcp.f32 %v4593_v50  ;;  %v4606_v35 = vand.u32 2147483648, %v4593_v50  ;;  %v4604_v32 = vand.u32 2147483647, %v4593_v50  ;;  %vm4600_vm1 = vweird.f32 %v4593_v50 }
0x357a   :  { %5952 = vrcp.f32 %v4594_v10  ;;  %v4621_v16 = vand.u32 2147483648, %v4594_v10  ;;  %v4619_v42 = vand.u32 2147483647, %v4594_v10  ;;  %vm4615_vm3 = vweird.f32 %v4594_v10 }
0x357b   :  { %v4607_v57 = vor.u32 1.1754944e-38, %v4606_v35  ;;  %vm4605_vm6 = vcmp.eq.f32.partialorder %v4604_v32, 8.507059e+37 }
0x357c   :  { %v4622_v14 = vor.u32 1.1754944e-38, %v4621_v16  ;;  %vm4620_vm7 = vcmp.eq.f32.partialorder %v4619_v42, 8.507059e+37 }
0x357f   :  { %v5951_v45 = vpop.eup %5950 }
0x3580   :  { %v5953_v59 = vpop.eup %5952  ;;  %v4596_v26 = vmul.f32 %v5951_v45, %v4593_v50  ;;  %vm4601_vm14 = vweird.f32 %v5951_v45 }
0x3581   :  { %v4611_v17 = vmul.f32 %v5953_v59, %v4594_v10  ;;  %vm4616_vm15 = vweird.f32 %v5953_v59  ;;  %vm4602_vm4 = vmor %vm4600_vm1, %vm4601_vm14 }
0x3582   :  { %v4597_v24 = vsub.f32 1.0, %v4596_v26  ;;  %vm4617_vm5 = vmor %vm4615_vm3, %vm4616_vm15 }
0x3583   :  { %v4612_v58 = vsub.f32 1.0, %v4611_v17 }
0x3584   :  { %v4598_v40 = vmul.f32 %v5951_v45, %v4597_v24 }
0x3585   :  { %v4613_v15 = vmul.f32 %v5953_v59, %v4612_v58 }
0x3586   :  { %v4599_v53 = vadd.f32 %v5951_v45, %v4598_v40 }
0x3587   :  { %v4614_v2 = vadd.f32 %v5953_v59, %v4613_v15 }
0x3588   :  { %v4603_v31 = vsel %vm4602_vm4, %v5951_v45, %v4599_v53 }
0x3589   :  { %v4618_v46 = vsel %vm4617_vm5, %v5953_v59, %v4614_v2  ;;  %v4608_v56 = vsel %vm4605_vm6, %v4607_v57, %v4603_v31 }
0x358a   :  { %v4623_v39 = vsel %vm4620_vm7, %v4622_v14, %v4618_v46  ;;  %v4631_v21 = vmul.f32 %v4626_v8, %v4608_v56  ;;  %v4661_v38 = vmul.f32 %v4657_v52, %v4608_v56  ;;  %v4645_v8 = vsub.f32 1.0, %v4608_v56 }
0x358b   :  { %v4632_v63 = vmul.f32 %v4628_v25, %v4623_v39  ;;  %v4662_v9 = vmul.f32 %v4658_v44, %v4623_v39  ;;  %v4646_v17 = vsub.f32 1.0, %v4623_v39 }
0x358c   :  { %4635 = vrot.lane.b32.xlu2 %v4631_v21, %s6100_s26 }
0x358d   :  { %4637 = vrot.lane.b32.xlu1 %v4632_v63, %s6100_s26 }
0x35e6   :  { %v4636_v34 = vpop.permute.xlu2 %4635 }
0x35e7   :  { %v4641_v50 = vadd.f32 %v4636_v34, %v4578_v22 }
0x35e9   :  { %5954 = vtanh.f32 %v4641_v50 }
0x35ef   :  { %v5955_v10 = vpop.eup %5954 }
0x35f0   :  { %4649 = vrot.lane.b32.xlu0 %v5955_v10, %s6099_s3 }
0x35ff   :  { %v4638_v41 = vpop.permute.xlu1 %4637 }
0x3600   :  { %v4642_v45 = vadd.f32 %v4638_v41, %v4579_v51 }
0x3602   :  { %5956 = vtanh.f32 %v4642_v45 }
0x3608   :  { %v5957_v59 = vpop.eup %5956 }
0x3609   :  { %4651 = vrot.lane.b32.xlu2 %v5957_v59, %s6099_s3 }
0x3662   :  { %v4650_v26 = vpop.permute.xlu0 %4649 }
0x3663   :  { %v4655_v24 = vmul.f32 %v4650_v26, %v4645_v8  ;;  %v4652_v58 = vpop.permute.xlu2 %4651 }
0x3664   :  { %v4656_v35 = vmul.f32 %v4652_v58, %v4646_v17 }
0x3665   :  { %v7905_v16 = vadd.f32 %v4661_v38, %v4655_v24 }
0x3666   :  { %v7907_v40 = vadd.f32 %v4662_v9, %v4656_v35 }
0x3667   :  { %v4667_v22 = vrot.slane %v7905_v16, 5 }
0x3668   :  { %v4668_v32 = vrot.slane %v7907_v40, 4 }
0x366a   :  { %v4669_v51 = vsel %vm408_vm2, %v4668_v32, %v4667_v22 }
0x366b   :  { %4670 = vrot.lane.b32.xlu1 %v4669_v51, %s6099_s3 }
0x36dd   :  { %v4671_v15 = vpop.permute.xlu1 %4670 }
0x36de   :  { %5504 = vmatmul.msk.f32.vlgmr.msrb.gmra.mxu3 %vm83_vm0, %v4671_v15  ;;  %5505 = vmatmul.msk.f32.vlgmr.msra.gmra.mxu0 %vm83_vm0, %v4671_v15 }
0x36df   :  { %5328 = vmatpush.msrb.mxu3 %v7755_v0 }
0x36e1   :  { %5329 = vmatpush.msrb.mxu3 %v7762_v19 }
0x36e3   :  { %5330 = vmatpush.msrb.mxu3 %v7769_v49 }
0x36e5   :  { %5331 = vmatpush.msrb.mxu3 %v7776_v4 }
0x375b   :  { %v4735_v42 = vpop.f32.mrf.mxu0 }
0x375c   :  { %v4740_v53 = vrot.slane %v4735_v42, 1  ;;  %v4741_v2 = vperm.slane %v4735_v42, 0 }
0x375e   :  { %v4742_v57 = vperm.slane %v4740_v53, 0  ;;  %v4745_v52 = vadd.f32 %v4741_v2, %v7256_v5 }
0x3760   :  { %v4746_v14 = vadd.f32 %v4742_v57, %v7264_v13  ;;  %5958 = vtanh.f32 %v4745_v52  ;;  %v7940_v52 = vld [vmem:[%s8158_s17] ss:$0 sm:$0xff]  ;;  %s6110_s17 = smov [#allocation3]  }
0x3762   :  { %5960 = vtanh.f32 %v4746_v14  ;;  %v7943_v14 = vadd.f32 %v7940_v52, %v4735_v42 }
0x3766   :  { %v5959_v31 = vpop.eup %5958 }
0x3767   :  { %v4749_v44 = vmul.f32 %v5959_v31, %v7259_v43  ;;  %v4902_v31 = vrot.slane %v7943_v14, 2 }
0x3768   :  { %v5961_v0 = vpop.eup %5960 }
0x3769   :  { %4753 = vrot.lane.b32.xlu2 %v4749_v44, %s6101_s27  ;;  %v4750_v19 = vmul.f32 %v5961_v0, %v7259_v43 }
0x376b   :  { %4755 = vrot.lane.b32.xlu1 %v4750_v19, %s6101_s27 }
0x37c3   :  { %v4754_v49 = vpop.permute.xlu2 %4753 }
0x37c4   :  { %v4759_v4 = vsel %vm83_vm0, %v4754_v49, 0.0 }
0x37c5   :  { %4760 = vadd.xlane.f32.xlu2 %v4759_v4 }
0x37dd   :  { %v4756_v46 = vpop.permute.xlu1 %4755 }
0x37de   :  { %v4762_v56 = vsel %vm83_vm0, %v4756_v46, 0.0 }
0x37df   :  { %4763 = vadd.xlane.f32.xlu1 %v4762_v56 }
0x3838   :  { %v4761_v25 = vpop.xlane.xlu2 %4760 }
0x3839   :  { %v4765_v39 = vadd.f32 %v4761_v25, %v7275_v1 }
0x383b   :  { %4770 = vperm.xlu0 %5549, %v4765_v39  }
0x3852   :  { %v4764_v21 = vpop.xlane.xlu1 %4763 }
0x3853   :  { %v4766_v38 = vadd.f32 %v4764_v21, %v7278_v47 }
0x3855   :  { %4773 = vperm.xlu0 %5549, %v4766_v38  }
0x38ad   :  { %v4771_v63 = vpop.permute.xlu0 %4770 }
0x38ae   :  { %v4775_v34 = vperm.slane %v4771_v63, %v7281_v61 }
0x38c7   :  { %v4774_v9 = vpop.permute.xlu0 %4773 }
0x38c8   :  { %v4776_v50 = vperm.slane %v4774_v9, %v7281_v61 }
0x38ca   :  { %v4777_v10 = vsel %vm408_vm2, %v4776_v50, %v4775_v34 }
0x38cb   :  { %v4779_v41 = vsel %vm2859_vm13, %v4777_v10, -inf }
0x38cc   :  { %4780 = vmax.xlane.f32.xlu0 %v4779_v41 }
0x393f   :  { %v4781_v45 = vpop.xlane.xlu0 %4780 }
0x3940   :  { %v4783_v59 = vperm.slane %v4781_v45, 0  ;;  %v4784_v8 = vperm.slane %v4781_v45, 1 }
0x3942   :  { %v4787_v26 = vsub.f32 %v4765_v39, %v4783_v59  ;;  %v4788_v17 = vsub.f32 %v4766_v38, %v4784_v8 }
0x3944   :  { %v4789_v24 = vmul.f32 1.442695, %v4787_v26  ;;  %v4791_v58 = vmul.f32 1.442695, %v4788_v17 }
0x3946   :  { %5962 = vpow2.f32 %v4789_v24 }
0x3947   :  { %5964 = vpow2.f32 %v4791_v58 }
0x394c   :  { %v5963_v35 = vpop.eup %5962 }
0x394d   :  { %v5965_v22 = vpop.eup %5964  ;;  %4796 = vperm.xlu2 %5548, %v5963_v35  }
0x394e   :  { %4799 = vperm.xlu1 %5547, %v5965_v22  }
0x39a7   :  { %v4797_v32 = vpop.permute.xlu2 %4796 }
0x39a8   :  { %v4801_v15 = vperm.slane %v4797_v32, %v7281_v61  ;;  %v4903_v32 = vrot.slane %v7943_v14, 3 }
0x39c0   :  { %v4800_v51 = vpop.permute.xlu1 %4799 }
0x39c1   :  { %v4802_v53 = vperm.slane %v4800_v51, %v7281_v61 }
0x39c3   :  { %v4803_v2 = vsel %vm408_vm2, %v4802_v53, %v4801_v15 }
0x39c4   :  { %v4805_v57 = vsel %vm2859_vm13, %v4803_v2, 0.0 }
0x39c5   :  { %4806 = vadd.xlane.f32.xlu0 %v4805_v57 }
0x39d9   :  { %4946 = vrot.lane.b32.xlu0 %v4902_v31, %s6100_s26 }
0x3a38   :  { %v4807_v44 = vpop.xlane.xlu0 %4806 }
0x3a39   :  { %v4809_v0 = vperm.slane %v4807_v44, 0  ;;  %v4810_v19 = vperm.slane %v4807_v44, 1 }
0x3a3b   :  { %5966 = vrcp.f32 %v4809_v0  ;;  %v4824_v21 = vand.u32 2147483648, %v4809_v0  ;;  %v4839_v38 = vand.u32 2147483648, %v4810_v19  ;;  %v4822_v63 = vand.u32 2147483647, %v4809_v0 }
0x3a3c   :  { %5968 = vrcp.f32 %v4810_v19  ;;  %v4837_v34 = vand.u32 2147483647, %v4810_v19  ;;  %vm4818_vm10 = vweird.f32 %v4809_v0  ;;  %vm4833_vm14 = vweird.f32 %v4810_v19 }
0x3a3d   :  { %v4825_v41 = vor.u32 1.1754944e-38, %v4824_v21  ;;  %v4840_v45 = vor.u32 1.1754944e-38, %v4839_v38  ;;  %vm4823_vm3 = vcmp.eq.f32.partialorder %v4822_v63, 8.507059e+37 }
0x3a3e   :  { %vm4838_vm4 = vcmp.eq.f32.partialorder %v4837_v34, 8.507059e+37 }
0x3a41   :  { %v5967_v49 = vpop.eup %5966 }
0x3a42   :  { %v5969_v4 = vpop.eup %5968  ;;  %v4814_v46 = vmul.f32 %v5967_v49, %v4809_v0  ;;  %vm4819_vm8 = vweird.f32 %v5967_v49 }
0x3a43   :  { %v4829_v56 = vmul.f32 %v5969_v4, %v4810_v19  ;;  %vm4834_vm9 = vweird.f32 %v5969_v4  ;;  %vm4820_vm15 = vmor %vm4818_vm10, %vm4819_vm8 }
0x3a44   :  { %v4815_v25 = vsub.f32 1.0, %v4814_v46  ;;  %vm4835_vm1 = vmor %vm4833_vm14, %vm4834_vm9 }
0x3a45   :  { %v4830_v39 = vsub.f32 1.0, %v4829_v56 }
0x3a46   :  { %v4816_v42 = vmul.f32 %v5967_v49, %v4815_v25 }
0x3a47   :  { %v4831_v9 = vmul.f32 %v5969_v4, %v4830_v39 }
0x3a48   :  { %v4817_v50 = vadd.f32 %v5967_v49, %v4816_v42 }
0x3a49   :  { %v4832_v10 = vadd.f32 %v5969_v4, %v4831_v9 }
0x3a4a   :  { %v4821_v59 = vsel %vm4820_vm15, %v5967_v49, %v4817_v50 }
0x3a4b   :  { %v4836_v8 = vsel %vm4835_vm1, %v5969_v4, %v4832_v10  ;;  %v4826_v26 = vsel %vm4823_vm3, %v4825_v41, %v4821_v59 }
0x3a4c   :  { %v4841_v17 = vsel %vm4838_vm4, %v4840_v45, %v4836_v8  ;;  %v4827_v24 = vmul.f32 %v5963_v35, %v4826_v26 }
0x3a4d   :  { %v4842_v58 = vmul.f32 %v5965_v22, %v4841_v17 }
0x3a4e   :  { %4845 = vperm.xlu2 %5548, %v4827_v24  }
0x3a4f   :  { %4850 = vperm.xlu1 %5547, %v4842_v58  }
0x3a56   :  { %4948 = vrot.lane.b32.xlu2 %v4903_v32, %s6100_s26 }
0x3aa8   :  { %v4846_v51 = vpop.permute.xlu2 %4845 }
0x3aa9   :  { %v4853_v15 = vmul.f32 %v7879_v54, %v4846_v51 }
0x3aab   :  { %v4855_v53 = vsel %vm2639_vm12, %v4853_v15, 0.0 }
0x3aac   :  { %v4856_v2 = vrot.slane %v4855_v53, 4 }
0x3aae   :  { %v4857_v57 = vadd.f32 %v4856_v2, %v4855_v53 }
0x3ab0   :  { %v4858_v19 = vrot.slane %v4857_v57, 2 }
0x3ab2   :  { %v4859_v49 = vadd.f32 %v4858_v19, %v4857_v57 }
0x3ab4   :  { %v4860_v56 = vrot.slane %v4859_v49, 1 }
0x3ab6   :  { %v4861_v21 = vadd.f32 %v4860_v56, %v4859_v49 }
0x3ac1   :  { %v4851_v44 = vpop.permute.xlu1 %4850 }
0x3ac2   :  { %v4854_v0 = vmul.f32 %v7883_v33, %v4851_v44 }
0x3ac4   :  { %v4862_v35 = vsel %vm2639_vm12, %v4854_v0, 0.0 }
0x3ac5   :  { %v4863_v22 = vrot.slane %v4862_v35, 4 }
0x3ac7   :  { %v4864_v4 = vadd.f32 %v4863_v22, %v4862_v35 }
0x3ac9   :  { %v4865_v46 = vrot.slane %v4864_v4, 2 }
0x3acb   :  { %v4866_v25 = vadd.f32 %v4865_v46, %v4864_v4  ;;  %v4978_v46 = vrot.slane %v7905_v16, 7 }
0x3acd   :  { %v4867_v39 = vrot.slane %v4866_v25, 1 }
0x3acf   :  { %v4868_v42 = vadd.f32 %v4867_v39, %v4866_v25  ;;  %v4979_v39 = vrot.slane %v7907_v40, 7 }
0x3ad1   :  { %v4871_v38 = vsel %vm408_vm2, %v4868_v42, %v4861_v21  ;;  %v4947_v21 = vpop.permute.xlu0 %4946 }
0x3ad2   :  { %5506 = vmatmul.msk.f32.vlgmr.msrb.gmra.mxu2 %vm2639_vm12, %v4871_v38 }
0x3b55   :  { %v7957_v63 = vpop.f32.mrf.mxu2 }
0x3b56   :  { %v4895_v9 = vrot.slane %v7957_v63, 2  ;;  %v4896_v34 = vrot.slane %v7957_v63, 3 }
0x3b58   :  { %v4899_v50 = vadd.f32 %v4895_v9, %v7415_v28  ;;  %v4900_v10 = vadd.f32 %v4896_v34, %v7419_v30 }
0x3b5a   :  { %v4906_v41 = vadd.f32 %v4902_v31, %v4899_v50  ;;  %v4907_v45 = vadd.f32 %v4903_v32, %v4900_v10 }
0x3b5c   :  { %v5507_v59 = vmul.f32 -1.442695, %v4906_v41  ;;  %v5508_v8 = vmul.f32 -1.442695, %v4907_v45  ;;  %v4949_v41 = vpop.permute.xlu2 %4948 }
0x3b5e   :  { %5970 = vpow2.f32 %v5507_v59 }
0x3b5f   :  { %5972 = vpow2.f32 %v5508_v8 }
0x3b64   :  { %v5971_v26 = vpop.eup %5970 }
0x3b65   :  { %v5973_v17 = vpop.eup %5972  ;;  %v4914_v24 = vadd.f32 1.0, %v5971_v26 }
0x3b66   :  { %v4915_v58 = vadd.f32 1.0, %v5973_v17 }
0x3b67   :  { %5974 = vrcp.f32 %v4914_v24  ;;  %v4927_v0 = vand.u32 2147483648, %v4914_v24  ;;  %v4925_v32 = vand.u32 2147483647, %v4914_v24  ;;  %vm4921_vm7 = vweird.f32 %v4914_v24 }
0x3b68   :  { %5976 = vrcp.f32 %v4915_v58  ;;  %v4942_v14 = vand.u32 2147483648, %v4915_v58  ;;  %v4940_v35 = vand.u32 2147483647, %v4915_v58  ;;  %vm4936_vm8 = vweird.f32 %v4915_v58 }
0x3b69   :  { %v4928_v4 = vor.u32 1.1754944e-38, %v4927_v0  ;;  %vm4926_vm14 = vcmp.eq.f32.partialorder %v4925_v32, 8.507059e+37 }
0x3b6a   :  { %v4943_v56 = vor.u32 1.1754944e-38, %v4942_v14  ;;  %vm4941_vm15 = vcmp.eq.f32.partialorder %v4940_v35, 8.507059e+37 }
0x3b6d   :  { %v5975_v51 = vpop.eup %5974 }
0x3b6e   :  { %v5977_v15 = vpop.eup %5976  ;;  %v4917_v53 = vmul.f32 %v5975_v51, %v4914_v24  ;;  %vm4922_vm5 = vweird.f32 %v5975_v51 }
0x3b6f   :  { %v4932_v2 = vmul.f32 %v5977_v15, %v4915_v58  ;;  %vm4937_vm6 = vweird.f32 %v5977_v15  ;;  %vm4923_vm9 = vmor %vm4921_vm7, %vm4922_vm5 }
0x3b70   :  { %v4918_v57 = vsub.f32 1.0, %v4917_v53  ;;  %vm4938_vm10 = vmor %vm4936_vm8, %vm4937_vm6 }
0x3b71   :  { %v4933_v44 = vsub.f32 1.0, %v4932_v2 }
0x3b72   :  { %v4919_v31 = vmul.f32 %v5975_v51, %v4918_v57 }
0x3b73   :  { %v4934_v19 = vmul.f32 %v5977_v15, %v4933_v44 }
0x3b74   :  { %v4920_v22 = vadd.f32 %v5975_v51, %v4919_v31 }
0x3b75   :  { %v4935_v49 = vadd.f32 %v5977_v15, %v4934_v19 }
0x3b76   :  { %v4924_v25 = vsel %vm4923_vm9, %v5975_v51, %v4920_v22 }
0x3b77   :  { %v4939_v42 = vsel %vm4938_vm10, %v5977_v15, %v4935_v49  ;;  %v4929_v38 = vsel %vm4926_vm14, %v4928_v4, %v4924_v25 }
0x3b78   :  { %v4944_v45 = vsel %vm4941_vm15, %v4943_v56, %v4939_v42  ;;  %v4952_v59 = vmul.f32 %v4947_v21, %v4929_v38  ;;  %v4982_v8 = vmul.f32 %v4978_v46, %v4929_v38  ;;  %v4966_v0 = vsub.f32 1.0, %v4929_v38 }
0x3b79   :  { %v4953_v26 = vmul.f32 %v4949_v41, %v4944_v45  ;;  %v4983_v17 = vmul.f32 %v4979_v39, %v4944_v45  ;;  %v4967_v53 = vsub.f32 1.0, %v4944_v45 }
0x3b7a   :  { %4956 = vrot.lane.b32.xlu1 %v4952_v59, %s6100_s26 }
0x3b7b   :  { %4958 = vrot.lane.b32.xlu2 %v4953_v26, %s6100_s26 }
0x3bd5   :  { %v4959_v16 = vpop.permute.xlu2 %4958 }
0x3bd6   :  { %v4963_v24 = vadd.f32 %v4959_v16, %v4900_v10 }
0x3bd8   :  { %5978 = vtanh.f32 %v4963_v24 }
0x3bde   :  { %v5979_v58 = vpop.eup %5978 }
0x3bdf   :  { %4972 = vrot.lane.b32.xlu2 %v5979_v58, %s6099_s3 }
0x3bec   :  { %v4957_v40 = vpop.permute.xlu1 %4956 }
0x3bed   :  { %v4962_v51 = vadd.f32 %v4957_v40, %v4899_v50 }
0x3bef   :  { %5980 = vtanh.f32 %v4962_v51 }
0x3bf5   :  { %v5981_v15 = vpop.eup %5980 }
0x3bf6   :  { %4970 = vrot.lane.b32.xlu1 %v5981_v15, %s6099_s3 }
0x3c39   :  { %v4973_v2 = vpop.permute.xlu2 %4972 }
0x3c3a   :  { %v4977_v57 = vmul.f32 %v4973_v2, %v4967_v53 }
0x3c3c   :  { %v7975_v44 = vadd.f32 %v4983_v17, %v4977_v57 }
0x3c3e   :  { %v4989_v10 = vrot.slane %v7975_v44, 5 }
0x3c68   :  { %v4971_v14 = vpop.permute.xlu1 %4970 }
0x3c69   :  { %v4976_v31 = vmul.f32 %v4971_v14, %v4966_v0 }
0x3c6b   :  { %v7977_v32 = vadd.f32 %v4982_v8, %v4976_v31 }
0x3c6d   :  { %v4988_v19 = vrot.slane %v7977_v32, 6 }
0x3c6f   :  { %v4990_v50 = vsel %vm408_vm2, %v4989_v10, %v4988_v19 }
0x3c70   :  { %4991 = vrot.lane.b32.xlu0 %v4990_v50, %s6099_s3 }
0x3ce2   :  { %v4992_v35 = vpop.permute.xlu0 %4991 }
0x3ce3   :  { %5509 = vmatmul.msk.f32.vlgmr.msra.gmra.mxu3 %vm83_vm0, %v4992_v35  ;;  %5510 = vmatmul.msk.f32.vlgmr.msrb.gmra.mxu0 %vm83_vm0, %v4992_v35 }
0x3d60   :  { %v7985_v22 = vpop.f32.mrf.mxu0 }
0x3d61   :  { %v5061_v49 = vrot.slane %v7985_v22, 1  ;;  %v5062_v4 = vperm.slane %v7985_v22, 0 }
0x3d63   :  { %v5063_v46 = vperm.slane %v5061_v49, 0  ;;  %v5066_v56 = vadd.f32 %v5062_v4, %v7256_v5 }
0x3d65   :  { %v5067_v25 = vadd.f32 %v5063_v46, %v7264_v13  ;;  %5982 = vtanh.f32 %v5066_v56 }
0x3d67   :  { %5984 = vtanh.f32 %v5067_v25 }
0x3d6b   :  { %v5983_v39 = vpop.eup %5982 }
0x3d6c   :  { %v5070_v21 = vmul.f32 %v5983_v39, %v7259_v43 }
0x3d6d   :  { %v5985_v42 = vpop.eup %5984 }
0x3d6e   :  { %5074 = vrot.lane.b32.xlu1 %v5070_v21, %s6101_s27  ;;  %v5071_v38 = vmul.f32 %v5985_v42, %v7259_v43 }
0x3d70   :  { %5076 = vrot.lane.b32.xlu2 %v5071_v38, %s6101_s27 }
0x3dca   :  { %v5077_v41 = vpop.permute.xlu2 %5076 }
0x3dcb   :  { %v5083_v45 = vsel %vm83_vm0, %v5077_v41, 0.0 }
0x3dcc   :  { %5084 = vadd.xlane.f32.xlu1 %v5083_v45 }
0x3de0   :  { %v5075_v59 = vpop.permute.xlu1 %5074 }
0x3de1   :  { %v5080_v5 = vsel %vm83_vm0, %v5075_v59, 0.0 }
0x3de2   :  { %5081 = vadd.xlane.f32.xlu0 %v5080_v5 }
0x3e3f   :  { %v5085_v26 = vpop.xlane.xlu1 %5084 }
0x3e40   :  { %v5087_v17 = vadd.f32 %v5085_v26, %v7278_v47 }
0x3e55   :  { %v5082_v13 = vpop.xlane.xlu0 %5081 }
0x3e56   :  { %v5086_v8 = vadd.f32 %v5082_v13, %v7275_v1 }
0x3e58   :  { %5091 = vperm.xlu2 %5548, %v5086_v8  }
0x3e60   :  { %5094 = vperm.xlu2 %5548, %v5087_v17  }
0x3eb2   :  { %v5092_v16 = vpop.permute.xlu2 %5091 }
0x3eb3   :  { %v5096_v24 = vperm.slane %v5092_v16, %v7281_v61 }
0x3eba   :  { %v5095_v43 = vpop.permute.xlu2 %5094 }
0x3ebb   :  { %v5097_v58 = vperm.slane %v5095_v43, %v7281_v61 }
0x3ebd   :  { %v5098_v40 = vsel %vm408_vm2, %v5097_v58, %v5096_v24 }
0x3ebe   :  { %v5100_v51 = vsel %vm2859_vm13, %v5098_v40, -inf }
0x3ebf   :  { %5101 = vmax.xlane.f32.xlu2 %v5100_v51 }
0x3f32   :  { %v5102_v15 = vpop.xlane.xlu2 %5101 }
0x3f33   :  { %v5104_v53 = vperm.slane %v5102_v15, 0  ;;  %v5105_v2 = vperm.slane %v5102_v15, 1 }
0x3f35   :  { %v5108_v1 = vsub.f32 %v5086_v8, %v5104_v53  ;;  %v5109_v57 = vsub.f32 %v5087_v17, %v5105_v2 }
0x3f37   :  { %v5110_v0 = vmul.f32 1.442695, %v5108_v1  ;;  %v5112_v14 = vmul.f32 1.442695, %v5109_v57  ;;  %v5059_v1 = vadd.f32 %v7940_v52, %v7985_v22 }
0x3f39   :  { %5986 = vpow2.f32 %v5110_v0  ;;  %v5223_v57 = vrot.slane %v5059_v1, 1  ;;  %v5224_v0 = vrot.slane %v5059_v1, 2 }
0x3f3a   :  { %5988 = vpow2.f32 %v5112_v14 }
0x3f3f   :  { %v5987_v47 = vpop.eup %5986 }
0x3f40   :  { %v5989_v31 = vpop.eup %5988  ;;  %5117 = vperm.xlu0 %5549, %v5987_v47  }
0x3f41   :  { %5120 = vperm.xlu1 %5547, %v5989_v31  }
0x3fb2   :  { %v5118_v10 = vpop.permute.xlu0 %5117 }
0x3fb3   :  { %v5121_v19 = vpop.permute.xlu1 %5120  ;;  %v5122_v50 = vperm.slane %v5118_v10, %v7281_v61 }
0x3fb4   :  { %v5123_v35 = vperm.slane %v5121_v19, %v7281_v61 }
0x3fb6   :  { %v5124_v49 = vsel %vm408_vm2, %v5123_v35, %v5122_v50 }
0x3fb7   :  { %v5126_v4 = vsel %vm2859_vm13, %v5124_v49, 0.0 }
0x3fb8   :  { %5127 = vadd.xlane.f32.xlu0 %v5126_v4 }
0x402b   :  { %v5128_v46 = vpop.xlane.xlu0 %5127 }
0x402c   :  { %v5130_v56 = vperm.slane %v5128_v46, 0  ;;  %v5131_v25 = vperm.slane %v5128_v46, 1 }
0x402e   :  { %5990 = vrcp.f32 %v5130_v56  ;;  %v5145_v59 = vand.u32 2147483648, %v5130_v56  ;;  %v5160_v13 = vand.u32 2147483648, %v5131_v25  ;;  %v5143_v61 = vand.u32 2147483647, %v5130_v56 }
0x402f   :  { %5992 = vrcp.f32 %v5131_v25  ;;  %v5158_v26 = vand.u32 2147483647, %v5131_v25  ;;  %vm5139_vm13 = vweird.f32 %v5130_v56  ;;  %vm5154_vm4 = vweird.f32 %v5131_v25 }
0x4030   :  { %v5146_v43 = vor.u32 1.1754944e-38, %v5145_v59  ;;  %v5161_v24 = vor.u32 1.1754944e-38, %v5160_v13  ;;  %vm5144_vm7 = vcmp.eq.f32.partialorder %v5143_v61, 8.507059e+37 }
0x4031   :  { %vm5159_vm8 = vcmp.eq.f32.partialorder %v5158_v26, 8.507059e+37 }
0x4034   :  { %v5991_v39 = vpop.eup %5990 }
0x4035   :  { %v5993_v21 = vpop.eup %5992  ;;  %v5135_v42 = vmul.f32 %v5991_v39, %v5130_v56  ;;  %vm5140_vm1 = vweird.f32 %v5991_v39 }
0x4036   :  { %v5150_v38 = vmul.f32 %v5993_v21, %v5131_v25  ;;  %vm5155_vm3 = vweird.f32 %v5993_v21  ;;  %vm5141_vm5 = vmor %vm5139_vm13, %vm5140_vm1 }
0x4037   :  { %v5136_v41 = vsub.f32 1.0, %v5135_v42  ;;  %vm5156_vm6 = vmor %vm5154_vm4, %vm5155_vm3  ;;  %vm4394_vm4 = vcmask 258052  }
0x4038   :  { %v5151_v45 = vsub.f32 1.0, %v5150_v38 }
0x4039   :  { %v5137_v5 = vmul.f32 %v5991_v39, %v5136_v41 }
0x403a   :  { %v5152_v8 = vmul.f32 %v5993_v21, %v5151_v45 }
0x403b   :  { %v5138_v17 = vadd.f32 %v5991_v39, %v5137_v5 }
0x403c   :  { %v5153_v16 = vadd.f32 %v5993_v21, %v5152_v8 }
0x403d   :  { %v5142_v58 = vsel %vm5141_vm5, %v5991_v39, %v5138_v17  ;;  %vm5036_vm5 = vcmask 260102  }
0x403e   :  { %v5157_v40 = vsel %vm5156_vm6, %v5993_v21, %v5153_v16  ;;  %v5147_v51 = vsel %vm5144_vm7, %v5146_v43, %v5142_v58  ;;  %vm3752_vm6 = vcmask 256002   ;;  %vm4715_vm7 = vcmask 259077  }
0x403f   :  { %v5162_v15 = vsel %vm5159_vm8, %v5161_v24, %v5157_v40  ;;  %v5148_v53 = vmul.f32 %v5987_v47, %v5147_v51  ;;  %vm5357_vm8 = vcmask 261127  }
0x4040   :  { %v5163_v2 = vmul.f32 %v5989_v31, %v5162_v15 }
0x4041   :  { %5166 = vperm.xlu2 %5548, %v5148_v53  }
0x4042   :  { %5171 = vperm.xlu1 %5547, %v5163_v2  }
0x404a   :  { %5267 = vrot.lane.b32.xlu1 %v5223_v57, %s6100_s26 }
0x4052   :  { %5269 = vrot.lane.b32.xlu1 %v5224_v0, %s6100_s26 }
0x409b   :  { %v5167_v14 = vpop.permute.xlu2 %5166 }
0x409c   :  { %v5174_v10 = vmul.f32 %v7879_v54, %v5167_v14 }
0x409e   :  { %v5176_v19 = vsel %vm2639_vm12, %v5174_v10, 0.0 }
0x409f   :  { %v5177_v50 = vrot.slane %v5176_v19, 4 }
0x40a1   :  { %v5178_v35 = vadd.f32 %v5177_v50, %v5176_v19 }
0x40a3   :  { %v5179_v49 = vrot.slane %v5178_v35, 2 }
0x40a5   :  { %v5180_v22 = vadd.f32 %v5179_v49, %v5178_v35  ;;  %v5299_v49 = vrot.slane %v7977_v32, 7 }
0x40a7   :  { %v5181_v25 = vrot.slane %v5180_v22, 1 }
0x40a9   :  { %v5182_v42 = vadd.f32 %v5181_v25, %v5180_v22  ;;  %v5300_v22 = vrot.slane %v7975_v44, 7  ;;  %v3093_v44 = vpop.f32.mrf.mxu3 }
0x40b4   :  { %v5172_v47 = vpop.permute.xlu1 %5171 }
0x40b5   :  { %v5175_v31 = vmul.f32 %v7883_v33, %v5172_v47 }
0x40b7   :  { %v5183_v4 = vsel %vm2639_vm12, %v5175_v31, 0.0 }
0x40b8   :  { %v5184_v52 = vrot.slane %v5183_v4, 4 }
0x40ba   :  { %v5185_v46 = vadd.f32 %v5184_v52, %v5183_v4 }
0x40bc   :  { %v5186_v56 = vrot.slane %v5185_v46, 2  ;;  %v5268_v51 = vpop.permute.xlu1 %5267 }
0x40be   :  { %v5187_v39 = vadd.f32 %v5186_v56, %v5185_v46 }
0x40c0   :  { %v5188_v21 = vrot.slane %v5187_v39, 1 }
0x40c2   :  { %v5189_v38 = vadd.f32 %v5188_v21, %v5187_v39 }
0x40c4   :  { %v5192_v54 = vsel %vm408_vm2, %v5189_v38, %v5182_v42  ;;  %v5270_v25 = vpop.permute.xlu1 %5269 }
0x40c5   :  { %5511 = vmatmul.msk.f32.vlgmr.msra.gmra.mxu1 %vm2639_vm12, %v5192_v54 }
0x4142   :  { %v8017_v41 = vpop.f32.mrf.mxu1 }
0x4143   :  { %v5216_v33 = vrot.slane %v8017_v41, 1  ;;  %v5217_v45 = vrot.slane %v8017_v41, 2 }
0x4145   :  { %v5220_v59 = vadd.f32 %v5216_v33, %v7415_v28  ;;  %v5221_v5 = vadd.f32 %v5217_v45, %v7419_v30 }
0x4147   :  { %v5227_v13 = vadd.f32 %v5223_v57, %v5220_v59  ;;  %v5228_v61 = vadd.f32 %v5224_v0, %v5221_v5 }
0x4149   :  { %v5512_v8 = vmul.f32 -1.442695, %v5227_v13  ;;  %v5513_v26 = vmul.f32 -1.442695, %v5228_v61 }
0x414b   :  { %5994 = vpow2.f32 %v5512_v8 }
0x414c   :  { %5996 = vpow2.f32 %v5513_v26 }
0x4151   :  { %v5995_v17 = vpop.eup %5994 }
0x4152   :  { %v5997_v16 = vpop.eup %5996  ;;  %v5235_v43 = vadd.f32 1.0, %v5995_v17 }
0x4153   :  { %v5236_v24 = vadd.f32 1.0, %v5997_v16  ;;  %v3097_v16 = vrot.slane %v3093_v44, 1 }
0x4154   :  { %5998 = vrcp.f32 %v5235_v43  ;;  %v5248_v14 = vand.u32 2147483648, %v5235_v43  ;;  %v5246_v10 = vand.u32 2147483647, %v5235_v43  ;;  %vm5242_vm10 = vweird.f32 %v5235_v43 }
0x4155   :  { %6000 = vrcp.f32 %v5236_v24  ;;  %v5263_v57 = vand.u32 2147483648, %v5236_v24  ;;  %v5261_v50 = vand.u32 2147483647, %v5236_v24  ;;  %vm5257_vm14 = vweird.f32 %v5236_v24 }
0x4156   :  { %v5249_v31 = vor.u32 1.1754944e-38, %v5248_v14  ;;  %vm5247_vm3 = vcmp.eq.f32.partialorder %v5246_v10, 8.507059e+37 }
0x4157   :  { %v5264_v4 = vor.u32 1.1754944e-38, %v5263_v57  ;;  %vm5262_vm13 = vcmp.eq.f32.partialorder %v5261_v50, 8.507059e+37 }
0x415a   :  { %v5999_v58 = vpop.eup %5998 }
0x415b   :  { %v6001_v40 = vpop.eup %6000  ;;  %v5238_v15 = vmul.f32 %v5999_v58, %v5235_v43  ;;  %vm5243_vm12 = vweird.f32 %v5999_v58 }
0x415c   :  { %v5253_v53 = vmul.f32 %v6001_v40, %v5236_v24  ;;  %vm5258_vm9 = vweird.f32 %v6001_v40  ;;  %vm5244_vm15 = vmor %vm5242_vm10, %vm5243_vm12 }
0x415d   :  { %v5239_v2 = vsub.f32 1.0, %v5238_v15  ;;  %vm5259_vm1 = vmor %vm5257_vm14, %vm5258_vm9 }
0x415e   :  { %v5254_v1 = vsub.f32 1.0, %v5253_v53 }
0x415f   :  { %v5240_v0 = vmul.f32 %v5999_v58, %v5239_v2 }
0x4160   :  { %v5255_v19 = vmul.f32 %v6001_v40, %v5254_v1 }
0x4161   :  { %v5241_v35 = vadd.f32 %v5999_v58, %v5240_v0 }
0x4162   :  { %v5256_v47 = vadd.f32 %v6001_v40, %v5255_v19 }
0x4163   :  { %v5245_v52 = vsel %vm5244_vm15, %v5999_v58, %v5241_v35 }
0x4164   :  { %v5260_v46 = vsel %vm5259_vm1, %v6001_v40, %v5256_v47  ;;  %v5250_v56 = vsel %vm5247_vm3, %v5249_v31, %v5245_v52  ;;  %v3408_v40 = vpop.f32.mrf.mxu3 }
0x4165   :  { %v5265_v39 = vsel %vm5262_vm13, %v5264_v4, %v5260_v46  ;;  %v5273_v21 = vmul.f32 %v5268_v51, %v5250_v56  ;;  %v5303_v42 = vmul.f32 %v5299_v49, %v5250_v56  ;;  %v5287_v43 = vsub.f32 1.0, %v5250_v56 }
0x4166   :  { %v5274_v38 = vmul.f32 %v5270_v25, %v5265_v39  ;;  %v5304_v54 = vmul.f32 %v5300_v22, %v5265_v39  ;;  %v3412_v2 = vrot.slane %v3408_v40, 7  ;;  %v5288_v35 = vsub.f32 1.0, %v5265_v39 }
0x4167   :  { %5277 = vrot.lane.b32.xlu2 %v5273_v21, %s6100_s26 }
0x4168   :  { %5279 = vrot.lane.b32.xlu1 %v5274_v38, %s6100_s26 }
0x41c1   :  { %v5278_v32 = vpop.permute.xlu2 %5277 }
0x41c2   :  { %v5283_v13 = vadd.f32 %v5278_v32, %v5220_v59 }
0x41c4   :  { %6002 = vtanh.f32 %v5283_v13 }
0x41ca   :  { %v6003_v61 = vpop.eup %6002 }
0x41cb   :  { %5291 = vrot.lane.b32.xlu2 %v6003_v61, %s6099_s3 }
0x41d3   :  { %3098 = vrot.lane.b32.xlu2 %v3093_v44, %s6099_s3 }
0x41da   :  { %v5280_v8 = vpop.permute.xlu1 %5279 }
0x41db   :  { %v5284_v26 = vadd.f32 %v5280_v8, %v5221_v5  ;;  %v3728_v5 = vpop.f32.mrf.mxu3 }
0x41dc   :  { %v3732_v14 = vrot.slane %v3728_v5, 6  ;;  %v3733_v21 = vrot.slane %v3728_v5, 7 }
0x41dd   :  { %6004 = vtanh.f32 %v5284_v26 }
0x41e3   :  { %v6005_v17 = vpop.eup %6004  ;;  %v4049_v1 = vpop.f32.mrf.mxu3 }
0x41e4   :  { %5293 = vrot.lane.b32.xlu1 %v6005_v17, %s6099_s3  ;;  %v4054_v0 = vrot.slane %v4049_v1, 6  ;;  %v4053_v13 = vrot.slane %v4049_v1, 5 }
0x41eb   :  { %v4370_v57 = vpop.f32.mrf.mxu3 }
0x41ec   :  { %3100 = vrot.lane.b32.xlu1 %v3097_v16, %s6099_s3  ;;  %v4375_v61 = vrot.slane %v4370_v57, 5 }
0x41f3   :  { %v4691_v10 = vpop.f32.mrf.mxu3 }
0x41f4   :  { %v4695_v19 = vrot.slane %v4691_v10, 3  ;;  %v4696_v38 = vrot.slane %v4691_v10, 4 }
0x41fb   :  { %v5012_v50 = vpop.f32.mrf.mxu3 }
0x41fc   :  { %v5017_v49 = vrot.slane %v5012_v50, 3  ;;  %v5016_v44 = vrot.slane %v5012_v50, 2 }
0x4225   :  { %v5292_v24 = vpop.permute.xlu2 %5291 }
0x4226   :  { %v5297_v58 = vmul.f32 %v5292_v24, %v5287_v43 }
0x4228   :  { %v8035_v59 = vadd.f32 %v5303_v42, %v5297_v58  ;;  %v4374_v42 = vrot.slane %v4370_v57, 4 }
0x422a   :  { %v5309_v52 = vrot.slane %v8035_v59, 7 }
0x422d   :  { %v3099_v51 = vpop.permute.xlu2 %3098 }
0x422e   :  { %v3104_v15 = vadd.f32 %v3099_v51, %v7415_v28 }
0x4230   :  { %v3106_v53 = vadd.f32 %v3104_v15, %v7417_v7 }
0x4232   :  { %3110 = vrot.lane.b32.xlu2 %v3106_v53, %s6101_s27 }
0x423a   :  { %3413 = vrot.lane.b32.xlu2 %v3412_v2, %s6099_s3 }
0x4242   :  { %3734 = vrot.lane.b32.xlu2 %v3732_v14, %s6099_s3 }
0x424a   :  { %4057 = vrot.lane.b32.xlu2 %v4054_v0, %s6099_s3 }
0x4252   :  { %4697 = vrot.lane.b32.xlu2 %v4695_v19, %s6099_s3 }
0x4256   :  { %v5294_v47 = vpop.permute.xlu1 %5293 }
0x4257   :  { %v5298_v31 = vmul.f32 %v5294_v47, %v5288_v35 }
0x4259   :  { %v8044_v4 = vadd.f32 %v5304_v54, %v5298_v31 }
0x425a   :  { %5020 = vrot.lane.b32.xlu2 %v5017_v49, %s6099_s3 }
0x425b   :  { %v5310_v22 = vrot.slane %v8044_v4, 6 }
0x425d   :  { %v5311_v46 = vsel %vm408_vm2, %v5310_v22, %v5309_v52  ;;  %vm3431_vm2 = vcmask 254977  }
0x425e   :  { %5312 = vrot.lane.b32.xlu0 %v5311_v46, %s6099_s3  ;;  %v3101_v56 = vpop.permute.xlu1 %3100 }
0x425f   :  { %v3105_v25 = vadd.f32 %v3101_v56, %v7419_v30 }
0x4261   :  { %v3107_v39 = vadd.f32 %v3105_v25, %v2976_v55 }
0x4263   :  { %3112 = vrot.lane.b32.xlu1 %v3107_v39, %s6101_s27 }
0x4266   :  { %3415 = vrot.lane.b32.xlu0 %v3408_v40, %s6099_s3 }
0x426e   :  { %3736 = vrot.lane.b32.xlu0 %v3733_v21, %s6099_s3 }
0x4276   :  { %4376 = vrot.lane.b32.xlu0 %v4374_v42, %s6099_s3 }
0x427e   :  { %4699 = vrot.lane.b32.xlu0 %v4696_v38, %s6099_s3 }
0x428c   :  { %v3111_v54 = vpop.permute.xlu2 %3110 }
0x428d   :  { %3116 = vst.msk [vmem:[#allocation3] sm:$0x1] %vm443_vm11, %v3111_v54  ;;  %v5360_v54 = vrot.slane %v8044_v4, 7 }
0x4294   :  { %v3414_v32 = vpop.permute.xlu2 %3413 }
0x4295   :  { %v3419_v7 = vadd.f32 %v3414_v32, %v7415_v28 }
0x4297   :  { %v3421_v55 = vadd.f32 %v3419_v7, %v3295_v27 }
0x4299   :  { %3425 = vrot.lane.b32.xlu1 %v3421_v55, %s6101_s27 }
0x429c   :  { %v3735_v24 = vpop.permute.xlu2 %3734 }
0x42a1   :  { %4055 = vrot.lane.b32.xlu1 %v4053_v13, %s6099_s3 }
0x42a4   :  { %v4058_v15 = vpop.permute.xlu2 %4057 }
0x42a5   :  { %v4062_v52 = vadd.f32 %v4058_v15, %v7419_v30 }
0x42a7   :  { %v4064_v46 = vadd.f32 %v4062_v52, %v3933_v3 }
0x42a9   :  { %4378 = vrot.lane.b32.xlu1 %v4375_v61, %s6099_s3 }
0x42ac   :  { %v4698_v14 = vpop.permute.xlu2 %4697 }
0x42ad   :  { %v4703_v23 = vadd.f32 %v4698_v14, %v7415_v28 }
0x42b1   :  { %5018 = vrot.lane.b32.xlu1 %v5016_v44, %s6099_s3 }
0x42d0   :  { %v5313_v8 = vpop.permute.xlu0 %5312 }
0x42d1   :  { %5514 = vmatmul.msk.f32.vlgmr.msrb.gmra.mxu3 %vm83_vm0, %v5313_v8  ;;  %vm4073_vm0 = vcmask 257027  }
0x42d5   :  { %v3113_v26 = vpop.permute.xlu1 %3112 }
0x42d6   :  { %3117 = vst.msk [vmem:[#allocation3 + $0x8] sm:$0x1] %vm443_vm11, %v3113_v26 }
0x42d8   :  { %v3416_v17 = vpop.permute.xlu0 %3415 }
0x42d9   :  { %v3420_v27 = vadd.f32 %v3416_v17, %v7419_v30 }
0x42db   :  { %v3422_v16 = vadd.f32 %v3420_v27, %v7527_v6 }
0x42dd   :  { %3427 = vrot.lane.b32.xlu2 %v3422_v16, %s6101_s27 }
0x42e0   :  { %v3737_v10 = vpop.permute.xlu0 %3736 }
0x42e1   :  { %v3741_v47 = vadd.f32 %v3737_v10, %v7419_v30 }
0x42e3   :  { %v3743_v49 = vadd.f32 %v3741_v47, %v3612_v12  ;;  %v4705_v12 = vadd.f32 %v4703_v23, %v4574_v18 }
0x42e8   :  { %v4377_v31 = vpop.permute.xlu0 %4376 }
0x42e9   :  { %v4382_v22 = vadd.f32 %v4377_v31, %v7415_v28 }
0x42eb   :  { %v4384_v56 = vadd.f32 %v4382_v22, %v4253_v37 }
0x42f0   :  { %v4700_v25 = vpop.permute.xlu0 %4699 }
0x430b   :  { %v3426_v43 = vpop.permute.xlu1 %3425 }
0x430c   :  { %3432 = vst.msk [vmem:[#allocation3] sm:$0x2] %vm3431_vm2, %v3426_v43 }
0x4313   :  { %v4056_v58 = vpop.permute.xlu1 %4055 }
0x4314   :  { %v4061_v40 = vadd.f32 %v4056_v58, %v7415_v28 }
0x4316   :  { %v4063_v51 = vadd.f32 %v4061_v40, %v3932_v11  ;;  %v5021_v11 = vpop.permute.xlu2 %5020 }
0x4317   :  { %v5025_v36 = vadd.f32 %v5021_v11, %v7419_v30 }
0x4318   :  { %4067 = vrot.lane.b32.xlu2 %v4063_v51, %s6101_s27 }
0x4319   :  { %v5027_v60 = vadd.f32 %v5025_v36, %v4896_v34 }
0x431b   :  { %v4379_v53 = vpop.permute.xlu1 %4378 }
0x431c   :  { %v4383_v5 = vadd.f32 %v4379_v53, %v7419_v30 }
0x431e   :  { %v4385_v6 = vadd.f32 %v4383_v5, %v4254_v20  ;;  %v3740_v20 = vadd.f32 %v3735_v24, %v7415_v28 }
0x4320   :  { %4390 = vrot.lane.b32.xlu2 %v4385_v6, %s6101_s27 }
0x4323   :  { %v5019_v2 = vpop.permute.xlu1 %5018 }
0x4324   :  { %v5024_v1 = vadd.f32 %v5019_v2, %v7415_v28 }
0x4326   :  { %v5026_v57 = vadd.f32 %v5024_v1, %v4895_v9  ;;  %v3742_v9 = vadd.f32 %v3740_v20, %v3611_v48  ;;  %v4704_v48 = vadd.f32 %v4700_v25, %v7419_v30 }
0x4328   :  { %5030 = vrot.lane.b32.xlu2 %v5026_v57, %s6101_s27  ;;  %v4706_v39 = vadd.f32 %v4704_v48, %v4575_v62 }
0x4337   :  { %v3428_v0 = vpop.permute.xlu2 %3427 }
0x4338   :  { %3433 = vst.msk [vmem:[#allocation3 + $0x8] sm:$0x2] %vm3431_vm2, %v3428_v0 }
0x4354   :  { %v5333_v19 = vpop.f32.mrf.mxu3 }
0x4355   :  { %v5337_v50 = vrot.slane %v5333_v19, 1  ;;  %v5338_v35 = vrot.slane %v5333_v19, 2 }
0x4357   :  { %5339 = vrot.lane.b32.xlu0 %v5337_v50, %s6099_s3  ;;  %5341 = vrot.lane.b32.xlu1 %v5338_v35, %s6099_s3 }
0x435f   :  { %3746 = vrot.lane.b32.xlu0 %v3742_v9, %s6101_s27  ;;  %3748 = vrot.lane.b32.xlu1 %v3743_v49, %s6101_s27 }
0x4367   :  { %4069 = vrot.lane.b32.xlu0 %v4064_v46, %s6101_s27  ;;  %4388 = vrot.lane.b32.xlu1 %v4384_v56, %s6101_s27 }
0x436f   :  { %4709 = vrot.lane.b32.xlu0 %v4705_v12, %s6101_s27  ;;  %4711 = vrot.lane.b32.xlu1 %v4706_v39, %s6101_s27 }
0x4372   :  { %v4068_v3 = vpop.permute.xlu2 %4067 }
0x4373   :  { %4074 = vst.msk [vmem:[#allocation3] sm:$0x8] %vm4073_vm0, %v4068_v3 }
0x4377   :  { %5032 = vrot.lane.b32.xlu0 %v5027_v60, %s6101_s27 }
0x437a   :  { %v4391_v37 = vpop.permute.xlu2 %4390 }
0x437b   :  { %4396 = vst.msk [vmem:[#allocation3 + $0x8] sm:$0x10] %vm4394_vm4, %v4391_v37 }
0x437f   :  { %5361 = vrot.lane.b32.xlu0 %v8035_v59, %s6099_s3 }
0x4382   :  { %v5031_v29 = vpop.permute.xlu2 %5030 }
0x4383   :  { %5037 = vst.msk [vmem:[#allocation3] sm:$0x40] %vm5036_vm5, %v5031_v29 }
0x43c9   :  { %v5340_v18 = vpop.permute.xlu0 %5339  ;;  %v5342_v62 = vpop.permute.xlu1 %5341 }
0x43ca   :  { %v5345_v21 = vadd.f32 %v5340_v18, %v7415_v28  ;;  %v5346_v63 = vadd.f32 %v5342_v62, %v7419_v30 }
0x43cc   :  { %v5347_v34 = vadd.f32 %v5345_v21, %v5216_v33  ;;  %v5348_v42 = vadd.f32 %v5346_v63, %v5217_v45 }
0x43ce   :  { %5351 = vrot.lane.b32.xlu1 %v5347_v34, %s6101_s27  ;;  %5353 = vrot.lane.b32.xlu2 %v5348_v42, %s6101_s27 }
0x43d1   :  { %v3747_v59 = vpop.permute.xlu0 %3746  ;;  %v3749_v38 = vpop.permute.xlu1 %3748 }
0x43d2   :  { %3753 = vst.msk [vmem:[#allocation3] sm:$0x4] %vm3752_vm6, %v3747_v59 }
0x43d3   :  { %3754 = vst.msk [vmem:[#allocation3 + $0x8] sm:$0x4] %vm3752_vm6, %v3749_v38 }
0x43d6   :  { %5363 = vrot.lane.b32.xlu1 %v5360_v54, %s6099_s3  ;;  %s5373_s3 = sshll.u32 %s6110_s17, 4  ;;  %s5374_s3 = int_to_ptr.vmem [resolvable:$true] %s5373_s3 }
0x43d9   :  { %v4070_v28 = vpop.permute.xlu0 %4069  ;;  %v4389_v30 = vpop.permute.xlu1 %4388 }
0x43da   :  { %4075 = vst.msk [vmem:[#allocation3 + $0x8] sm:$0x8] %vm4073_vm0, %v4070_v28 }
0x43db   :  { %4395 = vst.msk [vmem:[#allocation3] sm:$0x10] %vm4394_vm4, %v4389_v30 }
0x43e1   :  { %v4710_v41 = vpop.permute.xlu0 %4709  ;;  %v4712_v33 = vpop.permute.xlu1 %4711 }
0x43e2   :  { %4716 = vst.msk [vmem:[#allocation3] sm:$0x20] %vm4715_vm7, %v4710_v41 }
0x43e3   :  { %4717 = vst.msk [vmem:[#allocation3 + $0x8] sm:$0x20] %vm4715_vm7, %v4712_v33 }
0x43e9   :  { %v5033_v45 = vpop.permute.xlu0 %5032 }
0x43ea   :  { %5038 = vst.msk [vmem:[#allocation3 + $0x8] sm:$0x40] %vm5036_vm5, %v5033_v45 }
0x43f1   :  { %v5362_v32 = vpop.permute.xlu0 %5361 }
0x43f2   :  { %5367 = vst.msk [vmem:[#allocation5 - $0x7] sm:$0x80] %vm5357_vm8, %v5362_v32 }
0x4428   :  { %v5354_v4 = vpop.permute.xlu2 %5353 }
0x4429   :  { %5359 = vst.msk [vmem:[#allocation3 + $0x8] sm:$0x80] %vm5357_vm8, %v5354_v4 }
0x4440   :  { %v5352_v7 = vpop.permute.xlu1 %5351 }
0x4441   :  { %5358 = vst.msk [vmem:[#allocation3] sm:$0x80] %vm5357_vm8, %v5352_v7 }
0x4442   :  { %5381 = dma.vmem_to_hbm [thread:$0]  %s5374_s3, 256, %s5376_s24, [#allocation4], %s6111_s2, %s6111_s2, %s6112_s5  }
0x4448   :  { %v5364_v55 = vpop.permute.xlu1 %5363 }
0x4449   :  { %5368 = vst.msk [vmem:[#allocation5 + $0x1] sm:$0x1] %vm443_vm11, %v5364_v55 }
0x444a   :  { %5392 = dma.vmem_to_hbm [thread:$0]  %s5388_s13, 32, %s5390_s16, [#allocation6]  }
0x444b   :  { %6094 = dma.done.wait [#allocation4], 256  }
0x444c   :  { %6095 = vsyncadd [#allocation4], 4294967040 }
0x444d   :  { %6096 = dma.done.wait [#allocation6], 32  }
0x444e   :  { %6097 = vsyncadd [#allocation6], 4294967264 }
0x444f   :  { %5401 = vsyncpa [#allocation4], 1 }
0x4450   :  { %5402 = vsyncpa [#allocation6], 1 }

</bundles_post_ra>
